<compile_context>
chip_gen: v7x
topology: tpu7x:2x2x1
jax: 0.10.0
libtpu: 0.0.40
codegen_flags: <defaults>
</compile_context>

<pallas_src>
import functools

import jax
import jax.numpy as jnp
import numpy as np
from jax.experimental import pallas as pl
from jax.experimental.pallas import tpu as pltpu


def _conv3x3_relu(pad_ref, col_ref, w_ref, b_ref, cin, H, W):
    """Fused 3x3 'same' conv + bias + ReLU on VMEM-resident data.

    pad_ref: (H+2, W+2, cin)   zero-bordered input
    col_ref: (H*W, >= 9*cin)   im2col scratch
    w_ref:   (9*cin, cout)     weights, rows ordered (dy, dx, cin)
    b_ref:   (1, cout)         bias row
    returns: (H*W, cout) float32
    """
    t = 0
    for dy in range(3):
        for dx in range(3):
            slab = pad_ref[dy:dy + H, dx:dx + W, :]               # (H, W, cin)
            col_ref[:, t * cin:(t + 1) * cin] = slab.reshape(H * W, cin)
            t += 1
    patches = col_ref[:, 0:9 * cin]                               # (H*W, 9*cin)
    # TODO(synk): cast patches/weights to bf16 on v6e/v7x for MXU throughput
    # at realistic channel counts (keep f32 accumulation + f32 epilogue).
    acc = jnp.dot(patches, w_ref[...],
                  preferred_element_type=jnp.float32)             # (H*W, cout)
    return jnp.maximum(acc + b_ref[...], 0.0)


def _encoder_block_kernel(x_ref, w1_ref, b1_ref, w2_ref, b2_ref, *refs, pool):
    if pool:
        skip_ref, out_ref, pad1_ref, pad2_ref, col_ref = refs
    else:
        skip_ref, pad1_ref, pad2_ref, col_ref = refs
        out_ref = None

    Hp, Wp, Cin = pad1_ref.shape
    H, W = Hp - 2, Wp - 2
    Cout = w1_ref.shape[1]

    # Zero the halo borders (the interior is fully overwritten below).
    pad1_ref[...] = jnp.zeros((Hp, Wp, Cin), jnp.float32)
    pad2_ref[...] = jnp.zeros((Hp, Wp, Cout), jnp.float32)

    # conv1 (+ReLU): result stays in VMEM / vregs, never touches HBM.
    pad1_ref[1:H + 1, 1:W + 1, :] = x_ref[0].astype(jnp.float32)
    h1 = _conv3x3_relu(pad1_ref, col_ref, w1_ref, b1_ref, Cin, H, W)

    # conv2 (+ReLU), fed straight from the conv1 activation.
    pad2_ref[1:H + 1, 1:W + 1, :] = h1.reshape(H, W, Cout)
    h2 = _conv3x3_relu(pad2_ref, col_ref, w2_ref, b2_ref, Cout, H, W)

    # Skip-connection output.
    skip_ref[0] = h2.reshape(H, W, Cout).astype(skip_ref.dtype)

    # 2x2 / stride-2 max pool on the in-register conv2 result (no strided
    # ref loads, no separate kernel).
    if pool:
        Ho, Wo = H // 2, W // 2
        pooled = jnp.max(h2.reshape(Ho, 2, Wo, 2, Cout), axis=(1, 3))
        out_ref[0] = pooled.astype(out_ref.dtype)


def encoder_block(x_nchw, params, max_pooling=True):
    """Matches EncoderBlock.forward: returns (matrix, skip), both NCHW.

    params = (w1, b1, w2, b2) in PyTorch layouts:
        w*: (Cout, Cin, 3, 3) OIHW, b*: (Cout,)
    """
    w1, b1, w2, b2 = params
    N, Cin, H, W = x_nchw.shape
    Cout = w1.shape[0]
    assert H % 2 == 0 and W % 2 == 0, "2x2 pooling requires even H, W"

    # Single boundary transpose to NHWC (channels -> 128-lane axis).
    # TODO(synk): keep the surrounding model NHWC end-to-end to drop this.
    x = jnp.transpose(x_nchw, (0, 2, 3, 1))

    # OIHW -> (9*Cin, Cout) im2col weight matrices (rows ordered dy, dx, cin);
    # biases as (1, Cout) rows.  Done once in the wrapper, not per kernel step.
    wm1 = jnp.transpose(w1, (2, 3, 1, 0)).reshape(9 * Cin, Cout)
    wm2 = jnp.transpose(w2, (2, 3, 1, 0)).reshape(9 * Cout, Cout)
    bm1 = b1.reshape(1, Cout)
    bm2 = b2.reshape(1, Cout)

    Ho, Wo = H // 2, W // 2
    cmax = max(Cin, Cout)
    scratch_shapes = [
        pltpu.VMEM((H + 2, W + 2, Cin), jnp.float32),    # padded conv1 input
        pltpu.VMEM((H + 2, W + 2, Cout), jnp.float32),   # padded conv1 output
        pltpu.VMEM((H * W, 9 * cmax), jnp.float32),      # shared im2col scratch
    ]
    in_specs = [
        pl.BlockSpec((1, H, W, Cin), lambda n: (n, 0, 0, 0)),
        pl.BlockSpec((9 * Cin, Cout), lambda n: (0, 0)),
        pl.BlockSpec((1, Cout), lambda n: (0, 0)),
        pl.BlockSpec((9 * Cout, Cout), lambda n: (0, 0)),
        pl.BlockSpec((1, Cout), lambda n: (0, 0)),
    ]
    skip_spec = pl.BlockSpec((1, H, W, Cout), lambda n: (n, 0, 0, 0))
    skip_sds = jax.ShapeDtypeStruct((N, H, W, Cout), x.dtype)
    compiler_params = pltpu.CompilerParams(
        dimension_semantics=("parallel",))   # batch shards across TCs (v7x)

    if max_pooling:
        out_spec = pl.BlockSpec((1, Ho, Wo, Cout), lambda n: (n, 0, 0, 0))
        out_sds = jax.ShapeDtypeStruct((N, Ho, Wo, Cout), x.dtype)
        skip, out = pl.pallas_call(
            functools.partial(_encoder_block_kernel, pool=True),
            out_shape=(skip_sds, out_sds),
            grid=(N,),
            in_specs=in_specs,
            out_specs=(skip_spec, out_spec),
            scratch_shapes=scratch_shapes,
            compiler_params=compiler_params,
        )(x, wm1, bm1, wm2, bm2)
    else:
        skip = pl.pallas_call(
            functools.partial(_encoder_block_kernel, pool=False),
            out_shape=skip_sds,
            grid=(N,),
            in_specs=in_specs,
            out_specs=skip_spec,
            scratch_shapes=scratch_shapes,
            compiler_params=compiler_params,
        )(x, wm1, bm1, wm2, bm2)
        out = skip

    to_nchw = lambda t: jnp.transpose(t, (0, 3, 1, 2))
    return to_nchw(out), to_nchw(skip)


if __name__ == "__main__":
    N, Cin, Cout, H, W = 2, 4, 8, 16, 16

    key = jax.random.PRNGKey(0)
    k0, k1, k2, k3, k4 = jax.random.split(key, 5)
    x = jax.random.normal(k0, (N, Cin, H, W), jnp.float32)
    # Parameters in PyTorch Conv2d layouts: weight OIHW, bias (Cout,).
    w1 = jax.random.normal(k1, (Cout, Cin, 3, 3), jnp.float32) * 0.1
    b1 = jax.random.normal(k2, (Cout,), jnp.float32) * 0.1
    w2 = jax.random.normal(k3, (Cout, Cout, 3, 3), jnp.float32) * 0.1
    b2 = jax.random.normal(k4, (Cout,), jnp.float32) * 0.1
    params = (w1, b1, w2, b2)

    out, skip = encoder_block(x, params, max_pooling=True)
    out = jax.block_until_ready(out)
    skip = jax.block_until_ready(skip)

    # Plain-JAX reference (NCHW / OIHW, like PyTorch).
    def ref_conv(xi, w, b):
        y = jax.lax.conv_general_dilated(
            xi, w, window_strides=(1, 1), padding="SAME",
            dimension_numbers=("NCHW", "OIHW", "NCHW"))
        return jax.nn.relu(y + b.reshape(1, -1, 1, 1))

    r_skip = ref_conv(ref_conv(x, w1, b1), w2, b2)
    r_out = jax.lax.reduce_window(
        r_skip, -jnp.inf, jax.lax.max, (1, 1, 2, 2), (1, 1, 2, 2), "VALID")

    assert out.shape == (N, Cout, H // 2, W // 2)
    assert skip.shape == (N, Cout, H, W)
    assert np.allclose(np.asarray(skip), np.asarray(r_skip), atol=1e-4, rtol=1e-4)
    assert np.allclose(np.asarray(out), np.asarray(r_out), atol=1e-4, rtol=1e-4)

    # Also exercise the max_pooling=False path (matrix == skip).
    out2, skip2 = encoder_block(x, params, max_pooling=False)
    out2 = jax.block_until_ready(out2)
    assert np.allclose(np.asarray(out2), np.asarray(r_skip), atol=1e-4, rtol=1e-4)
    assert np.allclose(np.asarray(skip2), np.asarray(r_skip), atol=1e-4, rtol=1e-4)

    print("KERNEL_OK")
</pallas_src>

<mosaic_0001>
module attributes {stable_mosaic.version = 11 : i64} {
  func.func @_encoder_block_kernel(%arg0: i32, %arg1: memref<1x16x16x4xf32, #tpu.memory_space<vmem>>, %arg2: memref<36x8xf32, #tpu.memory_space<vmem>>, %arg3: memref<1x8xf32, #tpu.memory_space<vmem>>, %arg4: memref<72x8xf32, #tpu.memory_space<vmem>>, %arg5: memref<1x8xf32, #tpu.memory_space<vmem>>, %arg6: memref<1x16x16x8xf32, #tpu.memory_space<vmem>>, %arg7: memref<1x8x8x8xf32, #tpu.memory_space<vmem>>, %arg8: memref<18x18x4xf32, #tpu.memory_space<vmem>>, %arg9: memref<18x18x8xf32, #tpu.memory_space<vmem>>, %arg10: memref<256x72xf32, #tpu.memory_space<vmem>>) attributes {dimension_semantics = [#tpu.dimension_semantics<parallel>], iteration_bounds = array<i64: 2>, scalar_prefetch = 0 : i64, scratch_operands = 3 : i64, tpu.core_type = #tpu.core_type<tc>, window_params = [{transform_indices = @transform_0, window_bounds = array<i64: 1, 16, 16, 4>}, {pipeline_mode = #tpu.pipeline_mode<synchronous>, transform_indices = @transform_1, window_bounds = array<i64: 36, 8>}, {pipeline_mode = #tpu.pipeline_mode<synchronous>, transform_indices = @transform_2, window_bounds = array<i64: 1, 8>}, {pipeline_mode = #tpu.pipeline_mode<synchronous>, transform_indices = @transform_3, window_bounds = array<i64: 72, 8>}, {pipeline_mode = #tpu.pipeline_mode<synchronous>, transform_indices = @transform_4, window_bounds = array<i64: 1, 8>}, {transform_indices = @transform_5, window_bounds = array<i64: 1, 16, 16, 8>}, {transform_indices = @transform_6, window_bounds = array<i64: 1, 8, 8, 8>}]} {
    %cst = arith.constant 0.000000e+00 : f32
    %0 = vector.broadcast %cst : f32 to vector<18x18x4xf32>
    %c0 = arith.constant 0 : index
    %c0_0 = arith.constant 0 : index
    %c0_1 = arith.constant 0 : index
    %1 = vector.load %arg8[%c0, %c0_0, %c0_1] : memref<18x18x4xf32, #tpu.memory_space<vmem>>, vector<18x18x4xf32>
    tpu.vector_store %arg8[%c0, %c0_0, %c0_1], %0 {strides = array<i32>} : memref<18x18x4xf32, #tpu.memory_space<vmem>>, vector<18x18x4xf32>,
    %cst_2 = arith.constant 0.000000e+00 : f32
    %2 = vector.broadcast %cst_2 : f32 to vector<18x18x8xf32>
    %c0_3 = arith.constant 0 : index
    %c0_4 = arith.constant 0 : index
    %c0_5 = arith.constant 0 : index
    %3 = vector.load %arg9[%c0_3, %c0_4, %c0_5] : memref<18x18x8xf32, #tpu.memory_space<vmem>>, vector<18x18x8xf32>
    tpu.vector_store %arg9[%c0_3, %c0_4, %c0_5], %2 {strides = array<i32>} : memref<18x18x8xf32, #tpu.memory_space<vmem>>, vector<18x18x8xf32>,
    %c0_6 = arith.constant 0 : index
    %c0_7 = arith.constant 0 : index
    %c0_8 = arith.constant 0 : index
    %c0_9 = arith.constant 0 : index
    %4 = vector.load %arg1[%c0_6, %c0_7, %c0_8, %c0_9] : memref<1x16x16x4xf32, #tpu.memory_space<vmem>>, vector<1x16x16x4xf32>
    %5 = vector.shape_cast %4 : vector<1x16x16x4xf32> to vector<16x16x4xf32>
    %c1 = arith.constant 1 : index
    %c1_10 = arith.constant 1 : index
    %c0_11 = arith.constant 0 : index
    %6 = vector.load %arg8[%c1, %c1_10, %c0_11] : memref<18x18x4xf32, #tpu.memory_space<vmem>>, vector<16x16x4xf32>
    tpu.vector_store %arg8[%c1, %c1_10, %c0_11], %5 {strides = array<i32>} : memref<18x18x4xf32, #tpu.memory_space<vmem>>, vector<16x16x4xf32>,
    %c0_12 = arith.constant 0 : index
    %c0_13 = arith.constant 0 : index
    %c0_14 = arith.constant 0 : index
    %7 = vector.load %arg8[%c0_12, %c0_13, %c0_14] : memref<18x18x4xf32, #tpu.memory_space<vmem>>, vector<16x16x4xf32>
    %8 = vector.shape_cast %7 : vector<16x16x4xf32> to vector<256x4xf32>
    %c0_15 = arith.constant 0 : index
    %c0_16 = arith.constant 0 : index
    %9 = vector.load %arg10[%c0_15, %c0_16] : memref<256x72xf32, #tpu.memory_space<vmem>>, vector<256x4xf32>
    tpu.vector_store %arg10[%c0_15, %c0_16], %8 {strides = array<i32>} : memref<256x72xf32, #tpu.memory_space<vmem>>, vector<256x4xf32>,
    %c0_17 = arith.constant 0 : index
    %c1_18 = arith.constant 1 : index
    %c0_19 = arith.constant 0 : index
    %10 = vector.load %arg8[%c0_17, %c1_18, %c0_19] : memref<18x18x4xf32, #tpu.memory_space<vmem>>, vector<16x16x4xf32>
    %11 = vector.shape_cast %10 : vector<16x16x4xf32> to vector<256x4xf32>
    %c0_20 = arith.constant 0 : index
    %c4 = arith.constant 4 : index
    %12 = vector.load %arg10[%c0_20, %c4] : memref<256x72xf32, #tpu.memory_space<vmem>>, vector<256x4xf32>
    tpu.vector_store %arg10[%c0_20, %c4], %11 {strides = array<i32>} : memref<256x72xf32, #tpu.memory_space<vmem>>, vector<256x4xf32>,
    %c0_21 = arith.constant 0 : index
    %c2 = arith.constant 2 : index
    %c0_22 = arith.constant 0 : index
    %13 = vector.load %arg8[%c0_21, %c2, %c0_22] : memref<18x18x4xf32, #tpu.memory_space<vmem>>, vector<16x16x4xf32>
    %14 = vector.shape_cast %13 : vector<16x16x4xf32> to vector<256x4xf32>
    %c0_23 = arith.constant 0 : index
    %c8 = arith.constant 8 : index
    %15 = vector.load %arg10[%c0_23, %c8] : memref<256x72xf32, #tpu.memory_space<vmem>>, vector<256x4xf32>
    tpu.vector_store %arg10[%c0_23, %c8], %14 {strides = array<i32>} : memref<256x72xf32, #tpu.memory_space<vmem>>, vector<256x4xf32>,
    %c1_24 = arith.constant 1 : index
    %c0_25 = arith.constant 0 : index
    %c0_26 = arith.constant 0 : index
    %16 = vector.load %arg8[%c1_24, %c0_25, %c0_26] : memref<18x18x4xf32, #tpu.memory_space<vmem>>, vector<16x16x4xf32>
    %17 = vector.shape_cast %16 : vector<16x16x4xf32> to vector<256x4xf32>
    %c0_27 = arith.constant 0 : index
    %c12 = arith.constant 12 : index
    %18 = vector.load %arg10[%c0_27, %c12] : memref<256x72xf32, #tpu.memory_space<vmem>>, vector<256x4xf32>
    tpu.vector_store %arg10[%c0_27, %c12], %17 {strides = array<i32>} : memref<256x72xf32, #tpu.memory_space<vmem>>, vector<256x4xf32>,
    %c1_28 = arith.constant 1 : index
    %c1_29 = arith.constant 1 : index
    %c0_30 = arith.constant 0 : index
    %19 = vector.load %arg8[%c1_28, %c1_29, %c0_30] : memref<18x18x4xf32, #tpu.memory_space<vmem>>, vector<16x16x4xf32>
    %20 = vector.shape_cast %19 : vector<16x16x4xf32> to vector<256x4xf32>
    %c0_31 = arith.constant 0 : index
    %c16 = arith.constant 16 : index
    %21 = vector.load %arg10[%c0_31, %c16] : memref<256x72xf32, #tpu.memory_space<vmem>>, vector<256x4xf32>
    tpu.vector_store %arg10[%c0_31, %c16], %20 {strides = array<i32>} : memref<256x72xf32, #tpu.memory_space<vmem>>, vector<256x4xf32>,
    %c1_32 = arith.constant 1 : index
    %c2_33 = arith.constant 2 : index
    %c0_34 = arith.constant 0 : index
    %22 = vector.load %arg8[%c1_32, %c2_33, %c0_34] : memref<18x18x4xf32, #tpu.memory_space<vmem>>, vector<16x16x4xf32>
    %23 = vector.shape_cast %22 : vector<16x16x4xf32> to vector<256x4xf32>
    %c0_35 = arith.constant 0 : index
    %c20 = arith.constant 20 : index
    %24 = vector.load %arg10[%c0_35, %c20] : memref<256x72xf32, #tpu.memory_space<vmem>>, vector<256x4xf32>
    tpu.vector_store %arg10[%c0_35, %c20], %23 {strides = array<i32>} : memref<256x72xf32, #tpu.memory_space<vmem>>, vector<256x4xf32>,
    %c2_36 = arith.constant 2 : index
    %c0_37 = arith.constant 0 : index
    %c0_38 = arith.constant 0 : index
    %25 = vector.load %arg8[%c2_36, %c0_37, %c0_38] : memref<18x18x4xf32, #tpu.memory_space<vmem>>, vector<16x16x4xf32>
    %26 = vector.shape_cast %25 : vector<16x16x4xf32> to vector<256x4xf32>
    %c0_39 = arith.constant 0 : index
    %c24 = arith.constant 24 : index
    %27 = vector.load %arg10[%c0_39, %c24] : memref<256x72xf32, #tpu.memory_space<vmem>>, vector<256x4xf32>
    tpu.vector_store %arg10[%c0_39, %c24], %26 {strides = array<i32>} : memref<256x72xf32, #tpu.memory_space<vmem>>, vector<256x4xf32>,
    %c2_40 = arith.constant 2 : index
    %c1_41 = arith.constant 1 : index
    %c0_42 = arith.constant 0 : index
    %28 = vector.load %arg8[%c2_40, %c1_41, %c0_42] : memref<18x18x4xf32, #tpu.memory_space<vmem>>, vector<16x16x4xf32>
    %29 = vector.shape_cast %28 : vector<16x16x4xf32> to vector<256x4xf32>
    %c0_43 = arith.constant 0 : index
    %c28 = arith.constant 28 : index
    %30 = vector.load %arg10[%c0_43, %c28] : memref<256x72xf32, #tpu.memory_space<vmem>>, vector<256x4xf32>
    tpu.vector_store %arg10[%c0_43, %c28], %29 {strides = array<i32>} : memref<256x72xf32, #tpu.memory_space<vmem>>, vector<256x4xf32>,
    %c2_44 = arith.constant 2 : index
    %c2_45 = arith.constant 2 : index
    %c0_46 = arith.constant 0 : index
    %31 = vector.load %arg8[%c2_44, %c2_45, %c0_46] : memref<18x18x4xf32, #tpu.memory_space<vmem>>, vector<16x16x4xf32>
    %32 = vector.shape_cast %31 : vector<16x16x4xf32> to vector<256x4xf32>
    %c0_47 = arith.constant 0 : index
    %c32 = arith.constant 32 : index
    %33 = vector.load %arg10[%c0_47, %c32] : memref<256x72xf32, #tpu.memory_space<vmem>>, vector<256x4xf32>
    tpu.vector_store %arg10[%c0_47, %c32], %32 {strides = array<i32>} : memref<256x72xf32, #tpu.memory_space<vmem>>, vector<256x4xf32>,
    %c0_48 = arith.constant 0 : index
    %c0_49 = arith.constant 0 : index
    %34 = vector.load %arg10[%c0_48, %c0_49] : memref<256x72xf32, #tpu.memory_space<vmem>>, vector<256x36xf32>
    %c0_50 = arith.constant 0 : index
    %c0_51 = arith.constant 0 : index
    %35 = vector.load %arg2[%c0_50, %c0_51] : memref<36x8xf32, #tpu.memory_space<vmem>>, vector<36x8xf32>
    %cst_52 = arith.constant dense<0.000000e+00> : vector<256x8xf32>
    %36 = tpu.matmul %34, %35, %cst_52 {dimension_numbers = #tpu.dot_dimension_numbers<[1], [0], [0], [1], [0, 0, 1, 1], [], []>} : vector<256x36xf32>, vector<36x8xf32>, vector<256x8xf32> -> vector<256x8xf32>
    %c0_53 = arith.constant 0 : index
    %c0_54 = arith.constant 0 : index
    %37 = vector.load %arg3[%c0_53, %c0_54] : memref<1x8xf32, #tpu.memory_space<vmem>>, vector<1x8xf32>
    %38 = vector.broadcast %37 : vector<1x8xf32> to vector<256x8xf32>
    %39 = arith.addf %36, %38 : vector<256x8xf32>
    %cst_55 = arith.constant 0.000000e+00 : f32
    %40 = vector.broadcast %cst_55 : f32 to vector<256x8xf32>
    %41 = arith.maximumf %39, %40 : vector<256x8xf32>
    %42 = vector.shape_cast %41 : vector<256x8xf32> to vector<16x16x8xf32>
    %c1_56 = arith.constant 1 : index
    %c1_57 = arith.constant 1 : index
    %c0_58 = arith.constant 0 : index
    %43 = vector.load %arg9[%c1_56, %c1_57, %c0_58] : memref<18x18x8xf32, #tpu.memory_space<vmem>>, vector<16x16x8xf32>
    tpu.vector_store %arg9[%c1_56, %c1_57, %c0_58], %42 {strides = array<i32>} : memref<18x18x8xf32, #tpu.memory_space<vmem>>, vector<16x16x8xf32>,
    %c0_59 = arith.constant 0 : index
    %c0_60 = arith.constant 0 : index
    %c0_61 = arith.constant 0 : index
    %44 = vector.load %arg9[%c0_59, %c0_60, %c0_61] : memref<18x18x8xf32, #tpu.memory_space<vmem>>, vector<16x16x8xf32>
    %45 = vector.shape_cast %44 : vector<16x16x8xf32> to vector<256x8xf32>
    %c0_62 = arith.constant 0 : index
    %c0_63 = arith.constant 0 : index
    %46 = vector.load %arg10[%c0_62, %c0_63] : memref<256x72xf32, #tpu.memory_space<vmem>>, vector<256x8xf32>
    tpu.vector_store %arg10[%c0_62, %c0_63], %45 {strides = array<i32>} : memref<256x72xf32, #tpu.memory_space<vmem>>, vector<256x8xf32>,
    %c0_64 = arith.constant 0 : index
    %c1_65 = arith.constant 1 : index
    %c0_66 = arith.constant 0 : index
    %47 = vector.load %arg9[%c0_64, %c1_65, %c0_66] : memref<18x18x8xf32, #tpu.memory_space<vmem>>, vector<16x16x8xf32>
    %48 = vector.shape_cast %47 : vector<16x16x8xf32> to vector<256x8xf32>
    %c0_67 = arith.constant 0 : index
    %c8_68 = arith.constant 8 : index
    %49 = vector.load %arg10[%c0_67, %c8_68] : memref<256x72xf32, #tpu.memory_space<vmem>>, vector<256x8xf32>
    tpu.vector_store %arg10[%c0_67, %c8_68], %48 {strides = array<i32>} : memref<256x72xf32, #tpu.memory_space<vmem>>, vector<256x8xf32>,
    %c0_69 = arith.constant 0 : index
    %c2_70 = arith.constant 2 : index
    %c0_71 = arith.constant 0 : index
    %50 = vector.load %arg9[%c0_69, %c2_70, %c0_71] : memref<18x18x8xf32, #tpu.memory_space<vmem>>, vector<16x16x8xf32>
    %51 = vector.shape_cast %50 : vector<16x16x8xf32> to vector<256x8xf32>
    %c0_72 = arith.constant 0 : index
    %c16_73 = arith.constant 16 : index
    %52 = vector.load %arg10[%c0_72, %c16_73] : memref<256x72xf32, #tpu.memory_space<vmem>>, vector<256x8xf32>
    tpu.vector_store %arg10[%c0_72, %c16_73], %51 {strides = array<i32>} : memref<256x72xf32, #tpu.memory_space<vmem>>, vector<256x8xf32>,
    %c1_74 = arith.constant 1 : index
    %c0_75 = arith.constant 0 : index
    %c0_76 = arith.constant 0 : index
    %53 = vector.load %arg9[%c1_74, %c0_75, %c0_76] : memref<18x18x8xf32, #tpu.memory_space<vmem>>, vector<16x16x8xf32>
    %54 = vector.shape_cast %53 : vector<16x16x8xf32> to vector<256x8xf32>
    %c0_77 = arith.constant 0 : index
    %c24_78 = arith.constant 24 : index
    %55 = vector.load %arg10[%c0_77, %c24_78] : memref<256x72xf32, #tpu.memory_space<vmem>>, vector<256x8xf32>
    tpu.vector_store %arg10[%c0_77, %c24_78], %54 {strides = array<i32>} : memref<256x72xf32, #tpu.memory_space<vmem>>, vector<256x8xf32>,
    %c1_79 = arith.constant 1 : index
    %c1_80 = arith.constant 1 : index
    %c0_81 = arith.constant 0 : index
    %56 = vector.load %arg9[%c1_79, %c1_80, %c0_81] : memref<18x18x8xf32, #tpu.memory_space<vmem>>, vector<16x16x8xf32>
    %57 = vector.shape_cast %56 : vector<16x16x8xf32> to vector<256x8xf32>
    %c0_82 = arith.constant 0 : index
    %c32_83 = arith.constant 32 : index
    %58 = vector.load %arg10[%c0_82, %c32_83] : memref<256x72xf32, #tpu.memory_space<vmem>>, vector<256x8xf32>
    tpu.vector_store %arg10[%c0_82, %c32_83], %57 {strides = array<i32>} : memref<256x72xf32, #tpu.memory_space<vmem>>, vector<256x8xf32>,
    %c1_84 = arith.constant 1 : index
    %c2_85 = arith.constant 2 : index
    %c0_86 = arith.constant 0 : index
    %59 = vector.load %arg9[%c1_84, %c2_85, %c0_86] : memref<18x18x8xf32, #tpu.memory_space<vmem>>, vector<16x16x8xf32>
    %60 = vector.shape_cast %59 : vector<16x16x8xf32> to vector<256x8xf32>
    %c0_87 = arith.constant 0 : index
    %c40 = arith.constant 40 : index
    %61 = vector.load %arg10[%c0_87, %c40] : memref<256x72xf32, #tpu.memory_space<vmem>>, vector<256x8xf32>
    tpu.vector_store %arg10[%c0_87, %c40], %60 {strides = array<i32>} : memref<256x72xf32, #tpu.memory_space<vmem>>, vector<256x8xf32>,
    %c2_88 = arith.constant 2 : index
    %c0_89 = arith.constant 0 : index
    %c0_90 = arith.constant 0 : index
    %62 = vector.load %arg9[%c2_88, %c0_89, %c0_90] : memref<18x18x8xf32, #tpu.memory_space<vmem>>, vector<16x16x8xf32>
    %63 = vector.shape_cast %62 : vector<16x16x8xf32> to vector<256x8xf32>
    %c0_91 = arith.constant 0 : index
    %c48 = arith.constant 48 : index
    %64 = vector.load %arg10[%c0_91, %c48] : memref<256x72xf32, #tpu.memory_space<vmem>>, vector<256x8xf32>
    tpu.vector_store %arg10[%c0_91, %c48], %63 {strides = array<i32>} : memref<256x72xf32, #tpu.memory_space<vmem>>, vector<256x8xf32>,
    %c2_92 = arith.constant 2 : index
    %c1_93 = arith.constant 1 : index
    %c0_94 = arith.constant 0 : index
    %65 = vector.load %arg9[%c2_92, %c1_93, %c0_94] : memref<18x18x8xf32, #tpu.memory_space<vmem>>, vector<16x16x8xf32>
    %66 = vector.shape_cast %65 : vector<16x16x8xf32> to vector<256x8xf32>
    %c0_95 = arith.constant 0 : index
    %c56 = arith.constant 56 : index
    %67 = vector.load %arg10[%c0_95, %c56] : memref<256x72xf32, #tpu.memory_space<vmem>>, vector<256x8xf32>
    tpu.vector_store %arg10[%c0_95, %c56], %66 {strides = array<i32>} : memref<256x72xf32, #tpu.memory_space<vmem>>, vector<256x8xf32>,
    %c2_96 = arith.constant 2 : index
    %c2_97 = arith.constant 2 : index
    %c0_98 = arith.constant 0 : index
    %68 = vector.load %arg9[%c2_96, %c2_97, %c0_98] : memref<18x18x8xf32, #tpu.memory_space<vmem>>, vector<16x16x8xf32>
    %69 = vector.shape_cast %68 : vector<16x16x8xf32> to vector<256x8xf32>
    %c0_99 = arith.constant 0 : index
    %c64 = arith.constant 64 : index
    %70 = vector.load %arg10[%c0_99, %c64] : memref<256x72xf32, #tpu.memory_space<vmem>>, vector<256x8xf32>
    tpu.vector_store %arg10[%c0_99, %c64], %69 {strides = array<i32>} : memref<256x72xf32, #tpu.memory_space<vmem>>, vector<256x8xf32>,
    %c0_100 = arith.constant 0 : index
    %c0_101 = arith.constant 0 : index
    %71 = vector.load %arg10[%c0_100, %c0_101] : memref<256x72xf32, #tpu.memory_space<vmem>>, vector<256x72xf32>
    %c0_102 = arith.constant 0 : index
    %c0_103 = arith.constant 0 : index
    %72 = vector.load %arg4[%c0_102, %c0_103] : memref<72x8xf32, #tpu.memory_space<vmem>>, vector<72x8xf32>
    %cst_104 = arith.constant dense<0.000000e+00> : vector<256x8xf32>
    %73 = tpu.matmul %71, %72, %cst_104 {dimension_numbers = #tpu.dot_dimension_numbers<[1], [0], [0], [1], [0, 0, 1, 1], [], []>} : vector<256x72xf32>, vector<72x8xf32>, vector<256x8xf32> -> vector<256x8xf32>
    %c0_105 = arith.constant 0 : index
    %c0_106 = arith.constant 0 : index
    %74 = vector.load %arg5[%c0_105, %c0_106] : memref<1x8xf32, #tpu.memory_space<vmem>>, vector<1x8xf32>
    %75 = vector.broadcast %74 : vector<1x8xf32> to vector<256x8xf32>
    %76 = arith.addf %73, %75 : vector<256x8xf32>
    %cst_107 = arith.constant 0.000000e+00 : f32
    %77 = vector.broadcast %cst_107 : f32 to vector<256x8xf32>
    %78 = arith.maximumf %76, %77 : vector<256x8xf32>
    %79 = vector.shape_cast %78 : vector<256x8xf32> to vector<16x16x8xf32>
    %c0_108 = arith.constant 0 : index
    %c0_109 = arith.constant 0 : index
    %c0_110 = arith.constant 0 : index
    %c0_111 = arith.constant 0 : index
    %80 = vector.load %arg6[%c0_108, %c0_109, %c0_110, %c0_111] : memref<1x16x16x8xf32, #tpu.memory_space<vmem>>, vector<1x16x16x8xf32>
    %81 = vector.shape_cast %80 : vector<1x16x16x8xf32> to vector<16x16x8xf32>
    %82 = vector.shape_cast %79 : vector<16x16x8xf32> to vector<1x16x16x8xf32>
    tpu.vector_store %arg6[%c0_108, %c0_109, %c0_110, %c0_111], %82 {strides = array<i32>} : memref<1x16x16x8xf32, #tpu.memory_space<vmem>>, vector<1x16x16x8xf32>,
    %83 = vector.shape_cast %78 : vector<256x8xf32> to vector<8x2x8x2x8xf32>
    %cst_112 = arith.constant dense<0xFF800000> : vector<8x8x8xf32>
    %84 = vector.multi_reduction <maximumf>, %83, %cst_112 [1, 3] : vector<8x2x8x2x8xf32> to vector<8x8x8xf32>
    %c0_113 = arith.constant 0 : index
    %c0_114 = arith.constant 0 : index
    %c0_115 = arith.constant 0 : index
    %c0_116 = arith.constant 0 : index
    %85 = vector.load %arg7[%c0_113, %c0_114, %c0_115, %c0_116] : memref<1x8x8x8xf32, #tpu.memory_space<vmem>>, vector<1x8x8x8xf32>
    %86 = vector.shape_cast %85 : vector<1x8x8x8xf32> to vector<8x8x8xf32>
    %87 = vector.shape_cast %84 : vector<8x8x8xf32> to vector<1x8x8x8xf32>
    tpu.vector_store %arg7[%c0_113, %c0_114, %c0_115, %c0_116], %87 {strides = array<i32>} : memref<1x8x8x8xf32, #tpu.memory_space<vmem>>, vector<1x8x8x8xf32>,
    return
  }
  func.func @transform_0(%arg0: i32) -> (i32, i32, i32, i32) {
    %c0_i32 = arith.constant 0 : i32
    %c0_i32_0 = arith.constant 0 : i32
    %c0_i32_1 = arith.constant 0 : i32
    %c0_i32_2 = arith.constant 0 : i32
    return %arg0, %c0_i32, %c0_i32_0, %c0_i32_1 : i32, i32, i32, i32
  }
  func.func @transform_1(%arg0: i32) -> (i32, i32) {
    %c0_i32 = arith.constant 0 : i32
    %c0_i32_0 = arith.constant 0 : i32
    %c0_i32_1 = arith.constant 0 : i32
    return %c0_i32, %c0_i32_0 : i32, i32
  }
  func.func @transform_2(%arg0: i32) -> (i32, i32) {
    %c0_i32 = arith.constant 0 : i32
    %c0_i32_0 = arith.constant 0 : i32
    %c0_i32_1 = arith.constant 0 : i32
    return %c0_i32, %c0_i32_0 : i32, i32
  }
  func.func @transform_3(%arg0: i32) -> (i32, i32) {
    %c0_i32 = arith.constant 0 : i32
    %c0_i32_0 = arith.constant 0 : i32
    %c0_i32_1 = arith.constant 0 : i32
    return %c0_i32, %c0_i32_0 : i32, i32
  }
  func.func @transform_4(%arg0: i32) -> (i32, i32) {
    %c0_i32 = arith.constant 0 : i32
    %c0_i32_0 = arith.constant 0 : i32
    %c0_i32_1 = arith.constant 0 : i32
    return %c0_i32, %c0_i32_0 : i32, i32
  }
  func.func @transform_5(%arg0: i32) -> (i32, i32, i32, i32) {
    %c0_i32 = arith.constant 0 : i32
    %c0_i32_0 = arith.constant 0 : i32
    %c0_i32_1 = arith.constant 0 : i32
    %c0_i32_2 = arith.constant 0 : i32
    return %arg0, %c0_i32, %c0_i32_0, %c0_i32_1 : i32, i32, i32, i32
  }
  func.func @transform_6(%arg0: i32) -> (i32, i32, i32, i32) {
    %c0_i32 = arith.constant 0 : i32
    %c0_i32_0 = arith.constant 0 : i32
    %c0_i32_1 = arith.constant 0 : i32
    %c0_i32_2 = arith.constant 0 : i32
    return %arg0, %c0_i32, %c0_i32_0, %c0_i32_1 : i32, i32, i32, i32
  }
}

</mosaic_0001>

<bundles_post_ra>
// kernel: tpu_custom_call.1
= control target key start
LH: loop header
LB: loop body
LE: loop exit
PB: predicated region body
PF: predicated region fallthrough
CT: control target
= control target key end

     0   :  { %12 = vsyncpa [#allocation6], 0  ;;  %s9337_s0 = inlined_call_operand.vmem [shape: f32[2,16,16,4], index: 0, kind: input, shape index: {}]   ;;  %s9338_s1 = inlined_call_operand.vmem [shape: f32[36,8], index: 1, kind: input, shape index: {}]   ;;  %s9339_s2 = inlined_call_operand.vmem [shape: f32[1,8], index: 2, kind: input, shape index: {}]   ;;  %s9340_s3 = inlined_call_operand.vmem [shape: f32[72,8], index: 3, kind: input, shape index: {}]   ;;  %s9341_s4 = inlined_call_operand.vmem [shape: f32[1,8], index: 4, kind: input, shape index: {}]   ;;  %s9342_s5 = inlined_call_operand.vmem [shape: f32[2,16,16,8], index: 5, kind: output, shape index: {0}]   ;;  %s9343_s6 = inlined_call_operand.hbm [shape: f32[2,8,8,8], index: 6, kind: output, shape index: {1}]  }
   0x1   :  { %14 = vsyncpa [#allocation6 + $0x1], 0  ;;  %s6549_s21 = smov 0   ;;  %s6551_s22 = smov 0  }
   0x2   :  { %s6553_s23 = smov 0   ;;  %s6555_s24 = smov 0  }
   0x3 LB: > { %s6570_s25 = sadd.s32 4294967295, %s6496_s24   ;;  %s6059_s26 = sadd.s32 4294967294, %s6496_s24   ;;  %s6496_s24 = sphi %s6555_s24, %s9442_s24   ;;  %s6492_s23 = sphi %s6553_s23, %s9441_s23   ;;  %s6488_s22 = sphi %s6551_s22, %s9440_s22   ;;  %s6484_s21 = sphi %s6549_s21, %s9439_s21  }
   0x4   : > { %s6574_s27 = sadd.s32 1, %s6496_s24   ;;  %s163_s28 = sadd.s32 1, %s6492_s23 }
   0x5   : > { %s160_s29 = ssub.s32 %s6496_s24, %s6574_s27  ;;  %p173_p0 = scmp.ne.s32.totalorder %s6492_s23, %s6488_s22 }
   0x6   : > { %p161_p1 = scmp.eq.s32.totalorder %s160_s29, 0  ;;  %p174_p2 = scmp.eq.s32.totalorder %s6570_s25, 1 }
   0x7   : > { %p179_p3 = scmp.ne.s32.totalorder %s6488_s22, %s6484_s21  ;;  %p180_p4 = scmp.eq.s32.totalorder %s6059_s26, 1 }
   0x8   : > { %s6585_s30 = scalar_select %p161_p1, %s6492_s23, %s163_s28  }
   0x9   : > { %p6587_p5 = por %p174_p2, %p173_p0  ;;  %p6591_p6 = por %p180_p4, %p179_p3 }
   0xa   : > { %p6062_p7 = scmp.ge.s32.totalorder %s6496_s24, 1  ;;  %p218_p8 = scmp.lt.s32.totalorder %s6496_s24, 3 }
   0xc   : > { %p219_p9 = pnand %p6062_p7, %p218_p8 }
   0xe   : > { %222 = sbr.rel (%p219_p9) target bundleno = 1750 (0x6d6), region = 40 }
  0x15   : > { %vm263_vm0 = vcmask 31744   ;;  %p253_p10 = scmp.lt.s32.totalorder %s6570_s25, 1  ;;  %vm266_vm1 = vcmask 25600   ;;  %v9344_v0 = vmov 0.0   ;;  %s6499_s14 = smov 4   ;;  %vm664_vm2 = vcmask 64544  }
  0x16   : > { %264 = vst.msk [vmem:[#allocation2] sm:$0xff] %vm263_vm0, %v9344_v0  ;;  %265 = vst.msk [vmem:[#allocation2 + $0x8] sm:$0xff] %vm263_vm0, %v9344_v0  ;;  %s6500_s15 = smov 8   ;;  %s6501_s16 = smov 12   ;;  %vm857_vm3 = vcmask 97344   ;;  %vm1050_vm4 = vcmask 130144  }
  0x17   : > { %268 = vst.msk [vmem:[#allocation2 + $0x18] sm:$0xff] %vm263_vm0, %v9344_v0  ;;  %269 = vst.msk [vmem:[#allocation2 + $0x20] sm:$0xff] %vm263_vm0, %v9344_v0  ;;  %s6709_s9 = scalar_select %p253_p10, %s6570_s25, 1  ;;  %vm1243_vm5 = vcmask 162944   ;;  %vm2190_vm6 = vcmask 1043456   ;;  %vm1436_vm7 = vcmask 195744  }
  0x18   : > { %271 = vst.msk [vmem:[#allocation2 + $0x30] sm:$0xff] %vm263_vm0, %v9344_v0  ;;  %272 = vst.msk [vmem:[#allocation2 + $0x38] sm:$0xff] %vm263_vm0, %v9344_v0  ;;  %s6502_s17 = smov 16   ;;  %s6503_s18 = smov 20   ;;  %vm1630_vm8 = vcmask 228544   ;;  %vm1823_vm9 = vcmask 261344  }
  0x19   : > { %274 = vst.msk [vmem:[#allocation2 + $0x48] sm:$0xff] %vm263_vm0, %v9344_v0  ;;  %275 = vst.msk [vmem:[#allocation2 + $0x50] sm:$0xff] %vm263_vm0, %v9344_v0  ;;  %s6140_s10 = sshll.u32 %s6709_s9, 8  ;;  %s6504_s19 = smov 24   ;;  %vm2016_vm10 = vcmask 294144   ;;  %vm2093_vm11 = vcmask 293888  }
  0x1a   : > { %277 = vst.msk [vmem:[#allocation2 + $0x60] sm:$0xff] %vm263_vm0, %v9344_v0  ;;  %278 = vst.msk [vmem:[#allocation2 + $0x68] sm:$0xff] %vm263_vm0, %v9344_v0  ;;  %s6717_s13 = scalar_lea.vmem %s9337_s0, %s6140_s10  ;;  %s6506_s26 = smov 32   ;;  %vm319_vm12 = vcmask 64512   ;;  %vm322_vm13 = vcmask 58368   ;;  %vm2708_vm14 = vcmask 130112  }
  0x1b   : > { %280 = vst.msk [vmem:[#allocation2 + $0x78] sm:$0xff] %vm263_vm0, %v9344_v0  ;;  %281 = vst.msk [vmem:[#allocation2 + $0x80] sm:$0xff] %vm263_vm0, %v9344_v0  ;;  %v375_v1 = vld [vmem:[%s6717_s13] sm:$0xff]  ;;  %v376_v2 = vld [vmem:[%s6717_s13 + $0x8] sm:$0xff]  ;;  %s6507_s28 = smov 40   ;;  %s6509_s29 = smov 56  }
  0x1c   : > { %283 = vst.msk [vmem:[#allocation2 + $0x90] sm:$0xff] %vm263_vm0, %v9344_v0  ;;  %284 = vst.msk [vmem:[#allocation2 + $0x98] sm:$0xff] %vm263_vm0, %v9344_v0  ;;  %v377_v3 = vld [vmem:[%s6717_s13 + $0x10] sm:$0xff]  ;;  %v378_v4 = vld [vmem:[%s6717_s13 + $0x18] sm:$0xff]  ;;  %s6510_s12 = smov 64   ;;  %vm2901_vm15 = vcmask 195712  }
  0x1d   : > { %286 = vst.msk [vmem:[#allocation2 + $0xa8] sm:$0xff] %vm263_vm0, %v9344_v0  ;;  %287 = vst.msk [vmem:[#allocation2 + $0xb0] sm:$0xff] %vm263_vm0, %v9344_v0  ;;  %v379_v5 = vld [vmem:[%s6717_s13 + $0x20] sm:$0xff]  ;;  %v380_v6 = vld [vmem:[%s6717_s13 + $0x28] sm:$0xff]  ;;  %s250_s9 = sand.u32 1, %s6488_s22  }
  0x1e   : > { %289 = vst.msk [vmem:[#allocation2 + $0xc0] sm:$0xff] %vm263_vm0, %v9344_v0  ;;  %290 = vst.msk [vmem:[#allocation2 + $0xc8] sm:$0xff] %vm263_vm0, %v9344_v0  ;;  %v504_v7 = vld [vmem:[#allocation2 + $0x1] sm:$0xff]  ;;  %v381_v9 = vld [vmem:[%s6717_s13 + $0x30] sm:$0xff] }
  0x1f   : > { %292 = vst.msk [vmem:[#allocation2 + $0xd8] sm:$0xff] %vm263_vm0, %v9344_v0  ;;  %293 = vst.msk [vmem:[#allocation2 + $0xe0] sm:$0xff] %vm263_vm0, %v9344_v0  ;;  %568 = vrot.lane.b32.xlu0 %v504_v7, %s6499_s14  ;;  %v382_v10 = vld [vmem:[%s6717_s13 + $0x38] sm:$0xff]  ;;  %v383_v11 = vld [vmem:[%s6717_s13 + $0x40] sm:$0xff] }
  0x20   : > { %295 = vst.msk [vmem:[#allocation2 + $0xf0] sm:$0xff] %vm263_vm0, %v9344_v0  ;;  %296 = vst.msk [vmem:[#allocation2 + $0xf8] sm:$0xff] %vm263_vm0, %v9344_v0  ;;  %v384_v12 = vld [vmem:[%s6717_s13 + $0x48] sm:$0xff]  ;;  %v385_v13 = vld [vmem:[%s6717_s13 + $0x50] sm:$0xff] }
  0x21   : > { %298 = vst.msk [vmem:[#allocation2 + $0x108] sm:$0xff] %vm263_vm0, %v9344_v0  ;;  %299 = vst.msk [vmem:[#allocation2 + $0x110] sm:$0xff] %vm263_vm0, %v9344_v0  ;;  %v386_v14 = vld [vmem:[%s6717_s13 + $0x58] sm:$0xff]  ;;  %v387_v15 = vld [vmem:[%s6717_s13 + $0x60] sm:$0xff] }
  0x22   : > { %301 = vst.msk [vmem:[#allocation2 + $0x120] sm:$0xff] %vm263_vm0, %v9344_v0  ;;  %302 = vst.msk [vmem:[#allocation2 + $0x128] sm:$0xff] %vm263_vm0, %v9344_v0  ;;  %v388_v16 = vld [vmem:[%s6717_s13 + $0x68] sm:$0xff]  ;;  %v389_v17 = vld [vmem:[%s6717_s13 + $0x70] sm:$0xff] }
  0x23   : > { %304 = vst.msk [vmem:[#allocation2 + $0x138] sm:$0xff] %vm263_vm0, %v9344_v0  ;;  %305 = vst.msk [vmem:[#allocation2 + $0x140] sm:$0xff] %vm263_vm0, %v9344_v0  ;;  %v390_v18 = vld [vmem:[%s6717_s13 + $0x78] sm:$0xff]  ;;  %v391_v19 = vld [vmem:[%s6717_s13 + $0x80] sm:$0xff] }
  0x24   : > { %307 = vst.msk [vmem:[#allocation2 + $0x150] sm:$0xff] %vm263_vm0, %v9344_v0  ;;  %308 = vst.msk [vmem:[#allocation2 + $0x158] sm:$0xff] %vm263_vm0, %v9344_v0  ;;  %v392_v20 = vld [vmem:[%s6717_s13 + $0x88] sm:$0xff]  ;;  %v393_v21 = vld [vmem:[%s6717_s13 + $0x90] sm:$0xff] }
  0x25   : > { %310 = vst.msk [vmem:[#allocation2 + $0x168] sm:$0xff] %vm263_vm0, %v9344_v0  ;;  %311 = vst.msk [vmem:[#allocation2 + $0x170] sm:$0xff] %vm263_vm0, %v9344_v0  ;;  %v394_v22 = vld [vmem:[%s6717_s13 + $0x98] sm:$0xff]  ;;  %v395_v23 = vld [vmem:[%s6717_s13 + $0xa0] sm:$0xff] }
  0x26   : > { %313 = vst.msk [vmem:[#allocation2 + $0x180] sm:$0xff] %vm263_vm0, %v9344_v0  ;;  %314 = vst.msk [vmem:[#allocation2 + $0x188] sm:$0xff] %vm263_vm0, %v9344_v0  ;;  %v396_v24 = vld [vmem:[%s6717_s13 + $0xa8] sm:$0xff]  ;;  %v397_v28 = vld [vmem:[%s6717_s13 + $0xb0] sm:$0xff] }
  0x27   : > { %316 = vst.msk [vmem:[#allocation2 + $0x198] sm:$0xff] %vm263_vm0, %v9344_v0  ;;  %317 = vst.msk [vmem:[#allocation2 + $0x1a0] sm:$0xff] %vm263_vm0, %v9344_v0  ;;  %v398_v29 = vld [vmem:[%s6717_s13 + $0xb8] sm:$0xff]  ;;  %v399_v33 = vld [vmem:[%s6717_s13 + $0xc0] sm:$0xff] }
  0x28   : > { %267 = vst.msk [vmem:[#allocation2 + $0x10] sm:$0x3] %vm266_vm1, %v9344_v0  ;;  %270 = vst.msk [vmem:[#allocation2 + $0x28] sm:$0x3] %vm266_vm1, %v9344_v0  ;;  %v400_v34 = vld [vmem:[%s6717_s13 + $0xc8] sm:$0xff]  ;;  %v401_v35 = vld [vmem:[%s6717_s13 + $0xd0] sm:$0xff] }
  0x29   : > { %273 = vst.msk [vmem:[#allocation2 + $0x40] sm:$0x3] %vm266_vm1, %v9344_v0  ;;  %276 = vst.msk [vmem:[#allocation2 + $0x58] sm:$0x3] %vm266_vm1, %v9344_v0  ;;  %v402_v36 = vld [vmem:[%s6717_s13 + $0xd8] sm:$0xff]  ;;  %v403_v37 = vld [vmem:[%s6717_s13 + $0xe0] sm:$0xff] }
  0x2a   : > { %279 = vst.msk [vmem:[#allocation2 + $0x70] sm:$0x3] %vm266_vm1, %v9344_v0  ;;  %282 = vst.msk [vmem:[#allocation2 + $0x88] sm:$0x3] %vm266_vm1, %v9344_v0  ;;  %v404_v38 = vld [vmem:[%s6717_s13 + $0xe8] sm:$0xff]  ;;  %v440_v45 = vld [vmem:[#allocation2] sm:$0xff] }
  0x2b   : > { %285 = vst.msk [vmem:[#allocation2 + $0xa0] sm:$0x3] %vm266_vm1, %v9344_v0  ;;  %288 = vst.msk [vmem:[#allocation2 + $0xb8] sm:$0x3] %vm266_vm1, %v9344_v0  ;;  %v441_v48 = vld [vmem:[#allocation2 + $0x8] sm:$0xff] }
  0x2c   : > { %291 = vst.msk [vmem:[#allocation2 + $0xd0] sm:$0x3] %vm266_vm1, %v9344_v0  ;;  %294 = vst.msk [vmem:[#allocation2 + $0xe8] sm:$0x3] %vm266_vm1, %v9344_v0 }
  0x2d   : > { %297 = vst.msk [vmem:[#allocation2 + $0x100] sm:$0x3] %vm266_vm1, %v9344_v0  ;;  %300 = vst.msk [vmem:[#allocation2 + $0x118] sm:$0x3] %vm266_vm1, %v9344_v0 }
  0x2e   : > { %303 = vst.msk [vmem:[#allocation2 + $0x130] sm:$0x3] %vm266_vm1, %v9344_v0  ;;  %306 = vst.msk [vmem:[#allocation2 + $0x148] sm:$0x3] %vm266_vm1, %v9344_v0 }
  0x2f   : > { %309 = vst.msk [vmem:[#allocation2 + $0x160] sm:$0x3] %vm266_vm1, %v9344_v0  ;;  %312 = vst.msk [vmem:[#allocation2 + $0x178] sm:$0x3] %vm266_vm1, %v9344_v0  ;;  %v505_v8 = vld [vmem:[#allocation2 + $0x9] sm:$0xff] }
  0x30   : > { %315 = vst.msk [vmem:[#allocation2 + $0x190] sm:$0x3] %vm266_vm1, %v9344_v0  ;;  %318 = vst.msk [vmem:[#allocation2 + $0x1a8] sm:$0x3] %vm266_vm1, %v9344_v0  ;;  %570 = vrot.lane.b32.xlu0 %v505_v8, %s6499_s14  ;;  %vm3287_vm1 = vcmask 326912  }
  0x31   : > { %408 = vst.msk [vmem:[#allocation2 + $0x19] sm:$0xff] %vm263_vm0, %v375_v1  ;;  %409 = vst.msk [vmem:[#allocation2 + $0x21] sm:$0xff] %vm263_vm0, %v376_v2 }
  0x32   : > { %410 = vst.msk [vmem:[#allocation2 + $0x31] sm:$0xff] %vm263_vm0, %v377_v3  ;;  %411 = vst.msk [vmem:[#allocation2 + $0x39] sm:$0xff] %vm263_vm0, %v378_v4 }
  0x33   : > { %412 = vst.msk [vmem:[#allocation2 + $0x49] sm:$0xff] %vm263_vm0, %v379_v5  ;;  %413 = vst.msk [vmem:[#allocation2 + $0x51] sm:$0xff] %vm263_vm0, %v380_v6 }
  0x34   : > { %414 = vst.msk [vmem:[#allocation2 + $0x61] sm:$0xff] %vm263_vm0, %v381_v9  ;;  %415 = vst.msk [vmem:[#allocation2 + $0x69] sm:$0xff] %vm263_vm0, %v382_v10 }
  0x35   : > { %416 = vst.msk [vmem:[#allocation2 + $0x79] sm:$0xff] %vm263_vm0, %v383_v11  ;;  %417 = vst.msk [vmem:[#allocation2 + $0x81] sm:$0xff] %vm263_vm0, %v384_v12 }
  0x36   : > { %418 = vst.msk [vmem:[#allocation2 + $0x91] sm:$0xff] %vm263_vm0, %v385_v13  ;;  %419 = vst.msk [vmem:[#allocation2 + $0x99] sm:$0xff] %vm263_vm0, %v386_v14 }
  0x37   : > { %420 = vst.msk [vmem:[#allocation2 + $0xa9] sm:$0xff] %vm263_vm0, %v387_v15  ;;  %421 = vst.msk [vmem:[#allocation2 + $0xb1] sm:$0xff] %vm263_vm0, %v388_v16 }
  0x38   : > { %422 = vst.msk [vmem:[#allocation2 + $0xc1] sm:$0xff] %vm263_vm0, %v389_v17  ;;  %423 = vst.msk [vmem:[#allocation2 + $0xc9] sm:$0xff] %vm263_vm0, %v390_v18  ;;  %v6762_v25 = vld [vmem:[#allocation2 + $0x19] sm:$0xff]  ;;  %v6771_v27 = vld [vmem:[#allocation2 + $0x21] sm:$0xff] }
  0x39   : > { %424 = vst.msk [vmem:[#allocation2 + $0xd9] sm:$0xff] %vm263_vm0, %v391_v19  ;;  %425 = vst.msk [vmem:[#allocation2 + $0xe1] sm:$0xff] %vm263_vm0, %v392_v20  ;;  %v6764_v26 = vld [vmem:[#allocation2 + $0x31] sm:$0xff]  ;;  %572 = vrot.lane.b32.xlu1 %v6762_v25, %s6499_s14  ;;  %v6783_v31 = vld [vmem:[#allocation2 + $0x39] sm:$0xff] }
  0x3a   : > { %426 = vst.msk [vmem:[#allocation2 + $0xf1] sm:$0xff] %vm263_vm0, %v393_v21  ;;  %427 = vst.msk [vmem:[#allocation2 + $0xf9] sm:$0xff] %vm263_vm0, %v394_v22  ;;  %576 = vrot.lane.b32.xlu0 %v6764_v26, %s6499_s14  ;;  %v6779_v30 = vld [vmem:[#allocation2 + $0x49] sm:$0xff]  ;;  %v6800_v39 = vld [vmem:[#allocation2 + $0x51] sm:$0xff] }
  0x3b   : > { %428 = vst.msk [vmem:[#allocation2 + $0x109] sm:$0xff] %vm263_vm0, %v395_v23  ;;  %429 = vst.msk [vmem:[#allocation2 + $0x111] sm:$0xff] %vm263_vm0, %v396_v24  ;;  %v6787_v32 = vld [vmem:[#allocation2 + $0x61] sm:$0xff]  ;;  %v6811_v41 = vld [vmem:[#allocation2 + $0x69] sm:$0xff] }
  0x3c   : > { %430 = vst.msk [vmem:[#allocation2 + $0x121] sm:$0xff] %vm263_vm0, %v397_v28  ;;  %431 = vst.msk [vmem:[#allocation2 + $0x129] sm:$0xff] %vm263_vm0, %v398_v29  ;;  %v6807_v40 = vld [vmem:[#allocation2 + $0x79] sm:$0xff]  ;;  %v6819_v43 = vld [vmem:[#allocation2 + $0x81] sm:$0xff] }
  0x3d   : > { %574 = vrot.lane.b32.xlu1 %v6771_v27, %s6499_s14  ;;  %432 = vst.msk [vmem:[#allocation2 + $0x139] sm:$0xff] %vm263_vm0, %v399_v33  ;;  %433 = vst.msk [vmem:[#allocation2 + $0x141] sm:$0xff] %vm263_vm0, %v400_v34  ;;  %v6815_v42 = vld [vmem:[#allocation2 + $0x91] sm:$0xff]  ;;  %v6827_v46 = vld [vmem:[#allocation2 + $0x99] sm:$0xff] }
  0x3e   : > { %580 = vrot.lane.b32.xlu0 %v6779_v30, %s6499_s14  ;;  %434 = vst.msk [vmem:[#allocation2 + $0x151] sm:$0xff] %vm263_vm0, %v401_v35  ;;  %435 = vst.msk [vmem:[#allocation2 + $0x159] sm:$0xff] %vm263_vm0, %v402_v36  ;;  %v6823_v44 = vld [vmem:[#allocation2 + $0xa9] sm:$0xff]  ;;  %v6830_v47 = vld [vmem:[#allocation2 + $0x18] sm:$0xff] }
  0x3f   : > { %436 = vst.msk [vmem:[#allocation2 + $0x169] sm:$0xff] %vm263_vm0, %v403_v37  ;;  %437 = vst.msk [vmem:[#allocation2 + $0x171] sm:$0xff] %vm263_vm0, %v404_v38  ;;  %v6837_v49 = vld [vmem:[#allocation2 + $0x20] sm:$0xff]  ;;  %v6839_v50 = vld [vmem:[#allocation2 + $0x30] sm:$0xff] }
  0x40   : > { %472 = vst.msk [vmem:[#allocation4] sm:$0xff] %vm263_vm0, %v440_v45  ;;  %474 = vst.msk [vmem:[#allocation4 + $0x10] sm:$0xff] %vm263_vm0, %v6830_v47  ;;  %v6841_v51 = vld [vmem:[#allocation2 + $0xc1] sm:$0xff]  ;;  %v6847_v52 = vld [vmem:[#allocation2 + $0x38] sm:$0xff] }
  0x41   : > { %578 = vrot.lane.b32.xlu1 %v6783_v31, %s6499_s14  ;;  %473 = vst.msk [vmem:[#allocation4 + $0x8] sm:$0xff] %vm263_vm0, %v441_v48  ;;  %475 = vst.msk [vmem:[#allocation4 + $0x18] sm:$0xff] %vm263_vm0, %v6837_v49  ;;  %v6851_v53 = vld [vmem:[#allocation2 + $0xb1] sm:$0xff]  ;;  %v6855_v54 = vld [vmem:[#allocation2 + $0x48] sm:$0xff] }
  0x42   : > { %584 = vrot.lane.b32.xlu0 %v6787_v32, %s6499_s14  ;;  %476 = vst.msk [vmem:[#allocation4 + $0x20] sm:$0xff] %vm263_vm0, %v6839_v50  ;;  %477 = vst.msk [vmem:[#allocation4 + $0x28] sm:$0xff] %vm263_vm0, %v6847_v52  ;;  %v6857_v55 = vld [vmem:[#allocation2 + $0x50] sm:$0xff]  ;;  %v6859_v56 = vld [vmem:[#allocation2 + $0xd9] sm:$0xff] }
  0x43   : > { %478 = vst.msk [vmem:[#allocation4 + $0x30] sm:$0xff] %vm263_vm0, %v6855_v54  ;;  %479 = vst.msk [vmem:[#allocation4 + $0x38] sm:$0xff] %vm263_vm0, %v6857_v55  ;;  %v6865_v57 = vld [vmem:[#allocation2 + $0x60] sm:$0xff]  ;;  %v6867_v58 = vld [vmem:[#allocation2 + $0x68] sm:$0xff] }
  0x44   : > { %v6869_v59 = vld [vmem:[#allocation2 + $0x78] sm:$0xff]  ;;  %480 = vst.msk [vmem:[#allocation4 + $0x40] sm:$0xff] %vm263_vm0, %v6865_v57  ;;  %481 = vst.msk [vmem:[#allocation4 + $0x48] sm:$0xff] %vm263_vm0, %v6867_v58  ;;  %v6879_v60 = vld [vmem:[#allocation2 + $0x80] sm:$0xff] }
  0x45   : > { %582 = vrot.lane.b32.xlu1 %v6800_v39, %s6499_s14  ;;  %482 = vst.msk [vmem:[#allocation4 + $0x50] sm:$0xff] %vm263_vm0, %v6869_v59  ;;  %v6881_v61 = vld [vmem:[#allocation2 + $0x90] sm:$0xff]  ;;  %v6883_v62 = vld [vmem:[#allocation2 + $0x98] sm:$0xff]  ;;  %483 = vst.msk [vmem:[#allocation4 + $0x58] sm:$0xff] %vm263_vm0, %v6879_v60 }
  0x46   : > { %588 = vrot.lane.b32.xlu0 %v6807_v40, %s6499_s14  ;;  %v6885_v63 = vld [vmem:[#allocation2 + $0xc9] sm:$0xff]  ;;  %484 = vst.msk [vmem:[#allocation4 + $0x60] sm:$0xff] %vm263_vm0, %v6881_v61  ;;  %485 = vst.msk [vmem:[#allocation4 + $0x68] sm:$0xff] %vm263_vm0, %v6883_v62  ;;  %v6897_v3 = vld [vmem:[#allocation2 + $0xc0] sm:$0xff] }
  0x47   : > { %v6893_v1 = vld [vmem:[#allocation2 + $0xa8] sm:$0xff]  ;;  %v6895_v2 = vld [vmem:[#allocation2 + $0xb0] sm:$0xff]  ;;  %488 = vst.msk [vmem:[#allocation4 + $0x80] sm:$0xff] %vm263_vm0, %v6897_v3  ;;  %v6909_v5 = vld [vmem:[#allocation2 + $0xd8] sm:$0xff] }
  0x48   : > { %486 = vst.msk [vmem:[#allocation4 + $0x70] sm:$0xff] %vm263_vm0, %v6893_v1  ;;  %487 = vst.msk [vmem:[#allocation4 + $0x78] sm:$0xff] %vm263_vm0, %v6895_v2  ;;  %v6907_v4 = vld [vmem:[#allocation2 + $0xc8] sm:$0xff]  ;;  %v6911_v6 = vld [vmem:[#allocation2 + $0xe0] sm:$0xff] }
  0x49   : > { %586 = vrot.lane.b32.xlu1 %v6811_v41, %s6499_s14  ;;  %489 = vst.msk [vmem:[#allocation4 + $0x88] sm:$0xff] %vm263_vm0, %v6907_v4  ;;  %490 = vst.msk [vmem:[#allocation4 + $0x90] sm:$0xff] %vm263_vm0, %v6909_v5  ;;  %v6919_v7 = vld [vmem:[#allocation2 + $0xf0] sm:$0xff]  ;;  %v6921_v8 = vld [vmem:[#allocation2 + $0xf8] sm:$0xff] }
  0x4a   : > { %592 = vrot.lane.b32.xlu0 %v6815_v42, %s6499_s14  ;;  %491 = vst.msk [vmem:[#allocation4 + $0x98] sm:$0xff] %vm263_vm0, %v6911_v6  ;;  %v6923_v9 = vld [vmem:[#allocation2 + $0x108] sm:$0xff]  ;;  %492 = vst.msk [vmem:[#allocation4 + $0xa0] sm:$0xff] %vm263_vm0, %v6919_v7  ;;  %v6933_v10 = vld [vmem:[#allocation2 + $0x110] sm:$0xff] }
  0x4b   : > { %493 = vst.msk [vmem:[#allocation4 + $0xa8] sm:$0xff] %vm263_vm0, %v6921_v8  ;;  %494 = vst.msk [vmem:[#allocation4 + $0xb0] sm:$0xff] %vm263_vm0, %v6923_v9  ;;  %v6935_v11 = vld [vmem:[#allocation2 + $0xf1] sm:$0xff]  ;;  %v6939_v12 = vld [vmem:[#allocation2 + $0x120] sm:$0xff] }
  0x4c   : > { %495 = vst.msk [vmem:[#allocation4 + $0xb8] sm:$0xff] %vm263_vm0, %v6933_v10  ;;  %496 = vst.msk [vmem:[#allocation4 + $0xc0] sm:$0xff] %vm263_vm0, %v6939_v12  ;;  %v6945_v13 = vld [vmem:[#allocation2 + $0x128] sm:$0xff]  ;;  %v6955_v16 = vld [vmem:[#allocation2 + $0x138] sm:$0xff] }
  0x4d   : > { %590 = vrot.lane.b32.xlu1 %v6819_v43, %s6499_s14  ;;  %v6947_v14 = vld [vmem:[#allocation2 + $0xe1] sm:$0xff]  ;;  %497 = vst.msk [vmem:[#allocation4 + $0xc8] sm:$0xff] %vm263_vm0, %v6945_v13  ;;  %v6953_v15 = vld [vmem:[#allocation2 + $0x109] sm:$0xff]  ;;  %498 = vst.msk [vmem:[#allocation4 + $0xd0] sm:$0xff] %vm263_vm0, %v6955_v16 }
  0x4e   : > { %596 = vrot.lane.b32.xlu0 %v6823_v44, %s6499_s14  ;;  %v6961_v17 = vld [vmem:[#allocation2 + $0x140] sm:$0xff]  ;;  %v6971_v20 = vld [vmem:[#allocation2 + $0x150] sm:$0xff]  ;;  %v6977_v21 = vld [vmem:[#allocation2 + $0x158] sm:$0xff] }
  0x4f   : > { %v6963_v18 = vld [vmem:[#allocation2 + $0xf9] sm:$0xff]  ;;  %499 = vst.msk [vmem:[#allocation4 + $0xd8] sm:$0xff] %vm263_vm0, %v6961_v17  ;;  %v6969_v19 = vld [vmem:[#allocation2 + $0x121] sm:$0xff]  ;;  %500 = vst.msk [vmem:[#allocation4 + $0xe0] sm:$0xff] %vm263_vm0, %v6971_v20 }
  0x50   : > { %v6979_v22 = vld [vmem:[#allocation2 + $0x111] sm:$0xff]  ;;  %501 = vst.msk [vmem:[#allocation4 + $0xe8] sm:$0xff] %vm263_vm0, %v6977_v21  ;;  %v6985_v23 = vld [vmem:[#allocation2 + $0x139] sm:$0xff]  ;;  %v6987_v24 = vld [vmem:[#allocation2 + $0x168] sm:$0xff] }
  0x51   : > { %594 = vrot.lane.b32.xlu1 %v6827_v46, %s6499_s14  ;;  %502 = vst.msk [vmem:[#allocation4 + $0xf0] sm:$0xff] %vm263_vm0, %v6987_v24  ;;  %v6993_v28 = vld [vmem:[#allocation2 + $0x170] sm:$0xff]  ;;  %v7005_v34 = vld [vmem:[#allocation2 + $0x141] sm:$0xff]  ;;  %v406_v37 = vld [vmem:[%s6717_s13 + $0xf8] sm:$0xff] }
  0x52   : > { %600 = vrot.lane.b32.xlu0 %v6841_v51, %s6499_s14  ;;  %v6995_v29 = vld [vmem:[#allocation2 + $0x129] sm:$0xff]  ;;  %503 = vst.msk [vmem:[#allocation4 + $0xf8] sm:$0xff] %vm263_vm0, %v6993_v28  ;;  %v7001_v33 = vld [vmem:[#allocation2 + $0x151] sm:$0xff]  ;;  %9378 = vst [vmem:[#allocation8_spill] sm:$0xff] %v7005_v34 }
  0x53   : > { %v405_v35 = vld [vmem:[%s6717_s13 + $0xf0] sm:$0xff]  ;;  %439 = vst.msk [vmem:[#allocation2 + $0x189] sm:$0xff] %vm263_vm0, %v406_v37  ;;  %v7017_v38 = vld [vmem:[#allocation2 + $0x159] sm:$0xff]  ;;  %v697_v45 = vld [vmem:[#allocation2 + $0x2] sm:$0xff]  ;;  %s6508_s13 = smov 48  }
  0x54   : > { %438 = vst.msk [vmem:[#allocation2 + $0x181] sm:$0xff] %vm263_vm0, %v405_v35  ;;  %v7011_v36 = vld [vmem:[#allocation2 + $0x169] sm:$0xff]  ;;  %9380 = vst [vmem:[#allocation10_spill] sm:$0xff] %v7017_v38  ;;  %v7023_v48 = vld [vmem:[#allocation2 + $0x171] sm:$0xff]  ;;  %vm3094_vm0 = vcmask 261312  }
  0x55   : > { %598 = vrot.lane.b32.xlu1 %v6851_v53, %s6499_s14  ;;  %9379 = vst [vmem:[#allocation9_spill] sm:$0xff] %v7011_v36  ;;  %9381 = vst [vmem:[#allocation11_spill] sm:$0xff] %v7023_v48  ;;  %v7026_v35 = vld [vmem:[#allocation2 + $0x1a] sm:$0xff]  ;;  %v698_v37 = vld [vmem:[#allocation2 + $0xa] sm:$0xff] }
  0x56   : > { %604 = vrot.lane.b32.xlu0 %v6859_v56, %s6499_s14  ;;  %9382 = vst [vmem:[#allocation12_spill] sm:$0xff] %v7026_v35  ;;  %v7032_v0 = vld [vmem:[#allocation2 + $0x32] sm:$0xff] }
  0x57   : > { %9383 = vst [vmem:[#allocation13_spill] sm:$0xff] %v7032_v0 }
  0x59   : > { %602 = vrot.lane.b32.xlu1 %v6885_v63, %s6499_s14 }
  0x5a   : > { %608 = vrot.lane.b32.xlu0 %v6935_v11, %s6499_s14 }
  0x5d   : > { %606 = vrot.lane.b32.xlu1 %v6947_v14, %s6499_s14 }
  0x5e   : > { %612 = vrot.lane.b32.xlu0 %v6953_v15, %s6499_s14 }
  0x61   : > { %610 = vrot.lane.b32.xlu1 %v6963_v18, %s6499_s14 }
  0x62   : > { %616 = vrot.lane.b32.xlu0 %v6969_v19, %s6499_s14 }
  0x65   : > { %614 = vrot.lane.b32.xlu1 %v6979_v22, %s6499_s14 }
  0x66   : > { %620 = vrot.lane.b32.xlu0 %v6985_v23, %s6499_s14 }
  0x69   : > { %618 = vrot.lane.b32.xlu1 %v6995_v29, %s6499_s14 }
  0x6a   : > { %624 = vrot.lane.b32.xlu0 %v7001_v33, %s6499_s14 }
  0x6d   : > { %622 = vrot.lane.b32.xlu1 %v7005_v34, %s6499_s14 }
  0x6e   : > { %628 = vrot.lane.b32.xlu0 %v7011_v36, %s6499_s14  ;;  %v7035_v36 = vld [vmem:[#allocation2 + $0x22] sm:$0xff] }
  0x6f   : > { %9384 = vst [vmem:[#allocation14_spill] sm:$0xff] %v7035_v36 }
  0x71   : > { %626 = vrot.lane.b32.xlu1 %v7017_v38, %s6499_s14  ;;  %v7039_v38 = vld [vmem:[#allocation2 + $0x4a] sm:$0xff] }
  0x72   : > { %761 = vrot.lane.b32.xlu0 %v697_v45, %s6500_s15  ;;  %9385 = vst [vmem:[#allocation15_spill] sm:$0xff] %v7039_v38  ;;  %v7043_v45 = vld [vmem:[#allocation2 + $0x3a] sm:$0xff] }
  0x73   : > { %9386 = vst [vmem:[#allocation16_spill] sm:$0xff] %v7043_v45 }
  0x75   : > { %630 = vrot.lane.b32.xlu1 %v7023_v48, %s6499_s14  ;;  %v7133_v48 = vld [vmem:[#allocation2 + $0x142] sm:$0xff]  ;;  %s8733_s14 = scalar_lea.vmem %s9342_s5, %s6140_s10  ;;  %s6063_s10 = sshll.u32 %s250_s9, 6 }
  0x76   : > { %765 = vrot.lane.b32.xlu0 %v7026_v35, %s6500_s15  ;;  %v7047_v35 = vld [vmem:[#allocation2 + $0x62] sm:$0xff]  ;;  %9407 = vst [vmem:[#allocation37_spill] sm:$0xff] %v7133_v48 }
  0x77   : > { %9387 = vst [vmem:[#allocation17_spill] sm:$0xff] %v7047_v35 }
  0x79   : > { %763 = vrot.lane.b32.xlu1 %v698_v37, %s6500_s15  ;;  %v7051_v37 = vld [vmem:[#allocation2 + $0x52] sm:$0xff] }
  0x7a   : > { %769 = vrot.lane.b32.xlu0 %v7032_v0, %s6500_s15  ;;  %9388 = vst [vmem:[#allocation18_spill] sm:$0xff] %v7051_v37  ;;  %v7055_v0 = vld [vmem:[#allocation2 + $0x7a] sm:$0xff] }
  0x7b   : > { %9389 = vst [vmem:[#allocation19_spill] sm:$0xff] %v7055_v0 }
  0x7d   : > { %767 = vrot.lane.b32.xlu1 %v7035_v36, %s6500_s15  ;;  %v7059_v36 = vld [vmem:[#allocation2 + $0x6a] sm:$0xff] }
  0x7e   : > { %773 = vrot.lane.b32.xlu0 %v7039_v38, %s6500_s15  ;;  %9390 = vst [vmem:[#allocation20_spill] sm:$0xff] %v7059_v36  ;;  %v7063_v38 = vld [vmem:[#allocation2 + $0x92] sm:$0xff] }
  0x7f   : > { %9391 = vst [vmem:[#allocation21_spill] sm:$0xff] %v7063_v38 }
  0x81   : > { %771 = vrot.lane.b32.xlu1 %v7043_v45, %s6500_s15  ;;  %v7067_v45 = vld [vmem:[#allocation2 + $0x82] sm:$0xff] }
  0x82   : > { %777 = vrot.lane.b32.xlu0 %v7047_v35, %s6500_s15  ;;  %9392 = vst [vmem:[#allocation22_spill] sm:$0xff] %v7067_v45  ;;  %v7071_v35 = vld [vmem:[#allocation2 + $0xaa] sm:$0xff] }
  0x83   : > { %9393 = vst [vmem:[#allocation23_spill] sm:$0xff] %v7071_v35 }
  0x85   : > { %775 = vrot.lane.b32.xlu1 %v7051_v37, %s6500_s15  ;;  %v7075_v37 = vld [vmem:[#allocation2 + $0x9a] sm:$0xff] }
  0x86   : > { %781 = vrot.lane.b32.xlu0 %v7055_v0, %s6500_s15  ;;  %9394 = vst [vmem:[#allocation24_spill] sm:$0xff] %v7075_v37  ;;  %v7079_v0 = vld [vmem:[#allocation2 + $0xc2] sm:$0xff] }
  0x87   : > { %9395 = vst [vmem:[#allocation25_spill] sm:$0xff] %v7079_v0 }
  0x89   : > { %779 = vrot.lane.b32.xlu1 %v7059_v36, %s6500_s15  ;;  %v7083_v36 = vld [vmem:[#allocation2 + $0xb2] sm:$0xff] }
  0x8a   : > { %785 = vrot.lane.b32.xlu0 %v7063_v38, %s6500_s15  ;;  %9396 = vst [vmem:[#allocation26_spill] sm:$0xff] %v7083_v36  ;;  %v7087_v38 = vld [vmem:[#allocation2 + $0xda] sm:$0xff] }
  0x8b   : > { %9397 = vst [vmem:[#allocation27_spill] sm:$0xff] %v7087_v38 }
  0x8d   : > { %783 = vrot.lane.b32.xlu1 %v7067_v45, %s6500_s15  ;;  %v7091_v45 = vld [vmem:[#allocation2 + $0xca] sm:$0xff] }
  0x8e   : > { %789 = vrot.lane.b32.xlu0 %v7071_v35, %s6500_s15  ;;  %9398 = vst [vmem:[#allocation28_spill] sm:$0xff] %v7091_v45  ;;  %v7095_v35 = vld [vmem:[#allocation2 + $0xf2] sm:$0xff] }
  0x8f   : > { %9399 = vst [vmem:[#allocation29_spill] sm:$0xff] %v7095_v35 }
  0x91   : > { %787 = vrot.lane.b32.xlu1 %v7075_v37, %s6500_s15  ;;  %v7099_v37 = vld [vmem:[#allocation2 + $0xe2] sm:$0xff] }
  0x92   : > { %793 = vrot.lane.b32.xlu0 %v7079_v0, %s6500_s15  ;;  %9400 = vst [vmem:[#allocation30_spill] sm:$0xff] %v7099_v37  ;;  %v7103_v0 = vld [vmem:[#allocation2 + $0x10a] sm:$0xff] }
  0x93   : > { %9401 = vst [vmem:[#allocation31_spill] sm:$0xff] %v7103_v0 }
  0x95   : > { %791 = vrot.lane.b32.xlu1 %v7083_v36, %s6500_s15  ;;  %v7107_v36 = vld [vmem:[#allocation2 + $0xfa] sm:$0xff] }
  0x96   : > { %797 = vrot.lane.b32.xlu0 %v7087_v38, %s6500_s15  ;;  %9402 = vst [vmem:[#allocation32_spill] sm:$0xff] %v7107_v36  ;;  %v7111_v38 = vld [vmem:[#allocation2 + $0x122] sm:$0xff] }
  0x97   : > { %9403 = vst [vmem:[#allocation33_spill] sm:$0xff] %v7111_v38 }
  0x99   : > { %795 = vrot.lane.b32.xlu1 %v7091_v45, %s6500_s15  ;;  %v7115_v45 = vld [vmem:[#allocation2 + $0x112] sm:$0xff] }
  0x9a   : > { %801 = vrot.lane.b32.xlu0 %v7095_v35, %s6500_s15  ;;  %9404 = vst [vmem:[#allocation34_spill] sm:$0xff] %v7115_v45  ;;  %v7119_v35 = vld [vmem:[#allocation2 + $0x13a] sm:$0xff] }
  0x9b   : > { %9405 = vst [vmem:[#allocation35_spill] sm:$0xff] %v7119_v35 }
  0x9d   : > { %799 = vrot.lane.b32.xlu1 %v7099_v37, %s6500_s15  ;;  %v569_v37 = vpop.permute.xlu0 %568 }
  0x9e   : > { %805 = vrot.lane.b32.xlu0 %v7103_v0, %s6500_s15  ;;  %665 = vst.msk [vmem:[#allocation4] sm:$0xff] %vm664_vm2, %v569_v37  ;;  %v7124_v0 = vld [vmem:[#allocation2 + $0x12a] sm:$0xff] }
  0x9f   : > { %9406 = vst [vmem:[#allocation36_spill] sm:$0xff] %v7124_v0  ;;  %v7138_v37 = vld [vmem:[#allocation2 + $0x16a] sm:$0xff] }
  0xa1   : > { %803 = vrot.lane.b32.xlu1 %v7107_v36, %s6500_s15  ;;  %v7128_v36 = vld [vmem:[#allocation2 + $0x152] sm:$0xff] }
  0xa2   : > { %809 = vrot.lane.b32.xlu0 %v7111_v38, %s6500_s15  ;;  %v571_v38 = vpop.permute.xlu0 %570 }
  0xa3   : > { %666 = vst.msk [vmem:[#allocation4 + $0x8] sm:$0xff] %vm664_vm2, %v571_v38  ;;  %v7151_v38 = vld [vmem:[#allocation2 + $0x172] sm:$0xff] }
  0xa5   : > { %807 = vrot.lane.b32.xlu1 %v7115_v45, %s6500_s15 }
  0xa6   : > { %813 = vrot.lane.b32.xlu0 %v7119_v35, %s6500_s15 }
  0xa9   : > { %811 = vrot.lane.b32.xlu1 %v7124_v0, %s6500_s15  ;;  %v7143_v0 = vld [vmem:[#allocation2 + $0x15a] sm:$0xff] }
  0xaa   : > { %817 = vrot.lane.b32.xlu0 %v7128_v36, %s6500_s15 }
  0xab   : > { %v573_v34 = vpop.permute.xlu1 %572 }
  0xac   : > { %667 = vst.msk [vmem:[#allocation4 + $0x10] sm:$0xff] %vm664_vm2, %v573_v34  ;;  %v577_v35 = vpop.permute.xlu0 %576 }
  0xad   : > { %815 = vrot.lane.b32.xlu1 %v7133_v48, %s6500_s15  ;;  %669 = vst.msk [vmem:[#allocation4 + $0x20] sm:$0xff] %vm664_vm2, %v577_v35 }
  0xae   : > { %821 = vrot.lane.b32.xlu0 %v7138_v37, %s6500_s15 }
  0xaf   : > { %v575_v45 = vpop.permute.xlu1 %574 }
  0xb0   : > { %668 = vst.msk [vmem:[#allocation4 + $0x18] sm:$0xff] %vm664_vm2, %v575_v45  ;;  %v581_v34 = vpop.permute.xlu0 %580 }
  0xb1   : > { %819 = vrot.lane.b32.xlu1 %v7143_v0, %s6500_s15  ;;  %671 = vst.msk [vmem:[#allocation4 + $0x30] sm:$0xff] %vm664_vm2, %v581_v34 }
  0xb2   : > { %954 = vrot.lane.b32.xlu0 %v6830_v47, %s6501_s16 }
  0xb3   : > { %v579_v48 = vpop.permute.xlu1 %578 }
  0xb4   : > { %670 = vst.msk [vmem:[#allocation4 + $0x28] sm:$0xff] %vm664_vm2, %v579_v48  ;;  %v585_v35 = vpop.permute.xlu0 %584 }
  0xb5   : > { %823 = vrot.lane.b32.xlu1 %v7151_v38, %s6500_s15  ;;  %673 = vst.msk [vmem:[#allocation4 + $0x40] sm:$0xff] %vm664_vm2, %v585_v35 }
  0xb6   : > { %958 = vrot.lane.b32.xlu0 %v6839_v50, %s6501_s16 }
  0xb7   : > { %v583_v45 = vpop.permute.xlu1 %582 }
  0xb8   : > { %672 = vst.msk [vmem:[#allocation4 + $0x38] sm:$0xff] %vm664_vm2, %v583_v45  ;;  %v589_v34 = vpop.permute.xlu0 %588 }
  0xb9   : > { %956 = vrot.lane.b32.xlu1 %v6837_v49, %s6501_s16  ;;  %675 = vst.msk [vmem:[#allocation4 + $0x50] sm:$0xff] %vm664_vm2, %v589_v34 }
  0xba   : > { %962 = vrot.lane.b32.xlu0 %v6855_v54, %s6501_s16 }
  0xbb   : > { %v587_v47 = vpop.permute.xlu1 %586 }
  0xbc   : > { %674 = vst.msk [vmem:[#allocation4 + $0x48] sm:$0xff] %vm664_vm2, %v587_v47  ;;  %v593_v48 = vpop.permute.xlu0 %592 }
  0xbd   : > { %960 = vrot.lane.b32.xlu1 %v6847_v52, %s6501_s16  ;;  %677 = vst.msk [vmem:[#allocation4 + $0x60] sm:$0xff] %vm664_vm2, %v593_v48 }
  0xbe   : > { %966 = vrot.lane.b32.xlu0 %v6865_v57, %s6501_s16 }
  0xbf   : > { %v591_v35 = vpop.permute.xlu1 %590 }
  0xc0   : > { %676 = vst.msk [vmem:[#allocation4 + $0x58] sm:$0xff] %vm664_vm2, %v591_v35  ;;  %v597_v49 = vpop.permute.xlu0 %596 }
  0xc1   : > { %964 = vrot.lane.b32.xlu1 %v6857_v55, %s6501_s16  ;;  %679 = vst.msk [vmem:[#allocation4 + $0x70] sm:$0xff] %vm664_vm2, %v597_v49 }
  0xc2   : > { %970 = vrot.lane.b32.xlu0 %v6869_v59, %s6501_s16 }
  0xc3   : > { %v595_v45 = vpop.permute.xlu1 %594 }
  0xc4   : > { %678 = vst.msk [vmem:[#allocation4 + $0x68] sm:$0xff] %vm664_vm2, %v595_v45  ;;  %v601_v34 = vpop.permute.xlu0 %600 }
  0xc5   : > { %968 = vrot.lane.b32.xlu1 %v6867_v58, %s6501_s16  ;;  %681 = vst.msk [vmem:[#allocation4 + $0x80] sm:$0xff] %vm664_vm2, %v601_v34 }
  0xc6   : > { %974 = vrot.lane.b32.xlu0 %v6881_v61, %s6501_s16 }
  0xc7   : > { %v599_v47 = vpop.permute.xlu1 %598 }
  0xc8   : > { %680 = vst.msk [vmem:[#allocation4 + $0x78] sm:$0xff] %vm664_vm2, %v599_v47  ;;  %v605_v48 = vpop.permute.xlu0 %604 }
  0xc9   : > { %972 = vrot.lane.b32.xlu1 %v6879_v60, %s6501_s16  ;;  %683 = vst.msk [vmem:[#allocation4 + $0x90] sm:$0xff] %vm664_vm2, %v605_v48 }
  0xca   : > { %978 = vrot.lane.b32.xlu0 %v6893_v1, %s6501_s16 }
  0xcb   : > { %v603_v35 = vpop.permute.xlu1 %602 }
  0xcc   : > { %682 = vst.msk [vmem:[#allocation4 + $0x88] sm:$0xff] %vm664_vm2, %v603_v35  ;;  %v609_v49 = vpop.permute.xlu0 %608 }
  0xcd   : > { %976 = vrot.lane.b32.xlu1 %v6883_v62, %s6501_s16  ;;  %685 = vst.msk [vmem:[#allocation4 + $0xa0] sm:$0xff] %vm664_vm2, %v609_v49 }
  0xce   : > { %982 = vrot.lane.b32.xlu0 %v6897_v3, %s6501_s16 }
  0xcf   : > { %v607_v45 = vpop.permute.xlu1 %606 }
  0xd0   : > { %684 = vst.msk [vmem:[#allocation4 + $0x98] sm:$0xff] %vm664_vm2, %v607_v45  ;;  %v613_v34 = vpop.permute.xlu0 %612 }
  0xd1   : > { %980 = vrot.lane.b32.xlu1 %v6895_v2, %s6501_s16  ;;  %687 = vst.msk [vmem:[#allocation4 + $0xb0] sm:$0xff] %vm664_vm2, %v613_v34 }
  0xd2   : > { %986 = vrot.lane.b32.xlu0 %v6909_v5, %s6501_s16 }
  0xd3   : > { %v611_v47 = vpop.permute.xlu1 %610 }
  0xd4   : > { %686 = vst.msk [vmem:[#allocation4 + $0xa8] sm:$0xff] %vm664_vm2, %v611_v47  ;;  %v617_v48 = vpop.permute.xlu0 %616 }
  0xd5   : > { %984 = vrot.lane.b32.xlu1 %v6907_v4, %s6501_s16  ;;  %689 = vst.msk [vmem:[#allocation4 + $0xc0] sm:$0xff] %vm664_vm2, %v617_v48 }
  0xd6   : > { %990 = vrot.lane.b32.xlu0 %v6919_v7, %s6501_s16 }
  0xd7   : > { %v615_v35 = vpop.permute.xlu1 %614 }
  0xd8   : > { %688 = vst.msk [vmem:[#allocation4 + $0xb8] sm:$0xff] %vm664_vm2, %v615_v35  ;;  %v621_v49 = vpop.permute.xlu0 %620 }
  0xd9   : > { %988 = vrot.lane.b32.xlu1 %v6911_v6, %s6501_s16  ;;  %691 = vst.msk [vmem:[#allocation4 + $0xd0] sm:$0xff] %vm664_vm2, %v621_v49 }
  0xda   : > { %994 = vrot.lane.b32.xlu0 %v6923_v9, %s6501_s16 }
  0xdb   : > { %v619_v45 = vpop.permute.xlu1 %618 }
  0xdc   : > { %690 = vst.msk [vmem:[#allocation4 + $0xc8] sm:$0xff] %vm664_vm2, %v619_v45  ;;  %v625_v34 = vpop.permute.xlu0 %624 }
  0xdd   : > { %992 = vrot.lane.b32.xlu1 %v6921_v8, %s6501_s16  ;;  %693 = vst.msk [vmem:[#allocation4 + $0xe0] sm:$0xff] %vm664_vm2, %v625_v34 }
  0xde   : > { %998 = vrot.lane.b32.xlu0 %v6939_v12, %s6501_s16 }
  0xdf   : > { %v623_v47 = vpop.permute.xlu1 %622 }
  0xe0   : > { %692 = vst.msk [vmem:[#allocation4 + $0xd8] sm:$0xff] %vm664_vm2, %v623_v47  ;;  %v629_v48 = vpop.permute.xlu0 %628 }
  0xe1   : > { %996 = vrot.lane.b32.xlu1 %v6933_v10, %s6501_s16  ;;  %695 = vst.msk [vmem:[#allocation4 + $0xf0] sm:$0xff] %vm664_vm2, %v629_v48  ;;  %v9409_v48 = vld [vmem:[#allocation9_spill] sm:$0xff] }
  0xe2   : > { %1002 = vrot.lane.b32.xlu0 %v6955_v16, %s6501_s16 }
  0xe3   : > { %v627_v9 = vpop.permute.xlu1 %626 }
  0xe4   : > { %694 = vst.msk [vmem:[#allocation4 + $0xe8] sm:$0xff] %vm664_vm2, %v627_v9  ;;  %v762_v8 = vpop.permute.xlu0 %761  ;;  %v9410_v9 = vld [vmem:[#allocation10_spill] sm:$0xff] }
  0xe5   : > { %1000 = vrot.lane.b32.xlu1 %v6945_v13, %s6501_s16  ;;  %858 = vst.msk [vmem:[#allocation4] sm:$0xff] %vm857_vm3, %v762_v8  ;;  %v920_v13 = vld [vmem:[#allocation2 + $0x180] sm:$0xff] }
  0xe6   : > { %1006 = vrot.lane.b32.xlu0 %v6971_v20, %s6501_s16 }
  0xe7   : > { %v631_v12 = vpop.permute.xlu1 %630 }
  0xe8   : > { %696 = vst.msk [vmem:[#allocation4 + $0xf8] sm:$0xff] %vm664_vm2, %v631_v12  ;;  %v766_v10 = vpop.permute.xlu0 %765  ;;  %v9411_v12 = vld [vmem:[#allocation11_spill] sm:$0xff]  ;;  %vm3480_vm2 = vcmask 392512  }
  0xe9   : > { %1004 = vrot.lane.b32.xlu1 %v6961_v17, %s6501_s16  ;;  %860 = vst.msk [vmem:[#allocation4 + $0x10] sm:$0xff] %vm857_vm3, %v766_v10 }
  0xea   : > { %1010 = vrot.lane.b32.xlu0 %v6987_v24, %s6501_s16  ;;  %v921_v24 = vld [vmem:[#allocation2 + $0x188] sm:$0xff] }
  0xeb   : > { %v764_v16 = vpop.permute.xlu1 %763 }
  0xec   : > { %859 = vst.msk [vmem:[#allocation4 + $0x8] sm:$0xff] %vm857_vm3, %v764_v16  ;;  %v770_v35 = vpop.permute.xlu0 %769  ;;  %v7342_v16 = vld [vmem:[#allocation2 + $0x189] sm:$0xff] }
  0xed   : > { %1008 = vrot.lane.b32.xlu1 %v6977_v21, %s6501_s16  ;;  %862 = vst.msk [vmem:[#allocation4 + $0x20] sm:$0xff] %vm857_vm3, %v770_v35  ;;  %v9412_v35 = vld [vmem:[#allocation12_spill] sm:$0xff] }
  0xee   : > { %1014 = vrot.lane.b32.xlu0 %v920_v13, %s6501_s16 }
  0xef   : > { %v768_v20 = vpop.permute.xlu1 %767 }
  0xf0   : > { %861 = vst.msk [vmem:[#allocation4 + $0x18] sm:$0xff] %vm857_vm3, %v768_v20  ;;  %v774_v17 = vpop.permute.xlu0 %773 }
  0xf1   : > { %1012 = vrot.lane.b32.xlu1 %v6993_v28, %s6501_s16  ;;  %864 = vst.msk [vmem:[#allocation4 + $0x30] sm:$0xff] %vm857_vm3, %v774_v17 }
  0xf2   : > { %1147 = vrot.lane.b32.xlu0 %v6762_v25, %s6502_s17 }
  0xf3   : > { %v772_v49 = vpop.permute.xlu1 %771 }
  0xf4   : > { %863 = vst.msk [vmem:[#allocation4 + $0x28] sm:$0xff] %vm857_vm3, %v772_v49  ;;  %v778_v21 = vpop.permute.xlu0 %777  ;;  %v9414_v49 = vld [vmem:[#allocation14_spill] sm:$0xff] }
  0xf5   : > { %1016 = vrot.lane.b32.xlu1 %v921_v24, %s6501_s16  ;;  %866 = vst.msk [vmem:[#allocation4 + $0x40] sm:$0xff] %vm857_vm3, %v778_v21  ;;  %v9413_v24 = vld [vmem:[#allocation13_spill] sm:$0xff]  ;;  %s6505_s16 = smov 28  }
  0xf6   : > { %1151 = vrot.lane.b32.xlu0 %v6764_v26, %s6502_s17 }
  0xf7   : > { %v776_v45 = vpop.permute.xlu1 %775 }
  0xf8   : > { %865 = vst.msk [vmem:[#allocation4 + $0x38] sm:$0xff] %vm857_vm3, %v776_v45  ;;  %v782_v28 = vpop.permute.xlu0 %781 }
  0xf9   : > { %1149 = vrot.lane.b32.xlu1 %v6771_v27, %s6502_s17  ;;  %868 = vst.msk [vmem:[#allocation4 + $0x50] sm:$0xff] %vm857_vm3, %v782_v28  ;;  %v9415_v28 = vld [vmem:[#allocation15_spill] sm:$0xff] }
  0xfa   : > { %1155 = vrot.lane.b32.xlu0 %v6779_v30, %s6502_s17 }
  0xfb   : > { %v780_v25 = vpop.permute.xlu1 %779 }
  0xfc   : > { %867 = vst.msk [vmem:[#allocation4 + $0x48] sm:$0xff] %vm857_vm3, %v780_v25  ;;  %v786_v34 = vpop.permute.xlu0 %785  ;;  %v9416_v25 = vld [vmem:[#allocation16_spill] sm:$0xff] }
  0xfd   : > { %1153 = vrot.lane.b32.xlu1 %v6783_v31, %s6502_s17  ;;  %870 = vst.msk [vmem:[#allocation4 + $0x60] sm:$0xff] %vm857_vm3, %v786_v34 }
  0xfe   : > { %1159 = vrot.lane.b32.xlu0 %v6787_v32, %s6502_s17 }
  0xff   : > { %v784_v26 = vpop.permute.xlu1 %783 }
 0x100   : > { %869 = vst.msk [vmem:[#allocation4 + $0x58] sm:$0xff] %vm857_vm3, %v784_v26  ;;  %v790_v27 = vpop.permute.xlu0 %789 }
 0x101   : > { %1157 = vrot.lane.b32.xlu1 %v6800_v39, %s6502_s17  ;;  %872 = vst.msk [vmem:[#allocation4 + $0x70] sm:$0xff] %vm857_vm3, %v790_v27  ;;  %v9417_v27 = vld [vmem:[#allocation17_spill] sm:$0xff] }
 0x102   : > { %1163 = vrot.lane.b32.xlu0 %v6807_v40, %s6502_s17 }
 0x103   : > { %v788_v30 = vpop.permute.xlu1 %787 }
 0x104   : > { %871 = vst.msk [vmem:[#allocation4 + $0x68] sm:$0xff] %vm857_vm3, %v788_v30  ;;  %v794_v31 = vpop.permute.xlu0 %793  ;;  %v9418_v30 = vld [vmem:[#allocation18_spill] sm:$0xff] }
 0x105   : > { %1161 = vrot.lane.b32.xlu1 %v6811_v41, %s6502_s17  ;;  %874 = vst.msk [vmem:[#allocation4 + $0x80] sm:$0xff] %vm857_vm3, %v794_v31 }
 0x106   : > { %1167 = vrot.lane.b32.xlu0 %v6815_v42, %s6502_s17 }
 0x107   : > { %v792_v32 = vpop.permute.xlu1 %791 }
 0x108   : > { %873 = vst.msk [vmem:[#allocation4 + $0x78] sm:$0xff] %vm857_vm3, %v792_v32  ;;  %v798_v39 = vpop.permute.xlu0 %797 }
 0x109   : > { %1165 = vrot.lane.b32.xlu1 %v6819_v43, %s6502_s17  ;;  %876 = vst.msk [vmem:[#allocation4 + $0x90] sm:$0xff] %vm857_vm3, %v798_v39  ;;  %v9419_v39 = vld [vmem:[#allocation19_spill] sm:$0xff] }
 0x10a   : > { %1171 = vrot.lane.b32.xlu0 %v6823_v44, %s6502_s17 }
 0x10b   : > { %v796_v40 = vpop.permute.xlu1 %795 }
 0x10c   : > { %875 = vst.msk [vmem:[#allocation4 + $0x88] sm:$0xff] %vm857_vm3, %v796_v40  ;;  %v802_v41 = vpop.permute.xlu0 %801  ;;  %v9420_v40 = vld [vmem:[#allocation20_spill] sm:$0xff] }
 0x10d   : > { %1169 = vrot.lane.b32.xlu1 %v6827_v46, %s6502_s17  ;;  %878 = vst.msk [vmem:[#allocation4 + $0xa0] sm:$0xff] %vm857_vm3, %v802_v41 }
 0x10e   : > { %1175 = vrot.lane.b32.xlu0 %v6841_v51, %s6502_s17 }
 0x10f   : > { %v800_v42 = vpop.permute.xlu1 %799 }
 0x110   : > { %877 = vst.msk [vmem:[#allocation4 + $0x98] sm:$0xff] %vm857_vm3, %v800_v42  ;;  %v806_v43 = vpop.permute.xlu0 %805 }
 0x111   : > { %1173 = vrot.lane.b32.xlu1 %v6851_v53, %s6502_s17  ;;  %880 = vst.msk [vmem:[#allocation4 + $0xb0] sm:$0xff] %vm857_vm3, %v806_v43  ;;  %v9421_v43 = vld [vmem:[#allocation21_spill] sm:$0xff] }
 0x112   : > { %1179 = vrot.lane.b32.xlu0 %v6859_v56, %s6502_s17 }
 0x113   : > { %v804_v44 = vpop.permute.xlu1 %803 }
 0x114   : > { %879 = vst.msk [vmem:[#allocation4 + $0xa8] sm:$0xff] %vm857_vm3, %v804_v44  ;;  %v810_v46 = vpop.permute.xlu0 %809  ;;  %v9422_v44 = vld [vmem:[#allocation22_spill] sm:$0xff] }
 0x115   : > { %1177 = vrot.lane.b32.xlu1 %v6885_v63, %s6502_s17  ;;  %882 = vst.msk [vmem:[#allocation4 + $0xc0] sm:$0xff] %vm857_vm3, %v810_v46 }
 0x116   : > { %1183 = vrot.lane.b32.xlu0 %v6935_v11, %s6502_s17 }
 0x117   : > { %v808_v51 = vpop.permute.xlu1 %807 }
 0x118   : > { %881 = vst.msk [vmem:[#allocation4 + $0xb8] sm:$0xff] %vm857_vm3, %v808_v51  ;;  %v814_v53 = vpop.permute.xlu0 %813 }
 0x119   : > { %1181 = vrot.lane.b32.xlu1 %v6947_v14, %s6502_s17  ;;  %884 = vst.msk [vmem:[#allocation4 + $0xd0] sm:$0xff] %vm857_vm3, %v814_v53  ;;  %v9423_v53 = vld [vmem:[#allocation23_spill] sm:$0xff] }
 0x11a   : > { %1187 = vrot.lane.b32.xlu0 %v6953_v15, %s6502_s17 }
 0x11b   : > { %v812_v56 = vpop.permute.xlu1 %811 }
 0x11c   : > { %883 = vst.msk [vmem:[#allocation4 + $0xc8] sm:$0xff] %vm857_vm3, %v812_v56  ;;  %v818_v63 = vpop.permute.xlu0 %817  ;;  %v9424_v56 = vld [vmem:[#allocation24_spill] sm:$0xff] }
 0x11d   : > { %1185 = vrot.lane.b32.xlu1 %v6963_v18, %s6502_s17  ;;  %886 = vst.msk [vmem:[#allocation4 + $0xe0] sm:$0xff] %vm857_vm3, %v818_v63 }
 0x11e   : > { %1191 = vrot.lane.b32.xlu0 %v6969_v19, %s6502_s17 }
 0x11f   : > { %v816_v11 = vpop.permute.xlu1 %815 }
 0x120   : > { %885 = vst.msk [vmem:[#allocation4 + $0xd8] sm:$0xff] %vm857_vm3, %v816_v11  ;;  %v822_v14 = vpop.permute.xlu0 %821 }
 0x121   : > { %1189 = vrot.lane.b32.xlu1 %v6979_v22, %s6502_s17  ;;  %888 = vst.msk [vmem:[#allocation4 + $0xf0] sm:$0xff] %vm857_vm3, %v822_v14  ;;  %v9408_v22 = vld [vmem:[#allocation8_spill] sm:$0xff]  ;;  %v9425_v14 = vld [vmem:[#allocation25_spill] sm:$0xff] }
 0x122   : > { %1195 = vrot.lane.b32.xlu0 %v6985_v23, %s6502_s17 }
 0x123   : > { %v820_v15 = vpop.permute.xlu1 %819 }
 0x124   : > { %887 = vst.msk [vmem:[#allocation4 + $0xe8] sm:$0xff] %vm857_vm3, %v820_v15  ;;  %v955_v18 = vpop.permute.xlu0 %954  ;;  %v9426_v15 = vld [vmem:[#allocation26_spill] sm:$0xff] }
 0x125   : > { %1193 = vrot.lane.b32.xlu1 %v6995_v29, %s6502_s17  ;;  %1051 = vst.msk [vmem:[#allocation4] sm:$0xff] %vm1050_vm4, %v955_v18  ;;  %v1113_v29 = vld [vmem:[#allocation2 + $0x181] sm:$0xff] }
 0x126   : > { %1199 = vrot.lane.b32.xlu0 %v7001_v33, %s6502_s17 }
 0x127   : > { %v824_v19 = vpop.permute.xlu1 %823 }
 0x128   : > { %889 = vst.msk [vmem:[#allocation4 + $0xf8] sm:$0xff] %vm857_vm3, %v824_v19  ;;  %v959_v47 = vpop.permute.xlu0 %958  ;;  %vm3674_vm3 = vcmask 458112  }
 0x129   : > { %1197 = vrot.lane.b32.xlu1 %v9408_v22, %s6502_s17  ;;  %1053 = vst.msk [vmem:[#allocation4 + $0x10] sm:$0xff] %vm1050_vm4, %v959_v47  ;;  %v9427_v22 = vld [vmem:[#allocation27_spill] sm:$0xff]  ;;  %v9428_v47 = vld [vmem:[#allocation28_spill] sm:$0xff] }
 0x12a   : > { %1203 = vrot.lane.b32.xlu0 %v9409_v48, %s6502_s17 }
 0x12b   : > { %v957_v23 = vpop.permute.xlu1 %956 }
 0x12c   : > { %1052 = vst.msk [vmem:[#allocation4 + $0x8] sm:$0xff] %vm1050_vm4, %v957_v23  ;;  %v963_v8 = vpop.permute.xlu0 %962 }
 0x12d   : > { %1201 = vrot.lane.b32.xlu1 %v9410_v9, %s6502_s17  ;;  %1055 = vst.msk [vmem:[#allocation4 + $0x20] sm:$0xff] %vm1050_vm4, %v963_v8  ;;  %v9430_v9 = vld [vmem:[#allocation30_spill] sm:$0xff] }
 0x12e   : > { %1207 = vrot.lane.b32.xlu0 %v1113_v29, %s6502_s17  ;;  %v9429_v29 = vld [vmem:[#allocation29_spill] sm:$0xff] }
 0x12f   : > { %v961_v33 = vpop.permute.xlu1 %960 }
 0x130   : > { %1054 = vst.msk [vmem:[#allocation4 + $0x18] sm:$0xff] %vm1050_vm4, %v961_v33  ;;  %v967_v10 = vpop.permute.xlu0 %966 }
 0x131   : > { %1205 = vrot.lane.b32.xlu1 %v9411_v12, %s6502_s17  ;;  %1057 = vst.msk [vmem:[#allocation4 + $0x30] sm:$0xff] %vm1050_vm4, %v967_v10  ;;  %v9431_v12 = vld [vmem:[#allocation31_spill] sm:$0xff]  ;;  %v9432_v10 = vld [vmem:[#allocation32_spill] sm:$0xff] }
 0x132   : > { %1340 = vrot.lane.b32.xlu0 %v9412_v35, %s6503_s18 }
 0x133   : > { %v965_v13 = vpop.permute.xlu1 %964 }
 0x134   : > { %1056 = vst.msk [vmem:[#allocation4 + $0x28] sm:$0xff] %vm1050_vm4, %v965_v13  ;;  %v971_v20 = vpop.permute.xlu0 %970 }
 0x135   : > { %1209 = vrot.lane.b32.xlu1 %v7342_v16, %s6502_s17  ;;  %1059 = vst.msk [vmem:[#allocation4 + $0x40] sm:$0xff] %vm1050_vm4, %v971_v20  ;;  %v9433_v20 = vld [vmem:[#allocation33_spill] sm:$0xff] }
 0x136   : > { %1344 = vrot.lane.b32.xlu0 %v9413_v24, %s6503_s18 }
 0x137   : > { %v969_v17 = vpop.permute.xlu1 %968 }
 0x138   : > { %1058 = vst.msk [vmem:[#allocation4 + $0x38] sm:$0xff] %vm1050_vm4, %v969_v17  ;;  %v975_v21 = vpop.permute.xlu0 %974  ;;  %v9434_v17 = vld [vmem:[#allocation34_spill] sm:$0xff] }
 0x139   : > { %1342 = vrot.lane.b32.xlu1 %v9414_v49, %s6503_s18  ;;  %1061 = vst.msk [vmem:[#allocation4 + $0x50] sm:$0xff] %vm1050_vm4, %v975_v21  ;;  %v9435_v21 = vld [vmem:[#allocation35_spill] sm:$0xff] }
 0x13a   : > { %1348 = vrot.lane.b32.xlu0 %v9415_v28, %s6503_s18 }
 0x13b   : > { %v973_v45 = vpop.permute.xlu1 %972 }
 0x13c   : > { %1060 = vst.msk [vmem:[#allocation4 + $0x48] sm:$0xff] %vm1050_vm4, %v973_v45  ;;  %v979_v34 = vpop.permute.xlu0 %978  ;;  %v9436_v45 = vld [vmem:[#allocation36_spill] sm:$0xff] }
 0x13d   : > { %1346 = vrot.lane.b32.xlu1 %v9416_v25, %s6503_s18  ;;  %1063 = vst.msk [vmem:[#allocation4 + $0x60] sm:$0xff] %vm1050_vm4, %v979_v34  ;;  %v9437_v34 = vld [vmem:[#allocation37_spill] sm:$0xff] }
 0x13e   : > { %1352 = vrot.lane.b32.xlu0 %v9417_v27, %s6503_s18 }
 0x13f   : > { %v977_v26 = vpop.permute.xlu1 %976 }
 0x140   : > { %1062 = vst.msk [vmem:[#allocation4 + $0x58] sm:$0xff] %vm1050_vm4, %v977_v26  ;;  %v983_v31 = vpop.permute.xlu0 %982 }
 0x141   : > { %1350 = vrot.lane.b32.xlu1 %v9418_v30, %s6503_s18  ;;  %1065 = vst.msk [vmem:[#allocation4 + $0x70] sm:$0xff] %vm1050_vm4, %v983_v31  ;;  %v7431_v30 = vld [vmem:[#allocation2 + $0x182] sm:$0xff] }
 0x142   : > { %1356 = vrot.lane.b32.xlu0 %v9419_v39, %s6503_s18 }
 0x143   : > { %v981_v32 = vpop.permute.xlu1 %980 }
 0x144   : > { %1064 = vst.msk [vmem:[#allocation4 + $0x68] sm:$0xff] %vm1050_vm4, %v981_v32  ;;  %v987_v41 = vpop.permute.xlu0 %986  ;;  %v7442_v32 = vld [vmem:[#allocation2 + $0x18a] sm:$0xff] }
 0x145   : > { %1354 = vrot.lane.b32.xlu1 %v9420_v40, %s6503_s18  ;;  %1067 = vst.msk [vmem:[#allocation4 + $0x80] sm:$0xff] %vm1050_vm4, %v987_v41 }
 0x146   : > { %1360 = vrot.lane.b32.xlu0 %v9421_v43, %s6503_s18 }
 0x147   : > { %v985_v42 = vpop.permute.xlu1 %984 }
 0x148   : > { %1066 = vst.msk [vmem:[#allocation4 + $0x78] sm:$0xff] %vm1050_vm4, %v985_v42  ;;  %v991_v46 = vpop.permute.xlu0 %990 }
 0x149   : > { %1358 = vrot.lane.b32.xlu1 %v9422_v44, %s6503_s18  ;;  %1069 = vst.msk [vmem:[#allocation4 + $0x90] sm:$0xff] %vm1050_vm4, %v991_v46  ;;  %v2084_v44 = vld [vmem:[%s9338_s1 + $0x18] sm:$0xff] }
 0x14a   : > { %1364 = vrot.lane.b32.xlu0 %v9423_v53, %s6503_s18  ;;  %v1663_v53 = vld [vmem:[#allocation2 + $0x31] sm:$0xff] }
 0x14b   : > { %v989_v51 = vpop.permute.xlu1 %988 }
 0x14c   : > { %1068 = vst.msk [vmem:[#allocation4 + $0x88] sm:$0xff] %vm1050_vm4, %v989_v51  ;;  %v995_v63 = vpop.permute.xlu0 %994 }
 0x14d   : > { %1362 = vrot.lane.b32.xlu1 %v9424_v56, %s6503_s18  ;;  %1071 = vst.msk [vmem:[#allocation4 + $0xa0] sm:$0xff] %vm1050_vm4, %v995_v63  ;;  %v1857_v63 = vld [vmem:[#allocation2 + $0x3a] sm:$0xff] }
 0x14e   : > { %1368 = vrot.lane.b32.xlu0 %v9425_v14, %s6503_s18 }
 0x14f   : > { %v993_v11 = vpop.permute.xlu1 %992 }
 0x150   : > { %1070 = vst.msk [vmem:[#allocation4 + $0x98] sm:$0xff] %vm1050_vm4, %v993_v11  ;;  %v999_v18 = vpop.permute.xlu0 %998  ;;  %v1856_v11 = vld [vmem:[#allocation2 + $0x32] sm:$0xff] }
 0x151   : > { %1366 = vrot.lane.b32.xlu1 %v9426_v15, %s6503_s18  ;;  %1073 = vst.msk [vmem:[#allocation4 + $0xb0] sm:$0xff] %vm1050_vm4, %v999_v18  ;;  %v1666_v15 = vld [vmem:[#allocation2 + $0x51] sm:$0xff] }
 0x152   : > { %1372 = vrot.lane.b32.xlu0 %v9427_v22, %s6503_s18 }
 0x153   : > { %v997_v19 = vpop.permute.xlu1 %996 }
 0x154   : > { %1072 = vst.msk [vmem:[#allocation4 + $0xa8] sm:$0xff] %vm1050_vm4, %v997_v19  ;;  %v1003_v23 = vpop.permute.xlu0 %1002  ;;  %v1665_v19 = vld [vmem:[#allocation2 + $0x49] sm:$0xff] }
 0x155   : > { %1370 = vrot.lane.b32.xlu1 %v9428_v47, %s6503_s18  ;;  %1075 = vst.msk [vmem:[#allocation4 + $0xc0] sm:$0xff] %vm1050_vm4, %v1003_v23  ;;  %v1859_v47 = vld [vmem:[#allocation2 + $0x52] sm:$0xff] }
 0x156   : > { %1376 = vrot.lane.b32.xlu0 %v9429_v29, %s6503_s18 }
 0x157   : > { %v1001_v48 = vpop.permute.xlu1 %1000 }
 0x158   : > { %1074 = vst.msk [vmem:[#allocation4 + $0xb8] sm:$0xff] %vm1050_vm4, %v1001_v48  ;;  %v1007_v8 = vpop.permute.xlu0 %1006  ;;  %v1858_v48 = vld [vmem:[#allocation2 + $0x4a] sm:$0xff] }
 0x159   : > { %1374 = vrot.lane.b32.xlu1 %v9430_v9, %s6503_s18  ;;  %1077 = vst.msk [vmem:[#allocation4 + $0xd0] sm:$0xff] %vm1050_vm4, %v1007_v8  ;;  %v1668_v9 = vld [vmem:[#allocation2 + $0x69] sm:$0xff] }
 0x15a   : > { %1380 = vrot.lane.b32.xlu0 %v9431_v12, %s6503_s18 }
 0x15b   : > { %v1005_v33 = vpop.permute.xlu1 %1004 }
 0x15c   : > { %1076 = vst.msk [vmem:[#allocation4 + $0xc8] sm:$0xff] %vm1050_vm4, %v1005_v33  ;;  %v1011_v13 = vpop.permute.xlu0 %1010  ;;  %v1667_v33 = vld [vmem:[#allocation2 + $0x61] sm:$0xff] }
 0x15d   : > { %1378 = vrot.lane.b32.xlu1 %v9432_v10, %s6503_s18  ;;  %1079 = vst.msk [vmem:[#allocation4 + $0xe0] sm:$0xff] %vm1050_vm4, %v1011_v13  ;;  %v1861_v10 = vld [vmem:[#allocation2 + $0x6a] sm:$0xff] }
 0x15e   : > { %1384 = vrot.lane.b32.xlu0 %v9433_v20, %s6503_s18 }
 0x15f   : > { %v1009_v35 = vpop.permute.xlu1 %1008 }
 0x160   : > { %1078 = vst.msk [vmem:[#allocation4 + $0xd8] sm:$0xff] %vm1050_vm4, %v1009_v35  ;;  %v1015_v24 = vpop.permute.xlu0 %1014  ;;  %v1860_v35 = vld [vmem:[#allocation2 + $0x62] sm:$0xff] }
 0x161   : > { %1382 = vrot.lane.b32.xlu1 %v9434_v17, %s6503_s18  ;;  %1081 = vst.msk [vmem:[#allocation4 + $0xf0] sm:$0xff] %vm1050_vm4, %v1015_v24  ;;  %v1670_v17 = vld [vmem:[#allocation2 + $0x81] sm:$0xff] }
 0x162   : > { %1388 = vrot.lane.b32.xlu0 %v9435_v21, %s6503_s18 }
 0x163   : > { %v1013_v49 = vpop.permute.xlu1 %1012 }
 0x164   : > { %1080 = vst.msk [vmem:[#allocation4 + $0xe8] sm:$0xff] %vm1050_vm4, %v1013_v49  ;;  %v1148_v28 = vpop.permute.xlu0 %1147  ;;  %v1669_v49 = vld [vmem:[#allocation2 + $0x79] sm:$0xff] }
 0x165   : > { %1386 = vrot.lane.b32.xlu1 %v9436_v45, %s6503_s18  ;;  %1244 = vst.msk [vmem:[#allocation4] sm:$0xff] %vm1243_vm5, %v1148_v28  ;;  %v1863_v45 = vld [vmem:[#allocation2 + $0x82] sm:$0xff] }
 0x166   : > { %1392 = vrot.lane.b32.xlu0 %v7128_v36, %s6503_s18 }
 0x167   : > { %v1017_v25 = vpop.permute.xlu1 %1016 }
 0x168   : > { %1082 = vst.msk [vmem:[#allocation4 + $0xf8] sm:$0xff] %vm1050_vm4, %v1017_v25  ;;  %v1152_v26 = vpop.permute.xlu0 %1151  ;;  %v1862_v25 = vld [vmem:[#allocation2 + $0x7a] sm:$0xff]  ;;  %vm3867_vm4 = vcmask 523712  }
 0x169   : > { %1390 = vrot.lane.b32.xlu1 %v9437_v34, %s6503_s18  ;;  %1246 = vst.msk [vmem:[#allocation4 + $0x10] sm:$0xff] %vm1243_vm5, %v1152_v26  ;;  %v1672_v26 = vld [vmem:[#allocation2 + $0x99] sm:$0xff] }
 0x16a   : > { %1396 = vrot.lane.b32.xlu0 %v7138_v37, %s6503_s18 }
 0x16b   : > { %v1150_v27 = vpop.permute.xlu1 %1149 }
 0x16c   : > { %1245 = vst.msk [vmem:[#allocation4 + $0x8] sm:$0xff] %vm1243_vm5, %v1150_v27  ;;  %v1156_v36 = vpop.permute.xlu0 %1155 }
 0x16d   : > { %1394 = vrot.lane.b32.xlu1 %v7143_v0, %s6503_s18  ;;  %1248 = vst.msk [vmem:[#allocation4 + $0x20] sm:$0xff] %vm1243_vm5, %v1156_v36  ;;  %v1671_v36 = vld [vmem:[#allocation2 + $0x91] sm:$0xff] }
 0x16e   : > { %1400 = vrot.lane.b32.xlu0 %v7431_v30, %s6503_s18 }
 0x16f   : > { %v1154_v31 = vpop.permute.xlu1 %1153 }
 0x170   : > { %1247 = vst.msk [vmem:[#allocation4 + $0x18] sm:$0xff] %vm1243_vm5, %v1154_v31  ;;  %v1160_v37 = vpop.permute.xlu0 %1159 }
 0x171   : > { %1398 = vrot.lane.b32.xlu1 %v7151_v38, %s6503_s18  ;;  %1250 = vst.msk [vmem:[#allocation4 + $0x30] sm:$0xff] %vm1243_vm5, %v1160_v37  ;;  %v1865_v37 = vld [vmem:[#allocation2 + $0x9a] sm:$0xff] }
 0x172   : > { %1534 = vrot.lane.b32.xlu0 %v6839_v50, %s6504_s19 }
 0x173   : > { %v1158_v39 = vpop.permute.xlu1 %1157 }
 0x174   : > { %1249 = vst.msk [vmem:[#allocation4 + $0x28] sm:$0xff] %vm1243_vm5, %v1158_v39  ;;  %v1164_v0 = vpop.permute.xlu0 %1163 }
 0x175   : > { %1402 = vrot.lane.b32.xlu1 %v7442_v32, %s6503_s18  ;;  %1252 = vst.msk [vmem:[#allocation4 + $0x40] sm:$0xff] %vm1243_vm5, %v1164_v0  ;;  %v1864_v0 = vld [vmem:[#allocation2 + $0x92] sm:$0xff] }
 0x176   : > { %1538 = vrot.lane.b32.xlu0 %v6855_v54, %s6504_s19 }
 0x177   : > { %v1162_v40 = vpop.permute.xlu1 %1161 }
 0x178   : > { %1251 = vst.msk [vmem:[#allocation4 + $0x38] sm:$0xff] %vm1243_vm5, %v1162_v40  ;;  %v1168_v38 = vpop.permute.xlu0 %1167 }
 0x179   : > { %1536 = vrot.lane.b32.xlu1 %v6847_v52, %s6504_s19  ;;  %1254 = vst.msk [vmem:[#allocation4 + $0x50] sm:$0xff] %vm1243_vm5, %v1168_v38  ;;  %v1674_v38 = vld [vmem:[#allocation2 + $0xb1] sm:$0xff] }
 0x17a   : > { %1542 = vrot.lane.b32.xlu0 %v6865_v57, %s6504_s19 }
 0x17b   : > { %v1166_v50 = vpop.permute.xlu1 %1165 }
 0x17c   : > { %1253 = vst.msk [vmem:[#allocation4 + $0x48] sm:$0xff] %vm1243_vm5, %v1166_v50  ;;  %v1172_v41 = vpop.permute.xlu0 %1171 }
 0x17d   : > { %1540 = vrot.lane.b32.xlu1 %v6857_v55, %s6504_s19  ;;  %1256 = vst.msk [vmem:[#allocation4 + $0x60] sm:$0xff] %vm1243_vm5, %v1172_v41  ;;  %v1673_v41 = vld [vmem:[#allocation2 + $0xa9] sm:$0xff] }
 0x17e   : > { %1546 = vrot.lane.b32.xlu0 %v6869_v59, %s6504_s19 }
 0x17f   : > { %v1170_v54 = vpop.permute.xlu1 %1169 }
 0x180   : > { %1255 = vst.msk [vmem:[#allocation4 + $0x58] sm:$0xff] %vm1243_vm5, %v1170_v54  ;;  %v1176_v52 = vpop.permute.xlu0 %1175 }
 0x181   : > { %1544 = vrot.lane.b32.xlu1 %v6867_v58, %s6504_s19  ;;  %1258 = vst.msk [vmem:[#allocation4 + $0x70] sm:$0xff] %vm1243_vm5, %v1176_v52  ;;  %v1867_v52 = vld [vmem:[#allocation2 + $0xb2] sm:$0xff] }
 0x182   : > { %1550 = vrot.lane.b32.xlu0 %v6881_v61, %s6504_s19 }
 0x183   : > { %v1174_v57 = vpop.permute.xlu1 %1173 }
 0x184   : > { %1257 = vst.msk [vmem:[#allocation4 + $0x68] sm:$0xff] %vm1243_vm5, %v1174_v57  ;;  %v1180_v55 = vpop.permute.xlu0 %1179 }
 0x185   : > { %1548 = vrot.lane.b32.xlu1 %v6879_v60, %s6504_s19  ;;  %1260 = vst.msk [vmem:[#allocation4 + $0x80] sm:$0xff] %vm1243_vm5, %v1180_v55  ;;  %v1866_v55 = vld [vmem:[#allocation2 + $0xaa] sm:$0xff] }
 0x186   : > { %1554 = vrot.lane.b32.xlu0 %v6893_v1, %s6504_s19  ;;  %v2081_v1 = vld [vmem:[%s9338_s1] sm:$0xff] }
 0x187   : > { %v1178_v59 = vpop.permute.xlu1 %1177 }
 0x188   : > { %1259 = vst.msk [vmem:[#allocation4 + $0x78] sm:$0xff] %vm1243_vm5, %v1178_v59  ;;  %v1184_v58 = vpop.permute.xlu0 %1183 }
 0x189   : > { %1552 = vrot.lane.b32.xlu1 %v6883_v62, %s6504_s19  ;;  %1262 = vst.msk [vmem:[#allocation4 + $0x90] sm:$0xff] %vm1243_vm5, %v1184_v58  ;;  %v2082_v62 = vld [vmem:[%s9338_s1 + $0x8] sm:$0xff] }
 0x18a   : > { %1558 = vrot.lane.b32.xlu0 %v6897_v3, %s6504_s19  ;;  %v6345_v42 = vpack.c.bf16 %v2082_v62, %v2081_v1  ;;  %v2083_v3 = vld [vmem:[%s9338_s1 + $0x10] sm:$0xff] }
 0x18b   : > { %v1182_v61 = vpop.permute.xlu1 %1181  ;;  %v6349_v46 = vpack.c.bf16 %v2084_v44, %v2083_v3  ;;  %v1676_v58 = vld [vmem:[#allocation2 + $0xc9] sm:$0xff]  ;;  %v1678_v3 = vld [vmem:[#allocation2 + $0xe1] sm:$0xff] }
 0x18c   : > { %1261 = vst.msk [vmem:[#allocation4 + $0x88] sm:$0xff] %vm1243_vm5, %v1182_v61  ;;  %v1188_v60 = vpop.permute.xlu0 %1187  ;;  %6346 = vmatprep.subr.bf16.mxu0 %v6345_v42  ;;  %v1869_v62 = vld [vmem:[#allocation2 + $0xca] sm:$0xff] }
 0x18d   : > { %1556 = vrot.lane.b32.xlu1 %v6895_v2, %s6504_s19  ;;  %1264 = vst.msk [vmem:[#allocation4 + $0xa0] sm:$0xff] %vm1243_vm5, %v1188_v60  ;;  %6348 = vmatpush3.bf16.msra.mxu0 %v6345_v42  ;;  %v1675_v60 = vld [vmem:[#allocation2 + $0xc1] sm:$0xff] }
 0x18e   : > { %1562 = vrot.lane.b32.xlu0 %v6909_v5, %s6504_s19  ;;  %6350 = vmatprep.subr.bf16.mxu0 %v6349_v46 }
 0x18f   : > { %v1186_v43 = vpop.permute.xlu1 %1185 }
 0x190   : > { %1263 = vst.msk [vmem:[#allocation4 + $0x98] sm:$0xff] %vm1243_vm5, %v1186_v43  ;;  %v1192_v2 = vpop.permute.xlu0 %1191  ;;  %v1868_v43 = vld [vmem:[#allocation2 + $0xc2] sm:$0xff] }
 0x191   : > { %1560 = vrot.lane.b32.xlu1 %v6907_v4, %s6504_s19  ;;  %1266 = vst.msk [vmem:[#allocation4 + $0xb0] sm:$0xff] %vm1243_vm5, %v1192_v2  ;;  %v1664_v4 = vld [vmem:[#allocation2 + $0x39] sm:$0xff]  ;;  %6352 = vmatpush3.bf16.msra.mxu0 %v6349_v46 }
 0x192   : > { %1566 = vrot.lane.b32.xlu0 %v6919_v7, %s6504_s19  ;;  %v2085_v7 = vld [vmem:[%s9338_s1 + $0x20] sm:$0xf] }
 0x193   : > { %v1190_v5 = vpop.permute.xlu1 %1189  ;;  %6229 = vmatprep.subr.msk.mxu0 %vm2190_vm6, %v2085_v7  ;;  %v1677_v46 = vld [vmem:[#allocation2 + $0xd9] sm:$0xff] }
 0x194   : > { %1265 = vst.msk [vmem:[#allocation4 + $0xa8] sm:$0xff] %vm1243_vm5, %v1190_v5  ;;  %v1196_v51 = vpop.permute.xlu0 %1195 }
 0x195   : > { %1564 = vrot.lane.b32.xlu1 %v6911_v6, %s6504_s19  ;;  %1268 = vst.msk [vmem:[#allocation4 + $0xc0] sm:$0xff] %vm1243_vm5, %v1196_v51  ;;  %6230 = vmatpush3.msk.msra.mxu0 %vm2190_vm6, %v2085_v7  ;;  %v1679_v7 = vld [vmem:[#allocation2 + $0xf1] sm:$0xff]  ;;  %vm4141_vm6 = vcmask 588800  }
 0x196   : > { %1729 = vrot.lane.b32.xlu0 %v1664_v4, %s6505_s16  ;;  %v1871_v4 = vld [vmem:[#allocation2 + $0xe2] sm:$0xff] }
 0x197   : > { %v1194_v56 = vpop.permute.xlu1 %1193 }
 0x198   : > { %1267 = vst.msk [vmem:[#allocation4 + $0xb8] sm:$0xff] %vm1243_vm5, %v1194_v56  ;;  %v1200_v6 = vpop.permute.xlu0 %1199 }
 0x199   : > { %1727 = vrot.lane.b32.xlu1 %v1663_v53, %s6505_s16  ;;  %1270 = vst.msk [vmem:[#allocation4 + $0xd0] sm:$0xff] %vm1243_vm5, %v1200_v6  ;;  %v1870_v53 = vld [vmem:[#allocation2 + $0xda] sm:$0xff] }
 0x19a   : > { %1922 = vrot.lane.b32.xlu0 %v1857_v63, %s6506_s26  ;;  %v1487_v6 = vld [vmem:[#allocation2 + $0xf8] sm:$0xff] }
 0x19b   : > { %v1198_v14 = vpop.permute.xlu1 %1197 }
 0x19c   : > { %1269 = vst.msk [vmem:[#allocation4 + $0xc8] sm:$0xff] %vm1243_vm5, %v1198_v14  ;;  %v1204_v18 = vpop.permute.xlu0 %1203  ;;  %v1872_v14 = vld [vmem:[#allocation2 + $0xf2] sm:$0xff] }
 0x19d   : > { %1920 = vrot.lane.b32.xlu1 %v1856_v11, %s6506_s26  ;;  %1272 = vst.msk [vmem:[#allocation4 + $0xe0] sm:$0xff] %vm1243_vm5, %v1204_v18  ;;  %v1680_v18 = vld [vmem:[#allocation2 + $0xf9] sm:$0xff] }
 0x19e   : > { %1733 = vrot.lane.b32.xlu0 %v1666_v15, %s6505_s16 }
 0x19f   : > { %v1202_v22 = vpop.permute.xlu1 %1201 }
 0x1a0   : > { %1271 = vst.msk [vmem:[#allocation4 + $0xd8] sm:$0xff] %vm1243_vm5, %v1202_v22  ;;  %v1208_v23 = vpop.permute.xlu0 %1207  ;;  %v1488_v22 = vld [vmem:[#allocation2 + $0x108] sm:$0xff] }
 0x1a1   : > { %1731 = vrot.lane.b32.xlu1 %v1665_v19, %s6505_s16  ;;  %1274 = vst.msk [vmem:[#allocation4 + $0xf0] sm:$0xff] %vm1243_vm5, %v1208_v23  ;;  %v1873_v23 = vld [vmem:[#allocation2 + $0xfa] sm:$0xff] }
 0x1a2   : > { %1926 = vrot.lane.b32.xlu0 %v1859_v47, %s6506_s26 }
 0x1a3   : > { %v1206_v29 = vpop.permute.xlu1 %1205 }
 0x1a4   : > { %1273 = vst.msk [vmem:[#allocation4 + $0xe8] sm:$0xff] %vm1243_vm5, %v1206_v29  ;;  %v1341_v8 = vpop.permute.xlu0 %1340  ;;  %v1681_v29 = vld [vmem:[#allocation2 + $0x109] sm:$0xff] }
 0x1a5   : > { %1924 = vrot.lane.b32.xlu1 %v1858_v48, %s6506_s26  ;;  %1437 = vst.msk [vmem:[#allocation4] sm:$0xff] %vm1436_vm7, %v1341_v8  ;;  %v1489_v8 = vld [vmem:[#allocation2 + $0x110] sm:$0xff] }
 0x1a6   : > { %1737 = vrot.lane.b32.xlu0 %v1668_v9, %s6505_s16 }
 0x1a7   : > { %v1210_v12 = vpop.permute.xlu1 %1209 }
 0x1a8   : > { %1275 = vst.msk [vmem:[#allocation4 + $0xf8] sm:$0xff] %vm1243_vm5, %v1210_v12  ;;  %v1345_v13 = vpop.permute.xlu0 %1344  ;;  %v1874_v12 = vld [vmem:[#allocation2 + $0x10a] sm:$0xff]  ;;  %vm4060_vm5 = vcmask 589312  }
 0x1a9   : > { %1735 = vrot.lane.b32.xlu1 %v1667_v33, %s6505_s16  ;;  %1439 = vst.msk [vmem:[#allocation4 + $0x10] sm:$0xff] %vm1436_vm7, %v1345_v13  ;;  %v1682_v13 = vld [vmem:[#allocation2 + $0x111] sm:$0xff] }
 0x1aa   : > { %1930 = vrot.lane.b32.xlu0 %v1861_v10, %s6506_s26 }
 0x1ab   : > { %v1343_v20 = vpop.permute.xlu1 %1342 }
 0x1ac   : > { %1438 = vst.msk [vmem:[#allocation4 + $0x8] sm:$0xff] %vm1436_vm7, %v1343_v20  ;;  %v1349_v24 = vpop.permute.xlu0 %1348  ;;  %v1490_v20 = vld [vmem:[#allocation2 + $0x120] sm:$0xff] }
 0x1ad   : > { %1928 = vrot.lane.b32.xlu1 %v1860_v35, %s6506_s26  ;;  %1441 = vst.msk [vmem:[#allocation4 + $0x20] sm:$0xff] %vm1436_vm7, %v1349_v24  ;;  %v1875_v24 = vld [vmem:[#allocation2 + $0x112] sm:$0xff] }
 0x1ae   : > { %1741 = vrot.lane.b32.xlu0 %v1670_v17, %s6505_s16 }
 0x1af   : > { %v1347_v21 = vpop.permute.xlu1 %1346 }
 0x1b0   : > { %1440 = vst.msk [vmem:[#allocation4 + $0x18] sm:$0xff] %vm1436_vm7, %v1347_v21  ;;  %v1353_v28 = vpop.permute.xlu0 %1352  ;;  %v1683_v21 = vld [vmem:[#allocation2 + $0x121] sm:$0xff] }
 0x1b1   : > { %1739 = vrot.lane.b32.xlu1 %v1669_v49, %s6505_s16  ;;  %1443 = vst.msk [vmem:[#allocation4 + $0x30] sm:$0xff] %vm1436_vm7, %v1353_v28  ;;  %v1491_v28 = vld [vmem:[#allocation2 + $0x128] sm:$0xff] }
 0x1b2   : > { %1934 = vrot.lane.b32.xlu0 %v1863_v45, %s6506_s26 }
 0x1b3   : > { %v1351_v34 = vpop.permute.xlu1 %1350 }
 0x1b4   : > { %1442 = vst.msk [vmem:[#allocation4 + $0x28] sm:$0xff] %vm1436_vm7, %v1351_v34  ;;  %v1357_v27 = vpop.permute.xlu0 %1356  ;;  %v1876_v34 = vld [vmem:[#allocation2 + $0x122] sm:$0xff] }
 0x1b5   : > { %1932 = vrot.lane.b32.xlu1 %v1862_v25, %s6506_s26  ;;  %1445 = vst.msk [vmem:[#allocation4 + $0x40] sm:$0xff] %vm1436_vm7, %v1357_v27  ;;  %v1684_v27 = vld [vmem:[#allocation2 + $0x129] sm:$0xff] }
 0x1b6   : > { %1745 = vrot.lane.b32.xlu0 %v1672_v26, %s6505_s16 }
 0x1b7   : > { %v1355_v31 = vpop.permute.xlu1 %1354 }
 0x1b8   : > { %1444 = vst.msk [vmem:[#allocation4 + $0x38] sm:$0xff] %vm1436_vm7, %v1355_v31  ;;  %v1361_v39 = vpop.permute.xlu0 %1360  ;;  %v1492_v31 = vld [vmem:[#allocation2 + $0x138] sm:$0xff] }
 0x1b9   : > { %1743 = vrot.lane.b32.xlu1 %v1671_v36, %s6505_s16  ;;  %1447 = vst.msk [vmem:[#allocation4 + $0x50] sm:$0xff] %vm1436_vm7, %v1361_v39  ;;  %v1877_v39 = vld [vmem:[#allocation2 + $0x12a] sm:$0xff] }
 0x1ba   : > { %1938 = vrot.lane.b32.xlu0 %v1865_v37, %s6506_s26 }
 0x1bb   : > { %v1359_v40 = vpop.permute.xlu1 %1358 }
 0x1bc   : > { %1446 = vst.msk [vmem:[#allocation4 + $0x48] sm:$0xff] %vm1436_vm7, %v1359_v40  ;;  %v1365_v50 = vpop.permute.xlu0 %1364  ;;  %v1685_v40 = vld [vmem:[#allocation2 + $0x139] sm:$0xff] }
 0x1bd   : > { %1936 = vrot.lane.b32.xlu1 %v1864_v0, %s6506_s26  ;;  %1449 = vst.msk [vmem:[#allocation4 + $0x60] sm:$0xff] %vm1436_vm7, %v1365_v50  ;;  %v1493_v50 = vld [vmem:[#allocation2 + $0x140] sm:$0xff] }
 0x1be   : > { %1749 = vrot.lane.b32.xlu0 %v1674_v38, %s6505_s16 }
 0x1bf   : > { %v1363_v54 = vpop.permute.xlu1 %1362 }
 0x1c0   : > { %1448 = vst.msk [vmem:[#allocation4 + $0x58] sm:$0xff] %vm1436_vm7, %v1363_v54  ;;  %v1369_v57 = vpop.permute.xlu0 %1368  ;;  %v1878_v54 = vld [vmem:[#allocation2 + $0x13a] sm:$0xff] }
 0x1c1   : > { %1747 = vrot.lane.b32.xlu1 %v1673_v41, %s6505_s16  ;;  %1451 = vst.msk [vmem:[#allocation4 + $0x70] sm:$0xff] %vm1436_vm7, %v1369_v57  ;;  %v1686_v57 = vld [vmem:[#allocation2 + $0x141] sm:$0xff] }
 0x1c2   : > { %1942 = vrot.lane.b32.xlu0 %v1867_v52, %s6506_s26 }
 0x1c3   : > { %v1367_v59 = vpop.permute.xlu1 %1366 }
 0x1c4   : > { %1450 = vst.msk [vmem:[#allocation4 + $0x68] sm:$0xff] %vm1436_vm7, %v1367_v59  ;;  %v1373_v61 = vpop.permute.xlu0 %1372  ;;  %v1494_v59 = vld [vmem:[#allocation2 + $0x150] sm:$0xff] }
 0x1c5   : > { %1940 = vrot.lane.b32.xlu1 %v1866_v55, %s6506_s26  ;;  %1453 = vst.msk [vmem:[#allocation4 + $0x80] sm:$0xff] %vm1436_vm7, %v1373_v61  ;;  %v1879_v61 = vld [vmem:[#allocation2 + $0x142] sm:$0xff] }
 0x1c6   : > { %1753 = vrot.lane.b32.xlu0 %v1676_v58, %s6505_s16 }
 0x1c7   : > { %v1371_v1 = vpop.permute.xlu1 %1370 }
 0x1c8   : > { %1452 = vst.msk [vmem:[#allocation4 + $0x78] sm:$0xff] %vm1436_vm7, %v1371_v1  ;;  %v1377_v42 = vpop.permute.xlu0 %1376  ;;  %v1687_v1 = vld [vmem:[#allocation2 + $0x151] sm:$0xff] }
 0x1c9   : > { %1751 = vrot.lane.b32.xlu1 %v1675_v60, %s6505_s16  ;;  %1455 = vst.msk [vmem:[#allocation4 + $0x90] sm:$0xff] %vm1436_vm7, %v1377_v42  ;;  %v1495_v42 = vld [vmem:[#allocation2 + $0x158] sm:$0xff] }
 0x1ca   : > { %1946 = vrot.lane.b32.xlu0 %v1869_v62, %s6506_s26 }
 0x1cb   : > { %v1375_v2 = vpop.permute.xlu1 %1374 }
 0x1cc   : > { %1454 = vst.msk [vmem:[#allocation4 + $0x88] sm:$0xff] %vm1436_vm7, %v1375_v2  ;;  %v1381_v44 = vpop.permute.xlu0 %1380  ;;  %v1880_v2 = vld [vmem:[#allocation2 + $0x152] sm:$0xff] }
 0x1cd   : > { %1944 = vrot.lane.b32.xlu1 %v1868_v43, %s6506_s26  ;;  %1457 = vst.msk [vmem:[#allocation4 + $0xa0] sm:$0xff] %vm1436_vm7, %v1381_v44  ;;  %v1688_v44 = vld [vmem:[#allocation2 + $0x159] sm:$0xff] }
 0x1ce   : > { %1757 = vrot.lane.b32.xlu0 %v1678_v3, %s6505_s16 }
 0x1cf   : > { %v1379_v5 = vpop.permute.xlu1 %1378 }
 0x1d0   : > { %1456 = vst.msk [vmem:[#allocation4 + $0x98] sm:$0xff] %vm1436_vm7, %v1379_v5  ;;  %v1385_v51 = vpop.permute.xlu0 %1384  ;;  %v1496_v5 = vld [vmem:[#allocation2 + $0x168] sm:$0xff] }
 0x1d1   : > { %1755 = vrot.lane.b32.xlu1 %v1677_v46, %s6505_s16  ;;  %1459 = vst.msk [vmem:[#allocation4 + $0xb0] sm:$0xff] %vm1436_vm7, %v1385_v51  ;;  %v1881_v51 = vld [vmem:[#allocation2 + $0x15a] sm:$0xff] }
 0x1d2   : > { %1950 = vrot.lane.b32.xlu0 %v1871_v4, %s6506_s26 }
 0x1d3   : > { %v1383_v56 = vpop.permute.xlu1 %1382 }
 0x1d4   : > { %1458 = vst.msk [vmem:[#allocation4 + $0xa8] sm:$0xff] %vm1436_vm7, %v1383_v56  ;;  %v1389_v63 = vpop.permute.xlu0 %1388  ;;  %v1689_v56 = vld [vmem:[#allocation2 + $0x169] sm:$0xff] }
 0x1d5   : > { %1948 = vrot.lane.b32.xlu1 %v1870_v53, %s6506_s26  ;;  %1461 = vst.msk [vmem:[#allocation4 + $0xc0] sm:$0xff] %vm1436_vm7, %v1389_v63  ;;  %v1497_v63 = vld [vmem:[#allocation2 + $0x170] sm:$0xff] }
 0x1d6   : > { %1759 = vrot.lane.b32.xlu0 %v1679_v7, %s6505_s16 }
 0x1d7   : > { %v1387_v11 = vpop.permute.xlu1 %1386 }
 0x1d8   : > { %1460 = vst.msk [vmem:[#allocation4 + $0xb8] sm:$0xff] %vm1436_vm7, %v1387_v11  ;;  %v1393_v15 = vpop.permute.xlu0 %1392  ;;  %v1882_v11 = vld [vmem:[#allocation2 + $0x16a] sm:$0xff] }
 0x1d9   : > { %1568 = vrot.lane.b32.xlu1 %v1487_v6, %s6504_s19  ;;  %1463 = vst.msk [vmem:[#allocation4 + $0xd0] sm:$0xff] %vm1436_vm7, %v1393_v15  ;;  %v1690_v15 = vld [vmem:[#allocation2 + $0x171] sm:$0xff] }
 0x1da   : > { %1952 = vrot.lane.b32.xlu0 %v1872_v14, %s6506_s26 }
 0x1db   : > { %v1391_v19 = vpop.permute.xlu1 %1390 }
 0x1dc   : > { %1462 = vst.msk [vmem:[#allocation4 + $0xc8] sm:$0xff] %vm1436_vm7, %v1391_v19  ;;  %v1397_v47 = vpop.permute.xlu0 %1396 }
 0x1dd   : > { %1761 = vrot.lane.b32.xlu1 %v1680_v18, %s6505_s16  ;;  %1465 = vst.msk [vmem:[#allocation4 + $0xe0] sm:$0xff] %vm1436_vm7, %v1397_v47  ;;  %v1498_v47 = vld [vmem:[#allocation2 + $0x180] sm:$0xff] }
 0x1de   : > { %1570 = vrot.lane.b32.xlu0 %v1488_v22, %s6504_s19 }
 0x1df   : > { %v1395_v48 = vpop.permute.xlu1 %1394 }
 0x1e0   : > { %1464 = vst.msk [vmem:[#allocation4 + $0xd8] sm:$0xff] %vm1436_vm7, %v1395_v48  ;;  %v1401_v9 = vpop.permute.xlu0 %1400  ;;  %v1883_v48 = vld [vmem:[#allocation2 + $0x172] sm:$0xff] }
 0x1e1   : > { %1954 = vrot.lane.b32.xlu1 %v1873_v23, %s6506_s26  ;;  %1467 = vst.msk [vmem:[#allocation4 + $0xf0] sm:$0xff] %vm1436_vm7, %v1401_v9  ;;  %v1691_v9 = vld [vmem:[#allocation2 + $0x181] sm:$0xff] }
 0x1e2   : > { %1763 = vrot.lane.b32.xlu0 %v1681_v29, %s6505_s16 }
 0x1e3   : > { %v1399_v33 = vpop.permute.xlu1 %1398 }
 0x1e4   : > { %1466 = vst.msk [vmem:[#allocation4 + $0xe8] sm:$0xff] %vm1436_vm7, %v1399_v33  ;;  %v1535_v10 = vpop.permute.xlu0 %1534  ;;  %v1499_v33 = vld [vmem:[#allocation2 + $0x188] sm:$0xff] }
 0x1e5   : > { %1572 = vrot.lane.b32.xlu1 %v1489_v8, %s6504_s19  ;;  %1631 = vst.msk [vmem:[#allocation4] sm:$0xff] %vm1630_vm8, %v1535_v10 }
 0x1e6   : > { %1956 = vrot.lane.b32.xlu0 %v1874_v12, %s6506_s26 }
 0x1e7   : > { %v1403_v35 = vpop.permute.xlu1 %1402 }
 0x1e8   : > { %1468 = vst.msk [vmem:[#allocation4 + $0xf8] sm:$0xff] %vm1436_vm7, %v1403_v35  ;;  %v1539_v17 = vpop.permute.xlu0 %1538  ;;  %vm5871_vm7 = vcmask 1041409  }
 0x1e9   : > { %1765 = vrot.lane.b32.xlu1 %v1682_v13, %s6505_s16  ;;  %1633 = vst.msk [vmem:[#allocation4 + $0x10] sm:$0xff] %vm1630_vm8, %v1539_v17  ;;  %v1500_v17 = vld [vmem:[#allocation2 + $0x198] sm:$0xff] }
 0x1ea   : > { %1574 = vrot.lane.b32.xlu0 %v1490_v20, %s6504_s19 }
 0x1eb   : > { %v1537_v49 = vpop.permute.xlu1 %1536 }
 0x1ec   : > { %1632 = vst.msk [vmem:[#allocation4 + $0x8] sm:$0xff] %vm1630_vm8, %v1537_v49  ;;  %v1543_v45 = vpop.permute.xlu0 %1542  ;;  %v9438_v49 = vmov 0.0  }
 0x1ed   : > { %1958 = vrot.lane.b32.xlu1 %v1875_v24, %s6506_s26  ;;  %1635 = vst.msk [vmem:[#allocation4 + $0x20] sm:$0xff] %vm1630_vm8, %v1543_v45 }
 0x1ee   : > { %1767 = vrot.lane.b32.xlu0 %v1683_v21, %s6505_s16  ;;  %325 = vst.msk [vmem:[#allocation3 + $0x20] sm:$0xff] %vm319_vm12, %v9438_v49  ;;  %320 = vst.msk [vmem:[#allocation3] sm:$0xff] %vm319_vm12, %v9438_v49 }
 0x1ef   : > { %v1541_v25 = vpop.permute.xlu1 %1540  ;;  %326 = vst.msk [vmem:[#allocation3 + $0x28] sm:$0x3] %vm322_vm13, %v9438_v49  ;;  %323 = vst.msk [vmem:[#allocation3 + $0x10] sm:$0x3] %vm322_vm13, %v9438_v49 }
 0x1f0   : > { %1634 = vst.msk [vmem:[#allocation4 + $0x18] sm:$0xff] %vm1630_vm8, %v1541_v25  ;;  %v1547_v26 = vpop.permute.xlu0 %1546 }
 0x1f1   : > { %1576 = vrot.lane.b32.xlu1 %v1491_v28, %s6504_s19  ;;  %1637 = vst.msk [vmem:[#allocation4 + $0x30] sm:$0xff] %vm1630_vm8, %v1547_v26  ;;  %v1501_v28 = vld [vmem:[#allocation2 + $0x1a0] sm:$0xff] }
 0x1f2   : > { %1960 = vrot.lane.b32.xlu0 %v1876_v34, %s6506_s26  ;;  %321 = vst.msk [vmem:[#allocation3 + $0x8] sm:$0xff] %vm319_vm12, %v9438_v49  ;;  %324 = vst.msk [vmem:[#allocation3 + $0x18] sm:$0xff] %vm319_vm12, %v9438_v49 }
 0x1f3   : > { %v1545_v36 = vpop.permute.xlu1 %1544  ;;  %327 = vst.msk [vmem:[#allocation3 + $0x30] sm:$0xff] %vm319_vm12, %v9438_v49  ;;  %328 = vst.msk [vmem:[#allocation3 + $0x38] sm:$0xff] %vm319_vm12, %v9438_v49 }
 0x1f4   : > { %1636 = vst.msk [vmem:[#allocation4 + $0x28] sm:$0xff] %vm1630_vm8, %v1545_v36  ;;  %v1551_v37 = vpop.permute.xlu0 %1550 }
 0x1f5   : > { %1769 = vrot.lane.b32.xlu1 %v1684_v27, %s6505_s16  ;;  %1639 = vst.msk [vmem:[#allocation4 + $0x40] sm:$0xff] %vm1630_vm8, %v1551_v37 }
 0x1f6   : > { %1578 = vrot.lane.b32.xlu0 %v1492_v31, %s6504_s19  ;;  %329 = vst.msk [vmem:[#allocation3 + $0x40] sm:$0x3] %vm322_vm13, %v9438_v49  ;;  %332 = vst.msk [vmem:[#allocation3 + $0x58] sm:$0x3] %vm322_vm13, %v9438_v49 }
 0x1f7   : > { %v1549_v0 = vpop.permute.xlu1 %1548  ;;  %330 = vst.msk [vmem:[#allocation3 + $0x48] sm:$0xff] %vm319_vm12, %v9438_v49  ;;  %331 = vst.msk [vmem:[#allocation3 + $0x50] sm:$0xff] %vm319_vm12, %v9438_v49 }
 0x1f8   : > { %1638 = vst.msk [vmem:[#allocation4 + $0x38] sm:$0xff] %vm1630_vm8, %v1549_v0  ;;  %v1555_v38 = vpop.permute.xlu0 %1554 }
 0x1f9   : > { %1962 = vrot.lane.b32.xlu1 %v1877_v39, %s6506_s26  ;;  %1641 = vst.msk [vmem:[#allocation4 + $0x50] sm:$0xff] %vm1630_vm8, %v1555_v38 }
 0x1fa   : > { %1771 = vrot.lane.b32.xlu0 %v1685_v40, %s6505_s16  ;;  %333 = vst.msk [vmem:[#allocation3 + $0x60] sm:$0xff] %vm319_vm12, %v9438_v49  ;;  %334 = vst.msk [vmem:[#allocation3 + $0x68] sm:$0xff] %vm319_vm12, %v9438_v49 }
 0x1fb   : > { %v1553_v41 = vpop.permute.xlu1 %1552  ;;  %335 = vst.msk [vmem:[#allocation3 + $0x70] sm:$0x3] %vm322_vm13, %v9438_v49  ;;  %338 = vst.msk [vmem:[#allocation3 + $0x88] sm:$0x3] %vm322_vm13, %v9438_v49 }
 0x1fc   : > { %1640 = vst.msk [vmem:[#allocation4 + $0x48] sm:$0xff] %vm1630_vm8, %v1553_v41  ;;  %v1559_v52 = vpop.permute.xlu0 %1558 }
 0x1fd   : > { %1580 = vrot.lane.b32.xlu1 %v1493_v50, %s6504_s19  ;;  %1643 = vst.msk [vmem:[#allocation4 + $0x60] sm:$0xff] %vm1630_vm8, %v1559_v52 }
 0x1fe   : > { %1964 = vrot.lane.b32.xlu0 %v1878_v54, %s6506_s26  ;;  %336 = vst.msk [vmem:[#allocation3 + $0x78] sm:$0xff] %vm319_vm12, %v9438_v49  ;;  %337 = vst.msk [vmem:[#allocation3 + $0x80] sm:$0xff] %vm319_vm12, %v9438_v49 }
 0x1ff   : > { %v1557_v55 = vpop.permute.xlu1 %1556  ;;  %339 = vst.msk [vmem:[#allocation3 + $0x90] sm:$0xff] %vm319_vm12, %v9438_v49  ;;  %340 = vst.msk [vmem:[#allocation3 + $0x98] sm:$0xff] %vm319_vm12, %v9438_v49 }
 0x200   : > { %1642 = vst.msk [vmem:[#allocation4 + $0x58] sm:$0xff] %vm1630_vm8, %v1557_v55  ;;  %v1563_v58 = vpop.permute.xlu0 %1562 }
 0x201   : > { %1773 = vrot.lane.b32.xlu1 %v1686_v57, %s6505_s16  ;;  %1645 = vst.msk [vmem:[#allocation4 + $0x70] sm:$0xff] %vm1630_vm8, %v1563_v58 }
 0x202   : > { %1582 = vrot.lane.b32.xlu0 %v1494_v59, %s6504_s19  ;;  %341 = vst.msk [vmem:[#allocation3 + $0xa0] sm:$0x3] %vm322_vm13, %v9438_v49  ;;  %344 = vst.msk [vmem:[#allocation3 + $0xb8] sm:$0x3] %vm322_vm13, %v9438_v49 }
 0x203   : > { %v1561_v60 = vpop.permute.xlu1 %1560  ;;  %342 = vst.msk [vmem:[#allocation3 + $0xa8] sm:$0xff] %vm319_vm12, %v9438_v49  ;;  %343 = vst.msk [vmem:[#allocation3 + $0xb0] sm:$0xff] %vm319_vm12, %v9438_v49 }
 0x204   : > { %1644 = vst.msk [vmem:[#allocation4 + $0x68] sm:$0xff] %vm1630_vm8, %v1561_v60  ;;  %v1567_v62 = vpop.permute.xlu0 %1566 }
 0x205   : > { %1966 = vrot.lane.b32.xlu1 %v1879_v61, %s6506_s26  ;;  %1647 = vst.msk [vmem:[#allocation4 + $0x80] sm:$0xff] %vm1630_vm8, %v1567_v62 }
 0x206   : > { %1775 = vrot.lane.b32.xlu0 %v1687_v1, %s6505_s16  ;;  %345 = vst.msk [vmem:[#allocation3 + $0xc0] sm:$0xff] %vm319_vm12, %v9438_v49  ;;  %346 = vst.msk [vmem:[#allocation3 + $0xc8] sm:$0xff] %vm319_vm12, %v9438_v49 }
 0x207   : > { %v1565_v43 = vpop.permute.xlu1 %1564  ;;  %347 = vst.msk [vmem:[#allocation3 + $0xd0] sm:$0x3] %vm322_vm13, %v9438_v49  ;;  %350 = vst.msk [vmem:[#allocation3 + $0xe8] sm:$0x3] %vm322_vm13, %v9438_v49 }
 0x208   : > { %1646 = vst.msk [vmem:[#allocation4 + $0x78] sm:$0xff] %vm1630_vm8, %v1565_v43  ;;  %v1730_v3 = vpop.permute.xlu0 %1729 }
 0x209   : > { %1584 = vrot.lane.b32.xlu1 %v1495_v42, %s6504_s19  ;;  %1825 = vst.msk [vmem:[#allocation4 + $0x8] sm:$0xff] %vm1823_vm9, %v1730_v3 }
 0x20a   : > { %1968 = vrot.lane.b32.xlu0 %v1880_v2, %s6506_s26  ;;  %348 = vst.msk [vmem:[#allocation3 + $0xd8] sm:$0xff] %vm319_vm12, %v9438_v49  ;;  %349 = vst.msk [vmem:[#allocation3 + $0xe0] sm:$0xff] %vm319_vm12, %v9438_v49 }
 0x20b   : > { %v1728_v46 = vpop.permute.xlu1 %1727  ;;  %351 = vst.msk [vmem:[#allocation3 + $0xf0] sm:$0xff] %vm319_vm12, %v9438_v49  ;;  %352 = vst.msk [vmem:[#allocation3 + $0xf8] sm:$0xff] %vm319_vm12, %v9438_v49 }
 0x20c   : > { %1824 = vst.msk [vmem:[#allocation4] sm:$0xff] %vm1823_vm9, %v1728_v46  ;;  %v1923_v4 = vpop.permute.xlu0 %1922 }
 0x20d   : > { %1777 = vrot.lane.b32.xlu1 %v1688_v44, %s6505_s16  ;;  %2018 = vst.msk [vmem:[#allocation4 + $0x8] sm:$0xff] %vm2016_vm10, %v1923_v4 }
 0x20e   : > { %1586 = vrot.lane.b32.xlu0 %v1496_v5, %s6504_s19  ;;  %353 = vst.msk [vmem:[#allocation3 + $0x100] sm:$0x3] %vm322_vm13, %v9438_v49  ;;  %356 = vst.msk [vmem:[#allocation3 + $0x118] sm:$0x3] %vm322_vm13, %v9438_v49 }
 0x20f   : > { %v1921_v53 = vpop.permute.xlu1 %1920  ;;  %354 = vst.msk [vmem:[#allocation3 + $0x108] sm:$0xff] %vm319_vm12, %v9438_v49  ;;  %355 = vst.msk [vmem:[#allocation3 + $0x110] sm:$0xff] %vm319_vm12, %v9438_v49 }
 0x210   : > { %2017 = vst.msk [vmem:[#allocation4] sm:$0xff] %vm2016_vm10, %v1921_v53  ;;  %v1734_v7 = vpop.permute.xlu0 %1733 }
 0x211   : > { %1970 = vrot.lane.b32.xlu1 %v1881_v51, %s6506_s26  ;;  %1827 = vst.msk [vmem:[#allocation4 + $0x18] sm:$0xff] %vm1823_vm9, %v1734_v7 }
 0x212   : > { %1779 = vrot.lane.b32.xlu0 %v1689_v56, %s6505_s16  ;;  %357 = vst.msk [vmem:[#allocation3 + $0x120] sm:$0xff] %vm319_vm12, %v9438_v49  ;;  %358 = vst.msk [vmem:[#allocation3 + $0x128] sm:$0xff] %vm319_vm12, %v9438_v49 }
 0x213   : > { %v1732_v6 = vpop.permute.xlu1 %1731  ;;  %359 = vst.msk [vmem:[#allocation3 + $0x130] sm:$0x3] %vm322_vm13, %v9438_v49  ;;  %362 = vst.msk [vmem:[#allocation3 + $0x148] sm:$0x3] %vm322_vm13, %v9438_v49 }
 0x214   : > { %1826 = vst.msk [vmem:[#allocation4 + $0x10] sm:$0xff] %vm1823_vm9, %v1732_v6  ;;  %v1927_v14 = vpop.permute.xlu0 %1926  ;;  %v2050_v18 = vld [vmem:[#allocation4 + $0x8] sm:$0xff] }
 0x215   : > { %1588 = vrot.lane.b32.xlu1 %v1497_v63, %s6504_s19  ;;  %2020 = vst.msk [vmem:[#allocation4 + $0x18] sm:$0xff] %vm2016_vm10, %v1927_v14 }
 0x216   : > { %1972 = vrot.lane.b32.xlu0 %v1882_v11, %s6506_s26  ;;  %360 = vst.msk [vmem:[#allocation3 + $0x138] sm:$0xff] %vm319_vm12, %v9438_v49  ;;  %361 = vst.msk [vmem:[#allocation3 + $0x140] sm:$0xff] %vm319_vm12, %v9438_v49 }
 0x217   : > { %v1925_v19 = vpop.permute.xlu1 %1924  ;;  %v2049_v22 = vld [vmem:[#allocation4] sm:$0xff]  ;;  %363 = vst.msk [vmem:[#allocation3 + $0x150] sm:$0xff] %vm319_vm12, %v9438_v49  ;;  %364 = vst.msk [vmem:[#allocation3 + $0x158] sm:$0xff] %vm319_vm12, %v9438_v49 }
 0x218   : > { %2019 = vst.msk [vmem:[#allocation4 + $0x10] sm:$0xff] %vm2016_vm10, %v1925_v19  ;;  %6231 = vmatprep.mubr.msk.f32.mxu0 %vm2093_vm11, %v2049_v22  ;;  %v1738_v23 = vpop.permute.xlu0 %1737 }
 0x219   : > { %1781 = vrot.lane.b32.xlu1 %v1690_v15, %s6505_s16  ;;  %6232 = vmatmul.mubr.msk.f32.vlgmr.msra.gmra.mrb[0].mxu0 %vm2093_vm11, %v2050_v18  ;;  %1829 = vst.msk [vmem:[#allocation4 + $0x28] sm:$0xff] %vm1823_vm9, %v1738_v23 }
 0x21a   : > { %1590 = vrot.lane.b32.xlu0 %v1498_v47, %s6504_s19  ;;  %365 = vst.msk [vmem:[#allocation3 + $0x160] sm:$0x3] %vm322_vm13, %v9438_v49  ;;  %368 = vst.msk [vmem:[#allocation3 + $0x178] sm:$0x3] %vm322_vm13, %v9438_v49 }
 0x21b   : > { %v1736_v29 = vpop.permute.xlu1 %1735  ;;  %366 = vst.msk [vmem:[#allocation3 + $0x168] sm:$0xff] %vm319_vm12, %v9438_v49  ;;  %367 = vst.msk [vmem:[#allocation3 + $0x170] sm:$0xff] %vm319_vm12, %v9438_v49 }
 0x21c   : > { %1828 = vst.msk [vmem:[#allocation4 + $0x20] sm:$0xff] %vm1823_vm9, %v1736_v29  ;;  %v1931_v8 = vpop.permute.xlu0 %1930  ;;  %v2052_v12 = vld [vmem:[#allocation4 + $0x18] sm:$0xff] }
 0x21d   : > { %1974 = vrot.lane.b32.xlu1 %v1883_v48, %s6506_s26  ;;  %2022 = vst.msk [vmem:[#allocation4 + $0x28] sm:$0xff] %vm2016_vm10, %v1931_v8  ;;  %v1693_v8 = vld [vmem:[#allocation2 + $0x199] sm:$0xff] }
 0x21e   : > { %1783 = vrot.lane.b32.xlu0 %v1691_v9, %s6505_s16  ;;  %369 = vst.msk [vmem:[#allocation3 + $0x180] sm:$0xff] %vm319_vm12, %v9438_v49  ;;  %370 = vst.msk [vmem:[#allocation3 + $0x188] sm:$0xff] %vm319_vm12, %v9438_v49 }
 0x21f   : > { %v1929_v10 = vpop.permute.xlu1 %1928  ;;  %v2051_v13 = vld [vmem:[#allocation4 + $0x10] sm:$0xff]  ;;  %371 = vst.msk [vmem:[#allocation3 + $0x190] sm:$0x3] %vm322_vm13, %v9438_v49  ;;  %374 = vst.msk [vmem:[#allocation3 + $0x1a8] sm:$0x3] %vm322_vm13, %v9438_v49 }
 0x220   : > { %2021 = vst.msk [vmem:[#allocation4 + $0x20] sm:$0xff] %vm2016_vm10, %v1929_v10  ;;  %6234 = vmatprep.mubr.msk.f32.mxu0 %vm2093_vm11, %v2051_v13  ;;  %v1742_v35 = vpop.permute.xlu0 %1741  ;;  %v1886_v13 = vld [vmem:[#allocation2 + $0x19a] sm:$0xff] }
 0x221   : > { %1592 = vrot.lane.b32.xlu1 %v1499_v33, %s6504_s19  ;;  %6235 = vmatmul.mubr.msk.f32.gmra.mrb[2].mxu0 %vm2093_vm11, %v2052_v12  ;;  %1831 = vst.msk [vmem:[#allocation4 + $0x38] sm:$0xff] %vm1823_vm9, %v1742_v35  ;;  %v1694_v33 = vld [vmem:[#allocation2 + $0x1a1] sm:$0xff] }
 0x222   : > { %1976 = vrot.lane.b32.xlu0 %v7431_v30, %s6506_s26  ;;  %372 = vst.msk [vmem:[#allocation3 + $0x198] sm:$0xff] %vm319_vm12, %v9438_v49  ;;  %373 = vst.msk [vmem:[#allocation3 + $0x1a0] sm:$0xff] %vm319_vm12, %v9438_v49  ;;  %v1887_v35 = vld [vmem:[#allocation2 + $0x1a2] sm:$0xff]  ;;  %v2548_v49 = vld [vmem:[#allocation3 + $0x1] sm:$0xff] }
 0x223   : > { %v1740_v20 = vpop.permute.xlu1 %1739 }
 0x224   : > { %1830 = vst.msk [vmem:[#allocation4 + $0x30] sm:$0xff] %vm1823_vm9, %v1740_v20  ;;  %v1935_v24 = vpop.permute.xlu0 %1934 }
 0x225   : > { %1785 = vrot.lane.b32.xlu1 %v7342_v16, %s6505_s16  ;;  %2024 = vst.msk [vmem:[#allocation4 + $0x38] sm:$0xff] %vm2016_vm10, %v1935_v24  ;;  %v2054_v16 = vld [vmem:[#allocation4 + $0x28] sm:$0xff] }
 0x226   : > { %1594 = vrot.lane.b32.xlu0 %v1500_v17, %s6504_s19 }
 0x227   : > { %v1933_v30 = vpop.permute.xlu1 %1932  ;;  %v2053_v21 = vld [vmem:[#allocation4 + $0x20] sm:$0xff] }
 0x228   : > { %2023 = vst.msk [vmem:[#allocation4 + $0x30] sm:$0xff] %vm2016_vm10, %v1933_v30  ;;  %6237 = vmatprep.mubr.msk.f32.mxu0 %vm2093_vm11, %v2053_v21  ;;  %v1746_v45 = vpop.permute.xlu0 %1745 }
 0x229   : > { %1978 = vrot.lane.b32.xlu1 %v7442_v32, %s6506_s26  ;;  %6238 = vmatmul.mubr.msk.f32.gmra.mrb[4].mxu0 %vm2093_vm11, %v2054_v16  ;;  %1833 = vst.msk [vmem:[#allocation4 + $0x48] sm:$0xff] %vm1823_vm9, %v1746_v45  ;;  %v2549_v16 = vld [vmem:[#allocation3 + $0x9] sm:$0xff] }
 0x22a   : > { %1787 = vrot.lane.b32.xlu0 %v1693_v8, %s6505_s16 }
 0x22b   : > { %v1744_v25 = vpop.permute.xlu1 %1743 }
 0x22c   : > { %1832 = vst.msk [vmem:[#allocation4 + $0x40] sm:$0xff] %vm1823_vm9, %v1744_v25  ;;  %v1939_v34 = vpop.permute.xlu0 %1938  ;;  %v2056_v26 = vld [vmem:[#allocation4 + $0x38] sm:$0xff] }
 0x22d   : > { %1596 = vrot.lane.b32.xlu1 %v1501_v28, %s6504_s19  ;;  %2026 = vst.msk [vmem:[#allocation4 + $0x48] sm:$0xff] %vm2016_vm10, %v1939_v34 }
 0x22e   : > { %1980 = vrot.lane.b32.xlu0 %v1886_v13, %s6506_s26 }
 0x22f   : > { %v1937_v27 = vpop.permute.xlu1 %1936  ;;  %v2055_v36 = vld [vmem:[#allocation4 + $0x30] sm:$0xff] }
 0x230   : > { %2025 = vst.msk [vmem:[#allocation4 + $0x40] sm:$0xff] %vm2016_vm10, %v1937_v27  ;;  %6240 = vmatprep.mubr.msk.f32.mxu0 %vm2093_vm11, %v2055_v36  ;;  %v1750_v32 = vpop.permute.xlu0 %1749 }
 0x231   : > { %6241 = vmatmul.mubr.msk.f32.gmra.mrb[6].mxu0 %vm2093_vm11, %v2056_v26  ;;  %1835 = vst.msk [vmem:[#allocation4 + $0x58] sm:$0xff] %vm1823_vm9, %v1750_v32  ;;  %1789 = vrot.lane.b32.xlu1 %v1694_v33, %s6505_s16  ;;  %s8859_s16 = scalar_lea.vmem [#allocation5], %s6063_s10 }
 0x232   : > { %2612 = vrot.lane.b32.xlu0 %v2548_v49, %s6500_s15 }
 0x233   : > { %v1748_v31 = vpop.permute.xlu1 %1747 }
 0x234   : > { %1834 = vst.msk [vmem:[#allocation4 + $0x50] sm:$0xff] %vm1823_vm9, %v1748_v31  ;;  %v1943_v37 = vpop.permute.xlu0 %1942  ;;  %v2058_v39 = vld [vmem:[#allocation4 + $0x48] sm:$0xff] }
 0x235   : > { %2028 = vst.msk [vmem:[#allocation4 + $0x58] sm:$0xff] %vm2016_vm10, %v1943_v37  ;;  %1982 = vrot.lane.b32.xlu1 %v1887_v35, %s6506_s26 }
 0x237   : > { %v1941_v0 = vpop.permute.xlu1 %1940  ;;  %v2057_v40 = vld [vmem:[#allocation4 + $0x40] sm:$0xff] }
 0x238   : > { %2027 = vst.msk [vmem:[#allocation4 + $0x50] sm:$0xff] %vm2016_vm10, %v1941_v0  ;;  %6243 = vmatprep.mubr.msk.f32.mxu0 %vm2093_vm11, %v2057_v40  ;;  %v1754_v38 = vpop.permute.xlu0 %1753 }
 0x239   : > { %6244 = vmatmul.mubr.msk.f32.gmra.mrb[8].mxu0 %vm2093_vm11, %v2058_v39  ;;  %1837 = vst.msk [vmem:[#allocation4 + $0x68] sm:$0xff] %vm1823_vm9, %v1754_v38  ;;  %2614 = vrot.lane.b32.xlu1 %v2549_v16, %s6500_s15 }
 0x23b   : > { %v1752_v50 = vpop.permute.xlu1 %1751 }
 0x23c   : > { %1836 = vst.msk [vmem:[#allocation4 + $0x60] sm:$0xff] %vm1823_vm9, %v1752_v50  ;;  %v1947_v41 = vpop.permute.xlu0 %1946  ;;  %v2060_v54 = vld [vmem:[#allocation4 + $0x58] sm:$0xff] }
 0x23d   : > { %2030 = vst.msk [vmem:[#allocation4 + $0x68] sm:$0xff] %vm2016_vm10, %v1947_v41 }
 0x23f   : > { %v1945_v52 = vpop.permute.xlu1 %1944  ;;  %v2059_v57 = vld [vmem:[#allocation4 + $0x50] sm:$0xff] }
 0x240   : > { %2029 = vst.msk [vmem:[#allocation4 + $0x60] sm:$0xff] %vm2016_vm10, %v1945_v52  ;;  %6246 = vmatprep.mubr.msk.f32.mxu0 %vm2093_vm11, %v2059_v57  ;;  %v1758_v55 = vpop.permute.xlu0 %1757 }
 0x241   : > { %6247 = vmatmul.mubr.msk.f32.gmra.mrb[10].mxu0 %vm2093_vm11, %v2060_v54  ;;  %1839 = vst.msk [vmem:[#allocation4 + $0x78] sm:$0xff] %vm1823_vm9, %v1758_v55 }
 0x243   : > { %v1756_v59 = vpop.permute.xlu1 %1755 }
 0x244   : > { %1838 = vst.msk [vmem:[#allocation4 + $0x70] sm:$0xff] %vm1823_vm9, %v1756_v59  ;;  %v1951_v58 = vpop.permute.xlu0 %1950  ;;  %v2062_v61 = vld [vmem:[#allocation4 + $0x68] sm:$0xff] }
 0x245   : > { %2032 = vst.msk [vmem:[#allocation4 + $0x78] sm:$0xff] %vm2016_vm10, %v1951_v58 }
 0x247   : > { %v1949_v60 = vpop.permute.xlu1 %1948  ;;  %v2061_v1 = vld [vmem:[#allocation4 + $0x60] sm:$0xff] }
 0x248   : > { %2031 = vst.msk [vmem:[#allocation4 + $0x70] sm:$0xff] %vm2016_vm10, %v1949_v60  ;;  %6249 = vmatprep.mubr.msk.f32.mxu0 %vm2093_vm11, %v2061_v1  ;;  %v1760_v62 = vpop.permute.xlu0 %1759 }
 0x249   : > { %6250 = vmatmul.mubr.msk.f32.gmra.mrb[12].mxu0 %vm2093_vm11, %v2062_v61  ;;  %1840 = vst.msk [vmem:[#allocation4 + $0x80] sm:$0xff] %vm1823_vm9, %v1760_v62 }
 0x24b   : > { %v1569_v42 = vpop.permute.xlu1 %1568 }
 0x24c   : > { %1648 = vst.msk [vmem:[#allocation4 + $0x88] sm:$0xff] %vm1630_vm8, %v1569_v42  ;;  %v1953_v43 = vpop.permute.xlu0 %1952  ;;  %v2064_v2 = vld [vmem:[#allocation4 + $0x78] sm:$0xff] }
 0x24d   : > { %2033 = vst.msk [vmem:[#allocation4 + $0x80] sm:$0xff] %vm2016_vm10, %v1953_v43 }
 0x24f   : > { %v1762_v3 = vpop.permute.xlu1 %1761  ;;  %v2063_v44 = vld [vmem:[#allocation4 + $0x70] sm:$0xff] }
 0x250   : > { %1841 = vst.msk [vmem:[#allocation4 + $0x88] sm:$0xff] %vm1823_vm9, %v1762_v3  ;;  %6252 = vmatprep.mubr.msk.f32.mxu0 %vm2093_vm11, %v2063_v44  ;;  %v1571_v46 = vpop.permute.xlu0 %1570  ;;  %v2484_v44 = vld [vmem:[#allocation3] sm:$0xff] }
 0x251   : > { %6253 = vmatmul.mubr.msk.f32.gmra.mrb[14].mxu0 %vm2093_vm11, %v2064_v2  ;;  %1649 = vst.msk [vmem:[#allocation4 + $0x90] sm:$0xff] %vm1630_vm8, %v1571_v46  ;;  %v2485_v46 = vld [vmem:[#allocation3 + $0x8] sm:$0xff] }
 0x252   : > { %2516 = vst.msk [vmem:[#allocation4] sm:$0xff] %vm319_vm12, %v2484_v44  ;;  %2517 = vst.msk [vmem:[#allocation4 + $0x8] sm:$0xff] %vm319_vm12, %v2485_v46 }
 0x253   : > { %v1955_v5 = vpop.permute.xlu1 %1954 }
 0x254   : > { %2034 = vst.msk [vmem:[#allocation4 + $0x88] sm:$0xff] %vm2016_vm10, %v1955_v5  ;;  %v1764_v4 = vpop.permute.xlu0 %1763  ;;  %v2065_v51 = vld [vmem:[#allocation4 + $0x80] sm:$0xff] }
 0x255   : > { %1842 = vst.msk [vmem:[#allocation4 + $0x90] sm:$0xff] %vm1823_vm9, %v1764_v4  ;;  %6255 = vmatprep.mubr.msk.f32.mxu0 %vm2093_vm11, %v2065_v51  ;;  %v7876_v51 = vld [vmem:[%s9339_s2] ss:$0 sm:$0xff] }
 0x257   : > { %v1573_v53 = vpop.permute.xlu1 %1572 }
 0x258   : > { %1650 = vst.msk [vmem:[#allocation4 + $0x98] sm:$0xff] %vm1630_vm8, %v1573_v53  ;;  %v1957_v56 = vpop.permute.xlu0 %1956 }
 0x259   : > { %2035 = vst.msk [vmem:[#allocation4 + $0x90] sm:$0xff] %vm2016_vm10, %v1957_v56 }
 0x25b   : > { %v1766_v7 = vpop.permute.xlu1 %1765  ;;  %v2066_v63 = vld [vmem:[#allocation4 + $0x88] sm:$0xff] }
 0x25c   : > { %1843 = vst.msk [vmem:[#allocation4 + $0x98] sm:$0xff] %vm1823_vm9, %v1766_v7  ;;  %6256 = vmatmul.mubr.msk.f32.gmra.mrb[16].mxu0 %vm2093_vm11, %v2066_v63  ;;  %v1575_v6 = vpop.permute.xlu0 %1574 }
 0x25d   : > { %1651 = vst.msk [vmem:[#allocation4 + $0xa0] sm:$0xff] %vm1630_vm8, %v1575_v6 }
 0x25f   : > { %v1959_v11 = vpop.permute.xlu1 %1958 }
 0x260   : > { %2036 = vst.msk [vmem:[#allocation4 + $0x98] sm:$0xff] %vm2016_vm10, %v1959_v11  ;;  %v1768_v14 = vpop.permute.xlu0 %1767  ;;  %v2067_v15 = vld [vmem:[#allocation4 + $0x90] sm:$0xff] }
 0x261   : > { %1844 = vst.msk [vmem:[#allocation4 + $0xa0] sm:$0xff] %vm1823_vm9, %v1768_v14  ;;  %6258 = vmatprep.mubr.msk.f32.mxu0 %vm2093_vm11, %v2067_v15 }
 0x263   : > { %v1577_v18 = vpop.permute.xlu1 %1576 }
 0x264   : > { %1652 = vst.msk [vmem:[#allocation4 + $0xa8] sm:$0xff] %vm1630_vm8, %v1577_v18  ;;  %v1961_v19 = vpop.permute.xlu0 %1960 }
 0x265   : > { %2037 = vst.msk [vmem:[#allocation4 + $0xa0] sm:$0xff] %vm2016_vm10, %v1961_v19 }
 0x267   : > { %v1770_v22 = vpop.permute.xlu1 %1769  ;;  %v2068_v47 = vld [vmem:[#allocation4 + $0x98] sm:$0xff] }
 0x268   : > { %1845 = vst.msk [vmem:[#allocation4 + $0xa8] sm:$0xff] %vm1823_vm9, %v1770_v22  ;;  %6259 = vmatmul.mubr.msk.f32.gmra.mrb[18].mxu0 %vm2093_vm11, %v2068_v47  ;;  %v1579_v23 = vpop.permute.xlu0 %1578 }
 0x269   : > { %1653 = vst.msk [vmem:[#allocation4 + $0xb0] sm:$0xff] %vm1630_vm8, %v1579_v23 }
 0x26b   : > { %v1963_v48 = vpop.permute.xlu1 %1962 }
 0x26c   : > { %2038 = vst.msk [vmem:[#allocation4 + $0xa8] sm:$0xff] %vm2016_vm10, %v1963_v48  ;;  %v1772_v29 = vpop.permute.xlu0 %1771  ;;  %v2069_v9 = vld [vmem:[#allocation4 + $0xa0] sm:$0xff] }
 0x26d   : > { %1846 = vst.msk [vmem:[#allocation4 + $0xb0] sm:$0xff] %vm1823_vm9, %v1772_v29  ;;  %6261 = vmatprep.mubr.msk.f32.mxu0 %vm2093_vm11, %v2069_v9 }
 0x26f   : > { %v1581_v12 = vpop.permute.xlu1 %1580 }
 0x270   : > { %1654 = vst.msk [vmem:[#allocation4 + $0xb8] sm:$0xff] %vm1630_vm8, %v1581_v12  ;;  %v1965_v10 = vpop.permute.xlu0 %1964 }
 0x271   : > { %2039 = vst.msk [vmem:[#allocation4 + $0xb0] sm:$0xff] %vm2016_vm10, %v1965_v10 }
 0x273   : > { %v1774_v20 = vpop.permute.xlu1 %1773  ;;  %v2070_v17 = vld [vmem:[#allocation4 + $0xa8] sm:$0xff] }
 0x274   : > { %1847 = vst.msk [vmem:[#allocation4 + $0xb8] sm:$0xff] %vm1823_vm9, %v1774_v20  ;;  %6262 = vmatmul.mubr.msk.f32.gmra.mrb[20].mxu0 %vm2093_vm11, %v2070_v17  ;;  %v1583_v24 = vpop.permute.xlu0 %1582 }
 0x275   : > { %1655 = vst.msk [vmem:[#allocation4 + $0xc0] sm:$0xff] %vm1630_vm8, %v1583_v24 }
 0x277   : > { %v1967_v30 = vpop.permute.xlu1 %1966 }
 0x278   : > { %2040 = vst.msk [vmem:[#allocation4 + $0xb8] sm:$0xff] %vm2016_vm10, %v1967_v30  ;;  %v1776_v21 = vpop.permute.xlu0 %1775  ;;  %v2071_v45 = vld [vmem:[#allocation4 + $0xb0] sm:$0xff] }
 0x279   : > { %1848 = vst.msk [vmem:[#allocation4 + $0xc0] sm:$0xff] %vm1823_vm9, %v1776_v21  ;;  %6264 = vmatprep.mubr.msk.f32.mxu0 %vm2093_vm11, %v2071_v45 }
 0x27b   : > { %v1585_v28 = vpop.permute.xlu1 %1584 }
 0x27c   : > { %1656 = vst.msk [vmem:[#allocation4 + $0xc8] sm:$0xff] %vm1630_vm8, %v1585_v28  ;;  %v1969_v25 = vpop.permute.xlu0 %1968 }
 0x27d   : > { %2041 = vst.msk [vmem:[#allocation4 + $0xc0] sm:$0xff] %vm2016_vm10, %v1969_v25 }
 0x27f   : > { %v1778_v34 = vpop.permute.xlu1 %1777  ;;  %v2072_v26 = vld [vmem:[#allocation4 + $0xb8] sm:$0xff] }
 0x280   : > { %1849 = vst.msk [vmem:[#allocation4 + $0xc8] sm:$0xff] %vm1823_vm9, %v1778_v34  ;;  %6265 = vmatmul.mubr.msk.f32.gmra.mrb[22].mxu0 %vm2093_vm11, %v2072_v26  ;;  %v1587_v27 = vpop.permute.xlu0 %1586 }
 0x281   : > { %1657 = vst.msk [vmem:[#allocation4 + $0xd0] sm:$0xff] %vm1630_vm8, %v1587_v27 }
 0x283   : > { %v1971_v36 = vpop.permute.xlu1 %1970 }
 0x284   : > { %2042 = vst.msk [vmem:[#allocation4 + $0xc8] sm:$0xff] %vm2016_vm10, %v1971_v36  ;;  %v1780_v32 = vpop.permute.xlu0 %1779  ;;  %v2073_v31 = vld [vmem:[#allocation4 + $0xc0] sm:$0xff] }
 0x285   : > { %1850 = vst.msk [vmem:[#allocation4 + $0xd0] sm:$0xff] %vm1823_vm9, %v1780_v32  ;;  %6267 = vmatprep.mubr.msk.f32.mxu0 %vm2093_vm11, %v2073_v31 }
 0x287   : > { %v1589_v37 = vpop.permute.xlu1 %1588 }
 0x288   : > { %1658 = vst.msk [vmem:[#allocation4 + $0xd8] sm:$0xff] %vm1630_vm8, %v1589_v37  ;;  %v1973_v39 = vpop.permute.xlu0 %1972 }
 0x289   : > { %2043 = vst.msk [vmem:[#allocation4 + $0xd0] sm:$0xff] %vm2016_vm10, %v1973_v39 }
 0x28b   : > { %v1782_v0 = vpop.permute.xlu1 %1781  ;;  %v2074_v40 = vld [vmem:[#allocation4 + $0xc8] sm:$0xff] }
 0x28c   : > { %1851 = vst.msk [vmem:[#allocation4 + $0xd8] sm:$0xff] %vm1823_vm9, %v1782_v0  ;;  %6268 = vmatmul.mubr.msk.f32.gmra.mrb[24].mxu0 %vm2093_vm11, %v2074_v40  ;;  %v1591_v38 = vpop.permute.xlu0 %1590 }
 0x28d   : > { %1659 = vst.msk [vmem:[#allocation4 + $0xe0] sm:$0xff] %vm1630_vm8, %v1591_v38 }
 0x28f   : > { %v1975_v50 = vpop.permute.xlu1 %1974 }
 0x290   : > { %2044 = vst.msk [vmem:[#allocation4 + $0xd8] sm:$0xff] %vm2016_vm10, %v1975_v50  ;;  %v1784_v41 = vpop.permute.xlu0 %1783  ;;  %v2075_v54 = vld [vmem:[#allocation4 + $0xd0] sm:$0xff] }
 0x291   : > { %1852 = vst.msk [vmem:[#allocation4 + $0xe0] sm:$0xff] %vm1823_vm9, %v1784_v41  ;;  %6270 = vmatprep.mubr.msk.f32.mxu0 %vm2093_vm11, %v2075_v54 }
 0x293   : > { %v1593_v52 = vpop.permute.xlu1 %1592 }
 0x294   : > { %1660 = vst.msk [vmem:[#allocation4 + $0xe8] sm:$0xff] %vm1630_vm8, %v1593_v52  ;;  %v1977_v57 = vpop.permute.xlu0 %1976 }
 0x295   : > { %2045 = vst.msk [vmem:[#allocation4 + $0xe0] sm:$0xff] %vm2016_vm10, %v1977_v57 }
 0x297   : > { %v1786_v55 = vpop.permute.xlu1 %1785  ;;  %v2076_v59 = vld [vmem:[#allocation4 + $0xd8] sm:$0xff] }
 0x298   : > { %1853 = vst.msk [vmem:[#allocation4 + $0xe8] sm:$0xff] %vm1823_vm9, %v1786_v55  ;;  %6271 = vmatmul.mubr.msk.f32.gmra.mrb[26].mxu0 %vm2093_vm11, %v2076_v59  ;;  %v1595_v1 = vpop.permute.xlu0 %1594 }
 0x299   : > { %1661 = vst.msk [vmem:[#allocation4 + $0xf0] sm:$0xff] %vm1630_vm8, %v1595_v1 }
 0x29b   : > { %v1979_v58 = vpop.permute.xlu1 %1978 }
 0x29c   : > { %2046 = vst.msk [vmem:[#allocation4 + $0xe8] sm:$0xff] %vm2016_vm10, %v1979_v58  ;;  %v2077_v61 = vld [vmem:[#allocation4 + $0xe0] sm:$0xff]  ;;  %v1788_v42 = vpop.permute.xlu0 %1787 }
 0x29d   : > { %6273 = vmatprep.mubr.msk.f32.mxu0 %vm2093_vm11, %v2077_v61  ;;  %1854 = vst.msk [vmem:[#allocation4 + $0xf0] sm:$0xff] %vm1823_vm9, %v1788_v42 }
 0x29f   : > { %v1597_v62 = vpop.permute.xlu1 %1596 }
 0x2a0   : > { %1662 = vst.msk [vmem:[#allocation4 + $0xf8] sm:$0xff] %vm1630_vm8, %v1597_v62  ;;  %v1981_v2 = vpop.permute.xlu0 %1980  ;;  %vm5873_vm8 = vcmask 1042434  }
 0x2a1   : > { %2047 = vst.msk [vmem:[#allocation4 + $0xf0] sm:$0xff] %vm2016_vm10, %v1981_v2 }
 0x2a3   : > { %v2078_v60 = vld [vmem:[#allocation4 + $0xe8] sm:$0xff]  ;;  %v1790_v43 = vpop.permute.xlu1 %1789 }
 0x2a4   : > { %6274 = vmatmul.mubr.msk.f32.gmra.mrb[28].mxu0 %vm2093_vm11, %v2078_v60  ;;  %1855 = vst.msk [vmem:[#allocation4 + $0xf8] sm:$0xff] %vm1823_vm9, %v1790_v43  ;;  %v2613_v5 = vpop.permute.xlu0 %2612  ;;  %vm5875_vm9 = vcmask 1043459  }
 0x2a5   : > { %2709 = vst.msk [vmem:[#allocation4] sm:$0xff] %vm2708_vm14, %v2613_v5 }
 0x2a7   : > { %v1983_v3 = vpop.permute.xlu1 %1982 }
 0x2a8   : > { %2048 = vst.msk [vmem:[#allocation4 + $0xf8] sm:$0xff] %vm2016_vm10, %v1983_v3  ;;  %v2079_v45 = vld [vmem:[#allocation4 + $0xf0] sm:$0xff]  ;;  %vm5877_vm10 = vcmask 1044484  }
 0x2a9   : > { %6276 = vmatprep.mubr.msk.f32.mxu0 %vm2093_vm11, %v2079_v45 }
 0x2ab   : > { %v2615_v4 = vpop.permute.xlu1 %2614 }
 0x2ac   : > { %2710 = vst.msk [vmem:[#allocation4 + $0x8] sm:$0xff] %vm2708_vm14, %v2615_v4 }
 0x2af   : > { %v2080_v25 = vld [vmem:[#allocation4 + $0xf8] sm:$0xff] }
 0x2b0   : > { %6277 = vmatmul.mubr.msk.f32.gmra.mrb[30].mxu0 %vm2093_vm11, %v2080_v25  ;;  %vm5879_vm11 = vcmask 1045509  }
 0x2ec   : > { %v6233_v53 = vpop.f32.mrb[0].mxu0 }
 0x2ed   : > { %v2266_v56 = vadd.f32 %v6233_v53, %v7876_v51  ;;  %v2260_v7 = vpop.f32.mrb[1].mxu0 }
 0x2ee   : > { %v2261_v63 = vadd.f32 %v7876_v51, %v2260_v7 }
 0x2ef   : > { %v2420_v6 = vmax.f32 %v2266_v56, 0.0 }
 0x2f0   : > { %v2419_v11 = vmax.f32 %v2261_v63, 0.0 }
 0x2f1   : > { %2453 = vst.msk [vmem:[#allocation3 + $0x21] sm:$0xff] %vm319_vm12, %v2420_v6 }
 0x2f2   : > { %2452 = vst.msk [vmem:[#allocation3 + $0x19] sm:$0xff] %vm319_vm12, %v2419_v11 }
 0x2f4   : > { %v6236_v14 = vpop.f32.mrb[2].mxu0 }
 0x2f5   : > { %v2276_v15 = vadd.f32 %v6236_v14, %v7876_v51  ;;  %v2270_v18 = vpop.f32.mrb[3].mxu0 }
 0x2f6   : > { %v2271_v19 = vadd.f32 %v7876_v51, %v2270_v18 }
 0x2f7   : > { %v2422_v22 = vmax.f32 %v2276_v15, 0.0 }
 0x2f8   : > { %v2421_v47 = vmax.f32 %v2271_v19, 0.0  ;;  %v2551_v23 = vld [vmem:[#allocation3 + $0x21] sm:$0xff] }
 0x2f9   : > { %2455 = vst.msk [vmem:[#allocation3 + $0x39] sm:$0xff] %vm319_vm12, %v2422_v22  ;;  %2618 = vrot.lane.b32.xlu1 %v2551_v23, %s6500_s15  ;;  %v2550_v48 = vld [vmem:[#allocation3 + $0x19] sm:$0xff] }
 0x2fa   : > { %v7888_v29 = vld [vmem:[#allocation3 + $0x18] sm:$0xff]  ;;  %v7890_v9 = vld [vmem:[#allocation3 + $0x20] sm:$0xff]  ;;  %2454 = vst.msk [vmem:[#allocation3 + $0x31] sm:$0xff] %vm319_vm12, %v2421_v47  ;;  %2616 = vrot.lane.b32.xlu0 %v2550_v48, %s6500_s15 }
 0x2fb   : > { %2518 = vst.msk [vmem:[#allocation4 + $0x10] sm:$0xff] %vm319_vm12, %v7888_v29  ;;  %2519 = vst.msk [vmem:[#allocation4 + $0x18] sm:$0xff] %vm319_vm12, %v7890_v9 }
 0x2fc   : > { %v6239_v8 = vpop.f32.mrb[4].mxu0 }
 0x2fd   : > { %v2286_v33 = vadd.f32 %v6239_v8, %v7876_v51  ;;  %v2280_v12 = vpop.f32.mrb[5].mxu0 }
 0x2fe   : > { %v2281_v10 = vadd.f32 %v7876_v51, %v2280_v12 }
 0x2ff   : > { %v2424_v13 = vmax.f32 %v2286_v33, 0.0 }
 0x300   : > { %v2423_v35 = vmax.f32 %v2281_v10, 0.0  ;;  %v7900_v20 = vld [vmem:[#allocation3 + $0x39] sm:$0xff] }
 0x301   : > { %2457 = vst.msk [vmem:[#allocation3 + $0x51] sm:$0xff] %vm319_vm12, %v2424_v13  ;;  %2622 = vrot.lane.b32.xlu1 %v7900_v20, %s6500_s15  ;;  %v7905_v17 = vld [vmem:[#allocation3 + $0x31] sm:$0xff] }
 0x302   : > { %v7907_v24 = vld [vmem:[#allocation3 + $0x38] sm:$0xff]  ;;  %v7909_v49 = vld [vmem:[#allocation3 + $0x30] sm:$0xff]  ;;  %2456 = vst.msk [vmem:[#allocation3 + $0x49] sm:$0xff] %vm319_vm12, %v2423_v35  ;;  %2620 = vrot.lane.b32.xlu0 %v7905_v17, %s6500_s15 }
 0x303   : > { %2521 = vst.msk [vmem:[#allocation4 + $0x28] sm:$0xff] %vm319_vm12, %v7907_v24  ;;  %2520 = vst.msk [vmem:[#allocation4 + $0x20] sm:$0xff] %vm319_vm12, %v7909_v49 }
 0x304   : > { %v6242_v16 = vpop.f32.mrb[6].mxu0 }
 0x305   : > { %v2296_v30 = vadd.f32 %v6242_v16, %v7876_v51  ;;  %v2290_v21 = vpop.f32.mrb[7].mxu0 }
 0x306   : > { %v2291_v28 = vadd.f32 %v7876_v51, %v2290_v21 }
 0x307   : > { %v2426_v34 = vmax.f32 %v2296_v30, 0.0 }
 0x308   : > { %v2425_v26 = vmax.f32 %v2291_v28, 0.0  ;;  %v7922_v27 = vld [vmem:[#allocation3 + $0x51] sm:$0xff] }
 0x309   : > { %2459 = vst.msk [vmem:[#allocation3 + $0x69] sm:$0xff] %vm319_vm12, %v2426_v34  ;;  %2626 = vrot.lane.b32.xlu1 %v7922_v27, %s6500_s15  ;;  %v7927_v36 = vld [vmem:[#allocation3 + $0x49] sm:$0xff] }
 0x30a   : > { %v7929_v32 = vld [vmem:[#allocation3 + $0x50] sm:$0xff]  ;;  %v7931_v31 = vld [vmem:[#allocation3 + $0x48] sm:$0xff]  ;;  %2458 = vst.msk [vmem:[#allocation3 + $0x61] sm:$0xff] %vm319_vm12, %v2425_v26  ;;  %2624 = vrot.lane.b32.xlu0 %v7927_v36, %s6500_s15 }
 0x30b   : > { %2523 = vst.msk [vmem:[#allocation4 + $0x38] sm:$0xff] %vm319_vm12, %v7929_v32  ;;  %2522 = vst.msk [vmem:[#allocation4 + $0x30] sm:$0xff] %vm319_vm12, %v7931_v31 }
 0x30c   : > { %v6245_v37 = vpop.f32.mrb[8].mxu0 }
 0x30d   : > { %v2306_v39 = vadd.f32 %v6245_v37, %v7876_v51  ;;  %v2300_v0 = vpop.f32.mrb[9].mxu0 }
 0x30e   : > { %v2301_v40 = vadd.f32 %v7876_v51, %v2300_v0 }
 0x30f   : > { %v2428_v38 = vmax.f32 %v2306_v39, 0.0 }
 0x310   : > { %v2427_v50 = vmax.f32 %v2301_v40, 0.0  ;;  %v7942_v41 = vld [vmem:[#allocation3 + $0x69] sm:$0xff] }
 0x311   : > { %2461 = vst.msk [vmem:[#allocation3 + $0x81] sm:$0xff] %vm319_vm12, %v2428_v38  ;;  %2630 = vrot.lane.b32.xlu1 %v7942_v41, %s6500_s15  ;;  %v7947_v54 = vld [vmem:[#allocation3 + $0x61] sm:$0xff] }
 0x312   : > { %v7949_v52 = vld [vmem:[#allocation3 + $0x68] sm:$0xff]  ;;  %v7951_v57 = vld [vmem:[#allocation3 + $0x60] sm:$0xff]  ;;  %2460 = vst.msk [vmem:[#allocation3 + $0x79] sm:$0xff] %vm319_vm12, %v2427_v50  ;;  %2628 = vrot.lane.b32.xlu0 %v7947_v54, %s6500_s15 }
 0x313   : > { %2525 = vst.msk [vmem:[#allocation4 + $0x48] sm:$0xff] %vm319_vm12, %v7949_v52  ;;  %2524 = vst.msk [vmem:[#allocation4 + $0x40] sm:$0xff] %vm319_vm12, %v7951_v57 }
 0x314   : > { %v6248_v55 = vpop.f32.mrb[10].mxu0 }
 0x315   : > { %v2316_v59 = vadd.f32 %v6248_v55, %v7876_v51  ;;  %v2310_v58 = vpop.f32.mrb[11].mxu0 }
 0x316   : > { %v2311_v61 = vadd.f32 %v7876_v51, %v2310_v58 }
 0x317   : > { %v2430_v60 = vmax.f32 %v2316_v59, 0.0 }
 0x318   : > { %v2429_v1 = vmax.f32 %v2311_v61, 0.0  ;;  %v7962_v62 = vld [vmem:[#allocation3 + $0x81] sm:$0xff] }
 0x319   : > { %2463 = vst.msk [vmem:[#allocation3 + $0x99] sm:$0xff] %vm319_vm12, %v2430_v60  ;;  %2634 = vrot.lane.b32.xlu1 %v7962_v62, %s6500_s15  ;;  %v7967_v42 = vld [vmem:[#allocation3 + $0x79] sm:$0xff] }
 0x31a   : > { %v7969_v43 = vld [vmem:[#allocation3 + $0x80] sm:$0xff]  ;;  %v7971_v2 = vld [vmem:[#allocation3 + $0x78] sm:$0xff]  ;;  %2462 = vst.msk [vmem:[#allocation3 + $0x91] sm:$0xff] %vm319_vm12, %v2429_v1  ;;  %2632 = vrot.lane.b32.xlu0 %v7967_v42, %s6500_s15 }
 0x31b   : > { %2527 = vst.msk [vmem:[#allocation4 + $0x58] sm:$0xff] %vm319_vm12, %v7969_v43  ;;  %2526 = vst.msk [vmem:[#allocation4 + $0x50] sm:$0xff] %vm319_vm12, %v7971_v2 }
 0x31c   : > { %v6251_v3 = vpop.f32.mrb[12].mxu0 }
 0x31d   : > { %v2326_v44 = vadd.f32 %v6251_v3, %v7876_v51  ;;  %v2320_v46 = vpop.f32.mrb[13].mxu0 }
 0x31e   : > { %v2321_v5 = vadd.f32 %v7876_v51, %v2320_v46 }
 0x31f   : > { %v2432_v4 = vmax.f32 %v2326_v44, 0.0 }
 0x320   : > { %v2431_v53 = vmax.f32 %v2321_v5, 0.0  ;;  %v7982_v56 = vld [vmem:[#allocation3 + $0x99] sm:$0xff] }
 0x321   : > { %2465 = vst.msk [vmem:[#allocation3 + $0xb1] sm:$0xff] %vm319_vm12, %v2432_v4  ;;  %2638 = vrot.lane.b32.xlu1 %v7982_v56, %s6500_s15  ;;  %v7987_v7 = vld [vmem:[#allocation3 + $0x91] sm:$0xff] }
 0x322   : > { %v7989_v63 = vld [vmem:[#allocation3 + $0x98] sm:$0xff]  ;;  %v7991_v6 = vld [vmem:[#allocation3 + $0x90] sm:$0xff]  ;;  %2464 = vst.msk [vmem:[#allocation3 + $0xa9] sm:$0xff] %vm319_vm12, %v2431_v53  ;;  %2636 = vrot.lane.b32.xlu0 %v7987_v7, %s6500_s15 }
 0x323   : > { %2529 = vst.msk [vmem:[#allocation4 + $0x68] sm:$0xff] %vm319_vm12, %v7989_v63  ;;  %2528 = vst.msk [vmem:[#allocation4 + $0x60] sm:$0xff] %vm319_vm12, %v7991_v6 }
 0x324   : > { %v6254_v11 = vpop.f32.mrb[14].mxu0 }
 0x325   : > { %v2336_v14 = vadd.f32 %v6254_v11, %v7876_v51  ;;  %v2330_v15 = vpop.f32.mrb[15].mxu0 }
 0x326   : > { %v2331_v18 = vadd.f32 %v7876_v51, %v2330_v15 }
 0x327   : > { %v2434_v19 = vmax.f32 %v2336_v14, 0.0 }
 0x328   : > { %v2433_v22 = vmax.f32 %v2331_v18, 0.0  ;;  %v8002_v47 = vld [vmem:[#allocation3 + $0xb1] sm:$0xff] }
 0x329   : > { %2467 = vst.msk [vmem:[#allocation3 + $0xc9] sm:$0xff] %vm319_vm12, %v2434_v19  ;;  %2642 = vrot.lane.b32.xlu1 %v8002_v47, %s6500_s15  ;;  %v8007_v23 = vld [vmem:[#allocation3 + $0xa9] sm:$0xff] }
 0x32a   : > { %v8009_v48 = vld [vmem:[#allocation3 + $0xb0] sm:$0xff]  ;;  %v8011_v8 = vld [vmem:[#allocation3 + $0xa8] sm:$0xff]  ;;  %2466 = vst.msk [vmem:[#allocation3 + $0xc1] sm:$0xff] %vm319_vm12, %v2433_v22  ;;  %2640 = vrot.lane.b32.xlu0 %v8007_v23, %s6500_s15 }
 0x32b   : > { %2531 = vst.msk [vmem:[#allocation4 + $0x78] sm:$0xff] %vm319_vm12, %v8009_v48  ;;  %2530 = vst.msk [vmem:[#allocation4 + $0x70] sm:$0xff] %vm319_vm12, %v8011_v8 }
 0x32f   : > { %v6257_v33 = vpop.f32.mrb[16].mxu0 }
 0x330   : > { %v2346_v12 = vadd.f32 %v6257_v33, %v7876_v51  ;;  %v2340_v10 = vpop.f32.mrb[17].mxu0  ;;  %v2565_v13 = vld [vmem:[#allocation3 + $0xc9] sm:$0xff] }
 0x331   : > { %v2341_v35 = vadd.f32 %v7876_v51, %v2340_v10  ;;  %2646 = vrot.lane.b32.xlu1 %v2565_v13, %s6500_s15  ;;  %v2564_v16 = vld [vmem:[#allocation3 + $0xc1] sm:$0xff] }
 0x332   : > { %v8023_v30 = vld [vmem:[#allocation3 + $0xc8] sm:$0xff]  ;;  %v8025_v21 = vld [vmem:[#allocation3 + $0xc0] sm:$0xff]  ;;  %v2436_v45 = vmax.f32 %v2346_v12, 0.0  ;;  %2644 = vrot.lane.b32.xlu0 %v2564_v16, %s6500_s15 }
 0x333   : > { %2533 = vst.msk [vmem:[#allocation4 + $0x88] sm:$0xff] %vm319_vm12, %v8023_v30  ;;  %2532 = vst.msk [vmem:[#allocation4 + $0x80] sm:$0xff] %vm319_vm12, %v8025_v21  ;;  %v2435_v28 = vmax.f32 %v2341_v35, 0.0 }
 0x334   : > { %2469 = vst.msk [vmem:[#allocation3 + $0xe1] sm:$0xff] %vm319_vm12, %v2436_v45 }
 0x335   : > { %2468 = vst.msk [vmem:[#allocation3 + $0xd9] sm:$0xff] %vm319_vm12, %v2435_v28 }
 0x33b   : > { %v6260_v25 = vpop.f32.mrb[18].mxu0  ;;  %v2567_v34 = vld [vmem:[#allocation3 + $0xe1] sm:$0xff] }
 0x33c   : > { %v2356_v26 = vadd.f32 %v6260_v25, %v7876_v51  ;;  %2650 = vrot.lane.b32.xlu1 %v2567_v34, %s6500_s15  ;;  %v2350_v37 = vpop.f32.mrb[19].mxu0  ;;  %v2566_v39 = vld [vmem:[#allocation3 + $0xd9] sm:$0xff] }
 0x33d   : > { %v8036_v0 = vld [vmem:[#allocation3 + $0xe0] sm:$0xff]  ;;  %v2351_v40 = vadd.f32 %v7876_v51, %v2350_v37  ;;  %2648 = vrot.lane.b32.xlu0 %v2566_v39, %s6500_s15  ;;  %v8042_v38 = vld [vmem:[#allocation3 + $0xd8] sm:$0xff] }
 0x33e   : > { %2535 = vst.msk [vmem:[#allocation4 + $0x98] sm:$0xff] %vm319_vm12, %v8036_v0  ;;  %v2438_v50 = vmax.f32 %v2356_v26, 0.0  ;;  %2534 = vst.msk [vmem:[#allocation4 + $0x90] sm:$0xff] %vm319_vm12, %v8042_v38 }
 0x33f   : > { %v2437_v55 = vmax.f32 %v2351_v40, 0.0 }
 0x340   : > { %2471 = vst.msk [vmem:[#allocation3 + $0xf9] sm:$0xff] %vm319_vm12, %v2438_v50 }
 0x341   : > { %2470 = vst.msk [vmem:[#allocation3 + $0xf1] sm:$0xff] %vm319_vm12, %v2437_v55 }
 0x347   : > { %v6263_v59 = vpop.f32.mrb[20].mxu0  ;;  %v2569_v58 = vld [vmem:[#allocation3 + $0xf9] sm:$0xff] }
 0x348   : > { %v2366_v61 = vadd.f32 %v6263_v59, %v7876_v51  ;;  %2654 = vrot.lane.b32.xlu1 %v2569_v58, %s6500_s15  ;;  %v2360_v60 = vpop.f32.mrb[21].mxu0  ;;  %v2568_v1 = vld [vmem:[#allocation3 + $0xf1] sm:$0xff] }
 0x349   : > { %v8050_v3 = vld [vmem:[#allocation3 + $0xf8] sm:$0xff]  ;;  %v2361_v44 = vadd.f32 %v7876_v51, %v2360_v60  ;;  %2652 = vrot.lane.b32.xlu0 %v2568_v1, %s6500_s15  ;;  %v8056_v46 = vld [vmem:[#allocation3 + $0xf0] sm:$0xff] }
 0x34a   : > { %2537 = vst.msk [vmem:[#allocation4 + $0xa8] sm:$0xff] %vm319_vm12, %v8050_v3  ;;  %v2440_v5 = vmax.f32 %v2366_v61, 0.0  ;;  %2536 = vst.msk [vmem:[#allocation4 + $0xa0] sm:$0xff] %vm319_vm12, %v8056_v46 }
 0x34b   : > { %v2439_v4 = vmax.f32 %v2361_v44, 0.0 }
 0x34c   : > { %2473 = vst.msk [vmem:[#allocation3 + $0x111] sm:$0xff] %vm319_vm12, %v2440_v5 }
 0x34d   : > { %2472 = vst.msk [vmem:[#allocation3 + $0x109] sm:$0xff] %vm319_vm12, %v2439_v4 }
 0x353   : > { %v6266_v53 = vpop.f32.mrb[22].mxu0  ;;  %v2571_v11 = vld [vmem:[#allocation3 + $0x111] sm:$0xff] }
 0x354   : > { %v2376_v14 = vadd.f32 %v6266_v53, %v7876_v51  ;;  %2658 = vrot.lane.b32.xlu1 %v2571_v11, %s6500_s15  ;;  %v2370_v15 = vpop.f32.mrb[23].mxu0  ;;  %v2570_v18 = vld [vmem:[#allocation3 + $0x109] sm:$0xff] }
 0x355   : > { %v8064_v19 = vld [vmem:[#allocation3 + $0x110] sm:$0xff]  ;;  %v2371_v22 = vadd.f32 %v7876_v51, %v2370_v15  ;;  %2656 = vrot.lane.b32.xlu0 %v2570_v18, %s6500_s15  ;;  %v8070_v33 = vld [vmem:[#allocation3 + $0x108] sm:$0xff] }
 0x356   : > { %2539 = vst.msk [vmem:[#allocation4 + $0xb8] sm:$0xff] %vm319_vm12, %v8064_v19  ;;  %v2442_v12 = vmax.f32 %v2376_v14, 0.0  ;;  %2538 = vst.msk [vmem:[#allocation4 + $0xb0] sm:$0xff] %vm319_vm12, %v8070_v33 }
 0x357   : > { %v2441_v10 = vmax.f32 %v2371_v22, 0.0 }
 0x358   : > { %2475 = vst.msk [vmem:[#allocation3 + $0x129] sm:$0xff] %vm319_vm12, %v2442_v12 }
 0x359   : > { %2474 = vst.msk [vmem:[#allocation3 + $0x121] sm:$0xff] %vm319_vm12, %v2441_v10 }
 0x35f   : > { %v6269_v13 = vpop.f32.mrb[24].mxu0  ;;  %v2573_v35 = vld [vmem:[#allocation3 + $0x129] sm:$0xff] }
 0x360   : > { %v2386_v16 = vadd.f32 %v6269_v13, %v7876_v51  ;;  %2662 = vrot.lane.b32.xlu1 %v2573_v35, %s6500_s15  ;;  %v2380_v45 = vpop.f32.mrb[25].mxu0  ;;  %v2572_v28 = vld [vmem:[#allocation3 + $0x121] sm:$0xff] }
 0x361   : > { %v8078_v25 = vld [vmem:[#allocation3 + $0x128] sm:$0xff]  ;;  %v2381_v34 = vadd.f32 %v7876_v51, %v2380_v45  ;;  %2660 = vrot.lane.b32.xlu0 %v2572_v28, %s6500_s15  ;;  %v8084_v26 = vld [vmem:[#allocation3 + $0x120] sm:$0xff] }
 0x362   : > { %2541 = vst.msk [vmem:[#allocation4 + $0xc8] sm:$0xff] %vm319_vm12, %v8078_v25  ;;  %v2444_v37 = vmax.f32 %v2386_v16, 0.0  ;;  %2540 = vst.msk [vmem:[#allocation4 + $0xc0] sm:$0xff] %vm319_vm12, %v8084_v26 }
 0x363   : > { %v2443_v39 = vmax.f32 %v2381_v34, 0.0 }
 0x364   : > { %2477 = vst.msk [vmem:[#allocation3 + $0x141] sm:$0xff] %vm319_vm12, %v2444_v37 }
 0x365   : > { %2476 = vst.msk [vmem:[#allocation3 + $0x139] sm:$0xff] %vm319_vm12, %v2443_v39 }
 0x36b   : > { %v6272_v40 = vpop.f32.mrb[26].mxu0  ;;  %v2575_v50 = vld [vmem:[#allocation3 + $0x141] sm:$0xff]  ;;  %v2619_v55 = vpop.permute.xlu1 %2618 }
 0x36c   : > { %v2396_v59 = vadd.f32 %v6272_v40, %v7876_v51  ;;  %2666 = vrot.lane.b32.xlu1 %v2575_v50, %s6500_s15  ;;  %v2390_v58 = vpop.f32.mrb[27].mxu0  ;;  %v2617_v61 = vpop.permute.xlu0 %2616  ;;  %2712 = vst.msk [vmem:[#allocation4 + $0x18] sm:$0xff] %vm2708_vm14, %v2619_v55  ;;  %v2574_v60 = vld [vmem:[#allocation3 + $0x139] sm:$0xff] }
 0x36d   : > { %v2511_v1 = vld [vmem:[#allocation3 + $0x140] sm:$0xff]  ;;  %v2391_v44 = vadd.f32 %v7876_v51, %v2390_v58  ;;  %2711 = vst.msk [vmem:[#allocation4 + $0x10] sm:$0xff] %vm2708_vm14, %v2617_v61  ;;  %2664 = vrot.lane.b32.xlu0 %v2574_v60, %s6500_s15  ;;  %v2510_v5 = vld [vmem:[#allocation3 + $0x138] sm:$0xff]  ;;  %v2742_v58 = vld [vmem:[#allocation3 + $0xa] sm:$0xff] }
 0x36e   : > { %2543 = vst.msk [vmem:[#allocation4 + $0xd8] sm:$0xff] %vm319_vm12, %v2511_v1  ;;  %v2446_v4 = vmax.f32 %v2396_v59, 0.0  ;;  %2542 = vst.msk [vmem:[#allocation4 + $0xd0] sm:$0xff] %vm319_vm12, %v2510_v5  ;;  %v2741_v60 = vld [vmem:[#allocation3 + $0x2] sm:$0xff]  ;;  %v2743_v5 = vld [vmem:[#allocation3 + $0x1a] sm:$0xff] }
 0x36f   : > { %v2445_v53 = vmax.f32 %v2391_v44, 0.0  ;;  %v2744_v1 = vld [vmem:[#allocation3 + $0x22] sm:$0xff] }
 0x370   : > { %2479 = vst.msk [vmem:[#allocation3 + $0x159] sm:$0xff] %vm319_vm12, %v2446_v4 }
 0x371   : > { %2478 = vst.msk [vmem:[#allocation3 + $0x151] sm:$0xff] %vm319_vm12, %v2445_v53  ;;  %v8124_v53 = vld [vmem:[#allocation3 + $0x3a] sm:$0xff] }
 0x373   : > { %v2623_v11 = vpop.permute.xlu1 %2622 }
 0x374   : > { %2714 = vst.msk [vmem:[#allocation4 + $0x28] sm:$0xff] %vm2708_vm14, %v2623_v11  ;;  %v2621_v14 = vpop.permute.xlu0 %2620  ;;  %v8128_v11 = vld [vmem:[#allocation3 + $0x32] sm:$0xff] }
 0x375   : > { %2713 = vst.msk [vmem:[#allocation4 + $0x20] sm:$0xff] %vm2708_vm14, %v2621_v14  ;;  %v8132_v14 = vld [vmem:[#allocation3 + $0x52] sm:$0xff] }
 0x377   : > { %v6275_v15 = vpop.f32.mrb[28].mxu0  ;;  %v2577_v18 = vld [vmem:[#allocation3 + $0x159] sm:$0xff] }
 0x378   : > { %v2406_v22 = vadd.f32 %v6275_v15, %v7876_v51  ;;  %2670 = vrot.lane.b32.xlu1 %v2577_v18, %s6500_s15  ;;  %v2400_v12 = vpop.f32.mrb[29].mxu0  ;;  %v2576_v10 = vld [vmem:[#allocation3 + $0x151] sm:$0xff] }
 0x379   : > { %v2513_v13 = vld [vmem:[#allocation3 + $0x158] sm:$0xff]  ;;  %v2401_v35 = vadd.f32 %v7876_v51, %v2400_v12  ;;  %2668 = vrot.lane.b32.xlu0 %v2576_v10, %s6500_s15  ;;  %v2512_v16 = vld [vmem:[#allocation3 + $0x150] sm:$0xff]  ;;  %v8146_v10 = vld [vmem:[#allocation3 + $0x62] sm:$0xff] }
 0x37a   : > { %2545 = vst.msk [vmem:[#allocation4 + $0xe8] sm:$0xff] %vm319_vm12, %v2513_v13  ;;  %v2448_v45 = vmax.f32 %v2406_v22, 0.0  ;;  %2544 = vst.msk [vmem:[#allocation4 + $0xe0] sm:$0xff] %vm319_vm12, %v2512_v16  ;;  %v8137_v18 = vld [vmem:[#allocation3 + $0x4a] sm:$0xff]  ;;  %v8150_v13 = vld [vmem:[#allocation3 + $0x82] sm:$0xff] }
 0x37b   : > { %v2447_v28 = vmax.f32 %v2401_v35, 0.0  ;;  %v2627_v34 = vpop.permute.xlu1 %2626  ;;  %v8142_v12 = vld [vmem:[#allocation3 + $0x6a] sm:$0xff]  ;;  %v8155_v16 = vld [vmem:[#allocation3 + $0x7a] sm:$0xff] }
 0x37c   : > { %2481 = vst.msk [vmem:[#allocation3 + $0x171] sm:$0xff] %vm319_vm12, %v2448_v45  ;;  %v2625_v37 = vpop.permute.xlu0 %2624 }
 0x37d   : > { %2716 = vst.msk [vmem:[#allocation4 + $0x38] sm:$0xff] %vm2708_vm14, %v2627_v34  ;;  %2715 = vst.msk [vmem:[#allocation4 + $0x30] sm:$0xff] %vm2708_vm14, %v2625_v37  ;;  %v8164_v34 = vld [vmem:[#allocation3 + $0x92] sm:$0xff] }
 0x37e   : > { %2480 = vst.msk [vmem:[#allocation3 + $0x169] sm:$0xff] %vm319_vm12, %v2447_v28  ;;  %v8160_v28 = vld [vmem:[#allocation3 + $0x9a] sm:$0xff]  ;;  %v8168_v37 = vld [vmem:[#allocation3 + $0xb2] sm:$0xff] }
 0x383   : > { %v2579_v39 = vld [vmem:[#allocation3 + $0x171] sm:$0xff]  ;;  %v2631_v40 = vpop.permute.xlu1 %2630 }
 0x384   : > { %2674 = vrot.lane.b32.xlu1 %v2579_v39, %s6500_s15  ;;  %2718 = vst.msk [vmem:[#allocation4 + $0x48] sm:$0xff] %vm2708_vm14, %v2631_v40  ;;  %v2629_v55 = vpop.permute.xlu0 %2628  ;;  %v8173_v40 = vld [vmem:[#allocation3 + $0xaa] sm:$0xff] }
 0x385   : > { %v2578_v50 = vld [vmem:[#allocation3 + $0x169] sm:$0xff]  ;;  %2717 = vst.msk [vmem:[#allocation4 + $0x40] sm:$0xff] %vm2708_vm14, %v2629_v55 }
 0x386   : > { %v2515_v59 = vld [vmem:[#allocation3 + $0x170] sm:$0xff]  ;;  %2672 = vrot.lane.b32.xlu0 %v2578_v50, %s6500_s15  ;;  %v2514_v61 = vld [vmem:[#allocation3 + $0x168] sm:$0xff] }
 0x387   : > { %2547 = vst.msk [vmem:[#allocation4 + $0xf8] sm:$0xff] %vm319_vm12, %v2515_v59  ;;  %2546 = vst.msk [vmem:[#allocation4 + $0xf0] sm:$0xff] %vm319_vm12, %v2514_v61  ;;  %v8178_v55 = vld [vmem:[#allocation3 + $0xca] sm:$0xff]  ;;  %v8182_v59 = vld [vmem:[#allocation3 + $0xc2] sm:$0xff] }
 0x388   : > { %2807 = vrot.lane.b32.xlu1 %v2742_v58, %s6502_s17  ;;  %v8186_v58 = vld [vmem:[#allocation3 + $0xe2] sm:$0xff]  ;;  %v8190_v61 = vld [vmem:[#allocation3 + $0xda] sm:$0xff] }
 0x38a   : > { %2805 = vrot.lane.b32.xlu0 %v2741_v60, %s6502_s17 }
 0x38b   : > { %v2635_v44 = vpop.permute.xlu1 %2634 }
 0x38c   : > { %2811 = vrot.lane.b32.xlu1 %v2744_v1, %s6502_s17  ;;  %2720 = vst.msk [vmem:[#allocation4 + $0x58] sm:$0xff] %vm2708_vm14, %v2635_v44  ;;  %v2633_v4 = vpop.permute.xlu0 %2632  ;;  %v8195_v44 = vld [vmem:[#allocation3 + $0xfa] sm:$0xff] }
 0x38d   : > { %2719 = vst.msk [vmem:[#allocation4 + $0x50] sm:$0xff] %vm2708_vm14, %v2633_v4  ;;  %v2764_v4 = vld [vmem:[#allocation3 + $0x112] sm:$0xff] }
 0x38e   : > { %2809 = vrot.lane.b32.xlu0 %v2743_v5, %s6502_s17  ;;  %v8200_v5 = vld [vmem:[#allocation3 + $0xf2] sm:$0xff] }
 0x390   : > { %2815 = vrot.lane.b32.xlu1 %v8124_v53, %s6502_s17 }
 0x392   : > { %2813 = vrot.lane.b32.xlu0 %v8128_v11, %s6502_s17 }
 0x393   : > { %v2639_v15 = vpop.permute.xlu1 %2638 }
 0x394   : > { %2819 = vrot.lane.b32.xlu1 %v8132_v14, %s6502_s17  ;;  %2722 = vst.msk [vmem:[#allocation4 + $0x68] sm:$0xff] %vm2708_vm14, %v2639_v15  ;;  %v2637_v22 = vpop.permute.xlu0 %2636  ;;  %v2763_v15 = vld [vmem:[#allocation3 + $0x10a] sm:$0xff] }
 0x395   : > { %2721 = vst.msk [vmem:[#allocation4 + $0x60] sm:$0xff] %vm2708_vm14, %v2637_v22  ;;  %v2766_v22 = vld [vmem:[#allocation3 + $0x12a] sm:$0xff] }
 0x396   : > { %2817 = vrot.lane.b32.xlu0 %v8137_v18, %s6502_s17 }
 0x398   : > { %2823 = vrot.lane.b32.xlu1 %v8142_v12, %s6502_s17 }
 0x39a   : > { %2821 = vrot.lane.b32.xlu0 %v8146_v10, %s6502_s17 }
 0x39b   : > { %v2643_v35 = vpop.permute.xlu1 %2642 }
 0x39c   : > { %2827 = vrot.lane.b32.xlu1 %v8150_v13, %s6502_s17  ;;  %2724 = vst.msk [vmem:[#allocation4 + $0x78] sm:$0xff] %vm2708_vm14, %v2643_v35  ;;  %v2641_v45 = vpop.permute.xlu0 %2640  ;;  %v2765_v35 = vld [vmem:[#allocation3 + $0x122] sm:$0xff] }
 0x39d   : > { %2723 = vst.msk [vmem:[#allocation4 + $0x70] sm:$0xff] %vm2708_vm14, %v2641_v45 }
 0x39e   : > { %2825 = vrot.lane.b32.xlu0 %v8155_v16, %s6502_s17 }
 0x3a0   : > { %2831 = vrot.lane.b32.xlu1 %v8160_v28, %s6502_s17 }
 0x3a2   : > { %2829 = vrot.lane.b32.xlu0 %v8164_v34, %s6502_s17 }
 0x3a3   : > { %v2647_v39 = vpop.permute.xlu1 %2646 }
 0x3a4   : > { %2835 = vrot.lane.b32.xlu1 %v8168_v37, %s6502_s17  ;;  %2726 = vst.msk [vmem:[#allocation4 + $0x88] sm:$0xff] %vm2708_vm14, %v2647_v39  ;;  %v2645_v50 = vpop.permute.xlu0 %2644 }
 0x3a5   : > { %2725 = vst.msk [vmem:[#allocation4 + $0x80] sm:$0xff] %vm2708_vm14, %v2645_v50  ;;  %v2768_v50 = vld [vmem:[#allocation3 + $0x142] sm:$0xff] }
 0x3a6   : > { %2833 = vrot.lane.b32.xlu0 %v8173_v40, %s6502_s17 }
 0x3a8   : > { %2839 = vrot.lane.b32.xlu1 %v8178_v55, %s6502_s17 }
 0x3aa   : > { %2837 = vrot.lane.b32.xlu0 %v8182_v59, %s6502_s17 }
 0x3ac   : > { %2843 = vrot.lane.b32.xlu1 %v8186_v58, %s6502_s17 }
 0x3ae   : > { %2841 = vrot.lane.b32.xlu0 %v8190_v61, %s6502_s17  ;;  %v2651_v60 = vpop.permute.xlu1 %2650 }
 0x3af   : > { %2728 = vst.msk [vmem:[#allocation4 + $0x98] sm:$0xff] %vm2708_vm14, %v2651_v60  ;;  %v2649_v1 = vpop.permute.xlu0 %2648  ;;  %v2767_v60 = vld [vmem:[#allocation3 + $0x13a] sm:$0xff] }
 0x3b0   : > { %2727 = vst.msk [vmem:[#allocation4 + $0x90] sm:$0xff] %vm2708_vm14, %v2649_v1  ;;  %2847 = vrot.lane.b32.xlu1 %v8195_v44, %s6502_s17  ;;  %v2770_v1 = vld [vmem:[#allocation3 + $0x15a] sm:$0xff] }
 0x3b2   : > { %2845 = vrot.lane.b32.xlu0 %v8200_v5, %s6502_s17 }
 0x3b4   : > { %2851 = vrot.lane.b32.xlu1 %v2764_v4, %s6502_s17  ;;  %v2769_v4 = vld [vmem:[#allocation3 + $0x152] sm:$0xff] }
 0x3b6   : > { %2849 = vrot.lane.b32.xlu0 %v2763_v15, %s6502_s17  ;;  %v2772_v15 = vld [vmem:[#allocation3 + $0x172] sm:$0xff] }
 0x3b8   : > { %2855 = vrot.lane.b32.xlu1 %v2766_v22, %s6502_s17  ;;  %v2771_v22 = vld [vmem:[#allocation3 + $0x16a] sm:$0xff] }
 0x3ba   : > { %2853 = vrot.lane.b32.xlu0 %v2765_v35, %s6502_s17  ;;  %v2655_v45 = vpop.permute.xlu1 %2654 }
 0x3bb   : > { %2730 = vst.msk [vmem:[#allocation4 + $0xa8] sm:$0xff] %vm2708_vm14, %v2655_v45  ;;  %v2653_v39 = vpop.permute.xlu0 %2652 }
 0x3bc   : > { %2729 = vst.msk [vmem:[#allocation4 + $0xa0] sm:$0xff] %vm2708_vm14, %v2653_v39  ;;  %2859 = vrot.lane.b32.xlu1 %v2768_v50, %s6502_s17 }
 0x3be   : > { %2857 = vrot.lane.b32.xlu0 %v2767_v60, %s6502_s17  ;;  %v4128_v60 = vld [vmem:[%s9340_s3 + $0x18] sm:$0xff] }
 0x3c0   : > { %2863 = vrot.lane.b32.xlu1 %v2770_v1, %s6502_s17  ;;  %v4129_v1 = vld [vmem:[%s9340_s3 + $0x20] sm:$0xff] }
 0x3c2   : > { %2861 = vrot.lane.b32.xlu0 %v2769_v4, %s6502_s17  ;;  %v4130_v4 = vld [vmem:[%s9340_s3 + $0x28] sm:$0xff] }
 0x3c4   : > { %2867 = vrot.lane.b32.xlu1 %v2772_v15, %s6502_s17 }
 0x3c6   : > { %2865 = vrot.lane.b32.xlu0 %v2771_v22, %s6502_s17  ;;  %v2659_v35 = vpop.permute.xlu1 %2658  ;;  %v4131_v22 = vld [vmem:[%s9340_s3 + $0x30] sm:$0xff]  ;;  %s5972_s17 = sshll.u32 %s8859_s16, 4  ;;  %s9288_s17 = int_to_ptr.vmem [resolvable:$true] %s5972_s17 }
 0x3c7   : > { %2732 = vst.msk [vmem:[#allocation4 + $0xb8] sm:$0xff] %vm2708_vm14, %v2659_v35  ;;  %v2657_v45 = vpop.permute.xlu0 %2656  ;;  %v4132_v35 = vld [vmem:[%s9340_s3 + $0x38] sm:$0xff] }
 0x3c8   : > { %2731 = vst.msk [vmem:[#allocation4 + $0xb0] sm:$0xff] %vm2708_vm14, %v2657_v45  ;;  %3000 = vrot.lane.b32.xlu1 %v7890_v9, %s6504_s19  ;;  %v4126_v9 = vld [vmem:[%s9340_s3 + $0x8] sm:$0xff] }
 0x3ca   : > { %2998 = vrot.lane.b32.xlu0 %v7888_v29, %s6504_s19  ;;  %v4125_v29 = vld [vmem:[%s9340_s3] sm:$0xff] }
 0x3cc   : > { %3004 = vrot.lane.b32.xlu1 %v7907_v24, %s6504_s19  ;;  %v6353_v24 = vpack.c.bf16 %v4126_v9, %v4125_v29 }
 0x3ce   : > { %3002 = vrot.lane.b32.xlu0 %v7909_v49, %s6504_s19  ;;  %6369 = vmatprep.subr.bf16.mxu1 %v6353_v24  ;;  %v4127_v49 = vld [vmem:[%s9340_s3 + $0x10] sm:$0xff] }
 0x3cf   : > { %6354 = vmatprep.subr.bf16.mxu0 %v6353_v24  ;;  %6374 = vmatpush3.bf16.msra.mxu1 %v6353_v24 }
 0x3d0   : > { %3008 = vrot.lane.b32.xlu1 %v7929_v32, %s6504_s19  ;;  %6356 = vmatpush3.bf16.msra.mxu0 %v6353_v24 }
 0x3d2   : > { %3006 = vrot.lane.b32.xlu0 %v7931_v31, %s6504_s19  ;;  %v2663_v39 = vpop.permute.xlu1 %2662 }
 0x3d3   : > { %2734 = vst.msk [vmem:[#allocation4 + $0xc8] sm:$0xff] %vm2708_vm14, %v2663_v39  ;;  %v2661_v50 = vpop.permute.xlu0 %2660 }
 0x3d4   : > { %2733 = vst.msk [vmem:[#allocation4 + $0xc0] sm:$0xff] %vm2708_vm14, %v2661_v50  ;;  %3195 = vrot.lane.b32.xlu1 %v7905_v17, %s6506_s26  ;;  %v6357_v17 = vpack.c.bf16 %v4128_v60, %v4127_v49 }
 0x3d6   : > { %3010 = vrot.lane.b32.xlu0 %v7951_v57, %s6504_s19  ;;  %6370 = vmatprep.subr.bf16.mxu1 %v6357_v17 }
 0x3d7   : > { %6358 = vmatprep.subr.bf16.mxu0 %v6357_v17  ;;  %6375 = vmatpush3.bf16.msra.mxu1 %v6357_v17 }
 0x3d8   : > { %3388 = vrot.lane.b32.xlu1 %v8128_v11, %s6507_s28  ;;  %6360 = vmatpush3.bf16.msra.mxu0 %v6357_v17  ;;  %v6361_v11 = vpack.c.bf16 %v4130_v4, %v4129_v1 }
 0x3da   : > { %3197 = vrot.lane.b32.xlu0 %v7900_v20, %s6506_s26  ;;  %6371 = vmatprep.subr.bf16.mxu1 %v6361_v11 }
 0x3db   : > { %6362 = vmatprep.subr.bf16.mxu0 %v6361_v11  ;;  %6376 = vmatpush3.bf16.msra.mxu1 %v6361_v11 }
 0x3dc   : > { %3582 = vrot.lane.b32.xlu1 %v7931_v31, %s6508_s13  ;;  %6364 = vmatpush3.bf16.msra.mxu0 %v6361_v11  ;;  %v6365_v31 = vpack.c.bf16 %v4132_v35, %v4131_v22 }
 0x3de   : > { %3390 = vrot.lane.b32.xlu0 %v8124_v53, %s6507_s28  ;;  %v2667_v20 = vpop.permute.xlu1 %2666  ;;  %6372 = vmatprep.subr.bf16.mxu1 %v6365_v31  ;;  %v4133_v53 = vld [vmem:[%s9340_s3 + $0x40] sm:$0xff] }
 0x3df   : > { %2736 = vst.msk [vmem:[#allocation4 + $0xd8] sm:$0xff] %vm2708_vm14, %v2667_v20  ;;  %v2665_v15 = vpop.permute.xlu0 %2664  ;;  %6366 = vmatprep.subr.bf16.mxu0 %v6365_v31  ;;  %6377 = vmatpush3.bf16.msra.mxu1 %v6365_v31 }
 0x3e0   : > { %2735 = vst.msk [vmem:[#allocation4 + $0xd0] sm:$0xff] %vm2708_vm14, %v2665_v15  ;;  %3775 = vrot.lane.b32.xlu1 %v7927_v36, %s6509_s29  ;;  %6368 = vmatpush3.bf16.msra.mxu0 %v6365_v31 }
 0x3e1   : > { %6373 = vmatprep.subr.mxu1 %v4133_v53  ;;  %6295 = vmatprep.subr.mxu0 %v4133_v53 }
 0x3e2   : > { %3584 = vrot.lane.b32.xlu0 %v7929_v32, %s6508_s13 }
 0x3e3   : > { %6378 = vmatpush3.msra.mxu1 %v4133_v53 }
 0x3e4   : > { %3777 = vrot.lane.b32.xlu1 %v7922_v27, %s6509_s29  ;;  %6296 = vmatpush3.msra.mxu0 %v4133_v53 }
 0x3e6   : > { %3199 = vrot.lane.b32.xlu0 %v7927_v36, %s6506_s26 }
 0x3e8   : > { %3201 = vrot.lane.b32.xlu1 %v7922_v27, %s6506_s26 }
 0x3ea   : > { %3968 = vrot.lane.b32.xlu0 %v8137_v18, %s6510_s12  ;;  %v2671_v32 = vpop.permute.xlu1 %2670 }
 0x3eb   : > { %2738 = vst.msk [vmem:[#allocation4 + $0xe8] sm:$0xff] %vm2708_vm14, %v2671_v32  ;;  %v2669_v45 = vpop.permute.xlu0 %2668 }
 0x3ec   : > { %2737 = vst.msk [vmem:[#allocation4 + $0xe0] sm:$0xff] %vm2708_vm14, %v2669_v45  ;;  %3970 = vrot.lane.b32.xlu1 %v8132_v14, %s6510_s12 }
 0x3ee   : > { %3392 = vrot.lane.b32.xlu0 %v8137_v18, %s6507_s28 }
 0x3f0   : > { %3586 = vrot.lane.b32.xlu1 %v7951_v57, %s6508_s13 }
 0x3f2   : > { %3394 = vrot.lane.b32.xlu0 %v8132_v14, %s6507_s28 }
 0x3f4   : > { %3779 = vrot.lane.b32.xlu1 %v7947_v54, %s6509_s29 }
 0x3f6   : > { %3588 = vrot.lane.b32.xlu0 %v7949_v52, %s6508_s13  ;;  %v2675_v27 = vpop.permute.xlu1 %2674 }
 0x3f7   : > { %2740 = vst.msk [vmem:[#allocation4 + $0xf8] sm:$0xff] %vm2708_vm14, %v2675_v27 }
 0x3f8   : > { %v2673_v36 = vpop.permute.xlu0 %2672  ;;  %3203 = vrot.lane.b32.xlu1 %v7947_v54, %s6506_s26 }
 0x3f9   : > { %2739 = vst.msk [vmem:[#allocation4 + $0xf0] sm:$0xff] %vm2708_vm14, %v2673_v36  ;;  %vm5881_vm14 = vcmask 1046534  }
 0x3fa   : > { %3012 = vrot.lane.b32.xlu0 %v7949_v52, %s6504_s19  ;;  %v2808_v57 = vpop.permute.xlu1 %2807 }
 0x3fb   : > { %2903 = vst.msk [vmem:[#allocation4 + $0x8] sm:$0xff] %vm2901_vm15, %v2808_v57 }
 0x3fc   : > { %v2806_v14 = vpop.permute.xlu0 %2805  ;;  %3972 = vrot.lane.b32.xlu1 %v8146_v10, %s6510_s12 }
 0x3fd   : > { %2902 = vst.msk [vmem:[#allocation4] sm:$0xff] %vm2901_vm15, %v2806_v14 }
 0x3fe   : > { %3781 = vrot.lane.b32.xlu0 %v7942_v41, %s6509_s29  ;;  %v2812_v18 = vpop.permute.xlu1 %2811 }
 0x3ff   : > { %2905 = vst.msk [vmem:[#allocation4 + $0x18] sm:$0xff] %vm2901_vm15, %v2812_v18 }
 0x400   : > { %v2810_v54 = vpop.permute.xlu0 %2809  ;;  %3396 = vrot.lane.b32.xlu1 %v8146_v10, %s6507_s28 }
 0x401   : > { %2904 = vst.msk [vmem:[#allocation4 + $0x10] sm:$0xff] %vm2901_vm15, %v2810_v54 }
 0x402   : > { %3205 = vrot.lane.b32.xlu0 %v7942_v41, %s6506_s26  ;;  %v2816_v52 = vpop.permute.xlu1 %2815 }
 0x403   : > { %2907 = vst.msk [vmem:[#allocation4 + $0x28] sm:$0xff] %vm2901_vm15, %v2816_v52 }
 0x404   : > { %v2814_v39 = vpop.permute.xlu0 %2813  ;;  %3398 = vrot.lane.b32.xlu1 %v8142_v12, %s6507_s28 }
 0x405   : > { %2906 = vst.msk [vmem:[#allocation4 + $0x20] sm:$0xff] %vm2901_vm15, %v2814_v39 }
 0x406   : > { %3974 = vrot.lane.b32.xlu0 %v8142_v12, %s6510_s12  ;;  %v2820_v50 = vpop.permute.xlu1 %2819 }
 0x407   : > { %2909 = vst.msk [vmem:[#allocation4 + $0x38] sm:$0xff] %vm2901_vm15, %v2820_v50  ;;  %v3719_v50 = vld [vmem:[#allocation3 + $0xc1] sm:$0xff] }
 0x408   : > { %v2818_v29 = vpop.permute.xlu0 %2817  ;;  %3014 = vrot.lane.b32.xlu1 %v7971_v2, %s6504_s19 }
 0x409   : > { %2908 = vst.msk [vmem:[#allocation4 + $0x30] sm:$0xff] %vm2901_vm15, %v2818_v29 }
 0x40a   : > { %3590 = vrot.lane.b32.xlu0 %v7971_v2, %s6508_s13  ;;  %v2824_v41 = vpop.permute.xlu1 %2823  ;;  %v6278_v2 = vpop.f32.mrb[30].mxu0 }
 0x40b   : > { %2911 = vst.msk [vmem:[#allocation4 + $0x48] sm:$0xff] %vm2901_vm15, %v2824_v41  ;;  %v2416_v49 = vadd.f32 %v6278_v2, %v7876_v51  ;;  %v2410_v17 = vpop.f32.mrb[31].mxu0 }
 0x40c   : > { %v2822_v10 = vpop.permute.xlu0 %2821  ;;  %3783 = vrot.lane.b32.xlu1 %v7967_v42, %s6509_s29  ;;  %v2411_v4 = vadd.f32 %v7876_v51, %v2410_v17 }
 0x40d   : > { %2910 = vst.msk [vmem:[#allocation4 + $0x40] sm:$0xff] %vm2901_vm15, %v2822_v10  ;;  %v2450_v1 = vmax.f32 %v2416_v49, 0.0  ;;  %v3720_v10 = vld [vmem:[#allocation3 + $0xc9] sm:$0xff] }
 0x40e   : > { %3592 = vrot.lane.b32.xlu0 %v7969_v43, %s6508_s13  ;;  %v2828_v12 = vpop.permute.xlu1 %2827 }
 0x40f   : > { %2913 = vst.msk [vmem:[#allocation4 + $0x58] sm:$0xff] %vm2901_vm15, %v2828_v12 }
 0x410   : > { %v2826_v9 = vpop.permute.xlu0 %2825  ;;  %3207 = vrot.lane.b32.xlu1 %v7967_v42, %s6506_s26  ;;  %2483 = vst.msk [vmem:[#allocation3 + $0x189] sm:$0xff] %vm319_vm12, %v2450_v1 }
 0x411   : > { %2912 = vst.msk [vmem:[#allocation4 + $0x50] sm:$0xff] %vm2901_vm15, %v2826_v9 }
 0x412   : > { %3016 = vrot.lane.b32.xlu0 %v7969_v43, %s6504_s19  ;;  %v2832_v24 = vpop.permute.xlu1 %2831  ;;  %v2449_v43 = vmax.f32 %v2411_v4, 0.0 }
 0x413   : > { %2915 = vst.msk [vmem:[#allocation4 + $0x68] sm:$0xff] %vm2901_vm15, %v2832_v24 }
 0x414   : > { %v2830_v60 = vpop.permute.xlu0 %2829  ;;  %3976 = vrot.lane.b32.xlu1 %v8155_v16, %s6510_s12  ;;  %2482 = vst.msk [vmem:[#allocation3 + $0x181] sm:$0xff] %vm319_vm12, %v2449_v43 }
 0x415   : > { %2914 = vst.msk [vmem:[#allocation4 + $0x60] sm:$0xff] %vm2901_vm15, %v2830_v60 }
 0x416   : > { %3785 = vrot.lane.b32.xlu0 %v7962_v62, %s6509_s29  ;;  %v2836_v42 = vpop.permute.xlu1 %2835 }
 0x417   : > { %2917 = vst.msk [vmem:[#allocation4 + $0x78] sm:$0xff] %vm2901_vm15, %v2836_v42 }
 0x418   : > { %v2834_v11 = vpop.permute.xlu0 %2833  ;;  %3400 = vrot.lane.b32.xlu1 %v8155_v16, %s6507_s28 }
 0x419   : > { %2916 = vst.msk [vmem:[#allocation4 + $0x70] sm:$0xff] %vm2901_vm15, %v2834_v11  ;;  %v3722_v11 = vld [vmem:[#allocation3 + $0xe1] sm:$0xff] }
 0x41a   : > { %3209 = vrot.lane.b32.xlu0 %v7962_v62, %s6506_s26  ;;  %v2840_v51 = vpop.permute.xlu1 %2839 }
 0x41b   : > { %2919 = vst.msk [vmem:[#allocation4 + $0x88] sm:$0xff] %vm2901_vm15, %v2840_v51 }
 0x41c   : > { %v2838_v20 = vpop.permute.xlu0 %2837  ;;  %3402 = vrot.lane.b32.xlu1 %v8150_v13, %s6507_s28 }
 0x41d   : > { %2918 = vst.msk [vmem:[#allocation4 + $0x80] sm:$0xff] %vm2901_vm15, %v2838_v20 }
 0x41e   : > { %3978 = vrot.lane.b32.xlu0 %v8150_v13, %s6510_s12  ;;  %v2844_v15 = vpop.permute.xlu1 %2843 }
 0x41f   : > { %2921 = vst.msk [vmem:[#allocation4 + $0x98] sm:$0xff] %vm2901_vm15, %v2844_v15 }
 0x420   : > { %v2842_v16 = vpop.permute.xlu0 %2841  ;;  %3018 = vrot.lane.b32.xlu1 %v7991_v6, %s6504_s19 }
 0x421   : > { %2920 = vst.msk [vmem:[#allocation4 + $0x90] sm:$0xff] %vm2901_vm15, %v2842_v16 }
 0x422   : > { %3594 = vrot.lane.b32.xlu0 %v7991_v6, %s6508_s13  ;;  %v2848_v62 = vpop.permute.xlu1 %2847 }
 0x423   : > { %2923 = vst.msk [vmem:[#allocation4 + $0xa8] sm:$0xff] %vm2901_vm15, %v2848_v62 }
 0x424   : > { %v2846_v22 = vpop.permute.xlu0 %2845  ;;  %3787 = vrot.lane.b32.xlu1 %v7987_v7, %s6509_s29 }
 0x425   : > { %2922 = vst.msk [vmem:[#allocation4 + $0xa0] sm:$0xff] %vm2901_vm15, %v2846_v22 }
 0x426   : > { %3596 = vrot.lane.b32.xlu0 %v7989_v63, %s6508_s13  ;;  %v2852_v13 = vpop.permute.xlu1 %2851 }
 0x427   : > { %2925 = vst.msk [vmem:[#allocation4 + $0xb8] sm:$0xff] %vm2901_vm15, %v2852_v13 }
 0x428   : > { %v2850_v35 = vpop.permute.xlu0 %2849  ;;  %3211 = vrot.lane.b32.xlu1 %v7987_v7, %s6506_s26 }
 0x429   : > { %2924 = vst.msk [vmem:[#allocation4 + $0xb0] sm:$0xff] %vm2901_vm15, %v2850_v35 }
 0x42a   : > { %3020 = vrot.lane.b32.xlu0 %v7989_v63, %s6504_s19  ;;  %v2856_v6 = vpop.permute.xlu1 %2855 }
 0x42b   : > { %2927 = vst.msk [vmem:[#allocation4 + $0xc8] sm:$0xff] %vm2901_vm15, %v2856_v6 }
 0x42c   : > { %v2854_v31 = vpop.permute.xlu0 %2853  ;;  %3980 = vrot.lane.b32.xlu1 %v8164_v34, %s6510_s12 }
 0x42d   : > { %2926 = vst.msk [vmem:[#allocation4 + $0xc0] sm:$0xff] %vm2901_vm15, %v2854_v31 }
 0x42e   : > { %3789 = vrot.lane.b32.xlu0 %v7982_v56, %s6509_s29  ;;  %v2860_v53 = vpop.permute.xlu1 %2859 }
 0x42f   : > { %2929 = vst.msk [vmem:[#allocation4 + $0xd8] sm:$0xff] %vm2901_vm15, %v2860_v53 }
 0x430   : > { %v2858_v32 = vpop.permute.xlu0 %2857  ;;  %3404 = vrot.lane.b32.xlu1 %v8164_v34, %s6507_s28 }
 0x431   : > { %2928 = vst.msk [vmem:[#allocation4 + $0xd0] sm:$0xff] %vm2901_vm15, %v2858_v32  ;;  %v3724_v32 = vld [vmem:[#allocation3 + $0xf9] sm:$0xff] }
 0x432   : > { %3213 = vrot.lane.b32.xlu0 %v7982_v56, %s6506_s26  ;;  %v2864_v7 = vpop.permute.xlu1 %2863 }
 0x433   : > { %2931 = vst.msk [vmem:[#allocation4 + $0xe8] sm:$0xff] %vm2901_vm15, %v2864_v7 }
 0x434   : > { %v2862_v63 = vpop.permute.xlu0 %2861  ;;  %3406 = vrot.lane.b32.xlu1 %v8160_v28, %s6507_s28 }
 0x435   : > { %2930 = vst.msk [vmem:[#allocation4 + $0xe0] sm:$0xff] %vm2901_vm15, %v2862_v63 }
 0x436   : > { %3982 = vrot.lane.b32.xlu0 %v8160_v28, %s6510_s12  ;;  %v2868_v45 = vpop.permute.xlu1 %2867 }
 0x437   : > { %2933 = vst.msk [vmem:[#allocation4 + $0xf8] sm:$0xff] %vm2901_vm15, %v2868_v45 }
 0x438   : > { %v2866_v27 = vpop.permute.xlu0 %2865  ;;  %3022 = vrot.lane.b32.xlu1 %v8011_v8, %s6504_s19 }
 0x439   : > { %2932 = vst.msk [vmem:[#allocation4 + $0xf0] sm:$0xff] %vm2901_vm15, %v2866_v27  ;;  %vm5883_vm15 = vcmask 1047559  }
 0x43a   : > { %3598 = vrot.lane.b32.xlu0 %v8011_v8, %s6508_s13  ;;  %v3001_v56 = vpop.permute.xlu1 %3000 }
 0x43b   : > { %3096 = vst.msk [vmem:[#allocation4 + $0x8] sm:$0xff] %vm3094_vm0, %v3001_v56 }
 0x43c   : > { %v2999_v34 = vpop.permute.xlu0 %2998  ;;  %3791 = vrot.lane.b32.xlu1 %v8007_v23, %s6509_s29 }
 0x43d   : > { %3095 = vst.msk [vmem:[#allocation4] sm:$0xff] %vm3094_vm0, %v2999_v34 }
 0x43e   : > { %3600 = vrot.lane.b32.xlu0 %v8009_v48, %s6508_s13  ;;  %v3005_v28 = vpop.permute.xlu1 %3004 }
 0x43f   : > { %3098 = vst.msk [vmem:[#allocation4 + $0x18] sm:$0xff] %vm3094_vm0, %v3005_v28 }
 0x440   : > { %v3003_v36 = vpop.permute.xlu0 %3002  ;;  %3215 = vrot.lane.b32.xlu1 %v8007_v23, %s6506_s26 }
 0x441   : > { %3097 = vst.msk [vmem:[#allocation4 + $0x10] sm:$0xff] %vm3094_vm0, %v3003_v36 }
 0x442   : > { %3024 = vrot.lane.b32.xlu0 %v8009_v48, %s6504_s19  ;;  %v3009_v8 = vpop.permute.xlu1 %3008  ;;  %v3140_v48 = vld [vmem:[#allocation3 + $0xb1] sm:$0xff] }
 0x443   : > { %3100 = vst.msk [vmem:[#allocation4 + $0x28] sm:$0xff] %vm3094_vm0, %v3009_v8 }
 0x444   : > { %v3007_v57 = vpop.permute.xlu0 %3006  ;;  %3984 = vrot.lane.b32.xlu1 %v8173_v40, %s6510_s12 }
 0x445   : > { %3099 = vst.msk [vmem:[#allocation4 + $0x20] sm:$0xff] %vm3094_vm0, %v3007_v57 }
 0x446   : > { %3793 = vrot.lane.b32.xlu0 %v8002_v47, %s6509_s29  ;;  %v3196_v14 = vpop.permute.xlu1 %3195 }
 0x447   : > { %3290 = vst.msk [vmem:[#allocation4 + $0x10] sm:$0xff] %vm3287_vm1, %v3196_v14 }
 0x448   : > { %v3011_v23 = vpop.permute.xlu0 %3010  ;;  %3408 = vrot.lane.b32.xlu1 %v8173_v40, %s6507_s28 }
 0x449   : > { %3101 = vst.msk [vmem:[#allocation4 + $0x30] sm:$0xff] %vm3094_vm0, %v3011_v23  ;;  %v3918_v23 = vld [vmem:[#allocation3 + $0x10a] sm:$0xff] }
 0x44a   : > { %3217 = vrot.lane.b32.xlu0 %v3140_v48, %s6506_s26  ;;  %v3389_v18 = vpop.permute.xlu1 %3388  ;;  %v3726_v48 = vld [vmem:[#allocation3 + $0x111] sm:$0xff] }
 0x44b   : > { %3483 = vst.msk [vmem:[#allocation4 + $0x10] sm:$0xff] %vm3480_vm2, %v3389_v18 }
 0x44c   : > { %v3198_v54 = vpop.permute.xlu0 %3197  ;;  %3410 = vrot.lane.b32.xlu1 %v8168_v37, %s6507_s28 }
 0x44d   : > { %3291 = vst.msk [vmem:[#allocation4 + $0x18] sm:$0xff] %vm3287_vm1, %v3198_v54 }
 0x44e   : > { %3986 = vrot.lane.b32.xlu0 %v8168_v37, %s6510_s12  ;;  %v3583_v47 = vpop.permute.xlu1 %3582 }
 0x44f   : > { %3677 = vst.msk [vmem:[#allocation4 + $0x10] sm:$0xff] %vm3674_vm3, %v3583_v47 }
 0x450   : > { %v3391_v40 = vpop.permute.xlu0 %3390  ;;  %3026 = vrot.lane.b32.xlu1 %v8025_v21, %s6504_s19 }
 0x451   : > { %3484 = vst.msk [vmem:[#allocation4 + $0x18] sm:$0xff] %vm3480_vm2, %v3391_v40 }
 0x452   : > { %3602 = vrot.lane.b32.xlu0 %v8025_v21, %s6508_s13  ;;  %v3776_v52 = vpop.permute.xlu1 %3775 }
 0x453   : > { %3870 = vst.msk [vmem:[#allocation4 + $0x10] sm:$0xff] %vm3867_vm4, %v3776_v52  ;;  %v3341_v52 = vld [vmem:[#allocation3 + $0x112] sm:$0xff] }
 0x454   : > { %v3585_v39 = vpop.permute.xlu0 %3584  ;;  %3795 = vrot.lane.b32.xlu1 %v3719_v50, %s6509_s29 }
 0x455   : > { %3678 = vst.msk [vmem:[#allocation4 + $0x18] sm:$0xff] %vm3674_vm3, %v3585_v39 }
 0x456   : > { %3604 = vrot.lane.b32.xlu0 %v8023_v30, %s6508_s13  ;;  %v3778_v37 = vpop.permute.xlu1 %3777 }
 0x457   : > { %3871 = vst.msk [vmem:[#allocation4 + $0x18] sm:$0xff] %vm3867_vm4, %v3778_v37 }
 0x458   : > { %v3200_v29 = vpop.permute.xlu0 %3199  ;;  %3219 = vrot.lane.b32.xlu1 %v3719_v50, %s6506_s26 }
 0x459   : > { %3292 = vst.msk [vmem:[#allocation4 + $0x20] sm:$0xff] %vm3287_vm1, %v3200_v29 }
 0x45a   : > { %3028 = vrot.lane.b32.xlu0 %v8023_v30, %s6504_s19  ;;  %v3202_v21 = vpop.permute.xlu1 %3201 }
 0x45b   : > { %3293 = vst.msk [vmem:[#allocation4 + $0x28] sm:$0xff] %vm3287_vm1, %v3202_v21 }
 0x45c   : > { %v3969_v41 = vpop.permute.xlu0 %3968  ;;  %3988 = vrot.lane.b32.xlu1 %v8182_v59, %s6510_s12 }
 0x45d   : > { %4063 = vst.msk [vmem:[#allocation4 + $0x10] sm:$0xff] %vm4060_vm5, %v3969_v41  ;;  %v3727_v41 = vld [vmem:[#allocation3 + $0x121] sm:$0xff] }
 0x45e   : > { %3797 = vrot.lane.b32.xlu0 %v3720_v10, %s6509_s29  ;;  %v3971_v12 = vpop.permute.xlu1 %3970 }
 0x45f   : > { %4064 = vst.msk [vmem:[#allocation4 + $0x18] sm:$0xff] %vm4060_vm5, %v3971_v12 }
 0x460   : > { %v3393_v9 = vpop.permute.xlu0 %3392  ;;  %3412 = vrot.lane.b32.xlu1 %v8182_v59, %s6507_s28 }
 0x461   : > { %3485 = vst.msk [vmem:[#allocation4 + $0x20] sm:$0xff] %vm3480_vm2, %v3393_v9 }
 0x462   : > { %3221 = vrot.lane.b32.xlu0 %v3720_v10, %s6506_s26  ;;  %v3587_v30 = vpop.permute.xlu1 %3586 }
 0x463   : > { %3679 = vst.msk [vmem:[#allocation4 + $0x20] sm:$0xff] %vm3674_vm3, %v3587_v30  ;;  %v3920_v30 = vld [vmem:[#allocation3 + $0x122] sm:$0xff] }
 0x464   : > { %v3395_v2 = vpop.permute.xlu0 %3394  ;;  %v4095_v24 = vld [vmem:[#allocation4 + $0x10] sm:$0xff]  ;;  %3414 = vrot.lane.b32.xlu1 %v8178_v55, %s6507_s28 }
 0x465   : > { %3486 = vst.msk [vmem:[#allocation4 + $0x28] sm:$0xff] %vm3480_vm2, %v3395_v2  ;;  %6300 = vmatprep.mubr.msk.f32.mxu1 %vm4141_vm6, %v4095_v24  ;;  %v3728_v2 = vld [vmem:[#allocation3 + $0x129] sm:$0xff] }
 0x466   : > { %3990 = vrot.lane.b32.xlu0 %v8178_v55, %s6510_s12  ;;  %v3780_v49 = vpop.permute.xlu1 %3779  ;;  %v4096_v59 = vld [vmem:[#allocation4 + $0x18] sm:$0xff]  ;;  %v3721_v55 = vld [vmem:[#allocation3 + $0xd9] sm:$0xff] }
 0x467   : > { %3872 = vst.msk [vmem:[#allocation4 + $0x20] sm:$0xff] %vm3867_vm4, %v3780_v49  ;;  %6301 = vmatmul.mubr.msk.f32.vlgmr.msra.gmra.mrb[0].mxu1 %vm4141_vm6, %v4096_v59 }
 0x468   : > { %v3589_v60 = vpop.permute.xlu0 %3588  ;;  %3030 = vrot.lane.b32.xlu1 %v8042_v38, %s6504_s19 }
 0x469   : > { %3680 = vst.msk [vmem:[#allocation4 + $0x28] sm:$0xff] %vm3674_vm3, %v3589_v60 }
 0x46a   : > { %3606 = vrot.lane.b32.xlu0 %v8042_v38, %s6508_s13  ;;  %v3204_v17 = vpop.permute.xlu1 %3203 }
 0x46b   : > { %3294 = vst.msk [vmem:[#allocation4 + $0x30] sm:$0xff] %vm3287_vm1, %v3204_v17  ;;  %v3343_v17 = vld [vmem:[#allocation3 + $0x12a] sm:$0xff] }
 0x46c   : > { %v3013_v1 = vpop.permute.xlu0 %3012  ;;  %3799 = vrot.lane.b32.xlu1 %v3721_v55, %s6509_s29 }
 0x46d   : > { %3102 = vst.msk [vmem:[#allocation4 + $0x38] sm:$0xff] %vm3094_vm0, %v3013_v1 }
 0x46e   : > { %3608 = vrot.lane.b32.xlu0 %v8036_v0, %s6508_s13  ;;  %v3973_v4 = vpop.permute.xlu1 %3972 }
 0x46f   : > { %4065 = vst.msk [vmem:[#allocation4 + $0x20] sm:$0xff] %vm4060_vm5, %v3973_v4  ;;  %v2958_v4 = vld [vmem:[#allocation3 + $0x138] sm:$0xff] }
 0x470   : > { %v3782_v42 = vpop.permute.xlu0 %3781  ;;  %3223 = vrot.lane.b32.xlu1 %v3721_v55, %s6506_s26 }
 0x471   : > { %3873 = vst.msk [vmem:[#allocation4 + $0x28] sm:$0xff] %vm3867_vm4, %v3782_v42 }
 0x472   : > { %3032 = vrot.lane.b32.xlu0 %v8036_v0, %s6504_s19  ;;  %v3397_v38 = vpop.permute.xlu1 %3396 }
 0x473   : > { %3487 = vst.msk [vmem:[#allocation4 + $0x30] sm:$0xff] %vm3480_vm2, %v3397_v38 }
 0x474   : > { %v3206_v43 = vpop.permute.xlu0 %3205  ;;  %3992 = vrot.lane.b32.xlu1 %v8190_v61, %s6510_s12 }
 0x475   : > { %3295 = vst.msk [vmem:[#allocation4 + $0x38] sm:$0xff] %vm3287_vm1, %v3206_v43 }
 0x476   : > { %3801 = vrot.lane.b32.xlu0 %v3722_v11, %s6509_s29  ;;  %v3399_v51 = vpop.permute.xlu1 %3398  ;;  %v4097_v20 = vld [vmem:[#allocation4 + $0x20] sm:$0xff] }
 0x477   : > { %3488 = vst.msk [vmem:[#allocation4 + $0x38] sm:$0xff] %vm3480_vm2, %v3399_v51  ;;  %6303 = vmatprep.mubr.msk.f32.mxu1 %vm4141_vm6, %v4097_v20  ;;  %v3537_v51 = vld [vmem:[#allocation3 + $0x140] sm:$0xff] }
 0x478   : > { %v3975_v15 = vpop.permute.xlu0 %3974  ;;  %3416 = vrot.lane.b32.xlu1 %v8190_v61, %s6507_s28 }
 0x479   : > { %4066 = vst.msk [vmem:[#allocation4 + $0x28] sm:$0xff] %vm4060_vm5, %v3975_v15 }
 0x47a   : > { %3225 = vrot.lane.b32.xlu0 %v3722_v11, %s6506_s26  ;;  %v3015_v0 = vpop.permute.xlu1 %3014  ;;  %v3729_v11 = vld [vmem:[#allocation3 + $0x139] sm:$0xff] }
 0x47b   : > { %3103 = vst.msk [vmem:[#allocation4 + $0x40] sm:$0xff] %vm3094_vm0, %v3015_v0 }
 0x47c   : > { %v3591_v16 = vpop.permute.xlu0 %3590  ;;  %3418 = vrot.lane.b32.xlu1 %v8186_v58, %s6507_s28 }
 0x47d   : > { %3681 = vst.msk [vmem:[#allocation4 + $0x30] sm:$0xff] %vm3674_vm3, %v3591_v16 }
 0x47e   : > { %3994 = vrot.lane.b32.xlu0 %v8186_v58, %s6510_s12  ;;  %v3784_v62 = vpop.permute.xlu1 %3783  ;;  %v3723_v58 = vld [vmem:[#allocation3 + $0xf1] sm:$0xff] }
 0x47f   : > { %3874 = vst.msk [vmem:[#allocation4 + $0x30] sm:$0xff] %vm3867_vm4, %v3784_v62  ;;  %v3922_v62 = vld [vmem:[#allocation3 + $0x13a] sm:$0xff] }
 0x480   : > { %v3593_v22 = vpop.permute.xlu0 %3592  ;;  %v4098_v13 = vld [vmem:[#allocation4 + $0x28] sm:$0xff]  ;;  %3034 = vrot.lane.b32.xlu1 %v8056_v46, %s6504_s19 }
 0x481   : > { %3682 = vst.msk [vmem:[#allocation4 + $0x38] sm:$0xff] %vm3674_vm3, %v3593_v22  ;;  %6304 = vmatmul.mubr.msk.f32.gmra.mrb[2].mxu1 %vm4141_vm6, %v4098_v13  ;;  %v3730_v22 = vld [vmem:[#allocation3 + $0x141] sm:$0xff] }
 0x482   : > { %3610 = vrot.lane.b32.xlu0 %v8056_v46, %s6508_s13  ;;  %v3208_v61 = vpop.permute.xlu1 %3207 }
 0x483   : > { %3296 = vst.msk [vmem:[#allocation4 + $0x40] sm:$0xff] %vm3287_vm1, %v3208_v61 }
 0x484   : > { %v3017_v35 = vpop.permute.xlu0 %3016  ;;  %3803 = vrot.lane.b32.xlu1 %v3723_v58, %s6509_s29 }
 0x485   : > { %3104 = vst.msk [vmem:[#allocation4 + $0x48] sm:$0xff] %vm3094_vm0, %v3017_v35 }
 0x486   : > { %3612 = vrot.lane.b32.xlu0 %v8050_v3, %s6508_s13  ;;  %v3977_v6 = vpop.permute.xlu1 %3976 }
 0x487   : > { %4067 = vst.msk [vmem:[#allocation4 + $0x30] sm:$0xff] %vm4060_vm5, %v3977_v6 }
 0x488   : > { %v3786_v31 = vpop.permute.xlu0 %3785  ;;  %3227 = vrot.lane.b32.xlu1 %v3723_v58, %s6506_s26 }
 0x489   : > { %3875 = vst.msk [vmem:[#allocation4 + $0x38] sm:$0xff] %vm3867_vm4, %v3786_v31  ;;  %v3345_v31 = vld [vmem:[#allocation3 + $0x142] sm:$0xff] }
 0x48a   : > { %3036 = vrot.lane.b32.xlu0 %v8050_v3, %s6504_s19  ;;  %v3401_v46 = vpop.permute.xlu1 %3400 }
 0x48b   : > { %3489 = vst.msk [vmem:[#allocation4 + $0x40] sm:$0xff] %vm3480_vm2, %v3401_v46 }
 0x48c   : > { %v3210_v53 = vpop.permute.xlu0 %3209  ;;  %3996 = vrot.lane.b32.xlu1 %v8200_v5, %s6510_s12 }
 0x48d   : > { %3297 = vst.msk [vmem:[#allocation4 + $0x48] sm:$0xff] %vm3287_vm1, %v3210_v53 }
 0x48e   : > { %3805 = vrot.lane.b32.xlu0 %v3724_v32, %s6509_s29  ;;  %v3403_v7 = vpop.permute.xlu1 %3402  ;;  %v4099_v63 = vld [vmem:[#allocation4 + $0x30] sm:$0xff] }
 0x48f   : > { %3490 = vst.msk [vmem:[#allocation4 + $0x48] sm:$0xff] %vm3480_vm2, %v3403_v7  ;;  %6306 = vmatprep.mubr.msk.f32.mxu1 %vm4141_vm6, %v4099_v63 }
 0x490   : > { %v3979_v45 = vpop.permute.xlu0 %3978  ;;  %3420 = vrot.lane.b32.xlu1 %v8200_v5, %s6507_s28 }
 0x491   : > { %4068 = vst.msk [vmem:[#allocation4 + $0x38] sm:$0xff] %vm4060_vm5, %v3979_v45 }
 0x492   : > { %3229 = vrot.lane.b32.xlu0 %v3724_v32, %s6506_s26  ;;  %v3019_v3 = vpop.permute.xlu1 %3018  ;;  %v2960_v32 = vld [vmem:[#allocation3 + $0x150] sm:$0xff] }
 0x493   : > { %3105 = vst.msk [vmem:[#allocation4 + $0x50] sm:$0xff] %vm3094_vm0, %v3019_v3  ;;  %v3731_v3 = vld [vmem:[#allocation3 + $0x151] sm:$0xff] }
 0x494   : > { %v3595_v27 = vpop.permute.xlu0 %3594  ;;  %3422 = vrot.lane.b32.xlu1 %v8195_v44, %s6507_s28 }
 0x495   : > { %3683 = vst.msk [vmem:[#allocation4 + $0x40] sm:$0xff] %vm3674_vm3, %v3595_v27  ;;  %v3539_v27 = vld [vmem:[#allocation3 + $0x158] sm:$0xff] }
 0x496   : > { %3998 = vrot.lane.b32.xlu0 %v8195_v44, %s6510_s12  ;;  %v3788_v56 = vpop.permute.xlu1 %3787  ;;  %v3725_v44 = vld [vmem:[#allocation3 + $0x109] sm:$0xff] }
 0x497   : > { %3876 = vst.msk [vmem:[#allocation4 + $0x40] sm:$0xff] %vm3867_vm4, %v3788_v56 }
 0x498   : > { %v3597_v34 = vpop.permute.xlu0 %3596  ;;  %v4100_v28 = vld [vmem:[#allocation4 + $0x38] sm:$0xff]  ;;  %3038 = vrot.lane.b32.xlu1 %v8070_v33, %s6504_s19 }
 0x499   : > { %3684 = vst.msk [vmem:[#allocation4 + $0x48] sm:$0xff] %vm3674_vm3, %v3597_v34  ;;  %6307 = vmatmul.mubr.msk.f32.gmra.mrb[4].mxu1 %vm4141_vm6, %v4100_v28 }
 0x49a   : > { %3614 = vrot.lane.b32.xlu0 %v8070_v33, %s6508_s13  ;;  %v3212_v5 = vpop.permute.xlu1 %3211 }
 0x49b   : > { %3298 = vst.msk [vmem:[#allocation4 + $0x50] sm:$0xff] %vm3287_vm1, %v3212_v5 }
 0x49c   : > { %v3021_v36 = vpop.permute.xlu0 %3020  ;;  %3807 = vrot.lane.b32.xlu1 %v3725_v44, %s6509_s29 }
 0x49d   : > { %3106 = vst.msk [vmem:[#allocation4 + $0x58] sm:$0xff] %vm3094_vm0, %v3021_v36  ;;  %v3924_v36 = vld [vmem:[#allocation3 + $0x152] sm:$0xff] }
 0x49e   : > { %3616 = vrot.lane.b32.xlu0 %v8064_v19, %s6508_s13  ;;  %v3981_v8 = vpop.permute.xlu1 %3980 }
 0x49f   : > { %4069 = vst.msk [vmem:[#allocation4 + $0x40] sm:$0xff] %vm4060_vm5, %v3981_v8 }
 0x4a0   : > { %v3790_v57 = vpop.permute.xlu0 %3789  ;;  %3231 = vrot.lane.b32.xlu1 %v3725_v44, %s6506_s26  ;;  %v3732_v44 = vld [vmem:[#allocation3 + $0x159] sm:$0xff] }
 0x4a1   : > { %3877 = vst.msk [vmem:[#allocation4 + $0x48] sm:$0xff] %vm3867_vm4, %v3790_v57 }
 0x4a2   : > { %3040 = vrot.lane.b32.xlu0 %v8064_v19, %s6504_s19  ;;  %v3405_v33 = vpop.permute.xlu1 %3404 }
 0x4a3   : > { %3491 = vst.msk [vmem:[#allocation4 + $0x50] sm:$0xff] %vm3480_vm2, %v3405_v33 }
 0x4a4   : > { %v3214_v14 = vpop.permute.xlu0 %3213  ;;  %4000 = vrot.lane.b32.xlu1 %v3918_v23, %s6510_s12 }
 0x4a5   : > { %3299 = vst.msk [vmem:[#allocation4 + $0x58] sm:$0xff] %vm3287_vm1, %v3214_v14 }
 0x4a6   : > { %3809 = vrot.lane.b32.xlu0 %v3726_v48, %s6509_s29  ;;  %v3407_v18 = vpop.permute.xlu1 %3406  ;;  %v4101_v54 = vld [vmem:[#allocation4 + $0x40] sm:$0xff] }
 0x4a7   : > { %3492 = vst.msk [vmem:[#allocation4 + $0x58] sm:$0xff] %vm3480_vm2, %v3407_v18  ;;  %6309 = vmatprep.mubr.msk.f32.mxu1 %vm4141_vm6, %v4101_v54 }
 0x4a8   : > { %v3983_v47 = vpop.permute.xlu0 %3982  ;;  %3424 = vrot.lane.b32.xlu1 %v3918_v23, %s6507_s28 }
 0x4a9   : > { %4070 = vst.msk [vmem:[#allocation4 + $0x48] sm:$0xff] %vm4060_vm5, %v3983_v47  ;;  %v2962_v47 = vld [vmem:[#allocation3 + $0x168] sm:$0xff] }
 0x4aa   : > { %3233 = vrot.lane.b32.xlu0 %v3726_v48, %s6506_s26  ;;  %v3023_v19 = vpop.permute.xlu1 %3022  ;;  %v3347_v48 = vld [vmem:[#allocation3 + $0x15a] sm:$0xff] }
 0x4ab   : > { %3107 = vst.msk [vmem:[#allocation4 + $0x60] sm:$0xff] %vm3094_vm0, %v3023_v19 }
 0x4ac   : > { %v3599_v40 = vpop.permute.xlu0 %3598  ;;  %3426 = vrot.lane.b32.xlu1 %v3341_v52, %s6507_s28 }
 0x4ad   : > { %3685 = vst.msk [vmem:[#allocation4 + $0x50] sm:$0xff] %vm3674_vm3, %v3599_v40 }
 0x4ae   : > { %4002 = vrot.lane.b32.xlu0 %v3341_v52, %s6510_s12  ;;  %v3792_v39 = vpop.permute.xlu1 %3791 }
 0x4af   : > { %3878 = vst.msk [vmem:[#allocation4 + $0x50] sm:$0xff] %vm3867_vm4, %v3792_v39  ;;  %v3733_v39 = vld [vmem:[#allocation3 + $0x169] sm:$0xff] }
 0x4b0   : > { %v3601_v50 = vpop.permute.xlu0 %3600  ;;  %v4102_v37 = vld [vmem:[#allocation4 + $0x48] sm:$0xff]  ;;  %3042 = vrot.lane.b32.xlu1 %v8084_v26, %s6504_s19 }
 0x4b1   : > { %3686 = vst.msk [vmem:[#allocation4 + $0x58] sm:$0xff] %vm3674_vm3, %v3601_v50  ;;  %6310 = vmatmul.mubr.msk.f32.gmra.mrb[6].mxu1 %vm4141_vm6, %v4102_v37  ;;  %v3541_v50 = vld [vmem:[#allocation3 + $0x170] sm:$0xff] }
 0x4b2   : > { %3618 = vrot.lane.b32.xlu0 %v8084_v26, %s6508_s13  ;;  %v3216_v29 = vpop.permute.xlu1 %3215 }
 0x4b3   : > { %3300 = vst.msk [vmem:[#allocation4 + $0x60] sm:$0xff] %vm3287_vm1, %v3216_v29 }
 0x4b4   : > { %v3025_v21 = vpop.permute.xlu0 %3024  ;;  %3811 = vrot.lane.b32.xlu1 %v3727_v41, %s6509_s29 }
 0x4b5   : > { %3108 = vst.msk [vmem:[#allocation4 + $0x68] sm:$0xff] %vm3094_vm0, %v3025_v21 }
 0x4b6   : > { %3620 = vrot.lane.b32.xlu0 %v8078_v25, %s6508_s13  ;;  %v3985_v10 = vpop.permute.xlu1 %3984 }
 0x4b7   : > { %4071 = vst.msk [vmem:[#allocation4 + $0x50] sm:$0xff] %vm4060_vm5, %v3985_v10  ;;  %v3926_v10 = vld [vmem:[#allocation3 + $0x16a] sm:$0xff] }
 0x4b8   : > { %v3794_v12 = vpop.permute.xlu0 %3793  ;;  %3235 = vrot.lane.b32.xlu1 %v3727_v41, %s6506_s26 }
 0x4b9   : > { %3879 = vst.msk [vmem:[#allocation4 + $0x58] sm:$0xff] %vm3867_vm4, %v3794_v12  ;;  %v3734_v12 = vld [vmem:[#allocation3 + $0x171] sm:$0xff] }
 0x4ba   : > { %3044 = vrot.lane.b32.xlu0 %v8078_v25, %s6504_s19  ;;  %v3409_v26 = vpop.permute.xlu1 %3408 }
 0x4bb   : > { %3493 = vst.msk [vmem:[#allocation4 + $0x60] sm:$0xff] %vm3480_vm2, %v3409_v26 }
 0x4bc   : > { %v3218_v9 = vpop.permute.xlu0 %3217  ;;  %4004 = vrot.lane.b32.xlu1 %v3920_v30, %s6510_s12 }
 0x4bd   : > { %3301 = vst.msk [vmem:[#allocation4 + $0x68] sm:$0xff] %vm3287_vm1, %v3218_v9 }
 0x4be   : > { %3813 = vrot.lane.b32.xlu0 %v3728_v2, %s6509_s29  ;;  %v3411_v24 = vpop.permute.xlu1 %3410  ;;  %v4103_v49 = vld [vmem:[#allocation4 + $0x50] sm:$0xff] }
 0x4bf   : > { %3494 = vst.msk [vmem:[#allocation4 + $0x68] sm:$0xff] %vm3480_vm2, %v3411_v24  ;;  %6312 = vmatprep.mubr.msk.f32.mxu1 %vm4141_vm6, %v4103_v49  ;;  %v3349_v49 = vld [vmem:[#allocation3 + $0x172] sm:$0xff] }
 0x4c0   : > { %v3987_v59 = vpop.permute.xlu0 %3986  ;;  %3428 = vrot.lane.b32.xlu1 %v3920_v30, %s6507_s28 }
 0x4c1   : > { %4072 = vst.msk [vmem:[#allocation4 + $0x58] sm:$0xff] %vm4060_vm5, %v3987_v59 }
 0x4c2   : > { %3237 = vrot.lane.b32.xlu0 %v3728_v2, %s6506_s26  ;;  %v3027_v25 = vpop.permute.xlu1 %3026 }
 0x4c3   : > { %3109 = vst.msk [vmem:[#allocation4 + $0x70] sm:$0xff] %vm3094_vm0, %v3027_v25 }
 0x4c4   : > { %v3603_v60 = vpop.permute.xlu0 %3602  ;;  %3430 = vrot.lane.b32.xlu1 %v3343_v17, %s6507_s28 }
 0x4c5   : > { %3687 = vst.msk [vmem:[#allocation4 + $0x60] sm:$0xff] %vm3674_vm3, %v3603_v60  ;;  %v2964_v60 = vld [vmem:[#allocation3 + $0x180] sm:$0xff] }
 0x4c6   : > { %4006 = vrot.lane.b32.xlu0 %v3343_v17, %s6510_s12  ;;  %v3796_v1 = vpop.permute.xlu1 %3795 }
 0x4c7   : > { %3880 = vst.msk [vmem:[#allocation4 + $0x60] sm:$0xff] %vm3867_vm4, %v3796_v1 }
 0x4c8   : > { %v3605_v55 = vpop.permute.xlu0 %3604  ;;  %v4104_v42 = vld [vmem:[#allocation4 + $0x58] sm:$0xff]  ;;  %3046 = vrot.lane.b32.xlu1 %v2958_v4, %s6504_s19 }
 0x4c9   : > { %3688 = vst.msk [vmem:[#allocation4 + $0x68] sm:$0xff] %vm3674_vm3, %v3605_v55  ;;  %6313 = vmatmul.mubr.msk.f32.gmra.mrb[8].mxu1 %vm4141_vm6, %v4104_v42  ;;  %v3543_v42 = vld [vmem:[#allocation3 + $0x188] sm:$0xff] }
 0x4ca   : > { %3622 = vrot.lane.b32.xlu0 %v2958_v4, %s6508_s13  ;;  %v3220_v38 = vpop.permute.xlu1 %3219  ;;  %v3735_v4 = vld [vmem:[#allocation3 + $0x181] sm:$0xff] }
 0x4cb   : > { %3302 = vst.msk [vmem:[#allocation4 + $0x70] sm:$0xff] %vm3287_vm1, %v3220_v38 }
 0x4cc   : > { %v3029_v43 = vpop.permute.xlu0 %3028  ;;  %3815 = vrot.lane.b32.xlu1 %v3729_v11, %s6509_s29 }
 0x4cd   : > { %3110 = vst.msk [vmem:[#allocation4 + $0x78] sm:$0xff] %vm3094_vm0, %v3029_v43 }
 0x4ce   : > { %3624 = vrot.lane.b32.xlu0 %v3537_v51, %s6508_s13  ;;  %v3989_v20 = vpop.permute.xlu1 %3988 }
 0x4cf   : > { %4073 = vst.msk [vmem:[#allocation4 + $0x60] sm:$0xff] %vm4060_vm5, %v3989_v20 }
 0x4d0   : > { %v3798_v15 = vpop.permute.xlu0 %3797  ;;  %3239 = vrot.lane.b32.xlu1 %v3729_v11, %s6506_s26  ;;  %v3127_v11 = vld [vmem:[#allocation3 + $0x19] sm:$0xff] }
 0x4d1   : > { %3881 = vst.msk [vmem:[#allocation4 + $0x68] sm:$0xff] %vm3867_vm4, %v3798_v15  ;;  %v3736_v15 = vld [vmem:[#allocation3 + $0x189] sm:$0xff] }
 0x4d2   : > { %3048 = vrot.lane.b32.xlu0 %v3537_v51, %s6504_s19  ;;  %v3413_v0 = vpop.permute.xlu1 %3412 }
 0x4d3   : > { %3495 = vst.msk [vmem:[#allocation4 + $0x70] sm:$0xff] %vm3480_vm2, %v3413_v0 }
 0x4d4   : > { %v3222_v16 = vpop.permute.xlu0 %3221  ;;  %4008 = vrot.lane.b32.xlu1 %v3922_v62, %s6510_s12 }
 0x4d5   : > { %3303 = vst.msk [vmem:[#allocation4 + $0x78] sm:$0xff] %vm3287_vm1, %v3222_v16 }
 0x4d6   : > { %3817 = vrot.lane.b32.xlu0 %v3730_v22, %s6509_s29  ;;  %v3415_v13 = vpop.permute.xlu1 %3414  ;;  %v4105_v61 = vld [vmem:[#allocation4 + $0x60] sm:$0xff] }
 0x4d7   : > { %3496 = vst.msk [vmem:[#allocation4 + $0x78] sm:$0xff] %vm3480_vm2, %v3415_v13  ;;  %6315 = vmatprep.mubr.msk.f32.mxu1 %vm4141_vm6, %v4105_v61  ;;  %v3928_v13 = vld [vmem:[#allocation3 + $0x182] sm:$0xff] }
 0x4d8   : > { %v3991_v35 = vpop.permute.xlu0 %3990  ;;  %3432 = vrot.lane.b32.xlu1 %v3922_v62, %s6507_s28 }
 0x4d9   : > { %4074 = vst.msk [vmem:[#allocation4 + $0x68] sm:$0xff] %vm4060_vm5, %v3991_v35 }
 0x4da   : > { %3241 = vrot.lane.b32.xlu0 %v3730_v22, %s6506_s26  ;;  %v3031_v58 = vpop.permute.xlu1 %3030  ;;  %v3128_v22 = vld [vmem:[#allocation3 + $0x21] sm:$0xff] }
 0x4db   : > { %3111 = vst.msk [vmem:[#allocation4 + $0x80] sm:$0xff] %vm3094_vm0, %v3031_v58  ;;  %v3320_v58 = vld [vmem:[#allocation3 + $0x1a] sm:$0xff] }
 0x4dc   : > { %v3607_v6 = vpop.permute.xlu0 %3606  ;;  %3434 = vrot.lane.b32.xlu1 %v3345_v31, %s6507_s28 }
 0x4dd   : > { %3689 = vst.msk [vmem:[#allocation4 + $0x70] sm:$0xff] %vm3674_vm3, %v3607_v6 }
 0x4de   : > { %4010 = vrot.lane.b32.xlu0 %v3345_v31, %s6510_s12  ;;  %v3800_v46 = vpop.permute.xlu1 %3799 }
 0x4df   : > { %3882 = vst.msk [vmem:[#allocation4 + $0x70] sm:$0xff] %vm3867_vm4, %v3800_v46  ;;  %v3929_v46 = vld [vmem:[#allocation3 + $0x18a] sm:$0xff] }
 0x4e0   : > { %v3609_v53 = vpop.permute.xlu0 %3608  ;;  %v4106_v7 = vld [vmem:[#allocation4 + $0x68] sm:$0xff]  ;;  %3050 = vrot.lane.b32.xlu1 %v2960_v32, %s6504_s19 }
 0x4e1   : > { %3690 = vst.msk [vmem:[#allocation4 + $0x78] sm:$0xff] %vm3674_vm3, %v3609_v53  ;;  %6316 = vmatmul.mubr.msk.f32.gmra.mrb[10].mxu1 %vm4141_vm6, %v4106_v7 }
 0x4e2   : > { %3626 = vrot.lane.b32.xlu0 %v2960_v32, %s6508_s13  ;;  %v3224_v63 = vpop.permute.xlu1 %3223 }
 0x4e3   : > { %3304 = vst.msk [vmem:[#allocation4 + $0x80] sm:$0xff] %vm3287_vm1, %v3224_v63  ;;  %v3321_v63 = vld [vmem:[#allocation3 + $0x22] sm:$0xff] }
 0x4e4   : > { %v3033_v45 = vpop.permute.xlu0 %3032  ;;  %3819 = vrot.lane.b32.xlu1 %v3731_v3, %s6509_s29 }
 0x4e5   : > { %3112 = vst.msk [vmem:[#allocation4 + $0x88] sm:$0xff] %vm3094_vm0, %v3033_v45  ;;  %v3544_v45 = vld [vmem:[#allocation3 + $0x198] sm:$0xff] }
 0x4e6   : > { %3628 = vrot.lane.b32.xlu0 %v3539_v27, %s6508_s13  ;;  %v3993_v56 = vpop.permute.xlu1 %3992 }
 0x4e7   : > { %4075 = vst.msk [vmem:[#allocation4 + $0x70] sm:$0xff] %vm4060_vm5, %v3993_v56  ;;  %v3514_v56 = vld [vmem:[#allocation3 + $0x30] sm:$0xff] }
 0x4e8   : > { %v3802_v34 = vpop.permute.xlu0 %3801  ;;  %3243 = vrot.lane.b32.xlu1 %v3731_v3, %s6506_s26 }
 0x4e9   : > { %3883 = vst.msk [vmem:[#allocation4 + $0x78] sm:$0xff] %vm3867_vm4, %v3802_v34  ;;  %v3545_v34 = vld [vmem:[#allocation3 + $0x1a0] sm:$0xff] }
 0x4ea   : > { %3052 = vrot.lane.b32.xlu0 %v3539_v27, %s6504_s19  ;;  %v3417_v28 = vpop.permute.xlu1 %3416 }
 0x4eb   : > { %3497 = vst.msk [vmem:[#allocation4 + $0x80] sm:$0xff] %vm3480_vm2, %v3417_v28 }
 0x4ec   : > { %v3226_v5 = vpop.permute.xlu0 %3225  ;;  %4012 = vrot.lane.b32.xlu1 %v3924_v36, %s6510_s12 }
 0x4ed   : > { %3305 = vst.msk [vmem:[#allocation4 + $0x88] sm:$0xff] %vm3287_vm1, %v3226_v5 }
 0x4ee   : > { %3821 = vrot.lane.b32.xlu0 %v3732_v44, %s6509_s29  ;;  %v3419_v8 = vpop.permute.xlu1 %3418  ;;  %v4107_v57 = vld [vmem:[#allocation4 + $0x70] sm:$0xff] }
 0x4ef   : > { %3498 = vst.msk [vmem:[#allocation4 + $0x88] sm:$0xff] %vm3480_vm2, %v3419_v8  ;;  %6318 = vmatprep.mubr.msk.f32.mxu1 %vm4141_vm6, %v4107_v57 }
 0x4f0   : > { %v3995_v33 = vpop.permute.xlu0 %3994  ;;  %3436 = vrot.lane.b32.xlu1 %v3924_v36, %s6507_s28  ;;  %v3515_v36 = vld [vmem:[#allocation3 + $0x38] sm:$0xff] }
 0x4f1   : > { %4076 = vst.msk [vmem:[#allocation4 + $0x78] sm:$0xff] %vm4060_vm5, %v3995_v33 }
 0x4f2   : > { %3245 = vrot.lane.b32.xlu0 %v3732_v44, %s6506_s26  ;;  %v3035_v14 = vpop.permute.xlu1 %3034  ;;  %v3737_v44 = vld [vmem:[#allocation3 + $0x199] sm:$0xff] }
 0x4f3   : > { %3113 = vst.msk [vmem:[#allocation4 + $0x90] sm:$0xff] %vm3094_vm0, %v3035_v14  ;;  %v3707_v14 = vld [vmem:[#allocation3 + $0x31] sm:$0xff] }
 0x4f4   : > { %v3611_v23 = vpop.permute.xlu0 %3610  ;;  %3438 = vrot.lane.b32.xlu1 %v3347_v48, %s6507_s28 }
 0x4f5   : > { %3691 = vst.msk [vmem:[#allocation4 + $0x80] sm:$0xff] %vm3674_vm3, %v3611_v23  ;;  %v8723_v23 = vld [vmem:[%s9341_s4] ss:$0 sm:$0xff] }
 0x4f6   : > { %4014 = vrot.lane.b32.xlu0 %v3347_v48, %s6510_s12  ;;  %v3804_v18 = vpop.permute.xlu1 %3803  ;;  %v3738_v48 = vld [vmem:[#allocation3 + $0x1a1] sm:$0xff] }
 0x4f7   : > { %3884 = vst.msk [vmem:[#allocation4 + $0x80] sm:$0xff] %vm3867_vm4, %v3804_v18 }
 0x4f8   : > { %v3613_v54 = vpop.permute.xlu0 %3612  ;;  %v4108_v19 = vld [vmem:[#allocation4 + $0x78] sm:$0xff]  ;;  %3054 = vrot.lane.b32.xlu1 %v2962_v47, %s6504_s19 }
 0x4f9   : > { %3692 = vst.msk [vmem:[#allocation4 + $0x88] sm:$0xff] %vm3674_vm3, %v3613_v54  ;;  %6319 = vmatmul.mubr.msk.f32.gmra.mrb[12].mxu1 %vm4141_vm6, %v4108_v19 }
 0x4fa   : > { %3630 = vrot.lane.b32.xlu0 %v2962_v47, %s6508_s13  ;;  %v3228_v40 = vpop.permute.xlu1 %3227 }
 0x4fb   : > { %3306 = vst.msk [vmem:[#allocation4 + $0x90] sm:$0xff] %vm3287_vm1, %v3228_v40 }
 0x4fc   : > { %v3037_v52 = vpop.permute.xlu0 %3036  ;;  %3823 = vrot.lane.b32.xlu1 %v3733_v39, %s6509_s29 }
 0x4fd   : > { %3114 = vst.msk [vmem:[#allocation4 + $0x98] sm:$0xff] %vm3094_vm0, %v3037_v52 }
 0x4fe   : > { %3632 = vrot.lane.b32.xlu0 %v3541_v50, %s6508_s13  ;;  %v3997_v37 = vpop.permute.xlu1 %3996 }
 0x4ff   : > { %4077 = vst.msk [vmem:[#allocation4 + $0x80] sm:$0xff] %vm4060_vm5, %v3997_v37  ;;  %v3930_v37 = vld [vmem:[#allocation3 + $0x19a] sm:$0xff] }
 0x500   : > { %v3806_v29 = vpop.permute.xlu0 %3805  ;;  %3247 = vrot.lane.b32.xlu1 %v3733_v39, %s6506_s26  ;;  %v3708_v39 = vld [vmem:[#allocation3 + $0x39] sm:$0xff] }
 0x501   : > { %3885 = vst.msk [vmem:[#allocation4 + $0x88] sm:$0xff] %vm3867_vm4, %v3806_v29 }
 0x502   : > { %3056 = vrot.lane.b32.xlu0 %v3541_v50, %s6504_s19  ;;  %v3421_v21 = vpop.permute.xlu1 %3420 }
 0x503   : > { %3499 = vst.msk [vmem:[#allocation4 + $0x90] sm:$0xff] %vm3480_vm2, %v3421_v21 }
 0x504   : > { %v3230_v41 = vpop.permute.xlu0 %3229  ;;  %4016 = vrot.lane.b32.xlu1 %v3926_v10, %s6510_s12 }
 0x505   : > { %3307 = vst.msk [vmem:[#allocation4 + $0x98] sm:$0xff] %vm3287_vm1, %v3230_v41 }
 0x506   : > { %3825 = vrot.lane.b32.xlu0 %v3734_v12, %s6509_s29  ;;  %v3423_v26 = vpop.permute.xlu1 %3422  ;;  %v4109_v9 = vld [vmem:[#allocation4 + $0x80] sm:$0xff] }
 0x507   : > { %3500 = vst.msk [vmem:[#allocation4 + $0x98] sm:$0xff] %vm3480_vm2, %v3423_v26  ;;  %6321 = vmatprep.mubr.msk.f32.mxu1 %vm4141_vm6, %v4109_v9  ;;  %v3931_v26 = vld [vmem:[#allocation3 + $0x1a2] sm:$0xff] }
 0x508   : > { %v3999_v30 = vpop.permute.xlu0 %3998  ;;  %3440 = vrot.lane.b32.xlu1 %v3926_v10, %s6507_s28 }
 0x509   : > { %4078 = vst.msk [vmem:[#allocation4 + $0x88] sm:$0xff] %vm4060_vm5, %v3999_v30 }
 0x50a   : > { %3249 = vrot.lane.b32.xlu0 %v3734_v12, %s6506_s26  ;;  %v3039_v2 = vpop.permute.xlu1 %3038  ;;  %v3900_v12 = vld [vmem:[#allocation3 + $0x32] sm:$0xff] }
 0x50b   : > { %3115 = vst.msk [vmem:[#allocation4 + $0xa0] sm:$0xff] %vm3094_vm0, %v3039_v2  ;;  %v3901_v2 = vld [vmem:[#allocation3 + $0x3a] sm:$0xff] }
 0x50c   : > { %v3615_v24 = vpop.permute.xlu0 %3614  ;;  %3442 = vrot.lane.b32.xlu1 %v3349_v49, %s6507_s28 }
 0x50d   : > { %3693 = vst.msk [vmem:[#allocation4 + $0x90] sm:$0xff] %vm3674_vm3, %v3615_v24 }
 0x50e   : > { %4018 = vrot.lane.b32.xlu0 %v3349_v49, %s6510_s12  ;;  %v3808_v59 = vpop.permute.xlu1 %3807 }
 0x50f   : > { %3886 = vst.msk [vmem:[#allocation4 + $0x90] sm:$0xff] %vm3867_vm4, %v3808_v59 }
 0x510   : > { %v3617_v25 = vpop.permute.xlu0 %3616  ;;  %v4110_v17 = vld [vmem:[#allocation4 + $0x88] sm:$0xff]  ;;  %3058 = vrot.lane.b32.xlu1 %v2964_v60, %s6504_s19 }
 0x511   : > { %3694 = vst.msk [vmem:[#allocation4 + $0x98] sm:$0xff] %vm3674_vm3, %v3617_v25  ;;  %6322 = vmatmul.mubr.msk.f32.gmra.mrb[14].mxu1 %vm4141_vm6, %v4110_v17 }
 0x512   : > { %3634 = vrot.lane.b32.xlu0 %v2964_v60, %s6508_s13  ;;  %v3232_v1 = vpop.permute.xlu1 %3231 }
 0x513   : > { %3308 = vst.msk [vmem:[#allocation4 + $0xa0] sm:$0xff] %vm3287_vm1, %v3232_v1 }
 0x514   : > { %v3041_v55 = vpop.permute.xlu0 %3040  ;;  %3827 = vrot.lane.b32.xlu1 %v3735_v4, %s6509_s29 }
 0x515   : > { %3116 = vst.msk [vmem:[#allocation4 + $0xa8] sm:$0xff] %vm3094_vm0, %v3041_v55 }
 0x516   : > { %3636 = vrot.lane.b32.xlu0 %v3543_v42, %s6508_s13  ;;  %v4001_v38 = vpop.permute.xlu1 %4000 }
 0x517   : > { %4079 = vst.msk [vmem:[#allocation4 + $0x90] sm:$0xff] %vm4060_vm5, %v4001_v38 }
 0x518   : > { %v3810_v43 = vpop.permute.xlu0 %3809  ;;  %3191 = vrot.lane.b32.xlu1 %v3127_v11, %s6506_s26 }
 0x519   : > { %3887 = vst.msk [vmem:[#allocation4 + $0x98] sm:$0xff] %vm3867_vm4, %v3810_v43 }
 0x51a   : > { %3060 = vrot.lane.b32.xlu0 %v3543_v42, %s6504_s19  ;;  %v3425_v51 = vpop.permute.xlu1 %3424 }
 0x51b   : > { %3501 = vst.msk [vmem:[#allocation4 + $0xa0] sm:$0xff] %vm3480_vm2, %v3425_v51 }
 0x51c   : > { %v3234_v20 = vpop.permute.xlu0 %3233  ;;  %3829 = vrot.lane.b32.xlu1 %v3736_v15, %s6509_s29 }
 0x51d   : > { %3309 = vst.msk [vmem:[#allocation4 + $0xa8] sm:$0xff] %vm3287_vm1, %v3234_v20 }
 0x51e   : > { %3251 = vrot.lane.b32.xlu0 %v3735_v4, %s6506_s26  ;;  %v3427_v0 = vpop.permute.xlu1 %3426  ;;  %v4111_v16 = vld [vmem:[#allocation4 + $0x90] sm:$0xff] }
 0x51f   : > { %3502 = vst.msk [vmem:[#allocation4 + $0xa8] sm:$0xff] %vm3480_vm2, %v3427_v0  ;;  %6324 = vmatprep.mubr.msk.f32.mxu1 %vm4141_vm6, %v4111_v16 }
 0x520   : > { %v4003_v62 = vpop.permute.xlu0 %4002  ;;  %3193 = vrot.lane.b32.xlu1 %v3128_v22, %s6506_s26 }
 0x521   : > { %4080 = vst.msk [vmem:[#allocation4 + $0x98] sm:$0xff] %vm4060_vm5, %v4003_v62 }
 0x522   : > { %4020 = vrot.lane.b32.xlu0 %v3928_v13, %s6510_s12  ;;  %v3043_v61 = vpop.permute.xlu1 %3042 }
 0x523   : > { %3117 = vst.msk [vmem:[#allocation4 + $0xb0] sm:$0xff] %vm3094_vm0, %v3043_v61 }
 0x524   : > { %v3619_v35 = vpop.permute.xlu0 %3618  ;;  %3384 = vrot.lane.b32.xlu1 %v3320_v58, %s6507_s28 }
 0x525   : > { %3695 = vst.msk [vmem:[#allocation4 + $0xa0] sm:$0xff] %vm3674_vm3, %v3619_v35  ;;  %v4563_v35 = vlaneseq }
 0x526   : > { %3253 = vrot.lane.b32.xlu0 %v3736_v15, %s6506_s26  ;;  %v3812_v6 = vpop.permute.xlu1 %3811  ;;  %s6434_s26 = scalar_lea.vmem %s9288_s17, 1024 }
 0x527   : > { %3888 = vst.msk [vmem:[#allocation4 + $0xa0] sm:$0xff] %vm3867_vm4, %v3812_v6  ;;  %p6435_p11 = scmp.ne.s32.totalorder %s9288_s17, %s6434_s26 }
 0x528   : > { %v3621_v31 = vpop.permute.xlu0 %3620  ;;  %v4112_v53 = vld [vmem:[#allocation4 + $0x98] sm:$0xff]  ;;  %4022 = vrot.lane.b32.xlu1 %v3929_v46, %s6510_s12 }
 0x529   : > { %3696 = vst.msk [vmem:[#allocation4 + $0xa8] sm:$0xff] %vm3674_vm3, %v3621_v31  ;;  %6325 = vmatmul.mubr.msk.f32.gmra.mrb[16].mxu1 %vm4141_vm6, %v4112_v53  ;;  %p6436_p12 = pnand %p6435_p11, %p6587_p5 }
 0x52a   : > { %3444 = vrot.lane.b32.xlu0 %v3928_v13, %s6507_s28  ;;  %v3236_v32 = vpop.permute.xlu1 %3235  ;;  %v6511_v13 = vmov 1983009808  }
 0x52b   : > { %3310 = vst.msk [vmem:[#allocation4 + $0xb0] sm:$0xff] %vm3287_vm1, %v3236_v32  ;;  %v4561_v61 = vunpack.c.l.s4 %v6511_v13  ;;  %p6437_p13 = pneg %p6436_p12 }
 0x52c   : > { %v3045_v7 = vpop.permute.xlu0 %3044  ;;  %3446 = vrot.lane.b32.xlu1 %v3929_v46, %s6507_s28  ;;  %v4564_v46 = vshrl.u32 %v4563_v35, 7 }
 0x52d   : > { %3118 = vst.msk [vmem:[#allocation4 + $0xb8] sm:$0xff] %vm3094_vm0, %v3045_v7  ;;  %v4562_v31 = vunpack.c.0.s8 %v4561_v61 }
 0x52e   : > { %3386 = vrot.lane.b32.xlu0 %v3321_v63, %s6507_s28  ;;  %v4005_v3 = vpop.permute.xlu1 %4004  ;;  %s6512_s28 = smov [#allocation5]  }
 0x52f   : > { %4081 = vst.msk [vmem:[#allocation4 + $0xa0] sm:$0xff] %vm4060_vm5, %v4005_v3  ;;  %v8782_v7 = vsub.s32 %v4562_v31, %v4564_v46 }
 0x530   : > { %v3814_v27 = vpop.permute.xlu0 %3813  ;;  %3638 = vrot.lane.b32.xlu1 %v3544_v45, %s6508_s13 }
 0x531   : > { %3889 = vst.msk [vmem:[#allocation4 + $0xa8] sm:$0xff] %vm3867_vm4, %v3814_v27 }
 0x532   : > { %3578 = vrot.lane.b32.xlu0 %v3514_v56, %s6508_s13  ;;  %v3429_v28 = vpop.permute.xlu1 %3428 }
 0x533   : > { %3503 = vst.msk [vmem:[#allocation4 + $0xb0] sm:$0xff] %vm3480_vm2, %v3429_v28 }
 0x534   : > { %v3238_v5 = vpop.permute.xlu0 %3237  ;;  %3640 = vrot.lane.b32.xlu1 %v3545_v34, %s6508_s13 }
 0x535   : > { %3311 = vst.msk [vmem:[#allocation4 + $0xb8] sm:$0xff] %vm3287_vm1, %v3238_v5 }
 0x536   : > { %3580 = vrot.lane.b32.xlu0 %v3515_v36, %s6508_s13  ;;  %v3431_v8 = vpop.permute.xlu1 %3430  ;;  %v4113_v57 = vld [vmem:[#allocation4 + $0xa0] sm:$0xff]  ;;  %s6438_s13 = sshll.u32 %s6512_s28, 4  ;;  %s6439_s13 = int_to_ptr.vmem [resolvable:$false] %s6438_s13 }
 0x537   : > { %3504 = vst.msk [vmem:[#allocation4 + $0xb8] sm:$0xff] %vm3480_vm2, %v3431_v8  ;;  %6327 = vmatprep.mubr.msk.f32.mxu1 %vm4141_vm6, %v4113_v57  ;;  %p6441_p0 = scmp.lt.s32.totalorder %s9288_s17, %s6439_s13 }
 0x538   : > { %v4007_v33 = vpop.permute.xlu0 %4006  ;;  %3831 = vrot.lane.b32.xlu1 %v3737_v44, %s6509_s29 }
 0x539   : > { %4082 = vst.msk [vmem:[#allocation4 + $0xa8] sm:$0xff] %vm4060_vm5, %v4007_v33 }
 0x53a   : > { %3771 = vrot.lane.b32.xlu0 %v3707_v14, %s6509_s29  ;;  %v3047_v18 = vpop.permute.xlu1 %3046  ;;  %v6302_v54 = vpop.f32.mrb[0].mxu1 }
 0x53b   : > { %3119 = vst.msk [vmem:[#allocation4 + $0xc0] sm:$0xff] %vm3094_vm0, %v3047_v18  ;;  %v4320_v47 = vadd.f32 %v6302_v54, %v8723_v23  ;;  %v4314_v19 = vpop.f32.mrb[1].mxu1 }
 0x53c   : > { %v3623_v40 = vpop.permute.xlu0 %3622  ;;  %v4315_v52 = vadd.f32 %v8723_v23, %v4314_v19  ;;  %3833 = vrot.lane.b32.xlu1 %v3738_v48, %s6509_s29 }
 0x53d   : > { %3697 = vst.msk [vmem:[#allocation4 + $0xb0] sm:$0xff] %vm3674_vm3, %v3623_v40  ;;  %v8738_v50 = vmax.f32 %v4320_v47, 0.0 }
 0x53e   : > { %3773 = vrot.lane.b32.xlu0 %v3708_v39, %s6509_s29  ;;  %v8741_v29 = vmax.f32 %v4315_v52, 0.0  ;;  %v3816_v21 = vpop.permute.xlu1 %3815  ;;  %s6142_s29 = sshll.u32 %s6570_s25, 10  ;;  %s9295_s25 = scalar_lea.sflag [#allocation6], %s250_s9 }
 0x53f   : > { %4498 = vst.msk [vmem:[%s8733_s14 + $0x18] sm:$0xff] %vm319_vm12, %v8738_v50  ;;  %s9285_s19 = scalar_lea.hbm %s9343_s6, %s6142_s29 }
 0x540   : > { %3890 = vst.msk [vmem:[#allocation4 + $0xb0] sm:$0xff] %vm3867_vm4, %v3816_v21  ;;  %v3625_v41 = vpop.permute.xlu0 %3624  ;;  %v4114_v10 = vld [vmem:[#allocation4 + $0xa8] sm:$0xff]  ;;  %4024 = vrot.lane.b32.xlu1 %v3930_v37, %s6510_s12 }
 0x541   : > { %4497 = vst.msk [vmem:[%s8733_s14 + $0x10] sm:$0xff] %vm319_vm12, %v8741_v29  ;;  %6328 = vmatmul.mubr.msk.f32.gmra.mrb[18].mxu1 %vm4141_vm6, %v4114_v10 }
 0x542   : > { %3698 = vst.msk [vmem:[#allocation4 + $0xb8] sm:$0xff] %vm3674_vm3, %v3625_v41  ;;  %3964 = vrot.lane.b32.xlu0 %v3900_v12, %s6510_s12  ;;  %v3240_v9 = vpop.permute.xlu1 %3239 }
 0x543   : > { %3312 = vst.msk [vmem:[#allocation4 + $0xc0] sm:$0xff] %vm3287_vm1, %v3240_v9 }
 0x544   : > { %v3049_v30 = vpop.permute.xlu0 %3048  ;;  %4026 = vrot.lane.b32.xlu1 %v3931_v26, %s6510_s12 }
 0x545   : > { %3120 = vst.msk [vmem:[#allocation4 + $0xc8] sm:$0xff] %vm3094_vm0, %v3049_v30 }
 0x546   : > { %3966 = vrot.lane.b32.xlu0 %v3901_v2, %s6510_s12  ;;  %v4009_v24 = vpop.permute.xlu1 %4008 }
 0x547   : > { %4083 = vst.msk [vmem:[#allocation4 + $0xb0] sm:$0xff] %vm4060_vm5, %v4009_v24 }
 0x548   : > { %v3818_v49 = vpop.permute.xlu0 %3817 }
 0x549   : > { %3891 = vst.msk [vmem:[#allocation4 + $0xb8] sm:$0xff] %vm3867_vm4, %v3818_v49 }
 0x54a   : > { %v3433_v59 = vpop.permute.xlu1 %3432 }
 0x54b   : > { %3505 = vst.msk [vmem:[#allocation4 + $0xc0] sm:$0xff] %vm3480_vm2, %v3433_v59 }
 0x54c   : > { %v3242_v25 = vpop.permute.xlu0 %3241 }
 0x54d   : > { %3313 = vst.msk [vmem:[#allocation4 + $0xc8] sm:$0xff] %vm3287_vm1, %v3242_v25 }
 0x54e   : > { %v3435_v60 = vpop.permute.xlu1 %3434  ;;  %v4115_v17 = vld [vmem:[#allocation4 + $0xb0] sm:$0xff] }
 0x54f   : > { %3506 = vst.msk [vmem:[#allocation4 + $0xc8] sm:$0xff] %vm3480_vm2, %v3435_v60  ;;  %6330 = vmatprep.mubr.msk.f32.mxu1 %vm4141_vm6, %v4115_v17 }
 0x550   : > { %v4011_v1 = vpop.permute.xlu0 %4010 }
 0x551   : > { %4084 = vst.msk [vmem:[#allocation4 + $0xb8] sm:$0xff] %vm4060_vm5, %v4011_v1 }
 0x552   : > { %v3051_v55 = vpop.permute.xlu1 %3050 }
 0x553   : > { %3121 = vst.msk [vmem:[#allocation4 + $0xd0] sm:$0xff] %vm3094_vm0, %v3051_v55 }
 0x554   : > { %v3627_v4 = vpop.permute.xlu0 %3626  ;;  %v6305_v42 = vpop.f32.mrb[2].mxu1 }
 0x555   : > { %3699 = vst.msk [vmem:[#allocation4 + $0xc0] sm:$0xff] %vm3674_vm3, %v3627_v4  ;;  %v4330_v38 = vadd.f32 %v6305_v42, %v8723_v23  ;;  %v4324_v43 = vpop.f32.mrb[3].mxu1 }
 0x556   : > { %v4325_v11 = vadd.f32 %v8723_v23, %v4324_v43  ;;  %v3820_v20 = vpop.permute.xlu1 %3819 }
 0x557   : > { %v4468_v51 = vmax.f32 %v4330_v38, 0.0  ;;  %3892 = vst.msk [vmem:[#allocation4 + $0xc0] sm:$0xff] %vm3867_vm4, %v3820_v20 }
 0x558   : > { %v4467_v15 = vmax.f32 %v4325_v11, 0.0  ;;  %v3629_v0 = vpop.permute.xlu0 %3628  ;;  %v4116_v16 = vld [vmem:[#allocation4 + $0xb8] sm:$0xff] }
 0x559   : > { %4500 = vst.msk [vmem:[%s8733_s14 + $0x28] sm:$0xff] %vm319_vm12, %v4468_v51  ;;  %6331 = vmatmul.mubr.msk.f32.gmra.mrb[20].mxu1 %vm4141_vm6, %v4116_v16  ;;  %v4644_v63 = vcombine.high %v4468_v51, %v4468_v51  ;;  %v4651_v27 = vrot.slane %v4468_v51, %v8782_v7 }
 0x55a   : > { %3700 = vst.msk [vmem:[#allocation4 + $0xc8] sm:$0xff] %vm3674_vm3, %v3629_v0  ;;  %v3244_v62 = vpop.permute.xlu1 %3243  ;;  %v4627_v34 = vcombine.high %v4467_v15, %v4467_v15  ;;  %v4634_v28 = vrot.slane %v4467_v15, %v8782_v7 }
 0x55b   : > { %4499 = vst.msk [vmem:[%s8733_s14 + $0x20] sm:$0xff] %vm319_vm12, %v4467_v15  ;;  %v4658_v5 = vrot.slane %v4644_v63, %v8782_v7  ;;  %v4659_v44 = vcombine.high %v4651_v27, %v4651_v27  ;;  %v5339_v52 = vsel %vm322_vm13, %v4651_v27, -inf }
 0x55c   : > { %3314 = vst.msk [vmem:[#allocation4 + $0xd0] sm:$0xff] %vm3287_vm1, %v3244_v62  ;;  %v3053_v22 = vpop.permute.xlu0 %3052  ;;  %v8792_v33 = vrot.slane %v4627_v34, %v8782_v7  ;;  %v4642_v18 = vcombine.high %v4634_v28, %v4634_v28  ;;  %v5303_v37 = vsel %vm322_vm13, %v4634_v28, -inf }
 0x55d   : > { %3122 = vst.msk [vmem:[#allocation4 + $0xd8] sm:$0xff] %vm3094_vm0, %v3053_v22  ;;  %v4660_v47 = vcombine.high %v4658_v5, %v4658_v5  ;;  %v5348_v39 = vsel %vm322_vm13, %v4659_v44, -inf  ;;  %v5357_v12 = vsel %vm322_vm13, %v4658_v5, -inf }
 0x55e   : > { %v4013_v58 = vpop.permute.xlu1 %4012  ;;  %v4643_v26 = vcombine.high %v8792_v33, %v8792_v33  ;;  %v5312_v2 = vsel %vm322_vm13, %v4642_v18, -inf  ;;  %v5321_v24 = vsel %vm322_vm13, %v8792_v33, -inf }
 0x55f   : > { %4085 = vst.msk [vmem:[#allocation4 + $0xc0] sm:$0xff] %vm4060_vm5, %v4013_v58  ;;  %v5366_v25 = vsel %vm322_vm13, %v4660_v47, -inf }
 0x560   : > { %v3822_v6 = vpop.permute.xlu0 %3821  ;;  %v5330_v28 = vsel %vm322_vm13, %v4643_v26, -inf }
 0x561   : > { %3893 = vst.msk [vmem:[#allocation4 + $0xc8] sm:$0xff] %vm3867_vm4, %v3822_v6 }
 0x562   : > { %v3437_v53 = vpop.permute.xlu1 %3436 }
 0x563   : > { %3507 = vst.msk [vmem:[#allocation4 + $0xd0] sm:$0xff] %vm3480_vm2, %v3437_v53 }
 0x564   : > { %v3246_v32 = vpop.permute.xlu0 %3245 }
 0x565   : > { %3315 = vst.msk [vmem:[#allocation4 + $0xd8] sm:$0xff] %vm3287_vm1, %v3246_v32 }
 0x566   : > { %v3439_v45 = vpop.permute.xlu1 %3438  ;;  %v4117_v3 = vld [vmem:[#allocation4 + $0xc0] sm:$0xff] }
 0x567   : > { %3508 = vst.msk [vmem:[#allocation4 + $0xd8] sm:$0xff] %vm3480_vm2, %v3439_v45  ;;  %6333 = vmatprep.mubr.msk.f32.mxu1 %vm4141_vm6, %v4117_v3 }
 0x568   : > { %v4015_v56 = vpop.permute.xlu0 %4014 }
 0x569   : > { %4086 = vst.msk [vmem:[#allocation4 + $0xc8] sm:$0xff] %vm4060_vm5, %v4015_v56 }
 0x56a   : > { %v3055_v36 = vpop.permute.xlu1 %3054 }
 0x56b   : > { %3123 = vst.msk [vmem:[#allocation4 + $0xe0] sm:$0xff] %vm3094_vm0, %v3055_v36 }
 0x56c   : > { %v3631_v8 = vpop.permute.xlu0 %3630  ;;  %v6308_v57 = vpop.f32.mrb[4].mxu1 }
 0x56d   : > { %3701 = vst.msk [vmem:[#allocation4 + $0xd0] sm:$0xff] %vm3674_vm3, %v3631_v8  ;;  %v4340_v14 = vadd.f32 %v6308_v57, %v8723_v23  ;;  %v4334_v48 = vpop.f32.mrb[5].mxu1 }
 0x56e   : > { %v4335_v54 = vadd.f32 %v8723_v23, %v4334_v48  ;;  %v3824_v40 = vpop.permute.xlu1 %3823 }
 0x56f   : > { %v4470_v19 = vmax.f32 %v4340_v14, 0.0  ;;  %3894 = vst.msk [vmem:[#allocation4 + $0xd0] sm:$0xff] %vm3867_vm4, %v3824_v40 }
 0x570   : > { %v4469_v21 = vmax.f32 %v4335_v54, 0.0  ;;  %v3633_v41 = vpop.permute.xlu0 %3632  ;;  %v4118_v10 = vld [vmem:[#allocation4 + $0xc8] sm:$0xff] }
 0x571   : > { %4502 = vst.msk [vmem:[%s8733_s14 + $0x38] sm:$0xff] %vm319_vm12, %v4470_v19  ;;  %v4678_v9 = vcombine.high %v4470_v19, %v4470_v19  ;;  %v4685_v30 = vrot.slane %v4470_v19, %v8782_v7  ;;  %6334 = vmatmul.mubr.msk.f32.gmra.mrb[22].mxu1 %vm4141_vm6, %v4118_v10 }
 0x572   : > { %3702 = vst.msk [vmem:[#allocation4 + $0xd8] sm:$0xff] %vm3674_vm3, %v3633_v41  ;;  %v4661_v49 = vcombine.high %v4469_v21, %v4469_v21  ;;  %v4668_v59 = vrot.slane %v4469_v21, %v8782_v7  ;;  %v3248_v55 = vpop.permute.xlu1 %3247 }
 0x573   : > { %4501 = vst.msk [vmem:[%s8733_s14 + $0x30] sm:$0xff] %vm319_vm12, %v4469_v21  ;;  %v4692_v60 = vrot.slane %v4678_v9, %v8782_v7  ;;  %v4693_v17 = vcombine.high %v4685_v30, %v4685_v30  ;;  %v5340_v1 = vsel %vm322_vm13, %v4685_v30, -inf }
 0x574   : > { %v5341_v4 = vmax.f32 %v5339_v52, %v5340_v1  ;;  %v4675_v42 = vrot.slane %v4661_v49, %v8782_v7  ;;  %v4676_v38 = vcombine.high %v4668_v59, %v4668_v59  ;;  %v5304_v43 = vsel %vm322_vm13, %v4668_v59, -inf  ;;  %3316 = vst.msk [vmem:[#allocation4 + $0xe0] sm:$0xff] %vm3287_vm1, %v3248_v55  ;;  %v3057_v11 = vpop.permute.xlu0 %3056 }
 0x575   : > { %v4694_v51 = vcombine.high %v4692_v60, %v4692_v60  ;;  %v5349_v20 = vsel %vm322_vm13, %v4693_v17, -inf  ;;  %v5358_v15 = vsel %vm322_vm13, %v4692_v60, -inf  ;;  %v5305_v0 = vmax.f32 %v5303_v37, %v5304_v43  ;;  %3124 = vst.msk [vmem:[#allocation4 + $0xe8] sm:$0xff] %vm3094_vm0, %v3057_v11 }
 0x576   : > { %v5342_v16 = vrot.slane %v5341_v4, 4  ;;  %v5350_v62 = vmax.f32 %v5348_v39, %v5349_v20  ;;  %v5359_v22 = vmax.f32 %v5357_v12, %v5358_v15  ;;  %v4677_v13 = vcombine.high %v4675_v42, %v4675_v42  ;;  %v4017_v31 = vpop.permute.xlu1 %4016 }
 0x577   : > { %v5367_v61 = vsel %vm322_vm13, %v4694_v51, -inf  ;;  %v5306_v35 = vrot.slane %v5305_v0, 4  ;;  %v5313_v58 = vsel %vm322_vm13, %v4676_v38, -inf  ;;  %v5322_v6 = vsel %vm322_vm13, %v4675_v42, -inf  ;;  %4087 = vst.msk [vmem:[#allocation4 + $0xd0] sm:$0xff] %vm4060_vm5, %v4017_v31 }
 0x578   : > { %v5343_v46 = vmax.f32 %v5341_v4, %v5342_v16  ;;  %v5351_v53 = vrot.slane %v5350_v62, 4  ;;  %v5360_v32 = vrot.slane %v5359_v22, 4  ;;  %v5368_v63 = vmax.f32 %v5366_v25, %v5367_v61  ;;  %v3826_v45 = vpop.permute.xlu0 %3825 }
 0x579   : > { %v5307_v3 = vmax.f32 %v5305_v0, %v5306_v35  ;;  %v5314_v27 = vmax.f32 %v5312_v2, %v5313_v58  ;;  %v5323_v56 = vmax.f32 %v5321_v24, %v5322_v6  ;;  %v5331_v34 = vsel %vm322_vm13, %v4677_v13, -inf  ;;  %3895 = vst.msk [vmem:[#allocation4 + $0xd8] sm:$0xff] %vm3867_vm4, %v3826_v45 }
 0x57a   : > { %v5352_v5 = vmax.f32 %v5350_v62, %v5351_v53  ;;  %v5361_v36 = vmax.f32 %v5359_v22, %v5360_v32  ;;  %v5369_v44 = vrot.slane %v5368_v63, 4  ;;  %v5332_v14 = vmax.f32 %v5330_v28, %v5331_v34  ;;  %v3441_v48 = vpop.permute.xlu1 %3440 }
 0x57b   : > { %v5308_v8 = vrot.slane %v5307_v3, 2  ;;  %v5315_v57 = vrot.slane %v5314_v27, 4  ;;  %v5324_v33 = vrot.slane %v5323_v56, 4  ;;  %v5344_v18 = vrot.slane %v5343_v46, 2  ;;  %3509 = vst.msk [vmem:[#allocation4 + $0xe0] sm:$0xff] %vm3480_vm2, %v3441_v48 }
 0x57c   : > { %v5353_v54 = vrot.slane %v5352_v5, 2  ;;  %v5370_v47 = vmax.f32 %v5368_v63, %v5369_v44  ;;  %v3250_v19 = vpop.permute.xlu0 %3249  ;;  %v5333_v37 = vrot.slane %v5332_v14, 4  ;;  %v5362_v21 = vrot.slane %v5361_v36, 2 }
 0x57d   : > { %v5309_v40 = vmax.f32 %v5307_v3, %v5308_v8  ;;  %v5316_v52 = vmax.f32 %v5314_v27, %v5315_v57  ;;  %v5325_v39 = vmax.f32 %v5323_v56, %v5324_v33  ;;  %3317 = vst.msk [vmem:[#allocation4 + $0xe8] sm:$0xff] %vm3287_vm1, %v3250_v19  ;;  %v5345_v2 = vmax.f32 %v5343_v46, %v5344_v18 }
 0x57e   : > { %v5371_v41 = vrot.slane %v5370_v47, 2  ;;  %v5334_v26 = vmax.f32 %v5332_v14, %v5333_v37  ;;  %v3443_v9 = vpop.permute.xlu1 %3442  ;;  %v4119_v30 = vld [vmem:[#allocation4 + $0xd0] sm:$0xff]  ;;  %v5354_v24 = vmax.f32 %v5352_v5, %v5353_v54  ;;  %v5363_v1 = vmax.f32 %v5361_v36, %v5362_v21 }
 0x57f   : > { %v5317_v10 = vrot.slane %v5316_v52, 2  ;;  %v5326_v12 = vrot.slane %v5325_v39, 2  ;;  %v5310_v49 = vrot.slane %v5309_v40, 1  ;;  %3510 = vst.msk [vmem:[#allocation4 + $0xe8] sm:$0xff] %vm3480_vm2, %v3443_v9  ;;  %6336 = vmatprep.mubr.msk.f32.mxu1 %vm4141_vm6, %v4119_v30  ;;  %v5346_v11 = vrot.slane %v5345_v2, 1 }
 0x580   : > { %v4019_v59 = vpop.permute.xlu0 %4018  ;;  %v5335_v17 = vrot.slane %v5334_v26, 2  ;;  %v5372_v55 = vmax.f32 %v5370_v47, %v5371_v41  ;;  %v5355_v51 = vrot.slane %v5354_v24, 1  ;;  %v5364_v35 = vrot.slane %v5363_v1, 1 }
 0x581   : > { %v5318_v25 = vmax.f32 %v5316_v52, %v5317_v10  ;;  %v5327_v60 = vmax.f32 %v5325_v39, %v5326_v12  ;;  %4088 = vst.msk [vmem:[#allocation4 + $0xd8] sm:$0xff] %vm4060_vm5, %v4019_v59  ;;  %v5311_v20 = vmax.f32 %v5309_v40, %v5310_v49  ;;  %v5347_v63 = vmax.f32 %v5345_v2, %v5346_v11 }
 0x582   : > { %v5336_v38 = vmax.f32 %v5334_v26, %v5335_v17  ;;  %v3059_v43 = vpop.permute.xlu1 %3058  ;;  %v5373_v6 = vrot.slane %v5372_v55, 1  ;;  %v5356_v34 = vmax.f32 %v5354_v24, %v5355_v51  ;;  %v5365_v5 = vmax.f32 %v5363_v1, %v5364_v35 }
 0x583   : > { %v5319_v4 = vrot.slane %v5318_v25, 1  ;;  %v5328_v42 = vrot.slane %v5327_v60, 1  ;;  %3125 = vst.msk [vmem:[#allocation4 + $0xf0] sm:$0xff] %vm3094_vm0, %v3059_v43 }
 0x584   : > { %v3635_v15 = vpop.permute.xlu0 %3634  ;;  %v6311_v0 = vpop.f32.mrb[6].mxu1  ;;  %v5337_v22 = vrot.slane %v5336_v38, 1  ;;  %v5374_v44 = vmax.f32 %v5372_v55, %v5373_v6 }
 0x585   : > { %v5320_v16 = vmax.f32 %v5318_v25, %v5319_v4  ;;  %v5329_v62 = vmax.f32 %v5327_v60, %v5328_v42  ;;  %3703 = vst.msk [vmem:[#allocation4 + $0xe0] sm:$0xff] %vm3674_vm3, %v3635_v15  ;;  %v4350_v13 = vadd.f32 %v6311_v0, %v8723_v23  ;;  %v4344_v61 = vpop.f32.mrb[7].mxu1 }
 0x586   : > { %v4345_v58 = vadd.f32 %v8723_v23, %v4344_v61  ;;  %v5338_v31 = vmax.f32 %v5336_v38, %v5337_v22  ;;  %v3828_v32 = vpop.permute.xlu1 %3827 }
 0x587   : > { %v5885_v46 = vsel %vm5871_vm7, %v5320_v16, %v5311_v20  ;;  %v4472_v53 = vmax.f32 %v4350_v13, 0.0  ;;  %3896 = vst.msk [vmem:[#allocation4 + $0xe0] sm:$0xff] %vm3867_vm4, %v3828_v32 }
 0x588   : > { %v5886_v45 = vsel %vm5873_vm8, %v5329_v62, %v5885_v46  ;;  %v4471_v3 = vmax.f32 %v4345_v58, 0.0  ;;  %v3637_v27 = vpop.permute.xlu0 %3636  ;;  %v4120_v56 = vld [vmem:[#allocation4 + $0xd8] sm:$0xff] }
 0x589   : > { %v5887_v28 = vsel %vm5875_vm9, %v5338_v31, %v5886_v45  ;;  %4504 = vst.msk [vmem:[%s8733_s14 + $0x48] sm:$0xff] %vm319_vm12, %v4472_v53  ;;  %6337 = vmatmul.mubr.msk.f32.gmra.mrb[24].mxu1 %vm4141_vm6, %v4120_v56  ;;  %v4712_v40 = vcombine.high %v4472_v53, %v4472_v53  ;;  %v4719_v39 = vrot.slane %v4472_v53, %v8782_v7 }
 0x58a   : > { %3704 = vst.msk [vmem:[#allocation4 + $0xe8] sm:$0xff] %vm3674_vm3, %v3637_v27  ;;  %v5888_v36 = vsel %vm5877_vm10, %v5347_v63, %v5887_v28  ;;  %v3192_v57 = vpop.permute.xlu1 %3191  ;;  %v4695_v21 = vcombine.high %v4471_v3, %v4471_v3  ;;  %v4702_v41 = vrot.slane %v4471_v3, %v8782_v7 }
 0x58b   : > { %4503 = vst.msk [vmem:[%s8733_s14 + $0x40] sm:$0xff] %vm319_vm12, %v4471_v3  ;;  %v5889_v8 = vsel %vm5879_vm11, %v5356_v34, %v5888_v36  ;;  %v4726_v10 = vrot.slane %v4712_v40, %v8782_v7  ;;  %v4727_v26 = vcombine.high %v4719_v39, %v4719_v39  ;;  %v5411_v4 = vsel %vm322_vm13, %v4719_v39, -inf }
 0x58c   : > { %v5890_v33 = vsel %vm5881_vm14, %v5365_v5, %v5889_v8  ;;  %3288 = vst.msk [vmem:[#allocation4] sm:$0xff] %vm3287_vm1, %v3192_v57  ;;  %v3061_v14 = vpop.permute.xlu0 %3060  ;;  %v8874_v24 = vrot.slane %v4695_v21, %v8782_v7  ;;  %v4710_v25 = vcombine.high %v4702_v41, %v4702_v41  ;;  %v5375_v38 = vsel %vm322_vm13, %v4702_v41, -inf }
 0x58d   : > { %v5891_v48 = vsel %vm5883_vm15, %v5374_v44, %v5890_v33  ;;  %3126 = vst.msk [vmem:[#allocation4 + $0xf8] sm:$0xff] %vm3094_vm0, %v3061_v14  ;;  %v4728_v17 = vcombine.high %v4726_v10, %v4726_v10  ;;  %v5420_v42 = vsel %vm322_vm13, %v4727_v26, -inf  ;;  %v5429_v51 = vsel %vm322_vm13, %v4726_v10, -inf }
 0x58e   : > { %5943 = vst.msk [vmem:[%s8859_s16 + $0x8] sm:$0xff] %vm319_vm12, %v5891_v48  ;;  %v3830_v18 = vpop.permute.xlu1 %3829  ;;  %v4711_v20 = vcombine.high %v8874_v24, %v8874_v24  ;;  %v5384_v16 = vsel %vm322_vm13, %v4710_v25, -inf  ;;  %v5393_v62 = vsel %vm322_vm13, %v8874_v24, -inf }
 0x58f   : > { %3897 = vst.msk [vmem:[#allocation4 + $0xe8] sm:$0xff] %vm3867_vm4, %v3830_v18  ;;  %v5438_v61 = vsel %vm322_vm13, %v4728_v17, -inf }
 0x590   : > { %v3252_v54 = vpop.permute.xlu0 %3251  ;;  %v5402_v10 = vsel %vm322_vm13, %v4711_v20, -inf }
 0x591   : > { %3318 = vst.msk [vmem:[#allocation4 + $0xf0] sm:$0xff] %vm3287_vm1, %v3252_v54 }
 0x592   : > { %v3194_v47 = vpop.permute.xlu1 %3193 }
 0x593   : > { %3289 = vst.msk [vmem:[#allocation4 + $0x8] sm:$0xff] %vm3287_vm1, %v3194_v47 }
 0x594   : > { %v4021_v19 = vpop.permute.xlu0 %4020 }
 0x595   : > { %4089 = vst.msk [vmem:[#allocation4 + $0xe0] sm:$0xff] %vm4060_vm5, %v4021_v19 }
 0x596   : > { %v3385_v52 = vpop.permute.xlu1 %3384 }
 0x597   : > { %3481 = vst.msk [vmem:[#allocation4] sm:$0xff] %vm3480_vm2, %v3385_v52 }
 0x598   : > { %v3254_v37 = vpop.permute.xlu0 %3253 }
 0x599   : > { %3319 = vst.msk [vmem:[#allocation4 + $0xf8] sm:$0xff] %vm3287_vm1, %v3254_v37 }
 0x59a   : > { %v4023_v12 = vpop.permute.xlu1 %4022 }
 0x59b   : > { %4090 = vst.msk [vmem:[#allocation4 + $0xe8] sm:$0xff] %vm4060_vm5, %v4023_v12 }
 0x59c   : > { %v3445_v9 = vpop.permute.xlu0 %3444  ;;  %v6314_v30 = vpop.f32.mrb[8].mxu1  ;;  %v4121_v2 = vld [vmem:[#allocation4 + $0xe0] sm:$0xff] }
 0x59d   : > { %3511 = vst.msk [vmem:[#allocation4 + $0xf0] sm:$0xff] %vm3480_vm2, %v3445_v9  ;;  %v4360_v49 = vadd.f32 %v6314_v30, %v8723_v23  ;;  %v4354_v59 = vpop.f32.mrb[9].mxu1  ;;  %6339 = vmatprep.mubr.msk.f32.mxu1 %vm4141_vm6, %v4121_v2 }
 0x59e   : > { %v4355_v60 = vadd.f32 %v8723_v23, %v4354_v59  ;;  %v3447_v55 = vpop.permute.xlu1 %3446 }
 0x59f   : > { %v4474_v1 = vmax.f32 %v4360_v49, 0.0  ;;  %3512 = vst.msk [vmem:[#allocation4 + $0xf8] sm:$0xff] %vm3480_vm2, %v3447_v55 }
 0x5a0   : > { %v4473_v43 = vmax.f32 %v4355_v60, 0.0  ;;  %v3387_v11 = vpop.permute.xlu0 %3386 }
 0x5a1   : > { %4506 = vst.msk [vmem:[%s8733_s14 + $0x58] sm:$0xff] %vm319_vm12, %v4474_v1  ;;  %v4746_v15 = vcombine.high %v4474_v1, %v4474_v1  ;;  %v4753_v0 = vrot.slane %v4474_v1, %v8782_v7 }
 0x5a2   : > { %3482 = vst.msk [vmem:[#allocation4 + $0x8] sm:$0xff] %vm3480_vm2, %v3387_v11  ;;  %v4729_v22 = vcombine.high %v4473_v43, %v4473_v43  ;;  %v4736_v13 = vrot.slane %v4473_v43, %v8782_v7  ;;  %v3639_v31 = vpop.permute.xlu1 %3638  ;;  %v4122_v46 = vld [vmem:[#allocation4 + $0xe8] sm:$0xff] }
 0x5a3   : > { %4505 = vst.msk [vmem:[%s8733_s14 + $0x50] sm:$0xff] %vm319_vm12, %v4473_v43  ;;  %v4760_v35 = vrot.slane %v4746_v15, %v8782_v7  ;;  %v4761_v58 = vcombine.high %v4753_v0, %v4753_v0  ;;  %v5412_v6 = vsel %vm322_vm13, %v4753_v0, -inf  ;;  %6340 = vmatmul.mubr.msk.f32.gmra.mrb[26].mxu1 %vm4141_vm6, %v4122_v46 }
 0x5a4   : > { %v5413_v53 = vmax.f32 %v5411_v4, %v5412_v6  ;;  %v4743_v32 = vrot.slane %v4729_v22, %v8782_v7  ;;  %v4744_v63 = vcombine.high %v4736_v13, %v4736_v13  ;;  %v5376_v45 = vsel %vm322_vm13, %v4736_v13, -inf  ;;  %3705 = vst.msk [vmem:[#allocation4 + $0xf0] sm:$0xff] %vm3674_vm3, %v3639_v31  ;;  %v3579_v3 = vpop.permute.xlu0 %3578 }
 0x5a5   : > { %v4762_v27 = vcombine.high %v4760_v35, %v4760_v35  ;;  %v5421_v56 = vsel %vm322_vm13, %v4761_v58, -inf  ;;  %v5430_v34 = vsel %vm322_vm13, %v4760_v35, -inf  ;;  %v5377_v28 = vmax.f32 %v5375_v38, %v5376_v45  ;;  %3675 = vst.msk [vmem:[#allocation4] sm:$0xff] %vm3674_vm3, %v3579_v3 }
 0x5a6   : > { %v5414_v5 = vrot.slane %v5413_v53, 4  ;;  %v5422_v36 = vmax.f32 %v5420_v42, %v5421_v56  ;;  %v5431_v44 = vmax.f32 %v5429_v51, %v5430_v34  ;;  %v4745_v8 = vcombine.high %v4743_v32, %v4743_v32  ;;  %v3641_v18 = vpop.permute.xlu1 %3640 }
 0x5a7   : > { %v5439_v57 = vsel %vm322_vm13, %v4762_v27, -inf  ;;  %v5378_v33 = vrot.slane %v5377_v28, 4  ;;  %v5385_v14 = vsel %vm322_vm13, %v4744_v63, -inf  ;;  %v5394_v48 = vsel %vm322_vm13, %v4743_v32, -inf  ;;  %3706 = vst.msk [vmem:[#allocation4 + $0xf8] sm:$0xff] %vm3674_vm3, %v3641_v18 }
 0x5a8   : > { %v5415_v54 = vmax.f32 %v5413_v53, %v5414_v5  ;;  %v5423_v47 = vrot.slane %v5422_v36, 4  ;;  %v5432_v19 = vrot.slane %v5431_v44, 4  ;;  %v5440_v40 = vmax.f32 %v5438_v61, %v5439_v57  ;;  %v3581_v52 = vpop.permute.xlu0 %3580 }
 0x5a9   : > { %v5379_v39 = vmax.f32 %v5377_v28, %v5378_v33  ;;  %v5386_v37 = vmax.f32 %v5384_v16, %v5385_v14  ;;  %v5395_v21 = vmax.f32 %v5393_v62, %v5394_v48  ;;  %v5403_v41 = vsel %vm322_vm13, %v4745_v8, -inf  ;;  %3676 = vst.msk [vmem:[#allocation4 + $0x8] sm:$0xff] %vm3674_vm3, %v3581_v52 }
 0x5aa   : > { %v5424_v12 = vmax.f32 %v5422_v36, %v5423_v47  ;;  %v5433_v26 = vmax.f32 %v5431_v44, %v5432_v19  ;;  %v5441_v9 = vrot.slane %v5440_v40, 4  ;;  %v5404_v49 = vmax.f32 %v5402_v10, %v5403_v41  ;;  %v3832_v59 = vpop.permute.xlu1 %3831 }
 0x5ab   : > { %v5380_v30 = vrot.slane %v5379_v39, 2  ;;  %v5387_v2 = vrot.slane %v5386_v37, 4  ;;  %v5396_v24 = vrot.slane %v5395_v21, 4  ;;  %v5416_v25 = vrot.slane %v5415_v54, 2  ;;  %3898 = vst.msk [vmem:[#allocation4 + $0xf0] sm:$0xff] %vm3867_vm4, %v3832_v59 }
 0x5ac   : > { %v5425_v60 = vrot.slane %v5424_v12, 2  ;;  %v5442_v17 = vmax.f32 %v5440_v40, %v5441_v9  ;;  %v3772_v1 = vpop.permute.xlu0 %3771  ;;  %v5405_v38 = vrot.slane %v5404_v49, 4  ;;  %v5434_v43 = vrot.slane %v5433_v26, 2 }
 0x5ad   : > { %v5381_v55 = vmax.f32 %v5379_v39, %v5380_v30  ;;  %v5388_v4 = vmax.f32 %v5386_v37, %v5387_v2  ;;  %v5397_v42 = vmax.f32 %v5395_v21, %v5396_v24  ;;  %3868 = vst.msk [vmem:[#allocation4] sm:$0xff] %vm3867_vm4, %v3772_v1  ;;  %v5417_v16 = vmax.f32 %v5415_v54, %v5416_v25 }
 0x5ae   : > { %v5443_v11 = vrot.slane %v5442_v17, 2  ;;  %v5406_v15 = vmax.f32 %v5404_v49, %v5405_v38  ;;  %v3834_v0 = vpop.permute.xlu1 %3833  ;;  %v5426_v62 = vmax.f32 %v5424_v12, %v5425_v60  ;;  %v5435_v6 = vmax.f32 %v5433_v26, %v5434_v43 }
 0x5af   : > { %v5389_v51 = vrot.slane %v5388_v4, 2  ;;  %v5398_v20 = vrot.slane %v5397_v42, 2  ;;  %v5382_v22 = vrot.slane %v5381_v55, 1  ;;  %3899 = vst.msk [vmem:[#allocation4 + $0xf8] sm:$0xff] %vm3867_vm4, %v3834_v0  ;;  %v5418_v45 = vrot.slane %v5417_v16, 1 }
 0x5b0   : > { %v3774_v13 = vpop.permute.xlu0 %3773  ;;  %v5407_v58 = vrot.slane %v5406_v15, 2  ;;  %v5444_v31 = vmax.f32 %v5442_v17, %v5443_v11  ;;  %v5427_v3 = vrot.slane %v5426_v62, 1  ;;  %v5436_v57 = vrot.slane %v5435_v6, 1 }
 0x5b1   : > { %v5390_v61 = vmax.f32 %v5388_v4, %v5389_v51  ;;  %v5399_v35 = vmax.f32 %v5397_v42, %v5398_v20  ;;  %3869 = vst.msk [vmem:[#allocation4 + $0x8] sm:$0xff] %vm3867_vm4, %v3774_v13  ;;  %v5383_v27 = vmax.f32 %v5381_v55, %v5382_v22  ;;  %v5419_v19 = vmax.f32 %v5417_v16, %v5418_v45 }
 0x5b2   : > { %v5408_v32 = vmax.f32 %v5406_v15, %v5407_v58  ;;  %v4025_v63 = vpop.permute.xlu1 %4024  ;;  %v5445_v14 = vrot.slane %v5444_v31, 1  ;;  %v5428_v37 = vmax.f32 %v5426_v62, %v5427_v3  ;;  %v5437_v41 = vmax.f32 %v5435_v6, %v5436_v57 }
 0x5b3   : > { %v5391_v46 = vrot.slane %v5390_v61, 1  ;;  %v5400_v53 = vrot.slane %v5399_v35, 1  ;;  %4091 = vst.msk [vmem:[#allocation4 + $0xf0] sm:$0xff] %vm4060_vm5, %v4025_v63 }
 0x5b4   : > { %v3965_v56 = vpop.permute.xlu0 %3964  ;;  %v6317_v34 = vpop.f32.mrb[10].mxu1  ;;  %v5409_v36 = vrot.slane %v5408_v32, 1  ;;  %v5446_v12 = vmax.f32 %v5444_v31, %v5445_v14 }
 0x5b5   : > { %v5392_v28 = vmax.f32 %v5390_v61, %v5391_v46  ;;  %v5401_v5 = vmax.f32 %v5399_v35, %v5400_v53  ;;  %4061 = vst.msk [vmem:[#allocation4] sm:$0xff] %vm4060_vm5, %v3965_v56  ;;  %v4370_v44 = vadd.f32 %v6317_v34, %v8723_v23  ;;  %v4364_v8 = vpop.f32.mrb[11].mxu1 }
 0x5b6   : > { %v4365_v33 = vadd.f32 %v8723_v23, %v4364_v8  ;;  %v5410_v48 = vmax.f32 %v5408_v32, %v5409_v36  ;;  %v4027_v47 = vpop.permute.xlu1 %4026 }
 0x5b7   : > { %v5892_v18 = vsel %vm5871_vm7, %v5392_v28, %v5383_v27  ;;  %v4476_v54 = vmax.f32 %v4370_v44, 0.0  ;;  %4092 = vst.msk [vmem:[#allocation4 + $0xf8] sm:$0xff] %vm4060_vm5, %v4027_v47 }
 0x5b8   : > { %v5893_v40 = vsel %vm5873_vm8, %v5401_v5, %v5892_v18  ;;  %v4475_v52 = vmax.f32 %v4365_v33, 0.0  ;;  %v3967_v39 = vpop.permute.xlu0 %3966 }
 0x5b9   : > { %v5894_v21 = vsel %vm5875_vm9, %v5410_v48, %v5893_v40  ;;  %4508 = vst.msk [vmem:[%s8733_s14 + $0x68] sm:$0xff] %vm319_vm12, %v4476_v54  ;;  %v4780_v25 = vcombine.high %v4476_v54, %v4476_v54  ;;  %v4787_v60 = vrot.slane %v4476_v54, %v8782_v7 }
 0x5ba   : > { %4062 = vst.msk [vmem:[#allocation4 + $0x8] sm:$0xff] %vm4060_vm5, %v3967_v39  ;;  %v5895_v10 = vsel %vm5877_vm10, %v5419_v19, %v5894_v21  ;;  %v4123_v9 = vld [vmem:[#allocation4 + $0xf0] sm:$0xff]  ;;  %v4763_v17 = vcombine.high %v4475_v52, %v4475_v52  ;;  %v4770_v1 = vrot.slane %v4475_v52, %v8782_v7 }
 0x5bb   : > { %4507 = vst.msk [vmem:[%s8733_s14 + $0x60] sm:$0xff] %vm319_vm12, %v4475_v52  ;;  %v5896_v26 = vsel %vm5879_vm11, %v5428_v37, %v5895_v10  ;;  %6342 = vmatprep.mubr.msk.f32.mxu1 %vm4141_vm6, %v4123_v9  ;;  %v4794_v55 = vrot.slane %v4780_v25, %v8782_v7  ;;  %v4795_v4 = vcombine.high %v4787_v60, %v4787_v60  ;;  %v5483_v16 = vsel %vm322_vm13, %v4787_v60, -inf }
 0x5bc   : > { %v5897_v30 = vsel %vm5881_vm14, %v5437_v41, %v5896_v26  ;;  %v4093_v2 = vld [vmem:[#allocation4] sm:$0xff]  ;;  %v4777_v38 = vrot.slane %v4763_v17, %v8782_v7  ;;  %v4778_v51 = vcombine.high %v4770_v1, %v4770_v1  ;;  %v5447_v22 = vsel %vm322_vm13, %v4770_v1, -inf }
 0x5bd   : > { %v5898_v24 = vsel %vm5883_vm15, %v5446_v12, %v5897_v30  ;;  %6297 = vmatprep.mubr.msk.f32.mxu0 %vm4141_vm6, %v4093_v2  ;;  %v4796_v15 = vcombine.high %v4794_v55, %v4794_v55  ;;  %v5492_v62 = vsel %vm322_vm13, %v4795_v4, -inf  ;;  %v5501_v61 = vsel %vm322_vm13, %v4794_v55, -inf }
 0x5be   : > { %5944 = vst.msk [vmem:[%s8859_s16 + $0x10] sm:$0xff] %vm319_vm12, %v5898_v24  ;;  %v4124_v49 = vld [vmem:[#allocation4 + $0xf8] sm:$0xff]  ;;  %v4779_v35 = vcombine.high %v4777_v38, %v4777_v38  ;;  %v5456_v31 = vsel %vm322_vm13, %v4778_v51, -inf }
 0x5bf   : > { %6343 = vmatmul.mubr.msk.f32.gmra.mrb[28].mxu1 %vm4141_vm6, %v4124_v49  ;;  %v5510_v32 = vsel %vm322_vm13, %v4796_v15, -inf }
 0x5c0   : > { %v5474_v26 = vsel %vm322_vm13, %v4779_v35, -inf }
 0x5c1   : > { %v4094_v59 = vld [vmem:[#allocation4 + $0x8] sm:$0xff] }
 0x5c2   : > { %6298 = vmatmul.mubr.msk.f32.vlgmr.msra.gmra.mrb[32].mxu0 %vm4141_vm6, %v4094_v59 }
 0x5cc   : > { %v6320_v42 = vpop.f32.mrb[12].mxu1 }
 0x5cd   : > { %v4380_v43 = vadd.f32 %v6320_v42, %v8723_v23  ;;  %v4374_v11 = vpop.f32.mrb[13].mxu1 }
 0x5ce   : > { %v4375_v20 = vadd.f32 %v8723_v23, %v4374_v11  ;;  %v5465_v23 = vsel %vm322_vm13, %v4777_v38, -inf }
 0x5cf   : > { %v4478_v0 = vmax.f32 %v4380_v43, 0.0 }
 0x5d0   : > { %v4477_v13 = vmax.f32 %v4375_v20, 0.0 }
 0x5d1   : > { %4510 = vst.msk [vmem:[%s8733_s14 + $0x78] sm:$0xff] %vm319_vm12, %v4478_v0  ;;  %v4814_v58 = vcombine.high %v4478_v0, %v4478_v0  ;;  %v4821_v6 = vrot.slane %v4478_v0, %v8782_v7 }
 0x5d2   : > { %4509 = vst.msk [vmem:[%s8733_s14 + $0x70] sm:$0xff] %vm319_vm12, %v4477_v13  ;;  %v4797_v46 = vcombine.high %v4477_v13, %v4477_v13  ;;  %v4804_v53 = vrot.slane %v4477_v13, %v8782_v7 }
 0x5d3   : > { %v4828_v63 = vrot.slane %v4814_v58, %v8782_v7  ;;  %v4829_v45 = vcombine.high %v4821_v6, %v4821_v6  ;;  %v5484_v3 = vsel %vm322_vm13, %v4821_v6, -inf }
 0x5d4   : > { %v5485_v27 = vmax.f32 %v5483_v16, %v5484_v3  ;;  %v4811_v56 = vrot.slane %v4797_v46, %v8782_v7  ;;  %v4812_v34 = vcombine.high %v4804_v53, %v4804_v53  ;;  %v5448_v28 = vsel %vm322_vm13, %v4804_v53, -inf }
 0x5d5   : > { %v4830_v5 = vcombine.high %v4828_v63, %v4828_v63  ;;  %v5493_v36 = vsel %vm322_vm13, %v4829_v45, -inf  ;;  %v5502_v44 = vsel %vm322_vm13, %v4828_v63, -inf  ;;  %v5449_v8 = vmax.f32 %v5447_v22, %v5448_v28 }
 0x5d6   : > { %v5486_v57 = vrot.slane %v5485_v27, 4  ;;  %v5494_v33 = vmax.f32 %v5492_v62, %v5493_v36  ;;  %v5503_v14 = vmax.f32 %v5501_v61, %v5502_v44  ;;  %v4813_v48 = vcombine.high %v4811_v56, %v4811_v56 }
 0x5d7   : > { %v5511_v18 = vsel %vm322_vm13, %v4830_v5, -inf  ;;  %v5450_v54 = vrot.slane %v5449_v8, 4  ;;  %v5457_v47 = vsel %vm322_vm13, %v4812_v34, -inf  ;;  %v5466_v19 = vsel %vm322_vm13, %v4811_v56, -inf  ;;  %v8974_v56 = vld [vmem:[%s9341_s4] ss:$0 sm:$0xff] }
 0x5d8   : > { %v5487_v40 = vmax.f32 %v5485_v27, %v5486_v57  ;;  %v5495_v52 = vrot.slane %v5494_v33, 4  ;;  %v5504_v39 = vrot.slane %v5503_v14, 4  ;;  %v5512_v37 = vmax.f32 %v5510_v32, %v5511_v18 }
 0x5d9   : > { %v5451_v21 = vmax.f32 %v5449_v8, %v5450_v54  ;;  %v5458_v41 = vmax.f32 %v5456_v31, %v5457_v47  ;;  %v5467_v10 = vmax.f32 %v5465_v23, %v5466_v19  ;;  %v5475_v12 = vsel %vm322_vm13, %v4813_v48, -inf }
 0x5da   : > { %v5496_v9 = vmax.f32 %v5494_v33, %v5495_v52  ;;  %v5505_v30 = vmax.f32 %v5503_v14, %v5504_v39  ;;  %v5513_v2 = vrot.slane %v5512_v37, 4  ;;  %v5476_v25 = vmax.f32 %v5474_v26, %v5475_v12 }
 0x5db   : > { %v5452_v24 = vrot.slane %v5451_v21, 2  ;;  %v5459_v49 = vrot.slane %v5458_v41, 4  ;;  %v5468_v59 = vrot.slane %v5467_v10, 4  ;;  %v5488_v60 = vrot.slane %v5487_v40, 2 }
 0x5dc   : > { %v5497_v17 = vrot.slane %v5496_v9, 2  ;;  %v5514_v1 = vmax.f32 %v5512_v37, %v5513_v2  ;;  %v5477_v38 = vrot.slane %v5476_v25, 4  ;;  %v5506_v43 = vrot.slane %v5505_v30, 2 }
 0x5dd   : > { %v5453_v55 = vmax.f32 %v5451_v21, %v5452_v24  ;;  %v5460_v4 = vmax.f32 %v5458_v41, %v5459_v49  ;;  %v5469_v42 = vmax.f32 %v5467_v10, %v5468_v59  ;;  %v5489_v0 = vmax.f32 %v5487_v40, %v5488_v60 }
 0x5de   : > { %v5515_v11 = vrot.slane %v5514_v1, 2  ;;  %v5478_v15 = vmax.f32 %v5476_v25, %v5477_v38  ;;  %v5498_v16 = vmax.f32 %v5496_v9, %v5497_v17  ;;  %v5507_v35 = vmax.f32 %v5505_v30, %v5506_v43 }
 0x5df   : > { %v5461_v51 = vrot.slane %v5460_v4, 2  ;;  %v5470_v20 = vrot.slane %v5469_v42, 2  ;;  %v5454_v62 = vrot.slane %v5453_v55, 1  ;;  %v5490_v46 = vrot.slane %v5489_v0, 1 }
 0x5e0   : > { %v5479_v61 = vrot.slane %v5478_v15, 2  ;;  %v5516_v58 = vmax.f32 %v5514_v1, %v5515_v11  ;;  %v5499_v53 = vrot.slane %v5498_v16, 1  ;;  %v5508_v5 = vrot.slane %v5507_v35, 1 }
 0x5e1   : > { %v5462_v22 = vmax.f32 %v5460_v4, %v5461_v51  ;;  %v5471_v13 = vmax.f32 %v5469_v42, %v5470_v20  ;;  %v5455_v32 = vmax.f32 %v5453_v55, %v5454_v62  ;;  %v5491_v14 = vmax.f32 %v5489_v0, %v5490_v46 }
 0x5e2   : > { %v5480_v23 = vmax.f32 %v5478_v15, %v5479_v61  ;;  %v5517_v44 = vrot.slane %v5516_v58, 1  ;;  %v5500_v54 = vmax.f32 %v5498_v16, %v5499_v53  ;;  %v5509_v19 = vmax.f32 %v5507_v35, %v5508_v5 }
 0x5e3   : > { %v5463_v6 = vrot.slane %v5462_v22, 1  ;;  %v5472_v31 = vrot.slane %v5471_v13, 1 }
 0x5e4   : > { %v6323_v63 = vpop.f32.mrb[14].mxu1  ;;  %v5481_v27 = vrot.slane %v5480_v23, 1  ;;  %v5518_v52 = vmax.f32 %v5516_v58, %v5517_v44 }
 0x5e5   : > { %v5464_v45 = vmax.f32 %v5462_v22, %v5463_v6  ;;  %v5473_v3 = vmax.f32 %v5471_v13, %v5472_v31  ;;  %v4390_v34 = vadd.f32 %v8974_v56, %v6323_v63  ;;  %v4384_v28 = vpop.f32.mrb[15].mxu1 }
 0x5e6   : > { %v4385_v36 = vadd.f32 %v8974_v56, %v4384_v28  ;;  %v5482_v8 = vmax.f32 %v5480_v23, %v5481_v27 }
 0x5e7   : > { %v5899_v57 = vsel %vm5871_vm7, %v5464_v45, %v5455_v32  ;;  %v4480_v33 = vmax.f32 %v4390_v34, 0.0 }
 0x5e8   : > { %v5900_v48 = vsel %vm5873_vm8, %v5473_v3, %v5899_v57  ;;  %v4479_v18 = vmax.f32 %v4385_v36, 0.0 }
 0x5e9   : > { %v5901_v47 = vsel %vm5875_vm9, %v5482_v8, %v5900_v48  ;;  %4512 = vst.msk [vmem:[%s8733_s14 + $0x88] sm:$0xff] %vm319_vm12, %v4480_v33  ;;  %v4848_v41 = vcombine.high %v4480_v33, %v4480_v33  ;;  %v4855_v10 = vrot.slane %v4480_v33, %v8782_v7 }
 0x5ea   : > { %v5902_v40 = vsel %vm5877_vm10, %v5491_v14, %v5901_v47  ;;  %4511 = vst.msk [vmem:[%s8733_s14 + $0x80] sm:$0xff] %vm319_vm12, %v4479_v18  ;;  %v4831_v12 = vcombine.high %v4479_v18, %v4479_v18  ;;  %v4838_v26 = vrot.slane %v4479_v18, %v8782_v7 }
 0x5eb   : > { %v5903_v39 = vsel %vm5879_vm11, %v5500_v54, %v5902_v40  ;;  %v4862_v9 = vrot.slane %v4848_v41, %v8782_v7  ;;  %v4863_v30 = vcombine.high %v4855_v10, %v4855_v10  ;;  %v5555_v55 = vsel %vm322_vm13, %v4855_v10, -inf }
 0x5ec   : > { %v5904_v37 = vsel %vm5881_vm14, %v5509_v19, %v5903_v39  ;;  %v4845_v24 = vrot.slane %v4831_v12, %v8782_v7  ;;  %v4846_v25 = vcombine.high %v4838_v26, %v4838_v26  ;;  %v5519_v42 = vsel %vm322_vm13, %v4838_v26, -inf }
 0x5ed   : > { %v5905_v21 = vsel %vm5883_vm15, %v5518_v52, %v5904_v37  ;;  %v4864_v17 = vcombine.high %v4862_v9, %v4862_v9  ;;  %v5564_v4 = vsel %vm322_vm13, %v4863_v30, -inf  ;;  %v5573_v43 = vsel %vm322_vm13, %v4862_v9, -inf }
 0x5ee   : > { %5945 = vst.msk [vmem:[%s8859_s16 + $0x18] sm:$0xff] %vm319_vm12, %v5905_v21  ;;  %v4847_v11 = vcombine.high %v4845_v24, %v4845_v24  ;;  %v5528_v15 = vsel %vm322_vm13, %v4846_v25, -inf  ;;  %v5537_v0 = vsel %vm322_vm13, %v4845_v24, -inf }
 0x5ef   : > { %v5582_v22 = vsel %vm322_vm13, %v4864_v17, -inf }
 0x5f0   : > { %v5546_v19 = vsel %vm322_vm13, %v4847_v11, -inf }
 0x5fc   : > { %v6326_v2 = vpop.f32.mrb[16].mxu1 }
 0x5fd   : > { %v4400_v49 = vadd.f32 %v8974_v56, %v6326_v2  ;;  %v4394_v59 = vpop.f32.mrb[17].mxu1 }
 0x5fe   : > { %v4395_v60 = vadd.f32 %v8974_v56, %v4394_v59 }
 0x5ff   : > { %v4482_v1 = vmax.f32 %v4400_v49, 0.0 }
 0x600   : > { %v4481_v38 = vmax.f32 %v4395_v60, 0.0 }
 0x601   : > { %4514 = vst.msk [vmem:[%s8733_s14 + $0x98] sm:$0xff] %vm319_vm12, %v4482_v1  ;;  %v4882_v51 = vcombine.high %v4482_v1, %v4482_v1  ;;  %v4889_v20 = vrot.slane %v4482_v1, %v8782_v7 }
 0x602   : > { %4513 = vst.msk [vmem:[%s8733_s14 + $0x90] sm:$0xff] %vm319_vm12, %v4481_v38  ;;  %v4865_v16 = vcombine.high %v4481_v38, %v4481_v38  ;;  %v4872_v62 = vrot.slane %v4481_v38, %v8782_v7 }
 0x603   : > { %v4896_v13 = vrot.slane %v4882_v51, %v8782_v7  ;;  %v4897_v61 = vcombine.high %v4889_v20, %v4889_v20  ;;  %v5556_v35 = vsel %vm322_vm13, %v4889_v20, -inf }
 0x604   : > { %v5557_v58 = vmax.f32 %v5555_v55, %v5556_v35  ;;  %v4879_v6 = vrot.slane %v4865_v16, %v8782_v7  ;;  %v4880_v31 = vcombine.high %v4872_v62, %v4872_v62  ;;  %v5520_v23 = vsel %vm322_vm13, %v4872_v62, -inf }
 0x605   : > { %v4898_v46 = vcombine.high %v4896_v13, %v4896_v13  ;;  %v5565_v53 = vsel %vm322_vm13, %v4897_v61, -inf  ;;  %v5574_v32 = vsel %vm322_vm13, %v4896_v13, -inf  ;;  %v5521_v63 = vmax.f32 %v5519_v42, %v5520_v23 }
 0x606   : > { %v5558_v45 = vrot.slane %v5557_v58, 4  ;;  %v5566_v3 = vmax.f32 %v5564_v4, %v5565_v53  ;;  %v5575_v27 = vmax.f32 %v5573_v43, %v5574_v32  ;;  %v4881_v34 = vcombine.high %v4879_v6, %v4879_v6 }
 0x607   : > { %v5583_v28 = vsel %vm322_vm13, %v4898_v46, -inf  ;;  %v5522_v5 = vrot.slane %v5521_v63, 4  ;;  %v5529_v36 = vsel %vm322_vm13, %v4880_v31, -inf  ;;  %v5538_v44 = vsel %vm322_vm13, %v4879_v6, -inf }
 0x608   : > { %v5559_v8 = vmax.f32 %v5557_v58, %v5558_v45  ;;  %v5567_v57 = vrot.slane %v5566_v3, 4  ;;  %v5576_v33 = vrot.slane %v5575_v27, 4  ;;  %v5584_v14 = vmax.f32 %v5582_v22, %v5583_v28 }
 0x609   : > { %v5523_v48 = vmax.f32 %v5521_v63, %v5522_v5  ;;  %v5530_v18 = vmax.f32 %v5528_v15, %v5529_v36  ;;  %v5539_v54 = vmax.f32 %v5537_v0, %v5538_v44  ;;  %v5547_v47 = vsel %vm322_vm13, %v4881_v34, -inf }
 0x60a   : > { %v5568_v40 = vmax.f32 %v5566_v3, %v5567_v57  ;;  %v5577_v52 = vmax.f32 %v5575_v27, %v5576_v33  ;;  %v5585_v39 = vrot.slane %v5584_v14, 4  ;;  %v5548_v10 = vmax.f32 %v5546_v19, %v5547_v47 }
 0x60b   : > { %v5524_v37 = vrot.slane %v5523_v48, 2  ;;  %v5531_v21 = vrot.slane %v5530_v18, 4  ;;  %v5540_v41 = vrot.slane %v5539_v54, 4  ;;  %v5560_v12 = vrot.slane %v5559_v8, 2 }
 0x60c   : > { %v5569_v26 = vrot.slane %v5568_v40, 2  ;;  %v5586_v9 = vmax.f32 %v5584_v14, %v5585_v39  ;;  %v5549_v49 = vrot.slane %v5548_v10, 4  ;;  %v5578_v59 = vrot.slane %v5577_v52, 2 }
 0x60d   : > { %v5525_v30 = vmax.f32 %v5523_v48, %v5524_v37  ;;  %v5532_v2 = vmax.f32 %v5530_v18, %v5531_v21  ;;  %v5541_v24 = vmax.f32 %v5539_v54, %v5540_v41  ;;  %v5561_v55 = vmax.f32 %v5559_v8, %v5560_v12 }
 0x60e   : > { %v5587_v25 = vrot.slane %v5586_v9, 2  ;;  %v5550_v1 = vmax.f32 %v5548_v10, %v5549_v49  ;;  %v5570_v4 = vmax.f32 %v5568_v40, %v5569_v26  ;;  %v5579_v51 = vmax.f32 %v5577_v52, %v5578_v59 }
 0x60f   : > { %v5533_v60 = vrot.slane %v5532_v2, 2  ;;  %v5542_v17 = vrot.slane %v5541_v24, 2  ;;  %v5526_v42 = vrot.slane %v5525_v30, 1  ;;  %v5562_v62 = vrot.slane %v5561_v55, 1 }
 0x610   : > { %v5551_v11 = vrot.slane %v5550_v1, 2  ;;  %v5588_v20 = vmax.f32 %v5586_v9, %v5587_v25  ;;  %v5571_v22 = vrot.slane %v5570_v4, 1  ;;  %v5580_v46 = vrot.slane %v5579_v51, 1 }
 0x611   : > { %v5534_v38 = vmax.f32 %v5532_v2, %v5533_v60  ;;  %v5543_v43 = vmax.f32 %v5541_v24, %v5542_v17  ;;  %v5527_v13 = vmax.f32 %v5525_v30, %v5526_v42  ;;  %v5563_v27 = vmax.f32 %v5561_v55, %v5562_v62 }
 0x612   : > { %v5552_v16 = vmax.f32 %v5550_v1, %v5551_v11  ;;  %v5589_v32 = vrot.slane %v5588_v20, 1  ;;  %v5572_v5 = vmax.f32 %v5570_v4, %v5571_v22  ;;  %v5581_v44 = vmax.f32 %v5579_v51, %v5580_v46 }
 0x613   : > { %v5535_v15 = vrot.slane %v5534_v38, 1  ;;  %v5544_v0 = vrot.slane %v5543_v43, 1 }
 0x614   : > { %v6329_v61 = vpop.f32.mrb[18].mxu1  ;;  %v5553_v6 = vrot.slane %v5552_v16, 1  ;;  %v5590_v57 = vmax.f32 %v5588_v20, %v5589_v32 }
 0x615   : > { %v5536_v35 = vmax.f32 %v5534_v38, %v5535_v15  ;;  %v5545_v58 = vmax.f32 %v5543_v43, %v5544_v0  ;;  %v4410_v31 = vadd.f32 %v8974_v56, %v6329_v61  ;;  %v4404_v23 = vpop.f32.mrb[19].mxu1 }
 0x616   : > { %v4405_v53 = vadd.f32 %v8974_v56, %v4404_v23  ;;  %v5554_v63 = vmax.f32 %v5552_v16, %v5553_v6 }
 0x617   : > { %v5906_v45 = vsel %vm5871_vm7, %v5536_v35, %v5527_v13  ;;  %v4484_v3 = vmax.f32 %v4410_v31, 0.0 }
 0x618   : > { %v5907_v34 = vsel %vm5873_vm8, %v5545_v58, %v5906_v45  ;;  %v4483_v28 = vmax.f32 %v4405_v53, 0.0 }
 0x619   : > { %v5908_v36 = vsel %vm5875_vm9, %v5554_v63, %v5907_v34  ;;  %4516 = vst.msk [vmem:[%s8733_s14 + $0xa8] sm:$0xff] %vm319_vm12, %v4484_v3  ;;  %v4916_v18 = vcombine.high %v4484_v3, %v4484_v3  ;;  %v4923_v54 = vrot.slane %v4484_v3, %v8782_v7 }
 0x61a   : > { %v5909_v8 = vsel %vm5877_vm10, %v5563_v27, %v5908_v36  ;;  %4515 = vst.msk [vmem:[%s8733_s14 + $0xa0] sm:$0xff] %vm319_vm12, %v4483_v28  ;;  %v4899_v47 = vcombine.high %v4483_v28, %v4483_v28  ;;  %v4906_v19 = vrot.slane %v4483_v28, %v8782_v7 }
 0x61b   : > { %v5910_v33 = vsel %vm5879_vm11, %v5572_v5, %v5909_v8  ;;  %v4930_v40 = vrot.slane %v4916_v18, %v8782_v7  ;;  %v4931_v52 = vcombine.high %v4923_v54, %v4923_v54  ;;  %v5627_v30 = vsel %vm322_vm13, %v4923_v54, -inf }
 0x61c   : > { %v5911_v14 = vsel %vm5881_vm14, %v5581_v44, %v5910_v33  ;;  %v4913_v37 = vrot.slane %v4899_v47, %v8782_v7  ;;  %v4914_v10 = vcombine.high %v4906_v19, %v4906_v19  ;;  %v5591_v24 = vsel %vm322_vm13, %v4906_v19, -inf }
 0x61d   : > { %v5912_v48 = vsel %vm5883_vm15, %v5590_v57, %v5911_v14  ;;  %v4932_v26 = vcombine.high %v4930_v40, %v4930_v40  ;;  %v5636_v2 = vsel %vm322_vm13, %v4931_v52, -inf  ;;  %v5645_v59 = vsel %vm322_vm13, %v4930_v40, -inf }
 0x61e   : > { %5946 = vst.msk [vmem:[%s8859_s16 + $0x20] sm:$0xff] %vm319_vm12, %v5912_v48  ;;  %v4915_v25 = vcombine.high %v4913_v37, %v4913_v37  ;;  %v5600_v1 = vsel %vm322_vm13, %v4914_v10, -inf  ;;  %v5609_v55 = vsel %vm322_vm13, %v4913_v37, -inf }
 0x61f   : > { %v5654_v38 = vsel %vm322_vm13, %v4932_v26, -inf }
 0x620   : > { %v5618_v44 = vsel %vm322_vm13, %v4915_v25, -inf }
 0x62c   : > { %v6332_v39 = vpop.f32.mrb[20].mxu1 }
 0x62d   : > { %v4420_v21 = vadd.f32 %v8974_v56, %v6332_v39  ;;  %v4414_v41 = vpop.f32.mrb[21].mxu1 }
 0x62e   : > { %v4415_v12 = vadd.f32 %v8974_v56, %v4414_v41 }
 0x62f   : > { %v4486_v9 = vmax.f32 %v4420_v21, 0.0 }
 0x630   : > { %v4485_v49 = vmax.f32 %v4415_v12, 0.0 }
 0x631   : > { %4518 = vst.msk [vmem:[%s8733_s14 + $0xb8] sm:$0xff] %vm319_vm12, %v4486_v9  ;;  %v4950_v60 = vcombine.high %v4486_v9, %v4486_v9  ;;  %v4957_v17 = vrot.slane %v4486_v9, %v8782_v7 }
 0x632   : > { %4517 = vst.msk [vmem:[%s8733_s14 + $0xb0] sm:$0xff] %vm319_vm12, %v4485_v49  ;;  %v4933_v4 = vcombine.high %v4485_v49, %v4485_v49  ;;  %v4940_v42 = vrot.slane %v4485_v49, %v8782_v7 }
 0x633   : > { %v4964_v43 = vrot.slane %v4950_v60, %v8782_v7  ;;  %v4965_v11 = vcombine.high %v4957_v17, %v4957_v17  ;;  %v5628_v51 = vsel %vm322_vm13, %v4957_v17, -inf }
 0x634   : > { %v5629_v20 = vmax.f32 %v5627_v30, %v5628_v51  ;;  %v4947_v15 = vrot.slane %v4933_v4, %v8782_v7  ;;  %v4948_v0 = vcombine.high %v4940_v42, %v4940_v42  ;;  %v5592_v16 = vsel %vm322_vm13, %v4940_v42, -inf }
 0x635   : > { %v4966_v62 = vcombine.high %v4964_v43, %v4964_v43  ;;  %v5637_v22 = vsel %vm322_vm13, %v4965_v11, -inf  ;;  %v5646_v13 = vsel %vm322_vm13, %v4964_v43, -inf  ;;  %v5593_v61 = vmax.f32 %v5591_v24, %v5592_v16 }
 0x636   : > { %v5630_v35 = vrot.slane %v5629_v20, 4  ;;  %v5638_v58 = vmax.f32 %v5636_v2, %v5637_v22  ;;  %v5647_v6 = vmax.f32 %v5645_v59, %v5646_v13  ;;  %v4949_v31 = vcombine.high %v4947_v15, %v4947_v15 }
 0x637   : > { %v5655_v23 = vsel %vm322_vm13, %v4966_v62, -inf  ;;  %v5594_v46 = vrot.slane %v5593_v61, 4  ;;  %v5601_v53 = vsel %vm322_vm13, %v4948_v0, -inf  ;;  %v5610_v32 = vsel %vm322_vm13, %v4947_v15, -inf }
 0x638   : > { %v5631_v63 = vmax.f32 %v5629_v20, %v5630_v35  ;;  %v5639_v45 = vrot.slane %v5638_v58, 4  ;;  %v5648_v3 = vrot.slane %v5647_v6, 4  ;;  %v5656_v27 = vmax.f32 %v5654_v38, %v5655_v23 }
 0x639   : > { %v5595_v34 = vmax.f32 %v5593_v61, %v5594_v46  ;;  %v5602_v28 = vmax.f32 %v5600_v1, %v5601_v53  ;;  %v5611_v5 = vmax.f32 %v5609_v55, %v5610_v32  ;;  %v5619_v36 = vsel %vm322_vm13, %v4949_v31, -inf }
 0x63a   : > { %v5640_v8 = vmax.f32 %v5638_v58, %v5639_v45  ;;  %v5649_v57 = vmax.f32 %v5647_v6, %v5648_v3  ;;  %v5657_v33 = vrot.slane %v5656_v27, 4  ;;  %v5620_v54 = vmax.f32 %v5618_v44, %v5619_v36 }
 0x63b   : > { %v5596_v14 = vrot.slane %v5595_v34, 2  ;;  %v5603_v48 = vrot.slane %v5602_v28, 4  ;;  %v5612_v18 = vrot.slane %v5611_v5, 4  ;;  %v5632_v47 = vrot.slane %v5631_v63, 2 }
 0x63c   : > { %v5641_v19 = vrot.slane %v5640_v8, 2  ;;  %v5658_v40 = vmax.f32 %v5656_v27, %v5657_v33  ;;  %v5621_v21 = vrot.slane %v5620_v54, 4  ;;  %v5650_v41 = vrot.slane %v5649_v57, 2 }
 0x63d   : > { %v5597_v52 = vmax.f32 %v5595_v34, %v5596_v14  ;;  %v5604_v39 = vmax.f32 %v5602_v28, %v5603_v48  ;;  %v5613_v37 = vmax.f32 %v5611_v5, %v5612_v18  ;;  %v5633_v30 = vmax.f32 %v5631_v63, %v5632_v47 }
 0x63e   : > { %v5659_v10 = vrot.slane %v5658_v40, 2  ;;  %v5622_v9 = vmax.f32 %v5620_v54, %v5621_v21  ;;  %v5642_v2 = vmax.f32 %v5640_v8, %v5641_v19  ;;  %v5651_v60 = vmax.f32 %v5649_v57, %v5650_v41 }
 0x63f   : > { %v5605_v12 = vrot.slane %v5604_v39, 2  ;;  %v5614_v26 = vrot.slane %v5613_v37, 2  ;;  %v5598_v24 = vrot.slane %v5597_v52, 1  ;;  %v5634_v42 = vrot.slane %v5633_v30, 1 }
 0x640   : > { %v5623_v25 = vrot.slane %v5622_v9, 2  ;;  %v5660_v17 = vmax.f32 %v5658_v40, %v5659_v10  ;;  %v5643_v38 = vrot.slane %v5642_v2, 1  ;;  %v5652_v62 = vrot.slane %v5651_v60, 1 }
 0x641   : > { %v5606_v49 = vmax.f32 %v5604_v39, %v5605_v12  ;;  %v5615_v59 = vmax.f32 %v5613_v37, %v5614_v26  ;;  %v5599_v43 = vmax.f32 %v5597_v52, %v5598_v24  ;;  %v5635_v6 = vmax.f32 %v5633_v30, %v5634_v42 }
 0x642   : > { %v5624_v4 = vmax.f32 %v5622_v9, %v5623_v25  ;;  %v5661_v13 = vrot.slane %v5660_v17, 1  ;;  %v5644_v46 = vmax.f32 %v5642_v2, %v5643_v38  ;;  %v5653_v32 = vmax.f32 %v5651_v60, %v5652_v62 }
 0x643   : > { %v5607_v1 = vrot.slane %v5606_v49, 1  ;;  %v5616_v55 = vrot.slane %v5615_v59, 1 }
 0x644   : > { %v6335_v11 = vpop.f32.mrb[22].mxu1  ;;  %v5625_v15 = vrot.slane %v5624_v4, 1  ;;  %v5662_v45 = vmax.f32 %v5660_v17, %v5661_v13 }
 0x645   : > { %v5608_v51 = vmax.f32 %v5606_v49, %v5607_v1  ;;  %v5617_v20 = vmax.f32 %v5615_v59, %v5616_v55  ;;  %v4430_v0 = vadd.f32 %v8974_v56, %v6335_v11  ;;  %v4424_v16 = vpop.f32.mrb[23].mxu1 }
 0x646   : > { %v4425_v22 = vadd.f32 %v8974_v56, %v4424_v16  ;;  %v5626_v61 = vmax.f32 %v5624_v4, %v5625_v15 }
 0x647   : > { %v5913_v35 = vsel %vm5871_vm7, %v5608_v51, %v5599_v43  ;;  %v4488_v58 = vmax.f32 %v4430_v0, 0.0 }
 0x648   : > { %v5914_v31 = vsel %vm5873_vm8, %v5617_v20, %v5913_v35  ;;  %v4487_v23 = vmax.f32 %v4425_v22, 0.0 }
 0x649   : > { %v5915_v53 = vsel %vm5875_vm9, %v5626_v61, %v5914_v31  ;;  %4520 = vst.msk [vmem:[%s8733_s14 + $0xc8] sm:$0xff] %vm319_vm12, %v4488_v58  ;;  %v4984_v28 = vcombine.high %v4488_v58, %v4488_v58  ;;  %v4991_v5 = vrot.slane %v4488_v58, %v8782_v7 }
 0x64a   : > { %v5916_v63 = vsel %vm5877_vm10, %v5635_v6, %v5915_v53  ;;  %4519 = vst.msk [vmem:[%s8733_s14 + $0xc0] sm:$0xff] %vm319_vm12, %v4487_v23  ;;  %v4967_v36 = vcombine.high %v4487_v23, %v4487_v23  ;;  %v4974_v44 = vrot.slane %v4487_v23, %v8782_v7 }
 0x64b   : > { %v5917_v3 = vsel %vm5879_vm11, %v5644_v46, %v5916_v63  ;;  %v4998_v8 = vrot.slane %v4984_v28, %v8782_v7  ;;  %v4999_v57 = vcombine.high %v4991_v5, %v4991_v5  ;;  %v5699_v52 = vsel %vm322_vm13, %v4991_v5, -inf }
 0x64c   : > { %v5918_v27 = vsel %vm5881_vm14, %v5653_v32, %v5917_v3  ;;  %v4981_v14 = vrot.slane %v4967_v36, %v8782_v7  ;;  %v4982_v54 = vcombine.high %v4974_v44, %v4974_v44  ;;  %v5663_v37 = vsel %vm322_vm13, %v4974_v44, -inf }
 0x64d   : > { %v5919_v34 = vsel %vm5883_vm15, %v5662_v45, %v5918_v27  ;;  %v5000_v19 = vcombine.high %v4998_v8, %v4998_v8  ;;  %v5708_v39 = vsel %vm322_vm13, %v4999_v57, -inf  ;;  %v5717_v41 = vsel %vm322_vm13, %v4998_v8, -inf }
 0x64e   : > { %5947 = vst.msk [vmem:[%s8859_s16 + $0x28] sm:$0xff] %vm319_vm12, %v5919_v34  ;;  %v4983_v10 = vcombine.high %v4981_v14, %v4981_v14  ;;  %v5672_v9 = vsel %vm322_vm13, %v4982_v54, -inf  ;;  %v5681_v30 = vsel %vm322_vm13, %v4981_v14, -inf }
 0x64f   : > { %v5726_v49 = vsel %vm322_vm13, %v5000_v19, -inf }
 0x650   : > { %v5690_v32 = vsel %vm322_vm13, %v4983_v10, -inf }
 0x65c   : > { %v6338_v33 = vpop.f32.mrb[24].mxu1 }
 0x65d   : > { %v4440_v48 = vadd.f32 %v8974_v56, %v6338_v33  ;;  %v4434_v18 = vpop.f32.mrb[25].mxu1 }
 0x65e   : > { %v4435_v47 = vadd.f32 %v8974_v56, %v4434_v18 }
 0x65f   : > { %v4490_v40 = vmax.f32 %v4440_v48, 0.0 }
 0x660   : > { %v4489_v21 = vmax.f32 %v4435_v47, 0.0 }
 0x661   : > { %4522 = vst.msk [vmem:[%s8733_s14 + $0xd8] sm:$0xff] %vm319_vm12, %v4490_v40  ;;  %v5018_v12 = vcombine.high %v4490_v40, %v4490_v40  ;;  %v5025_v26 = vrot.slane %v4490_v40, %v8782_v7 }
 0x662   : > { %4521 = vst.msk [vmem:[%s8733_s14 + $0xd0] sm:$0xff] %vm319_vm12, %v4489_v21  ;;  %v5001_v2 = vcombine.high %v4489_v21, %v4489_v21  ;;  %v5008_v24 = vrot.slane %v4489_v21, %v8782_v7 }
 0x663   : > { %v5032_v59 = vrot.slane %v5018_v12, %v8782_v7  ;;  %v5033_v25 = vcombine.high %v5025_v26, %v5025_v26  ;;  %v5700_v60 = vsel %vm322_vm13, %v5025_v26, -inf }
 0x664   : > { %v5701_v17 = vmax.f32 %v5699_v52, %v5700_v60  ;;  %v5015_v1 = vrot.slane %v5001_v2, %v8782_v7  ;;  %v5016_v55 = vcombine.high %v5008_v24, %v5008_v24  ;;  %v5664_v4 = vsel %vm322_vm13, %v5008_v24, -inf }
 0x665   : > { %v5034_v42 = vcombine.high %v5032_v59, %v5032_v59  ;;  %v5709_v38 = vsel %vm322_vm13, %v5033_v25, -inf  ;;  %v5718_v43 = vsel %vm322_vm13, %v5032_v59, -inf  ;;  %v5665_v11 = vmax.f32 %v5663_v37, %v5664_v4 }
 0x666   : > { %v5702_v51 = vrot.slane %v5701_v17, 4  ;;  %v5710_v20 = vmax.f32 %v5708_v39, %v5709_v38  ;;  %v5719_v15 = vmax.f32 %v5717_v41, %v5718_v43  ;;  %v5017_v0 = vcombine.high %v5015_v1, %v5015_v1 }
 0x667   : > { %v5727_v16 = vsel %vm322_vm13, %v5034_v42, -inf  ;;  %v5666_v62 = vrot.slane %v5665_v11, 4  ;;  %v5673_v22 = vsel %vm322_vm13, %v5016_v55, -inf  ;;  %v5682_v13 = vsel %vm322_vm13, %v5015_v1, -inf }
 0x668   : > { %v5703_v61 = vmax.f32 %v5701_v17, %v5702_v51  ;;  %v5711_v35 = vrot.slane %v5710_v20, 4  ;;  %v5720_v58 = vrot.slane %v5719_v15, 4  ;;  %v5728_v6 = vmax.f32 %v5726_v49, %v5727_v16 }
 0x669   : > { %v5667_v31 = vmax.f32 %v5665_v11, %v5666_v62  ;;  %v5674_v23 = vmax.f32 %v5672_v9, %v5673_v22  ;;  %v5683_v46 = vmax.f32 %v5681_v30, %v5682_v13  ;;  %v5691_v53 = vsel %vm322_vm13, %v5017_v0, -inf }
 0x66a   : > { %v5712_v63 = vmax.f32 %v5710_v20, %v5711_v35  ;;  %v5721_v45 = vmax.f32 %v5719_v15, %v5720_v58  ;;  %v5729_v3 = vrot.slane %v5728_v6, 4  ;;  %v5692_v5 = vmax.f32 %v5690_v32, %v5691_v53 }
 0x66b   : > { %v5668_v27 = vrot.slane %v5667_v31, 2  ;;  %v5675_v34 = vrot.slane %v5674_v23, 4  ;;  %v5684_v28 = vrot.slane %v5683_v46, 4  ;;  %v5704_v36 = vrot.slane %v5703_v61, 2 }
 0x66c   : > { %v5713_v44 = vrot.slane %v5712_v63, 2  ;;  %v5730_v8 = vmax.f32 %v5728_v6, %v5729_v3  ;;  %v5693_v48 = vrot.slane %v5692_v5, 4  ;;  %v5722_v18 = vrot.slane %v5721_v45, 2 }
 0x66d   : > { %v5669_v57 = vmax.f32 %v5667_v31, %v5668_v27  ;;  %v5676_v33 = vmax.f32 %v5674_v23, %v5675_v34  ;;  %v5685_v14 = vmax.f32 %v5683_v46, %v5684_v28  ;;  %v5705_v52 = vmax.f32 %v5703_v61, %v5704_v36 }
 0x66e   : > { %v5731_v54 = vrot.slane %v5730_v8, 2  ;;  %v5694_v40 = vmax.f32 %v5692_v5, %v5693_v48  ;;  %v5714_v39 = vmax.f32 %v5712_v63, %v5713_v44  ;;  %v5723_v12 = vmax.f32 %v5721_v45, %v5722_v18 }
 0x66f   : > { %v5677_v47 = vrot.slane %v5676_v33, 2  ;;  %v5686_v19 = vrot.slane %v5685_v14, 2  ;;  %v5670_v37 = vrot.slane %v5669_v57, 1  ;;  %v5706_v24 = vrot.slane %v5705_v52, 1 }
 0x670   : > { %v5695_v10 = vrot.slane %v5694_v40, 2  ;;  %v5732_v26 = vmax.f32 %v5730_v8, %v5731_v54  ;;  %v5715_v49 = vrot.slane %v5714_v39, 1  ;;  %v5724_v1 = vrot.slane %v5723_v12, 1 }
 0x671   : > { %v5678_v21 = vmax.f32 %v5676_v33, %v5677_v47  ;;  %v5687_v41 = vmax.f32 %v5685_v14, %v5686_v19  ;;  %v5671_v59 = vmax.f32 %v5669_v57, %v5670_v37  ;;  %v5707_v43 = vmax.f32 %v5705_v52, %v5706_v24 }
 0x672   : > { %v5696_v2 = vmax.f32 %v5694_v40, %v5695_v10  ;;  %v5733_v55 = vrot.slane %v5732_v26, 1  ;;  %v5716_v15 = vmax.f32 %v5714_v39, %v5715_v49  ;;  %v5725_v62 = vmax.f32 %v5723_v12, %v5724_v1 }
 0x673   : > { %v5679_v9 = vrot.slane %v5678_v21, 1  ;;  %v5688_v30 = vrot.slane %v5687_v41, 1  ;;  %v4610_v23 = vcombine.high %v8738_v50, %v8738_v50  ;;  %v4617_v46 = vrot.slane %v8738_v50, %v8782_v7 }
 0x674   : > { %v5697_v17 = vrot.slane %v5696_v2, 1  ;;  %v5734_v61 = vmax.f32 %v5732_v26, %v5733_v55  ;;  %v4593_v63 = vcombine.high %v8741_v29, %v8741_v29  ;;  %v9135_v3 = vrot.slane %v8741_v29, %v8782_v7 }
 0x675   : > { %v5680_v25 = vmax.f32 %v5678_v21, %v5679_v9  ;;  %v5689_v60 = vmax.f32 %v5687_v41, %v5688_v30  ;;  %v4624_v53 = vrot.slane %v4610_v23, %v8782_v7  ;;  %v4625_v45 = vcombine.high %v4617_v46, %v4617_v46 }
 0x676   : > { %v5698_v4 = vmax.f32 %v5696_v2, %v5697_v17  ;;  %v6341_v38 = vpop.f32.mrb[26].mxu1  ;;  %v5268_v5 = vsel %vm322_vm13, %v4617_v46, -inf  ;;  %v9141_v50 = vrot.slane %v4593_v63, %v8782_v7  ;;  %v4608_v8 = vcombine.high %v9135_v3, %v9135_v3 }
 0x677   : > { %v5920_v42 = vsel %vm5871_vm7, %v5680_v25, %v5671_v59  ;;  %v4450_v51 = vadd.f32 %v8974_v56, %v6341_v38  ;;  %v4444_v20 = vpop.f32.mrb[27].mxu1  ;;  %v4626_v34 = vcombine.high %v4624_v53, %v4624_v53  ;;  %v5277_v44 = vsel %vm322_vm13, %v4625_v45, -inf }
 0x678   : > { %v5921_v11 = vsel %vm5873_vm8, %v5689_v60, %v5920_v42  ;;  %v4445_v16 = vadd.f32 %v8974_v56, %v4444_v20  ;;  %v5286_v48 = vsel %vm322_vm13, %v4624_v53, -inf }
 0x679   : > { %v5922_v0 = vsel %vm5875_vm9, %v5698_v4, %v5921_v11  ;;  %v4492_v13 = vmax.f32 %v4450_v51, 0.0  ;;  %v5295_v40 = vsel %vm322_vm13, %v4626_v34, -inf }
 0x67a   : > { %v5923_v22 = vsel %vm5877_vm10, %v5707_v43, %v5922_v0  ;;  %v4491_v58 = vmax.f32 %v4445_v16, 0.0 }
 0x67b   : > { %v5924_v35 = vsel %vm5879_vm11, %v5716_v15, %v5923_v22  ;;  %4524 = vst.msk [vmem:[%s8733_s14 + $0xe8] sm:$0xff] %vm319_vm12, %v4492_v13  ;;  %v5052_v32 = vcombine.high %v4492_v13, %v4492_v13  ;;  %v5059_v27 = vrot.slane %v4492_v13, %v8782_v7 }
 0x67c   : > { %v5925_v6 = vsel %vm5881_vm14, %v5725_v62, %v5924_v35  ;;  %4523 = vst.msk [vmem:[%s8733_s14 + $0xe0] sm:$0xff] %vm319_vm12, %v4491_v58  ;;  %v5035_v57 = vcombine.high %v4491_v58, %v4491_v58  ;;  %v9154_v41 = vrot.slane %v4491_v58, %v8782_v7 }
 0x67d   : > { %v5926_v31 = vsel %vm5883_vm15, %v5734_v61, %v5925_v6  ;;  %v5066_v28 = vrot.slane %v5052_v32, %v8782_v7  ;;  %v5067_v18 = vcombine.high %v5059_v27, %v5059_v27  ;;  %v5771_v21 = vsel %vm322_vm13, %v5059_v27, -inf }
 0x67e   : > { %5948 = vst.msk [vmem:[%s8859_s16 + $0x30] sm:$0xff] %vm319_vm12, %v5926_v31  ;;  %v9159_v26 = vrot.slane %v5035_v57, %v8782_v7 }
 0x67f   : > { %v5068_v52 = vcombine.high %v5066_v28, %v5066_v28  ;;  %v5789_v24 = vsel %vm322_vm13, %v5066_v28, -inf }
 0x681   : > { %v5798_v25 = vsel %vm322_vm13, %v5068_v52, -inf  ;;  %v5051_v52 = vcombine.high %v9159_v26, %v9159_v26 }
 0x692   : > { %v6344_v36 = vpop.f32.mrb[28].mxu1 }
 0x693   : > { %v4460_v29 = vadd.f32 %v8974_v56, %v6344_v36  ;;  %v4454_v14 = vpop.f32.mrb[29].mxu1 }
 0x694   : > { %v4455_v47 = vadd.f32 %v8974_v56, %v4454_v14  ;;  %v5232_v14 = vsel %vm322_vm13, %v9135_v3, -inf }
 0x695   : > { %v6299_v33 = vpop.f32.mrb[32].mxu0  ;;  %v4494_v39 = vmax.f32 %v4460_v29, 0.0 }
 0x696   : > { %v4310_v54 = vadd.f32 %v8974_v56, %v6299_v33  ;;  %v4304_v19 = vpop.f32.mrb[33].mxu0  ;;  %v9156_v12 = vmax.f32 %v4455_v47, 0.0  ;;  %v4609_v33 = vcombine.high %v9141_v50, %v9141_v50 }
 0x697   : > { %v4305_v37 = vadd.f32 %v8974_v56, %v4304_v19  ;;  %4526 = vst.msk [vmem:[%s8733_s14 + $0xf8] sm:$0xff] %vm319_vm12, %v4494_v39  ;;  %v5086_v9 = vcombine.high %v4494_v39, %v4494_v39  ;;  %v5093_v30 = vrot.slane %v4494_v39, %v8782_v7  ;;  %v5780_v56 = vsel %vm322_vm13, %v5067_v18, -inf }
 0x698   : > { %v4464_v10 = vmax.f32 %v4310_v54, 0.0  ;;  %4525 = vst.msk [vmem:[%s8733_s14 + $0xf0] sm:$0xff] %vm319_vm12, %v9156_v12  ;;  %v5241_v18 = vsel %vm322_vm13, %v4608_v8, -inf  ;;  %v5076_v8 = vrot.slane %v9156_v12, %v8782_v7 }
 0x699   : > { %v9164_v2 = vmax.f32 %v4305_v37, 0.0  ;;  %v5100_v60 = vrot.slane %v5086_v9, %v8782_v7  ;;  %v5101_v17 = vcombine.high %v5093_v30, %v5093_v30  ;;  %v5772_v1 = vsel %vm322_vm13, %v5093_v30, -inf }
 0x69a   : > { %4496 = vst.msk [vmem:[%s8733_s14 + $0x8] sm:$0xff] %vm319_vm12, %v4464_v10  ;;  %v4576_v49 = vcombine.high %v4464_v10, %v4464_v10  ;;  %v4583_v59 = vrot.slane %v4464_v10, %v8782_v7  ;;  %v5773_v55 = vmax.f32 %v5771_v21, %v5772_v1  ;;  %v5069_v37 = vcombine.high %v9156_v12, %v9156_v12 }
 0x69b   : > { %4495 = vst.msk [vmem:[%s8733_s14] sm:$0xff] %vm319_vm12, %v9164_v2  ;;  %v5102_v43 = vcombine.high %v5100_v60, %v5100_v60  ;;  %v5781_v11 = vsel %vm322_vm13, %v5101_v17, -inf  ;;  %v5790_v51 = vsel %vm322_vm13, %v5100_v60, -inf  ;;  %v5259_v9 = vsel %vm322_vm13, %v4609_v33, -inf  ;;  %s6440_s14 = scalar_lea.vmem %s6439_s13, 2048 }
 0x69c   : > { %v4590_v4 = vrot.slane %v4576_v49, %v8782_v7  ;;  %v4591_v42 = vcombine.high %v4583_v59, %v4583_v59  ;;  %v5267_v38 = vsel %vm322_vm13, %v4583_v59, -inf  ;;  %v5774_v15 = vrot.slane %v5773_v55, 4  ;;  %p6442_p1 = scmp.lt.s32.totalorder %s6440_s14, %s6434_s26 }
 0x69d   : > { %v5269_v20 = vmax.f32 %v5267_v38, %v5268_v5  ;;  %v5782_v0 = vmax.f32 %v5780_v56, %v5781_v11  ;;  %v5791_v16 = vmax.f32 %v5789_v24, %v5790_v51  ;;  %v5799_v22 = vsel %vm322_vm13, %v5102_v43, -inf }
 0x69e   : > { %v4592_v62 = vcombine.high %v4590_v4, %v4590_v4  ;;  %v5276_v61 = vsel %vm322_vm13, %v4591_v42, -inf  ;;  %v5285_v35 = vsel %vm322_vm13, %v4590_v4, -inf  ;;  %v5775_v58 = vmax.f32 %v5773_v55, %v5774_v15  ;;  %p6443_p2 = por %p6442_p1, %p6441_p0 }
 0x69f   : > { %v5270_v13 = vrot.slane %v5269_v20, 4  ;;  %v5783_v6 = vrot.slane %v5782_v0, 4  ;;  %v5792_v31 = vrot.slane %v5791_v16, 4  ;;  %v5800_v23 = vmax.f32 %v5798_v25, %v5799_v22 }
 0x6a0   : > { %v5278_v53 = vmax.f32 %v5276_v61, %v5277_v44  ;;  %v5287_v32 = vmax.f32 %v5285_v35, %v5286_v48  ;;  %v5294_v63 = vsel %vm322_vm13, %v4592_v62, -inf  ;;  %v5776_v45 = vrot.slane %v5775_v58, 2  ;;  %p6444_p3 = pnand %p6443_p2, %p6437_p13 }
 0x6a1   : > { %v5271_v46 = vmax.f32 %v5269_v20, %v5270_v13  ;;  %v5784_v27 = vmax.f32 %v5782_v0, %v5783_v6  ;;  %v5793_v34 = vmax.f32 %v5791_v16, %v5792_v31  ;;  %v5801_v28 = vrot.slane %v5800_v23, 4 }
 0x6a2   : > { %v5279_v36 = vrot.slane %v5278_v53, 4  ;;  %v5288_v57 = vrot.slane %v5287_v32, 4  ;;  %v5296_v29 = vmax.f32 %v5294_v63, %v5295_v40  ;;  %v5050_v44 = vcombine.high %v9154_v41, %v9154_v41 }
 0x6a3   : > { %v5272_v5 = vrot.slane %v5271_v46, 2  ;;  %v5777_v48 = vmax.f32 %v5775_v58, %v5776_v45  ;;  %v5785_v54 = vrot.slane %v5784_v27, 2  ;;  %v5794_v47 = vrot.slane %v5793_v34, 2 }
 0x6a4   : > { %v5802_v19 = vmax.f32 %v5800_v23, %v5801_v28  ;;  %v5250_v40 = vsel %vm322_vm13, %v9141_v50, -inf  ;;  %v5280_v21 = vmax.f32 %v5278_v53, %v5279_v36  ;;  %v9206_v10 = vmax.f32 %v5287_v32, %v5288_v57 }
 0x6a5   : > { %v9202_v39 = vmax.f32 %v5271_v46, %v5272_v5  ;;  %v5297_v3 = vrot.slane %v5296_v29, 4  ;;  %v5735_v50 = vsel %vm322_vm13, %v9154_v41, -inf  ;;  %v5744_v30 = vsel %vm322_vm13, %v5050_v44, -inf }
 0x6a6   : > { %v5778_v56 = vrot.slane %v5777_v48, 1  ;;  %v5753_v24 = vsel %vm322_vm13, %v9159_v26, -inf  ;;  %v9216_v49 = vmax.f32 %v5784_v27, %v5785_v54  ;;  %v9218_v59 = vmax.f32 %v5793_v34, %v5794_v47 }
 0x6a7   : > { %v5803_v25 = vrot.slane %v5802_v19, 2  ;;  %v5762_v60 = vsel %vm322_vm13, %v5051_v52, -inf  ;;  %v5274_v12 = vrot.slane %v9202_v39, 1  ;;  %v5083_v17 = vrot.slane %v5069_v37, %v8782_v7 }
 0x6a8   : > { %v4559_v41 = vcombine.high %v9164_v2, %v9164_v2  ;;  %v5281_v1 = vrot.slane %v5280_v21, 2  ;;  %v5290_v55 = vrot.slane %v9206_v10, 2  ;;  %v9226_v4 = vmax.f32 %v5296_v29, %v5297_v3 }
 0x6a9   : > { %v5084_v26 = vcombine.high %v5076_v8, %v5076_v8  ;;  %v9228_v42 = vmax.f32 %v5777_v48, %v5778_v56  ;;  %v5085_v38 = vcombine.high %v5083_v17, %v5083_v17  ;;  %v5736_v43 = vsel %vm322_vm13, %v5076_v8, -inf }
 0x6aa   : > { %v5754_v11 = vsel %vm322_vm13, %v5083_v17, -inf  ;;  %v5787_v51 = vrot.slane %v9216_v49, 1  ;;  %v5796_v20 = vrot.slane %v9218_v59, 1  ;;  %v9234_v15 = vmax.f32 %v5802_v19, %v5803_v25 }
 0x6ab   : > { %v5737_v0 = vmax.f32 %v5735_v50, %v5736_v43  ;;  %v5745_v16 = vsel %vm322_vm13, %v5084_v26, -inf  ;;  %v5755_v62 = vmax.f32 %v5753_v24, %v5754_v11  ;;  %v5763_v22 = vsel %vm322_vm13, %v5085_v38, -inf }
 0x6ac   : > { %v4566_v13 = vrot.slane %v9164_v2, %v8782_v7  ;;  %v9240_v61 = vmax.f32 %v5280_v21, %v5281_v1  ;;  %v5746_v58 = vmax.f32 %v5744_v30, %v5745_v16  ;;  %v5764_v6 = vmax.f32 %v5762_v60, %v5763_v22 }
 0x6ad   : > { %v5738_v35 = vrot.slane %v5737_v0, 4  ;;  %v5756_v31 = vrot.slane %v5755_v62, 4  ;;  %v4573_v23 = vrot.slane %v4559_v41, %v8782_v7 }
 0x6ae   : > { %v4574_v46 = vcombine.high %v4566_v13, %v4566_v13  ;;  %v5231_v53 = vsel %vm322_vm13, %v4566_v13, -inf  ;;  %v5747_v63 = vrot.slane %v5746_v58, 4  ;;  %v5765_v45 = vrot.slane %v5764_v6, 4 }
 0x6af   : > { %v5739_v32 = vmax.f32 %v5737_v0, %v5738_v35  ;;  %v5233_v27 = vmax.f32 %v5231_v53, %v5232_v14  ;;  %v5757_v34 = vmax.f32 %v5755_v62, %v5756_v31  ;;  %v4575_v28 = vcombine.high %v4573_v23, %v4573_v23 }
 0x6b0   : > { %v5240_v5 = vsel %vm322_vm13, %v4574_v46, -inf  ;;  %v5249_v2 = vsel %vm322_vm13, %v4573_v23, -inf  ;;  %v5748_v57 = vmax.f32 %v5746_v58, %v5747_v63  ;;  %v5766_v29 = vmax.f32 %v5764_v6, %v5765_v45 }
 0x6b1   : > { %v5740_v36 = vrot.slane %v5739_v32, 2  ;;  %v5234_v33 = vrot.slane %v5233_v27, 4  ;;  %v5758_v44 = vrot.slane %v5757_v34, 2  ;;  %v5242_v48 = vmax.f32 %v5240_v5, %v5241_v18 }
 0x6b2   : > { %v5251_v7 = vmax.f32 %v5249_v2, %v5250_v40  ;;  %v5258_v54 = vsel %vm322_vm13, %v4575_v28, -inf  ;;  %v5749_v19 = vrot.slane %v5748_v57, 2  ;;  %v5767_v52 = vrot.slane %v5766_v29, 2 }
 0x6b3   : > { %v5741_v47 = vmax.f32 %v5739_v32, %v5740_v36  ;;  %v5235_v37 = vmax.f32 %v5233_v27, %v5234_v33  ;;  %v5759_v14 = vmax.f32 %v5757_v34, %v5758_v44  ;;  %v5243_v21 = vrot.slane %v5242_v48, 4 }
 0x6b4   : > { %v5252_v3 = vrot.slane %v5251_v7, 4  ;;  %v5260_v8 = vmax.f32 %v5258_v54, %v5259_v9  ;;  %v5750_v30 = vmax.f32 %v5748_v57, %v5749_v19  ;;  %v5768_v56 = vmax.f32 %v5766_v29, %v5767_v52 }
 0x6b5   : > { %v5742_v50 = vrot.slane %v5741_v47, 1  ;;  %v5236_v24 = vrot.slane %v5235_v37, 2  ;;  %v5760_v25 = vrot.slane %v5759_v14, 1  ;;  %v5244_v60 = vmax.f32 %v5242_v48, %v5243_v21 }
 0x6b6   : > { %v5253_v17 = vmax.f32 %v5251_v7, %v5252_v3  ;;  %v5261_v41 = vrot.slane %v5260_v8, 4  ;;  %v5299_v18 = vrot.slane %v9226_v4, 2  ;;  %v5751_v40 = vrot.slane %v5750_v30, 1 }
 0x6b7   : > { %v5769_v1 = vrot.slane %v5768_v56, 1  ;;  %v5237_v26 = vmax.f32 %v5235_v37, %v5236_v24  ;;  %v5761_v38 = vmax.f32 %v5759_v14, %v5760_v25  ;;  %v5245_v43 = vrot.slane %v5244_v60, 2 }
 0x6b8   : > { %v5254_v11 = vrot.slane %v5253_v17, 2  ;;  %v5262_v0 = vmax.f32 %v5260_v8, %v5261_v41  ;;  %v5743_v16 = vmax.f32 %v5741_v47, %v5742_v50  ;;  %v5752_v62 = vmax.f32 %v5750_v30, %v5751_v40 }
 0x6b9   : > { %v5770_v9 = vmax.f32 %v5768_v56, %v5769_v1  ;;  %v5238_v22 = vrot.slane %v5237_v26, 1  ;;  %v5291_v13 = vmax.f32 %v9206_v10, %v5290_v55  ;;  %v5246_v35 = vmax.f32 %v5244_v60, %v5245_v43 }
 0x6ba   : > { %v5255_v58 = vmax.f32 %v5253_v17, %v5254_v11  ;;  %v5263_v6 = vrot.slane %v5262_v0, 2  ;;  %v5788_v31 = vmax.f32 %v9216_v49, %v5787_v51  ;;  %v5805_v23 = vrot.slane %v9234_v15, 1 }
 0x6bb   : > { %v5300_v46 = vmax.f32 %v9226_v4, %v5299_v18  ;;  %v5927_v53 = vsel %vm5871_vm7, %v5752_v62, %v5743_v16  ;;  %v5247_v63 = vrot.slane %v5246_v35, 1  ;;  %v5797_v10 = vmax.f32 %v9218_v59, %v5796_v20 }
 0x6bc   : > { %v5928_v32 = vsel %vm5873_vm8, %v5761_v38, %v5927_v53  ;;  %v5256_v45 = vrot.slane %v5255_v58, 1  ;;  %v5264_v27 = vmax.f32 %v5262_v0, %v5263_v6  ;;  %v5283_v55 = vrot.slane %v9240_v61, 1 }
 0x6bd   : > { %v5929_v34 = vsel %vm5875_vm9, %v5770_v9, %v5928_v32  ;;  %v5239_v49 = vmax.f32 %v5237_v26, %v5238_v22  ;;  %v5248_v51 = vmax.f32 %v5246_v35, %v5247_v63  ;;  %v5806_v2 = vmax.f32 %v9234_v15, %v5805_v23 }
 0x6be   : > { %v5930_v4 = vsel %vm5877_vm10, %v9228_v42, %v5929_v34  ;;  %v5257_v28 = vmax.f32 %v5255_v58, %v5256_v45  ;;  %v5265_v5 = vrot.slane %v5264_v27, 1  ;;  %v5292_v36 = vrot.slane %v5291_v13, 1 }
 0x6bf   : > { %v5931_v57 = vsel %vm5879_vm11, %v5788_v31, %v5930_v4  ;;  %v5301_v59 = vrot.slane %v5300_v46, 1  ;;  %v5872_v33 = vsel %vm5871_vm7, %v5248_v51, %v5239_v49  ;;  %v5275_v42 = vmax.f32 %v9202_v39, %v5274_v12 }
 0x6c0   : > { %v5932_v20 = vsel %vm5881_vm14, %v5797_v10, %v5931_v57  ;;  %v5266_v29 = vmax.f32 %v5264_v27, %v5265_v5  ;;  %v5874_v48 = vsel %vm5873_vm8, %v5257_v28, %v5872_v33  ;;  %v5284_v15 = vmax.f32 %v9240_v61, %v5283_v55 }
 0x6c1   : > { %v5933_v44 = vsel %vm5883_vm15, %v5806_v2, %v5932_v20  ;;  %v5293_v54 = vmax.f32 %v5291_v13, %v5292_v36  ;;  %v5302_v19 = vmax.f32 %v5300_v46, %v5301_v59 }
 0x6c2   : > { %5949 = vst.msk [vmem:[%s8859_s16 + $0x38] sm:$0xff] %vm319_vm12, %v5933_v44  ;;  %v5876_v7 = vsel %vm5875_vm9, %v5266_v29, %v5874_v48 }
 0x6c3   : > { %v5878_v47 = vsel %vm5877_vm10, %v5275_v42, %v5876_v7 }
 0x6c4   : > { %v5880_v39 = vsel %vm5879_vm11, %v5284_v15, %v5878_v47 }
 0x6c5   : > { %v5882_v12 = vsel %vm5881_vm14, %v5293_v54, %v5880_v39 }
 0x6c6   : > { %v5884_v61 = vsel %vm5883_vm15, %v5302_v19, %v5882_v12 }
 0x6c7   : > { %5942 = vst.msk [vmem:[%s8859_s16] sm:$0xff] %vm319_vm12, %v5884_v61 }
 0x6c8   : > { %6447 = shalt.err (!%p6444_p3)
}
 0x6c9   : > { %s6448_s9 = scalar_lea.hbm %s9285_s19, 1024  ;;  %s6452_s18 = scalar_lea.hbm %s9343_s6, 2048 }
 0x6ca   : > { %p6449_p4 = scmp.ne.s32.totalorder %s9285_s19, %s6448_s9  ;;  %p6453_p9 = scmp.lt.u32.totalorder %s9285_s19, %s9343_s6 }
 0x6cb   : > { %p6454_p10 = scmp.lt.u32.totalorder %s6452_s18, %s6448_s9  ;;  %p6456_p12 = scmp.lt.u32.totalorder %s6448_s9, %s9285_s19 }
 0x6cc   : > { %p6450_p7 = pnand %p6449_p4, %p6587_p5 }
 0x6cd   : > { %p6455_p11 = por %p6454_p10, %p6453_p9 }
 0x6ce   : > { %p6451_p8 = pneg %p6450_p7 }
 0x6cf   : > { %p6457_p13 = por %p6456_p12, %p6455_p11 }
 0x6d1   : > { %p6458_p0 = pnand %p6457_p13, %p6451_p8 }
 0x6d3   : > { %6461 = shalt.err (!%p6458_p0)
}
 0x6d4   : > { %s6513_s11 = smov 128  }
 0x6d5   : > { %6379 = dma.vmem_to_hbm [thread:$0]  (%p6587_p5), %s9288_s17, 1024, %s9285_s19, %s9295_s25, %s6513_s11, %s6513_s11, %s6500_s15  }
 0x6d6 PF: > { %p6385_p1 = scmp.ge.s32.totalorder %s6496_s24, 2  ;;  %s5995_s12 = sand.u32 1, %s6484_s21  }
 0x6d7   : > { %s5996_s26 = scalar_lea.sflag [#allocation6], %s5995_s12 }
 0x6d8   : > { %p6382_p2 = pnand %p6385_p1, %p6591_p6 }
 0x6da   : > { %6479 = dma.done.wait (!%p6382_p2), %s5996_s26, 1024  }
 0x6db   : > { %6481 = vsyncadd (!%p6382_p2), %s5996_s26, 4294966272  ;;  %p17_p3 = scmp.ge.s32.totalorder %s6574_s27, 4   ;;  %s9439_s21 = smov %s6488_s22 }
 0x6dc   : > { %s9440_s22 = smov %s6492_s23  ;;  %s9441_s23 = smov %s6585_s30 }
 0x6dd   : > { %s9442_s24 = smov %s6574_s27  ;;  %19 = sbr.rel (!%p17_p3) target bundleno = 3 (0x3), region = 91 }
 0x6e4   :  { %6001 = vsyncpa [#allocation6], 1 }
 0x6e5   :  { %6003 = vsyncpa [#allocation6 + $0x1], 1 }

</bundles_post_ra>
